<compile_context>
chip_gen: v7x
topology: tpu7x:2x2x1
jax: 0.10.0
libtpu: 0.0.40
codegen_flags: <defaults>
</compile_context>

<pallas_src>
import functools

import jax
import jax.numpy as jnp
from jax.experimental import pallas as pl
from jax.experimental.pallas import tpu as pltpu


# --------------------------- fused Refinement kernel ------------------------
def _refine_kernel(a_sm, x1_ref, x2_ref, wexp_ref, cb_ref, dw_ref, bn_ref,
                   wfc_ref, szbz_ref, wf_ref, bf_ref, pool_ref,
                   o_ref, pad_ref, fbuf_ref, *, H, W, C, d):
    WC = W * C
    PAD = 2                                  # max dilation

    # Zero only the 4 border rows once per grid step; the interior store below
    # never touches them, so they stay zero for both Dilation blocks.
    pad_ref[0:PAD, :] = jnp.zeros((PAD, WC), jnp.float32)
    pad_ref[PAD + H:PAD + H + PAD, :] = jnp.zeros((PAD, WC), jnp.float32)

    # ---- 1x1 conv as a single lane-dense MXU matmul ----
    # wexp = kron(eye(W), conv_w) is block-diagonal, so this applies the
    # cin->C projection independently per pixel; output is already (H, W*C).
    y = (jnp.dot(x1_ref[0], wexp_ref[...], preferred_element_type=jnp.float32)
         + cb_ref[...])                                         # (H, W*C)

    def dilation(x_hwc, blk):
        # interior written at lane 0 -> full-width unmasked stores
        pad_ref[PAD:PAD + H, :] = x_hwc

        def branch(br, dil):
            base = (blk * 2 + br) * 9
            # Pre-roll the whole padded slab once per non-zero dx (XLU slot).
            # Lanes that wrap around the W edge are killed by the 0/1 lane
            # masks folded into the packed dw rows host-side; dx==0 taps are
            # read straight from the ref (aligned full-width loads).
            slab = pad_ref[...]                                  # (H+4, W*C)
            slab_l = pltpu.roll(slab, shift=(dil * C) % WC, axis=1)   # dx=-dil
            slab_r = pltpu.roll(slab, shift=(-dil * C) % WC, axis=1)  # dx=+dil
            acc = jnp.zeros((H, WC), jnp.float32)
            for ky in range(3):
                r0 = PAD + (ky - 1) * dil
                r = base + ky * 3
                acc = acc + slab_l[r0:r0 + H, :] * dw_ref[r:r + 1, :]
                acc = acc + pad_ref[r0:r0 + H, :] * dw_ref[r + 1:r + 2, :]
                acc = acc + slab_r[r0:r0 + H, :] * dw_ref[r + 2:r + 3, :]
            s = bn_ref[blk * 4 + 2 * br:blk * 4 + 2 * br + 1, :]
            t = bn_ref[blk * 4 + 2 * br + 1:blk * 4 + 2 * br + 2, :]
            return jnp.maximum(acc * s + t, 0.0)                 # conv+BN+ReLU

        f1 = branch(0, 1)            # dilation 1
        fbuf_ref[...] = f1           # park f1 while f2's tap region runs
        f2 = branch(1, 2)            # dilation 2
        f1 = fbuf_ref[...]

        # fuse: global average pool -> fc+BN+ReLU -> per-branch fc -> softmax(M=2)
        U = f1 + f2
        # avg-pool: sublane reduce over H, then one MXU matmul folds the W-sum
        # and the 1/(H*W) scale (pool_ref is W stacked copies of I_C/(H*W)).
        S = jnp.dot(jnp.sum(U, axis=0, keepdims=True), pool_ref[...],
                    preferred_element_type=jnp.float32)          # (1, C)

        Z = jnp.dot(S, wfc_ref[blk * C:(blk + 1) * C, :],
                    preferred_element_type=jnp.float32)
        Z = jnp.maximum(Z * szbz_ref[blk * 2:blk * 2 + 1, :]
                        + szbz_ref[blk * 2 + 1:blk * 2 + 2, :], 0.0)   # (1, d)

        # Both branch logits from ONE matmul: wf1||wf2 (and bf1||bf2) are
        # concatenated along lanes host-side, so a1/a2 are lane-aligned slices.
        a12 = (jnp.dot(Z, wf_ref[blk * d:(blk + 1) * d, :],
                       preferred_element_type=jnp.float32)
               + bf_ref[blk:blk + 1, :])                         # (1, 2*W*C)
        a1 = a12[:, 0:WC]
        a2 = a12[:, WC:2 * WC]
        m = jnp.maximum(a1, a2)
        e1 = jnp.exp(a1 - m)
        e2 = jnp.exp(a2 - m)
        inv = pl.reciprocal(e1 + e2, approx=True)                # EUP slot
        return f1 * (e1 * inv) + f2 * (e2 * inv)                 # (H, W*C)

    a = a_sm[0, 0]
    # Park the first combine term in the (VMEM-resident) output block so g1 is
    # not live across the second dilation call's tap region.
    o_ref[0] = a * dilation(y, 0)                        # a * dila1(conv(x1))
    o_ref[0] = o_ref[0] + (1.0 - a) * dilation(x2_ref[0], 1)


# ----------------------------- parameter packing ----------------------------
def _pack_params(p, H, W):
    d1, d2 = p["dila1"], p["dila2"]
    C = p["conv_w"].shape[1]
    d = d1["wfc"].shape[1]
    WC = W * C
    tile = lambda v: jnp.tile(v, (1, W))

    wexp = jnp.kron(jnp.eye(W, dtype=jnp.float32), p["conv_w"])  # (W*cin, W*C)
    cb = tile(p["conv_b"])                                       # (1, W*C)

    # Depthwise taps, tiled W times along lanes, with the "same"-padding zero
    # border along W folded in as per-tap 0/1 lane masks (these kill the lanes
    # that the in-kernel lane roll wraps around).
    w_pix = jnp.arange(WC) // C
    def masked_taps(w9, dil):
        rows = []
        for ky in range(3):
            for kx in range(3):
                dx = (kx - 1) * dil
                valid = ((w_pix + dx >= 0) & (w_pix + dx < W)).astype(jnp.float32)
                rows.append(tile(w9[ky * 3 + kx:ky * 3 + kx + 1, :]) * valid[None, :])
        return jnp.concatenate(rows, axis=0)                     # (9, W*C)

    dw = jnp.concatenate(
        [masked_taps(d1["w1"], 1), masked_taps(d1["w2"], 2),
         masked_taps(d2["w1"], 1), masked_taps(d2["w2"], 2)], axis=0)  # (36, W*C)

    bn = tile(jnp.concatenate(
        [d1["s1"], d1["b1"], d1["s2"], d1["b2"],
         d2["s1"], d2["b1"], d2["s2"], d2["b2"]], axis=0))       # (8, W*C)
    wfc = jnp.concatenate([d1["wfc"], d2["wfc"]], axis=0)        # (2C, d)
    szbz = jnp.concatenate(
        [d1["sz"], d1["bz"], d2["sz"], d2["bz"]], axis=0)        # (4, d)

    # Per-dilation-block attention fc: branches concatenated along lanes so
    # one (1,d)@(d,2*W*C) matmul yields a1||a2 already lane-dense.
    wf = jnp.concatenate(
        [jnp.concatenate([tile(d1["wf1"]), tile(d1["wf2"])], axis=1),
         jnp.concatenate([tile(d2["wf1"]), tile(d2["wf2"])], axis=1)],
        axis=0)                                                  # (2d, 2*W*C)
    bf = jnp.concatenate(
        [jnp.concatenate([tile(d1["bf1"]), tile(d1["bf2"])], axis=1),
         jnp.concatenate([tile(d2["bf1"]), tile(d2["bf2"])], axis=1)],
        axis=0)                                                  # (2, 2*W*C)

    # Average-pool matrix: W stacked copies of I_C, scaled by 1/(H*W).
    pool = jnp.tile(jnp.eye(C, dtype=jnp.float32), (W, 1)) / float(H * W)

    a_sm = jnp.clip(p["a"], 0.0, 1.0).reshape(1, 1).astype(jnp.float32)
    return a_sm, wexp, cb, dw, bn, wfc, szbz, wf, bf, pool, d


# ------------------------------- forward pass -------------------------------
@functools.partial(jax.jit, static_argnames=("flag",))
def refinement_forward(params, x1, x2, *, flag):
    # x1: (B, H1, W1, cin) NHWC ; x2: (B, H, W, cout) NHWC
    if flag == 0:
        x1 = x1[:, ::2, ::2, :]   # 1x1 conv with stride 2 == strided sampling
    B, H, W, cin = x1.shape
    C = params["conv_w"].shape[1]
    (a_sm, wexp, cb, dw, bn, wfc, szbz, wf, bf, pool, d) = _pack_params(params, H, W)
    WC = W * C

    x1_ld = x1.reshape(B, H, W * cin)      # lane-dense loads
    x2_ld = x2.reshape(B, H, WC)

    def rep(arr):
        shp = arr.shape
        return pl.BlockSpec(shp, lambda b, _n=len(shp): (0,) * _n)

    kern = functools.partial(_refine_kernel, H=H, W=W, C=C, d=d)
    out = pl.pallas_call(
        kern,
        out_shape=jax.ShapeDtypeStruct((B, H, WC), jnp.float32),
        grid=(B,),
        in_specs=[
            pl.BlockSpec(memory_space=pltpu.MemorySpace.SMEM),      # a (scalar)
            pl.BlockSpec((1, H, W * cin), lambda b: (b, 0, 0)),     # x1
            pl.BlockSpec((1, H, WC), lambda b: (b, 0, 0)),          # x2
            rep(wexp), rep(cb), rep(dw), rep(bn),
            rep(wfc), rep(szbz), rep(wf), rep(bf), rep(pool),
        ],
        out_specs=pl.BlockSpec((1, H, WC), lambda b: (b, 0, 0)),
        scratch_shapes=[pltpu.VMEM((H + 4, WC), jnp.float32),   # padded slab
                        pltpu.VMEM((H, WC), jnp.float32)],      # f1 parking
        compiler_params=pltpu.CompilerParams(
            dimension_semantics=("parallel",)),   # v7x: one image per TC
    )(a_sm, x1_ld, x2_ld, wexp, cb, dw, bn, wfc, szbz, wf, bf, pool)
    return out.reshape(B, H, W, C)


# ----------------------- pure-JAX reference (correctness) -------------------
def _reference_forward(params, x1, x2, *, flag):
    hp = jax.lax.Precision.HIGHEST
    if flag == 0:
        x1 = x1[:, ::2, ::2, :]
    y = (jnp.einsum("bhwj,jc->bhwc", x1, params["conv_w"], precision=hp)
         + params["conv_b"][0])

    def dwconv(x, w9, dil):
        _, H, W, _ = x.shape
        xp = jnp.pad(x, ((0, 0), (dil, dil), (dil, dil), (0, 0)))
        out = jnp.zeros_like(x)
        for ky in range(3):
            for kx in range(3):
                patch = xp[:, ky * dil:ky * dil + H, kx * dil:kx * dil + W, :]
                out = out + patch * w9[ky * 3 + kx][None, None, None, :]
        return out

    def dilation(x, dp):
        f1 = jnp.maximum(dwconv(x, dp["w1"], 1) * dp["s1"][0] + dp["b1"][0], 0.0)
        f2 = jnp.maximum(dwconv(x, dp["w2"], 2) * dp["s2"][0] + dp["b2"][0], 0.0)
        S = jnp.mean(f1 + f2, axis=(1, 2))                            # (B, C)
        Z = jnp.maximum(jnp.dot(S, dp["wfc"], precision=hp) * dp["sz"][0]
                        + dp["bz"][0], 0.0)                           # (B, d)
        a1 = jnp.dot(Z, dp["wf1"], precision=hp) + dp["bf1"][0]
        a2 = jnp.dot(Z, dp["wf2"], precision=hp) + dp["bf2"][0]
        m = jnp.maximum(a1, a2)
        e1, e2 = jnp.exp(a1 - m), jnp.exp(a2 - m)
        w1 = (e1 / (e1 + e2))[:, None, None, :]
        w2 = (e2 / (e1 + e2))[:, None, None, :]
        return f1 * w1 + f2 * w2

    g1 = dilation(y, params["dila1"])
    g2 = dilation(x2, params["dila2"])
    a = jnp.clip(params["a"], 0.0, 1.0)[0]
    return a * g1 + (1.0 - a) * g2


# ----------------------------- parameter setup ------------------------------
def _fold_bn(gamma, beta, mean, var, eps=1e-5):
    scale = gamma / jnp.sqrt(var + eps)
    shift = beta - mean * scale
    return scale.reshape(1, -1), shift.reshape(1, -1)


def init_dilation_params(key, C, d):
    ks = jax.random.split(key, 10)
    n = lambda k, s, sc=0.1: sc * jax.random.normal(k, s, jnp.float32)
    g1, b1 = 1.0 + n(ks[2], (C,)), n(ks[3], (C,))
    g2, b2 = 1.0 + n(ks[4], (C,)), n(ks[5], (C,))
    gz, bz = 1.0 + n(ks[7], (d,)), n(ks[8], (d,))
    s1, sh1 = _fold_bn(g1, b1, jnp.zeros((C,)), jnp.ones((C,)))
    s2, sh2 = _fold_bn(g2, b2, jnp.zeros((C,)), jnp.ones((C,)))
    sz, shz = _fold_bn(gz, bz, jnp.zeros((d,)), jnp.ones((d,)))
    kf = jax.random.split(ks[9], 4)
    return {
        "w1": n(ks[0], (9, C)),            # depthwise 3x3, dilation 1
        "w2": n(ks[1], (9, C)),            # depthwise 3x3, dilation 2
        "s1": s1, "b1": sh1,
        "s2": s2, "b2": sh2,
        "wfc": n(ks[6], (C, d)),           # 1x1 conv C->d (no bias)
        "sz": sz, "bz": shz,
        "wf1": n(kf[0], (d, C)), "bf1": n(kf[1], (1, C)),
        "wf2": n(kf[2], (d, C)), "bf2": n(kf[3], (1, C)),
    }


def init_refinement_params(key, cin, cout, r=16, L=32):
    d = max(int(cout / r), L)
    k0, k1, k2, k3, k4 = jax.random.split(key, 5)
    return {
        "conv_w": 0.1 * jax.random.normal(k0, (cin, cout), jnp.float32),
        "conv_b": 0.1 * jax.random.normal(k1, (1, cout), jnp.float32),
        "a": jax.random.uniform(k2, (1,), jnp.float32),
        "dila1": init_dilation_params(k3, cout, d),
        "dila2": init_dilation_params(k4, cout, d),
    }


if __name__ == "__main__":
    key = jax.random.PRNGKey(0)
    cin, cout, flag = 8, 32, 0          # cout=32 => grouped conv (G=32) is depthwise
    B, H, W = 2, 16, 16
    k1, k2, kp = jax.random.split(key, 3)
    # flag==0 -> stride-2 1x1 conv, so x1 has 2x the spatial size of x2.
    x1 = jax.random.normal(k1, (B, 2 * H, 2 * W, cin), jnp.float32)   # NHWC
    x2 = jax.random.normal(k2, (B, H, W, cout), jnp.float32)          # NHWC

    params = init_refinement_params(kp, cin, cout)
    out = refinement_forward(params, x1, x2, flag=flag)
    out = jax.block_until_ready(out)
    assert out.shape == (B, H, W, cout), out.shape
    assert bool(jnp.all(jnp.isfinite(out)))

    ref = _reference_forward(params, x1, x2, flag=flag)
    max_err = float(jnp.max(jnp.abs(out - ref)))
    tol = 2e-2 * float(jnp.max(jnp.abs(ref))) + 1e-5
    assert max_err < tol, (max_err, tol)
    print("KERNEL_OK")
</pallas_src>

<mosaic_0001>
module attributes {stable_mosaic.version = 11 : i64} {
  func.func @_refine_kernel(%arg0: i32, %arg1: memref<1x1xf32, #tpu.memory_space<smem>>, %arg2: memref<1x16x128xf32, #tpu.memory_space<vmem>>, %arg3: memref<1x16x512xf32, #tpu.memory_space<vmem>>, %arg4: memref<128x512xf32, #tpu.memory_space<vmem>>, %arg5: memref<1x512xf32, #tpu.memory_space<vmem>>, %arg6: memref<36x512xf32, #tpu.memory_space<vmem>>, %arg7: memref<8x512xf32, #tpu.memory_space<vmem>>, %arg8: memref<64x32xf32, #tpu.memory_space<vmem>>, %arg9: memref<4x32xf32, #tpu.memory_space<vmem>>, %arg10: memref<64x1024xf32, #tpu.memory_space<vmem>>, %arg11: memref<2x1024xf32, #tpu.memory_space<vmem>>, %arg12: memref<512x32xf32, #tpu.memory_space<vmem>>, %arg13: memref<1x16x512xf32, #tpu.memory_space<vmem>>, %arg14: memref<20x512xf32, #tpu.memory_space<vmem>>, %arg15: memref<16x512xf32, #tpu.memory_space<vmem>>) attributes {dimension_semantics = [#tpu.dimension_semantics<parallel>], iteration_bounds = array<i64: 2>, scalar_prefetch = 0 : i64, scratch_operands = 2 : i64, tpu.core_type = #tpu.core_type<tc>, window_params = [{transform_indices = @transform_0, window_bounds = array<i64: 1, 1>}, {transform_indices = @transform_1, window_bounds = array<i64: 1, 16, 128>}, {transform_indices = @transform_2, window_bounds = array<i64: 1, 16, 512>}, {pipeline_mode = #tpu.pipeline_mode<synchronous>, transform_indices = @transform_3, window_bounds = array<i64: 128, 512>}, {pipeline_mode = #tpu.pipeline_mode<synchronous>, transform_indices = @transform_4, window_bounds = array<i64: 1, 512>}, {pipeline_mode = #tpu.pipeline_mode<synchronous>, transform_indices = @transform_5, window_bounds = array<i64: 36, 512>}, {pipeline_mode = #tpu.pipeline_mode<synchronous>, transform_indices = @transform_6, window_bounds = array<i64: 8, 512>}, {pipeline_mode = #tpu.pipeline_mode<synchronous>, transform_indices = @transform_7, window_bounds = array<i64: 64, 32>}, {pipeline_mode = #tpu.pipeline_mode<synchronous>, transform_indices = @transform_8, window_bounds = array<i64: 4, 32>}, {pipeline_mode = #tpu.pipeline_mode<synchronous>, transform_indices = @transform_9, window_bounds = array<i64: 64, 1024>}, {pipeline_mode = #tpu.pipeline_mode<synchronous>, transform_indices = @transform_10, window_bounds = array<i64: 2, 1024>}, {pipeline_mode = #tpu.pipeline_mode<synchronous>, transform_indices = @transform_11, window_bounds = array<i64: 512, 32>}, {transform_indices = @transform_12, window_bounds = array<i64: 1, 16, 512>}]} {
    %cst = arith.constant 0.000000e+00 : f32
    %0 = vector.broadcast %cst : f32 to vector<2x512xf32>
    %c0 = arith.constant 0 : index
    %c0_0 = arith.constant 0 : index
    %1 = vector.load %arg14[%c0, %c0_0] : memref<20x512xf32, #tpu.memory_space<vmem>>, vector<2x512xf32>
    tpu.vector_store %arg14[%c0, %c0_0], %0 {strides = array<i32>} : memref<20x512xf32, #tpu.memory_space<vmem>>, vector<2x512xf32>,
    %cst_1 = arith.constant 0.000000e+00 : f32
    %2 = vector.broadcast %cst_1 : f32 to vector<2x512xf32>
    %c18 = arith.constant 18 : index
    %c0_2 = arith.constant 0 : index
    %3 = vector.load %arg14[%c18, %c0_2] : memref<20x512xf32, #tpu.memory_space<vmem>>, vector<2x512xf32>
    tpu.vector_store %arg14[%c18, %c0_2], %2 {strides = array<i32>} : memref<20x512xf32, #tpu.memory_space<vmem>>, vector<2x512xf32>,
    %c0_3 = arith.constant 0 : index
    %c0_4 = arith.constant 0 : index
    %c0_5 = arith.constant 0 : index
    %4 = vector.load %arg2[%c0_3, %c0_4, %c0_5] : memref<1x16x128xf32, #tpu.memory_space<vmem>>, vector<1x16x128xf32>
    %5 = vector.shape_cast %4 : vector<1x16x128xf32> to vector<16x128xf32>
    %c0_6 = arith.constant 0 : index
    %c0_7 = arith.constant 0 : index
    %6 = vector.load %arg4[%c0_6, %c0_7] : memref<128x512xf32, #tpu.memory_space<vmem>>, vector<128x512xf32>
    %cst_8 = arith.constant dense<0.000000e+00> : vector<16x512xf32>
    %7 = tpu.matmul %5, %6, %cst_8 {dimension_numbers = #tpu.dot_dimension_numbers<[1], [0], [0], [1], [0, 0, 1, 1], [], []>} : vector<16x128xf32>, vector<128x512xf32>, vector<16x512xf32> -> vector<16x512xf32>
    %c0_9 = arith.constant 0 : index
    %c0_10 = arith.constant 0 : index
    %8 = vector.load %arg5[%c0_9, %c0_10] : memref<1x512xf32, #tpu.memory_space<vmem>>, vector<1x512xf32>
    %9 = vector.broadcast %8 : vector<1x512xf32> to vector<16x512xf32>
    %10 = arith.addf %7, %9 : vector<16x512xf32>
    %c0_11 = arith.constant 0 : index
    %c0_12 = arith.constant 0 : index
    %11 = memref.load %arg1[%c0_11, %c0_12] : memref<1x1xf32, #tpu.memory_space<smem>>
    %c2 = arith.constant 2 : index
    %c0_13 = arith.constant 0 : index
    %12 = vector.load %arg14[%c2, %c0_13] : memref<20x512xf32, #tpu.memory_space<vmem>>, vector<16x512xf32>
    tpu.vector_store %arg14[%c2, %c0_13], %10 {strides = array<i32>} : memref<20x512xf32, #tpu.memory_space<vmem>>, vector<16x512xf32>,
    %c0_14 = arith.constant 0 : index
    %c0_15 = arith.constant 0 : index
    %13 = vector.load %arg14[%c0_14, %c0_15] : memref<20x512xf32, #tpu.memory_space<vmem>>, vector<20x512xf32>
    %c32_i32 = arith.constant 32 : i32
    %14 = tpu.dynamic_rotate %13 by %c32_i32 dim 1 : vector<20x512xf32>, i32 -> vector<20x512xf32>
    %c480_i32 = arith.constant 480 : i32
    %15 = tpu.dynamic_rotate %13 by %c480_i32 dim 1 : vector<20x512xf32>, i32 -> vector<20x512xf32>
    %cst_16 = arith.constant 0.000000e+00 : f32
    %16 = vector.broadcast %cst_16 : f32 to vector<16x512xf32>
    %17 = vector.extract_strided_slice %14 {offsets = [1, 0], sizes = [16, 512], strides = [1, 1]} : vector<20x512xf32> to vector<16x512xf32>
    %c0_17 = arith.constant 0 : index
    %c0_18 = arith.constant 0 : index
    %18 = vector.load %arg6[%c0_17, %c0_18] : memref<36x512xf32, #tpu.memory_space<vmem>>, vector<1x512xf32>
    %19 = vector.broadcast %18 : vector<1x512xf32> to vector<16x512xf32>
    %20 = arith.mulf %17, %19 : vector<16x512xf32>
    %21 = arith.addf %16, %20 : vector<16x512xf32>
    %c1 = arith.constant 1 : index
    %c0_19 = arith.constant 0 : index
    %22 = vector.load %arg14[%c1, %c0_19] : memref<20x512xf32, #tpu.memory_space<vmem>>, vector<16x512xf32>
    %c1_20 = arith.constant 1 : index
    %c0_21 = arith.constant 0 : index
    %23 = vector.load %arg6[%c1_20, %c0_21] : memref<36x512xf32, #tpu.memory_space<vmem>>, vector<1x512xf32>
    %24 = vector.broadcast %23 : vector<1x512xf32> to vector<16x512xf32>
    %25 = arith.mulf %22, %24 : vector<16x512xf32>
    %26 = arith.addf %21, %25 : vector<16x512xf32>
    %27 = vector.extract_strided_slice %15 {offsets = [1, 0], sizes = [16, 512], strides = [1, 1]} : vector<20x512xf32> to vector<16x512xf32>
    %c2_22 = arith.constant 2 : index
    %c0_23 = arith.constant 0 : index
    %28 = vector.load %arg6[%c2_22, %c0_23] : memref<36x512xf32, #tpu.memory_space<vmem>>, vector<1x512xf32>
    %29 = vector.broadcast %28 : vector<1x512xf32> to vector<16x512xf32>
    %30 = arith.mulf %27, %29 : vector<16x512xf32>
    %31 = arith.addf %26, %30 : vector<16x512xf32>
    %32 = vector.extract_strided_slice %14 {offsets = [2, 0], sizes = [16, 512], strides = [1, 1]} : vector<20x512xf32> to vector<16x512xf32>
    %c3 = arith.constant 3 : index
    %c0_24 = arith.constant 0 : index
    %33 = vector.load %arg6[%c3, %c0_24] : memref<36x512xf32, #tpu.memory_space<vmem>>, vector<1x512xf32>
    %34 = vector.broadcast %33 : vector<1x512xf32> to vector<16x512xf32>
    %35 = arith.mulf %32, %34 : vector<16x512xf32>
    %36 = arith.addf %31, %35 : vector<16x512xf32>
    %c2_25 = arith.constant 2 : index
    %c0_26 = arith.constant 0 : index
    %37 = vector.load %arg14[%c2_25, %c0_26] : memref<20x512xf32, #tpu.memory_space<vmem>>, vector<16x512xf32>
    %c4 = arith.constant 4 : index
    %c0_27 = arith.constant 0 : index
    %38 = vector.load %arg6[%c4, %c0_27] : memref<36x512xf32, #tpu.memory_space<vmem>>, vector<1x512xf32>
    %39 = vector.broadcast %38 : vector<1x512xf32> to vector<16x512xf32>
    %40 = arith.mulf %37, %39 : vector<16x512xf32>
    %41 = arith.addf %36, %40 : vector<16x512xf32>
    %42 = vector.extract_strided_slice %15 {offsets = [2, 0], sizes = [16, 512], strides = [1, 1]} : vector<20x512xf32> to vector<16x512xf32>
    %c5 = arith.constant 5 : index
    %c0_28 = arith.constant 0 : index
    %43 = vector.load %arg6[%c5, %c0_28] : memref<36x512xf32, #tpu.memory_space<vmem>>, vector<1x512xf32>
    %44 = vector.broadcast %43 : vector<1x512xf32> to vector<16x512xf32>
    %45 = arith.mulf %42, %44 : vector<16x512xf32>
    %46 = arith.addf %41, %45 : vector<16x512xf32>
    %47 = vector.extract_strided_slice %14 {offsets = [3, 0], sizes = [16, 512], strides = [1, 1]} : vector<20x512xf32> to vector<16x512xf32>
    %c6 = arith.constant 6 : index
    %c0_29 = arith.constant 0 : index
    %48 = vector.load %arg6[%c6, %c0_29] : memref<36x512xf32, #tpu.memory_space<vmem>>, vector<1x512xf32>
    %49 = vector.broadcast %48 : vector<1x512xf32> to vector<16x512xf32>
    %50 = arith.mulf %47, %49 : vector<16x512xf32>
    %51 = arith.addf %46, %50 : vector<16x512xf32>
    %c3_30 = arith.constant 3 : index
    %c0_31 = arith.constant 0 : index
    %52 = vector.load %arg14[%c3_30, %c0_31] : memref<20x512xf32, #tpu.memory_space<vmem>>, vector<16x512xf32>
    %c7 = arith.constant 7 : index
    %c0_32 = arith.constant 0 : index
    %53 = vector.load %arg6[%c7, %c0_32] : memref<36x512xf32, #tpu.memory_space<vmem>>, vector<1x512xf32>
    %54 = vector.broadcast %53 : vector<1x512xf32> to vector<16x512xf32>
    %55 = arith.mulf %52, %54 : vector<16x512xf32>
    %56 = arith.addf %51, %55 : vector<16x512xf32>
    %57 = vector.extract_strided_slice %15 {offsets = [3, 0], sizes = [16, 512], strides = [1, 1]} : vector<20x512xf32> to vector<16x512xf32>
    %c8 = arith.constant 8 : index
    %c0_33 = arith.constant 0 : index
    %58 = vector.load %arg6[%c8, %c0_33] : memref<36x512xf32, #tpu.memory_space<vmem>>, vector<1x512xf32>
    %59 = vector.broadcast %58 : vector<1x512xf32> to vector<16x512xf32>
    %60 = arith.mulf %57, %59 : vector<16x512xf32>
    %61 = arith.addf %56, %60 : vector<16x512xf32>
    %c0_34 = arith.constant 0 : index
    %c0_35 = arith.constant 0 : index
    %62 = vector.load %arg7[%c0_34, %c0_35] : memref<8x512xf32, #tpu.memory_space<vmem>>, vector<1x512xf32>
    %c1_36 = arith.constant 1 : index
    %c0_37 = arith.constant 0 : index
    %63 = vector.load %arg7[%c1_36, %c0_37] : memref<8x512xf32, #tpu.memory_space<vmem>>, vector<1x512xf32>
    %64 = vector.broadcast %62 : vector<1x512xf32> to vector<16x512xf32>
    %65 = arith.mulf %61, %64 : vector<16x512xf32>
    %66 = vector.broadcast %63 : vector<1x512xf32> to vector<16x512xf32>
    %67 = arith.addf %65, %66 : vector<16x512xf32>
    %cst_38 = arith.constant 0.000000e+00 : f32
    %68 = vector.broadcast %cst_38 : f32 to vector<16x512xf32>
    %69 = arith.maximumf %67, %68 : vector<16x512xf32>
    %c0_39 = arith.constant 0 : index
    %c0_40 = arith.constant 0 : index
    %70 = vector.load %arg15[%c0_39, %c0_40] : memref<16x512xf32, #tpu.memory_space<vmem>>, vector<16x512xf32>
    tpu.vector_store %arg15[%c0_39, %c0_40], %69 {strides = array<i32>} : memref<16x512xf32, #tpu.memory_space<vmem>>, vector<16x512xf32>,
    %c0_41 = arith.constant 0 : index
    %c0_42 = arith.constant 0 : index
    %71 = vector.load %arg14[%c0_41, %c0_42] : memref<20x512xf32, #tpu.memory_space<vmem>>, vector<20x512xf32>
    %c64_i32 = arith.constant 64 : i32
    %72 = tpu.dynamic_rotate %71 by %c64_i32 dim 1 : vector<20x512xf32>, i32 -> vector<20x512xf32>
    %c448_i32 = arith.constant 448 : i32
    %73 = tpu.dynamic_rotate %71 by %c448_i32 dim 1 : vector<20x512xf32>, i32 -> vector<20x512xf32>
    %cst_43 = arith.constant 0.000000e+00 : f32
    %74 = vector.broadcast %cst_43 : f32 to vector<16x512xf32>
    %75 = vector.extract_strided_slice %72 {offsets = [0, 0], sizes = [16, 512], strides = [1, 1]} : vector<20x512xf32> to vector<16x512xf32>
    %c9 = arith.constant 9 : index
    %c0_44 = arith.constant 0 : index
    %76 = vector.load %arg6[%c9, %c0_44] : memref<36x512xf32, #tpu.memory_space<vmem>>, vector<1x512xf32>
    %77 = vector.broadcast %76 : vector<1x512xf32> to vector<16x512xf32>
    %78 = arith.mulf %75, %77 : vector<16x512xf32>
    %79 = arith.addf %74, %78 : vector<16x512xf32>
    %c0_45 = arith.constant 0 : index
    %c0_46 = arith.constant 0 : index
    %80 = vector.load %arg14[%c0_45, %c0_46] : memref<20x512xf32, #tpu.memory_space<vmem>>, vector<16x512xf32>
    %c10 = arith.constant 10 : index
    %c0_47 = arith.constant 0 : index
    %81 = vector.load %arg6[%c10, %c0_47] : memref<36x512xf32, #tpu.memory_space<vmem>>, vector<1x512xf32>
    %82 = vector.broadcast %81 : vector<1x512xf32> to vector<16x512xf32>
    %83 = arith.mulf %80, %82 : vector<16x512xf32>
    %84 = arith.addf %79, %83 : vector<16x512xf32>
    %85 = vector.extract_strided_slice %73 {offsets = [0, 0], sizes = [16, 512], strides = [1, 1]} : vector<20x512xf32> to vector<16x512xf32>
    %c11 = arith.constant 11 : index
    %c0_48 = arith.constant 0 : index
    %86 = vector.load %arg6[%c11, %c0_48] : memref<36x512xf32, #tpu.memory_space<vmem>>, vector<1x512xf32>
    %87 = vector.broadcast %86 : vector<1x512xf32> to vector<16x512xf32>
    %88 = arith.mulf %85, %87 : vector<16x512xf32>
    %89 = arith.addf %84, %88 : vector<16x512xf32>
    %90 = vector.extract_strided_slice %72 {offsets = [2, 0], sizes = [16, 512], strides = [1, 1]} : vector<20x512xf32> to vector<16x512xf32>
    %c12 = arith.constant 12 : index
    %c0_49 = arith.constant 0 : index
    %91 = vector.load %arg6[%c12, %c0_49] : memref<36x512xf32, #tpu.memory_space<vmem>>, vector<1x512xf32>
    %92 = vector.broadcast %91 : vector<1x512xf32> to vector<16x512xf32>
    %93 = arith.mulf %90, %92 : vector<16x512xf32>
    %94 = arith.addf %89, %93 : vector<16x512xf32>
    %c2_50 = arith.constant 2 : index
    %c0_51 = arith.constant 0 : index
    %95 = vector.load %arg14[%c2_50, %c0_51] : memref<20x512xf32, #tpu.memory_space<vmem>>, vector<16x512xf32>
    %c13 = arith.constant 13 : index
    %c0_52 = arith.constant 0 : index
    %96 = vector.load %arg6[%c13, %c0_52] : memref<36x512xf32, #tpu.memory_space<vmem>>, vector<1x512xf32>
    %97 = vector.broadcast %96 : vector<1x512xf32> to vector<16x512xf32>
    %98 = arith.mulf %95, %97 : vector<16x512xf32>
    %99 = arith.addf %94, %98 : vector<16x512xf32>
    %100 = vector.extract_strided_slice %73 {offsets = [2, 0], sizes = [16, 512], strides = [1, 1]} : vector<20x512xf32> to vector<16x512xf32>
    %c14 = arith.constant 14 : index
    %c0_53 = arith.constant 0 : index
    %101 = vector.load %arg6[%c14, %c0_53] : memref<36x512xf32, #tpu.memory_space<vmem>>, vector<1x512xf32>
    %102 = vector.broadcast %101 : vector<1x512xf32> to vector<16x512xf32>
    %103 = arith.mulf %100, %102 : vector<16x512xf32>
    %104 = arith.addf %99, %103 : vector<16x512xf32>
    %105 = vector.extract_strided_slice %72 {offsets = [4, 0], sizes = [16, 512], strides = [1, 1]} : vector<20x512xf32> to vector<16x512xf32>
    %c15 = arith.constant 15 : index
    %c0_54 = arith.constant 0 : index
    %106 = vector.load %arg6[%c15, %c0_54] : memref<36x512xf32, #tpu.memory_space<vmem>>, vector<1x512xf32>
    %107 = vector.broadcast %106 : vector<1x512xf32> to vector<16x512xf32>
    %108 = arith.mulf %105, %107 : vector<16x512xf32>
    %109 = arith.addf %104, %108 : vector<16x512xf32>
    %c4_55 = arith.constant 4 : index
    %c0_56 = arith.constant 0 : index
    %110 = vector.load %arg14[%c4_55, %c0_56] : memref<20x512xf32, #tpu.memory_space<vmem>>, vector<16x512xf32>
    %c16 = arith.constant 16 : index
    %c0_57 = arith.constant 0 : index
    %111 = vector.load %arg6[%c16, %c0_57] : memref<36x512xf32, #tpu.memory_space<vmem>>, vector<1x512xf32>
    %112 = vector.broadcast %111 : vector<1x512xf32> to vector<16x512xf32>
    %113 = arith.mulf %110, %112 : vector<16x512xf32>
    %114 = arith.addf %109, %113 : vector<16x512xf32>
    %115 = vector.extract_strided_slice %73 {offsets = [4, 0], sizes = [16, 512], strides = [1, 1]} : vector<20x512xf32> to vector<16x512xf32>
    %c17 = arith.constant 17 : index
    %c0_58 = arith.constant 0 : index
    %116 = vector.load %arg6[%c17, %c0_58] : memref<36x512xf32, #tpu.memory_space<vmem>>, vector<1x512xf32>
    %117 = vector.broadcast %116 : vector<1x512xf32> to vector<16x512xf32>
    %118 = arith.mulf %115, %117 : vector<16x512xf32>
    %119 = arith.addf %114, %118 : vector<16x512xf32>
    %c2_59 = arith.constant 2 : index
    %c0_60 = arith.constant 0 : index
    %120 = vector.load %arg7[%c2_59, %c0_60] : memref<8x512xf32, #tpu.memory_space<vmem>>, vector<1x512xf32>
    %c3_61 = arith.constant 3 : index
    %c0_62 = arith.constant 0 : index
    %121 = vector.load %arg7[%c3_61, %c0_62] : memref<8x512xf32, #tpu.memory_space<vmem>>, vector<1x512xf32>
    %122 = vector.broadcast %120 : vector<1x512xf32> to vector<16x512xf32>
    %123 = arith.mulf %119, %122 : vector<16x512xf32>
    %124 = vector.broadcast %121 : vector<1x512xf32> to vector<16x512xf32>
    %125 = arith.addf %123, %124 : vector<16x512xf32>
    %cst_63 = arith.constant 0.000000e+00 : f32
    %126 = vector.broadcast %cst_63 : f32 to vector<16x512xf32>
    %127 = arith.maximumf %125, %126 : vector<16x512xf32>
    %c0_64 = arith.constant 0 : index
    %c0_65 = arith.constant 0 : index
    %128 = vector.load %arg15[%c0_64, %c0_65] : memref<16x512xf32, #tpu.memory_space<vmem>>, vector<16x512xf32>
    %129 = arith.addf %128, %127 : vector<16x512xf32>
    %cst_66 = arith.constant dense<0.000000e+00> : vector<512xf32>
    %130 = vector.multi_reduction <add>, %129, %cst_66 [0] : vector<16x512xf32> to vector<512xf32>
    %131 = vector.shape_cast %130 : vector<512xf32> to vector<1x512xf32>
    %c0_67 = arith.constant 0 : index
    %c0_68 = arith.constant 0 : index
    %132 = vector.load %arg12[%c0_67, %c0_68] : memref<512x32xf32, #tpu.memory_space<vmem>>, vector<512x32xf32>
    %cst_69 = arith.constant dense<0.000000e+00> : vector<1x32xf32>
    %133 = tpu.matmul %131, %132, %cst_69 {dimension_numbers = #tpu.dot_dimension_numbers<[1], [0], [0], [1], [0, 0, 1, 1], [], []>} : vector<1x512xf32>, vector<512x32xf32>, vector<1x32xf32> -> vector<1x32xf32>
    %c0_70 = arith.constant 0 : index
    %c0_71 = arith.constant 0 : index
    %134 = vector.load %arg8[%c0_70, %c0_71] : memref<64x32xf32, #tpu.memory_space<vmem>>, vector<32x32xf32>
    %cst_72 = arith.constant dense<0.000000e+00> : vector<1x32xf32>
    %135 = tpu.matmul %133, %134, %cst_72 {dimension_numbers = #tpu.dot_dimension_numbers<[1], [0], [0], [1], [0, 0, 1, 1], [], []>} : vector<1x32xf32>, vector<32x32xf32>, vector<1x32xf32> -> vector<1x32xf32>
    %c0_73 = arith.constant 0 : index
    %c0_74 = arith.constant 0 : index
    %136 = vector.load %arg9[%c0_73, %c0_74] : memref<4x32xf32, #tpu.memory_space<vmem>>, vector<1x32xf32>
    %137 = arith.mulf %135, %136 : vector<1x32xf32>
    %c1_75 = arith.constant 1 : index
    %c0_76 = arith.constant 0 : index
    %138 = vector.load %arg9[%c1_75, %c0_76] : memref<4x32xf32, #tpu.memory_space<vmem>>, vector<1x32xf32>
    %139 = arith.addf %137, %138 : vector<1x32xf32>
    %cst_77 = arith.constant 0.000000e+00 : f32
    %140 = vector.broadcast %cst_77 : f32 to vector<1x32xf32>
    %141 = arith.maximumf %139, %140 : vector<1x32xf32>
    %c0_78 = arith.constant 0 : index
    %c0_79 = arith.constant 0 : index
    %142 = vector.load %arg10[%c0_78, %c0_79] : memref<64x1024xf32, #tpu.memory_space<vmem>>, vector<32x1024xf32>
    %cst_80 = arith.constant dense<0.000000e+00> : vector<1x1024xf32>
    %143 = tpu.matmul %141, %142, %cst_80 {dimension_numbers = #tpu.dot_dimension_numbers<[1], [0], [0], [1], [0, 0, 1, 1], [], []>} : vector<1x32xf32>, vector<32x1024xf32>, vector<1x1024xf32> -> vector<1x1024xf32>
    %c0_81 = arith.constant 0 : index
    %c0_82 = arith.constant 0 : index
    %144 = vector.load %arg11[%c0_81, %c0_82] : memref<2x1024xf32, #tpu.memory_space<vmem>>, vector<1x1024xf32>
    %145 = arith.addf %143, %144 : vector<1x1024xf32>
    %146 = vector.extract_strided_slice %145 {offsets = [0, 0], sizes = [1, 512], strides = [1, 1]} : vector<1x1024xf32> to vector<1x512xf32>
    %147 = vector.extract_strided_slice %145 {offsets = [0, 512], sizes = [1, 512], strides = [1, 1]} : vector<1x1024xf32> to vector<1x512xf32>
    %148 = arith.maximumf %146, %147 : vector<1x512xf32>
    %149 = arith.subf %146, %148 : vector<1x512xf32>
    %150 = math.exp %149 : vector<1x512xf32>
    %151 = arith.subf %147, %148 : vector<1x512xf32>
    %152 = math.exp %151 : vector<1x512xf32>
    %153 = arith.addf %150, %152 : vector<1x512xf32>
    %154 = tpu.reciprocal %153 {approx = true} : vector<1x512xf32> -> vector<1x512xf32>
    %155 = arith.mulf %150, %154 : vector<1x512xf32>
    %156 = vector.broadcast %155 : vector<1x512xf32> to vector<16x512xf32>
    %157 = arith.mulf %128, %156 : vector<16x512xf32>
    %158 = arith.mulf %152, %154 : vector<1x512xf32>
    %159 = vector.broadcast %158 : vector<1x512xf32> to vector<16x512xf32>
    %160 = arith.mulf %127, %159 : vector<16x512xf32>
    %161 = arith.addf %157, %160 : vector<16x512xf32>
    %162 = vector.broadcast %11 : f32 to vector<16x512xf32>
    %163 = arith.mulf %162, %161 : vector<16x512xf32>
    %c0_83 = arith.constant 0 : index
    %c0_84 = arith.constant 0 : index
    %c0_85 = arith.constant 0 : index
    %164 = vector.load %arg13[%c0_83, %c0_84, %c0_85] : memref<1x16x512xf32, #tpu.memory_space<vmem>>, vector<1x16x512xf32>
    %165 = vector.shape_cast %164 : vector<1x16x512xf32> to vector<16x512xf32>
    %166 = vector.shape_cast %163 : vector<16x512xf32> to vector<1x16x512xf32>
    tpu.vector_store %arg13[%c0_83, %c0_84, %c0_85], %166 {strides = array<i32>} : memref<1x16x512xf32, #tpu.memory_space<vmem>>, vector<1x16x512xf32>,
    %c0_86 = arith.constant 0 : index
    %c0_87 = arith.constant 0 : index
    %c0_88 = arith.constant 0 : index
    %167 = vector.load %arg13[%c0_86, %c0_87, %c0_88] : memref<1x16x512xf32, #tpu.memory_space<vmem>>, vector<1x16x512xf32>
    %168 = vector.shape_cast %167 : vector<1x16x512xf32> to vector<16x512xf32>
    %cst_89 = arith.constant 1.000000e+00 : f32
    %169 = arith.subf %cst_89, %11 : f32
    %c0_90 = arith.constant 0 : index
    %c0_91 = arith.constant 0 : index
    %c0_92 = arith.constant 0 : index
    %170 = vector.load %arg3[%c0_90, %c0_91, %c0_92] : memref<1x16x512xf32, #tpu.memory_space<vmem>>, vector<1x16x512xf32>
    %171 = vector.shape_cast %170 : vector<1x16x512xf32> to vector<16x512xf32>
    %c2_93 = arith.constant 2 : index
    %c0_94 = arith.constant 0 : index
    %172 = vector.load %arg14[%c2_93, %c0_94] : memref<20x512xf32, #tpu.memory_space<vmem>>, vector<16x512xf32>
    tpu.vector_store %arg14[%c2_93, %c0_94], %171 {strides = array<i32>} : memref<20x512xf32, #tpu.memory_space<vmem>>, vector<16x512xf32>,
    %c0_95 = arith.constant 0 : index
    %c0_96 = arith.constant 0 : index
    %173 = vector.load %arg14[%c0_95, %c0_96] : memref<20x512xf32, #tpu.memory_space<vmem>>, vector<20x512xf32>
    %c32_i32_97 = arith.constant 32 : i32
    %174 = tpu.dynamic_rotate %173 by %c32_i32_97 dim 1 : vector<20x512xf32>, i32 -> vector<20x512xf32>
    %c480_i32_98 = arith.constant 480 : i32
    %175 = tpu.dynamic_rotate %173 by %c480_i32_98 dim 1 : vector<20x512xf32>, i32 -> vector<20x512xf32>
    %cst_99 = arith.constant 0.000000e+00 : f32
    %176 = vector.broadcast %cst_99 : f32 to vector<16x512xf32>
    %177 = vector.extract_strided_slice %174 {offsets = [1, 0], sizes = [16, 512], strides = [1, 1]} : vector<20x512xf32> to vector<16x512xf32>
    %c18_100 = arith.constant 18 : index
    %c0_101 = arith.constant 0 : index
    %178 = vector.load %arg6[%c18_100, %c0_101] : memref<36x512xf32, #tpu.memory_space<vmem>>, vector<1x512xf32>
    %179 = vector.broadcast %178 : vector<1x512xf32> to vector<16x512xf32>
    %180 = arith.mulf %177, %179 : vector<16x512xf32>
    %181 = arith.addf %176, %180 : vector<16x512xf32>
    %c1_102 = arith.constant 1 : index
    %c0_103 = arith.constant 0 : index
    %182 = vector.load %arg14[%c1_102, %c0_103] : memref<20x512xf32, #tpu.memory_space<vmem>>, vector<16x512xf32>
    %c19 = arith.constant 19 : index
    %c0_104 = arith.constant 0 : index
    %183 = vector.load %arg6[%c19, %c0_104] : memref<36x512xf32, #tpu.memory_space<vmem>>, vector<1x512xf32>
    %184 = vector.broadcast %183 : vector<1x512xf32> to vector<16x512xf32>
    %185 = arith.mulf %182, %184 : vector<16x512xf32>
    %186 = arith.addf %181, %185 : vector<16x512xf32>
    %187 = vector.extract_strided_slice %175 {offsets = [1, 0], sizes = [16, 512], strides = [1, 1]} : vector<20x512xf32> to vector<16x512xf32>
    %c20 = arith.constant 20 : index
    %c0_105 = arith.constant 0 : index
    %188 = vector.load %arg6[%c20, %c0_105] : memref<36x512xf32, #tpu.memory_space<vmem>>, vector<1x512xf32>
    %189 = vector.broadcast %188 : vector<1x512xf32> to vector<16x512xf32>
    %190 = arith.mulf %187, %189 : vector<16x512xf32>
    %191 = arith.addf %186, %190 : vector<16x512xf32>
    %192 = vector.extract_strided_slice %174 {offsets = [2, 0], sizes = [16, 512], strides = [1, 1]} : vector<20x512xf32> to vector<16x512xf32>
    %c21 = arith.constant 21 : index
    %c0_106 = arith.constant 0 : index
    %193 = vector.load %arg6[%c21, %c0_106] : memref<36x512xf32, #tpu.memory_space<vmem>>, vector<1x512xf32>
    %194 = vector.broadcast %193 : vector<1x512xf32> to vector<16x512xf32>
    %195 = arith.mulf %192, %194 : vector<16x512xf32>
    %196 = arith.addf %191, %195 : vector<16x512xf32>
    %c2_107 = arith.constant 2 : index
    %c0_108 = arith.constant 0 : index
    %197 = vector.load %arg14[%c2_107, %c0_108] : memref<20x512xf32, #tpu.memory_space<vmem>>, vector<16x512xf32>
    %c22 = arith.constant 22 : index
    %c0_109 = arith.constant 0 : index
    %198 = vector.load %arg6[%c22, %c0_109] : memref<36x512xf32, #tpu.memory_space<vmem>>, vector<1x512xf32>
    %199 = vector.broadcast %198 : vector<1x512xf32> to vector<16x512xf32>
    %200 = arith.mulf %197, %199 : vector<16x512xf32>
    %201 = arith.addf %196, %200 : vector<16x512xf32>
    %202 = vector.extract_strided_slice %175 {offsets = [2, 0], sizes = [16, 512], strides = [1, 1]} : vector<20x512xf32> to vector<16x512xf32>
    %c23 = arith.constant 23 : index
    %c0_110 = arith.constant 0 : index
    %203 = vector.load %arg6[%c23, %c0_110] : memref<36x512xf32, #tpu.memory_space<vmem>>, vector<1x512xf32>
    %204 = vector.broadcast %203 : vector<1x512xf32> to vector<16x512xf32>
    %205 = arith.mulf %202, %204 : vector<16x512xf32>
    %206 = arith.addf %201, %205 : vector<16x512xf32>
    %207 = vector.extract_strided_slice %174 {offsets = [3, 0], sizes = [16, 512], strides = [1, 1]} : vector<20x512xf32> to vector<16x512xf32>
    %c24 = arith.constant 24 : index
    %c0_111 = arith.constant 0 : index
    %208 = vector.load %arg6[%c24, %c0_111] : memref<36x512xf32, #tpu.memory_space<vmem>>, vector<1x512xf32>
    %209 = vector.broadcast %208 : vector<1x512xf32> to vector<16x512xf32>
    %210 = arith.mulf %207, %209 : vector<16x512xf32>
    %211 = arith.addf %206, %210 : vector<16x512xf32>
    %c3_112 = arith.constant 3 : index
    %c0_113 = arith.constant 0 : index
    %212 = vector.load %arg14[%c3_112, %c0_113] : memref<20x512xf32, #tpu.memory_space<vmem>>, vector<16x512xf32>
    %c25 = arith.constant 25 : index
    %c0_114 = arith.constant 0 : index
    %213 = vector.load %arg6[%c25, %c0_114] : memref<36x512xf32, #tpu.memory_space<vmem>>, vector<1x512xf32>
    %214 = vector.broadcast %213 : vector<1x512xf32> to vector<16x512xf32>
    %215 = arith.mulf %212, %214 : vector<16x512xf32>
    %216 = arith.addf %211, %215 : vector<16x512xf32>
    %217 = vector.extract_strided_slice %175 {offsets = [3, 0], sizes = [16, 512], strides = [1, 1]} : vector<20x512xf32> to vector<16x512xf32>
    %c26 = arith.constant 26 : index
    %c0_115 = arith.constant 0 : index
    %218 = vector.load %arg6[%c26, %c0_115] : memref<36x512xf32, #tpu.memory_space<vmem>>, vector<1x512xf32>
    %219 = vector.broadcast %218 : vector<1x512xf32> to vector<16x512xf32>
    %220 = arith.mulf %217, %219 : vector<16x512xf32>
    %221 = arith.addf %216, %220 : vector<16x512xf32>
    %c4_116 = arith.constant 4 : index
    %c0_117 = arith.constant 0 : index
    %222 = vector.load %arg7[%c4_116, %c0_117] : memref<8x512xf32, #tpu.memory_space<vmem>>, vector<1x512xf32>
    %c5_118 = arith.constant 5 : index
    %c0_119 = arith.constant 0 : index
    %223 = vector.load %arg7[%c5_118, %c0_119] : memref<8x512xf32, #tpu.memory_space<vmem>>, vector<1x512xf32>
    %224 = vector.broadcast %222 : vector<1x512xf32> to vector<16x512xf32>
    %225 = arith.mulf %221, %224 : vector<16x512xf32>
    %226 = vector.broadcast %223 : vector<1x512xf32> to vector<16x512xf32>
    %227 = arith.addf %225, %226 : vector<16x512xf32>
    %cst_120 = arith.constant 0.000000e+00 : f32
    %228 = vector.broadcast %cst_120 : f32 to vector<16x512xf32>
    %229 = arith.maximumf %227, %228 : vector<16x512xf32>
    %c0_121 = arith.constant 0 : index
    %c0_122 = arith.constant 0 : index
    %230 = vector.load %arg15[%c0_121, %c0_122] : memref<16x512xf32, #tpu.memory_space<vmem>>, vector<16x512xf32>
    tpu.vector_store %arg15[%c0_121, %c0_122], %229 {strides = array<i32>} : memref<16x512xf32, #tpu.memory_space<vmem>>, vector<16x512xf32>,
    %c0_123 = arith.constant 0 : index
    %c0_124 = arith.constant 0 : index
    %231 = vector.load %arg14[%c0_123, %c0_124] : memref<20x512xf32, #tpu.memory_space<vmem>>, vector<20x512xf32>
    %c64_i32_125 = arith.constant 64 : i32
    %232 = tpu.dynamic_rotate %231 by %c64_i32_125 dim 1 : vector<20x512xf32>, i32 -> vector<20x512xf32>
    %c448_i32_126 = arith.constant 448 : i32
    %233 = tpu.dynamic_rotate %231 by %c448_i32_126 dim 1 : vector<20x512xf32>, i32 -> vector<20x512xf32>
    %cst_127 = arith.constant 0.000000e+00 : f32
    %234 = vector.broadcast %cst_127 : f32 to vector<16x512xf32>
    %235 = vector.extract_strided_slice %232 {offsets = [0, 0], sizes = [16, 512], strides = [1, 1]} : vector<20x512xf32> to vector<16x512xf32>
    %c27 = arith.constant 27 : index
    %c0_128 = arith.constant 0 : index
    %236 = vector.load %arg6[%c27, %c0_128] : memref<36x512xf32, #tpu.memory_space<vmem>>, vector<1x512xf32>
    %237 = vector.broadcast %236 : vector<1x512xf32> to vector<16x512xf32>
    %238 = arith.mulf %235, %237 : vector<16x512xf32>
    %239 = arith.addf %234, %238 : vector<16x512xf32>
    %c0_129 = arith.constant 0 : index
    %c0_130 = arith.constant 0 : index
    %240 = vector.load %arg14[%c0_129, %c0_130] : memref<20x512xf32, #tpu.memory_space<vmem>>, vector<16x512xf32>
    %c28 = arith.constant 28 : index
    %c0_131 = arith.constant 0 : index
    %241 = vector.load %arg6[%c28, %c0_131] : memref<36x512xf32, #tpu.memory_space<vmem>>, vector<1x512xf32>
    %242 = vector.broadcast %241 : vector<1x512xf32> to vector<16x512xf32>
    %243 = arith.mulf %240, %242 : vector<16x512xf32>
    %244 = arith.addf %239, %243 : vector<16x512xf32>
    %245 = vector.extract_strided_slice %233 {offsets = [0, 0], sizes = [16, 512], strides = [1, 1]} : vector<20x512xf32> to vector<16x512xf32>
    %c29 = arith.constant 29 : index
    %c0_132 = arith.constant 0 : index
    %246 = vector.load %arg6[%c29, %c0_132] : memref<36x512xf32, #tpu.memory_space<vmem>>, vector<1x512xf32>
    %247 = vector.broadcast %246 : vector<1x512xf32> to vector<16x512xf32>
    %248 = arith.mulf %245, %247 : vector<16x512xf32>
    %249 = arith.addf %244, %248 : vector<16x512xf32>
    %250 = vector.extract_strided_slice %232 {offsets = [2, 0], sizes = [16, 512], strides = [1, 1]} : vector<20x512xf32> to vector<16x512xf32>
    %c30 = arith.constant 30 : index
    %c0_133 = arith.constant 0 : index
    %251 = vector.load %arg6[%c30, %c0_133] : memref<36x512xf32, #tpu.memory_space<vmem>>, vector<1x512xf32>
    %252 = vector.broadcast %251 : vector<1x512xf32> to vector<16x512xf32>
    %253 = arith.mulf %250, %252 : vector<16x512xf32>
    %254 = arith.addf %249, %253 : vector<16x512xf32>
    %c2_134 = arith.constant 2 : index
    %c0_135 = arith.constant 0 : index
    %255 = vector.load %arg14[%c2_134, %c0_135] : memref<20x512xf32, #tpu.memory_space<vmem>>, vector<16x512xf32>
    %c31 = arith.constant 31 : index
    %c0_136 = arith.constant 0 : index
    %256 = vector.load %arg6[%c31, %c0_136] : memref<36x512xf32, #tpu.memory_space<vmem>>, vector<1x512xf32>
    %257 = vector.broadcast %256 : vector<1x512xf32> to vector<16x512xf32>
    %258 = arith.mulf %255, %257 : vector<16x512xf32>
    %259 = arith.addf %254, %258 : vector<16x512xf32>
    %260 = vector.extract_strided_slice %233 {offsets = [2, 0], sizes = [16, 512], strides = [1, 1]} : vector<20x512xf32> to vector<16x512xf32>
    %c32 = arith.constant 32 : index
    %c0_137 = arith.constant 0 : index
    %261 = vector.load %arg6[%c32, %c0_137] : memref<36x512xf32, #tpu.memory_space<vmem>>, vector<1x512xf32>
    %262 = vector.broadcast %261 : vector<1x512xf32> to vector<16x512xf32>
    %263 = arith.mulf %260, %262 : vector<16x512xf32>
    %264 = arith.addf %259, %263 : vector<16x512xf32>
    %265 = vector.extract_strided_slice %232 {offsets = [4, 0], sizes = [16, 512], strides = [1, 1]} : vector<20x512xf32> to vector<16x512xf32>
    %c33 = arith.constant 33 : index
    %c0_138 = arith.constant 0 : index
    %266 = vector.load %arg6[%c33, %c0_138] : memref<36x512xf32, #tpu.memory_space<vmem>>, vector<1x512xf32>
    %267 = vector.broadcast %266 : vector<1x512xf32> to vector<16x512xf32>
    %268 = arith.mulf %265, %267 : vector<16x512xf32>
    %269 = arith.addf %264, %268 : vector<16x512xf32>
    %c4_139 = arith.constant 4 : index
    %c0_140 = arith.constant 0 : index
    %270 = vector.load %arg14[%c4_139, %c0_140] : memref<20x512xf32, #tpu.memory_space<vmem>>, vector<16x512xf32>
    %c34 = arith.constant 34 : index
    %c0_141 = arith.constant 0 : index
    %271 = vector.load %arg6[%c34, %c0_141] : memref<36x512xf32, #tpu.memory_space<vmem>>, vector<1x512xf32>
    %272 = vector.broadcast %271 : vector<1x512xf32> to vector<16x512xf32>
    %273 = arith.mulf %270, %272 : vector<16x512xf32>
    %274 = arith.addf %269, %273 : vector<16x512xf32>
    %275 = vector.extract_strided_slice %233 {offsets = [4, 0], sizes = [16, 512], strides = [1, 1]} : vector<20x512xf32> to vector<16x512xf32>
    %c35 = arith.constant 35 : index
    %c0_142 = arith.constant 0 : index
    %276 = vector.load %arg6[%c35, %c0_142] : memref<36x512xf32, #tpu.memory_space<vmem>>, vector<1x512xf32>
    %277 = vector.broadcast %276 : vector<1x512xf32> to vector<16x512xf32>
    %278 = arith.mulf %275, %277 : vector<16x512xf32>
    %279 = arith.addf %274, %278 : vector<16x512xf32>
    %c6_143 = arith.constant 6 : index
    %c0_144 = arith.constant 0 : index
    %280 = vector.load %arg7[%c6_143, %c0_144] : memref<8x512xf32, #tpu.memory_space<vmem>>, vector<1x512xf32>
    %c7_145 = arith.constant 7 : index
    %c0_146 = arith.constant 0 : index
    %281 = vector.load %arg7[%c7_145, %c0_146] : memref<8x512xf32, #tpu.memory_space<vmem>>, vector<1x512xf32>
    %282 = vector.broadcast %280 : vector<1x512xf32> to vector<16x512xf32>
    %283 = arith.mulf %279, %282 : vector<16x512xf32>
    %284 = vector.broadcast %281 : vector<1x512xf32> to vector<16x512xf32>
    %285 = arith.addf %283, %284 : vector<16x512xf32>
    %cst_147 = arith.constant 0.000000e+00 : f32
    %286 = vector.broadcast %cst_147 : f32 to vector<16x512xf32>
    %287 = arith.maximumf %285, %286 : vector<16x512xf32>
    %c0_148 = arith.constant 0 : index
    %c0_149 = arith.constant 0 : index
    %288 = vector.load %arg15[%c0_148, %c0_149] : memref<16x512xf32, #tpu.memory_space<vmem>>, vector<16x512xf32>
    %289 = arith.addf %288, %287 : vector<16x512xf32>
    %cst_150 = arith.constant dense<0.000000e+00> : vector<512xf32>
    %290 = vector.multi_reduction <add>, %289, %cst_150 [0] : vector<16x512xf32> to vector<512xf32>
    %291 = vector.shape_cast %290 : vector<512xf32> to vector<1x512xf32>
    %c0_151 = arith.constant 0 : index
    %c0_152 = arith.constant 0 : index
    %292 = vector.load %arg12[%c0_151, %c0_152] : memref<512x32xf32, #tpu.memory_space<vmem>>, vector<512x32xf32>
    %cst_153 = arith.constant dense<0.000000e+00> : vector<1x32xf32>
    %293 = tpu.matmul %291, %292, %cst_153 {dimension_numbers = #tpu.dot_dimension_numbers<[1], [0], [0], [1], [0, 0, 1, 1], [], []>} : vector<1x512xf32>, vector<512x32xf32>, vector<1x32xf32> -> vector<1x32xf32>
    %c32_154 = arith.constant 32 : index
    %c0_155 = arith.constant 0 : index
    %294 = vector.load %arg8[%c32_154, %c0_155] : memref<64x32xf32, #tpu.memory_space<vmem>>, vector<32x32xf32>
    %cst_156 = arith.constant dense<0.000000e+00> : vector<1x32xf32>
    %295 = tpu.matmul %293, %294, %cst_156 {dimension_numbers = #tpu.dot_dimension_numbers<[1], [0], [0], [1], [0, 0, 1, 1], [], []>} : vector<1x32xf32>, vector<32x32xf32>, vector<1x32xf32> -> vector<1x32xf32>
    %c2_157 = arith.constant 2 : index
    %c0_158 = arith.constant 0 : index
    %296 = vector.load %arg9[%c2_157, %c0_158] : memref<4x32xf32, #tpu.memory_space<vmem>>, vector<1x32xf32>
    %297 = arith.mulf %295, %296 : vector<1x32xf32>
    %c3_159 = arith.constant 3 : index
    %c0_160 = arith.constant 0 : index
    %298 = vector.load %arg9[%c3_159, %c0_160] : memref<4x32xf32, #tpu.memory_space<vmem>>, vector<1x32xf32>
    %299 = arith.addf %297, %298 : vector<1x32xf32>
    %cst_161 = arith.constant 0.000000e+00 : f32
    %300 = vector.broadcast %cst_161 : f32 to vector<1x32xf32>
    %301 = arith.maximumf %299, %300 : vector<1x32xf32>
    %c32_162 = arith.constant 32 : index
    %c0_163 = arith.constant 0 : index
    %302 = vector.load %arg10[%c32_162, %c0_163] : memref<64x1024xf32, #tpu.memory_space<vmem>>, vector<32x1024xf32>
    %cst_164 = arith.constant dense<0.000000e+00> : vector<1x1024xf32>
    %303 = tpu.matmul %301, %302, %cst_164 {dimension_numbers = #tpu.dot_dimension_numbers<[1], [0], [0], [1], [0, 0, 1, 1], [], []>} : vector<1x32xf32>, vector<32x1024xf32>, vector<1x1024xf32> -> vector<1x1024xf32>
    %c1_165 = arith.constant 1 : index
    %c0_166 = arith.constant 0 : index
    %304 = vector.load %arg11[%c1_165, %c0_166] : memref<2x1024xf32, #tpu.memory_space<vmem>>, vector<1x1024xf32>
    %305 = arith.addf %303, %304 : vector<1x1024xf32>
    %306 = vector.extract_strided_slice %305 {offsets = [0, 0], sizes = [1, 512], strides = [1, 1]} : vector<1x1024xf32> to vector<1x512xf32>
    %307 = vector.extract_strided_slice %305 {offsets = [0, 512], sizes = [1, 512], strides = [1, 1]} : vector<1x1024xf32> to vector<1x512xf32>
    %308 = arith.maximumf %306, %307 : vector<1x512xf32>
    %309 = arith.subf %306, %308 : vector<1x512xf32>
    %310 = math.exp %309 : vector<1x512xf32>
    %311 = arith.subf %307, %308 : vector<1x512xf32>
    %312 = math.exp %311 : vector<1x512xf32>
    %313 = arith.addf %310, %312 : vector<1x512xf32>
    %314 = tpu.reciprocal %313 {approx = true} : vector<1x512xf32> -> vector<1x512xf32>
    %315 = arith.mulf %310, %314 : vector<1x512xf32>
    %316 = vector.broadcast %315 : vector<1x512xf32> to vector<16x512xf32>
    %317 = arith.mulf %288, %316 : vector<16x512xf32>
    %318 = arith.mulf %312, %314 : vector<1x512xf32>
    %319 = vector.broadcast %318 : vector<1x512xf32> to vector<16x512xf32>
    %320 = arith.mulf %287, %319 : vector<16x512xf32>
    %321 = arith.addf %317, %320 : vector<16x512xf32>
    %322 = vector.broadcast %169 : f32 to vector<16x512xf32>
    %323 = arith.mulf %322, %321 : vector<16x512xf32>
    %324 = arith.addf %168, %323 : vector<16x512xf32>
    %c0_167 = arith.constant 0 : index
    %c0_168 = arith.constant 0 : index
    %c0_169 = arith.constant 0 : index
    %325 = vector.load %arg13[%c0_167, %c0_168, %c0_169] : memref<1x16x512xf32, #tpu.memory_space<vmem>>, vector<1x16x512xf32>
    %326 = vector.shape_cast %325 : vector<1x16x512xf32> to vector<16x512xf32>
    %327 = vector.shape_cast %324 : vector<16x512xf32> to vector<1x16x512xf32>
    tpu.vector_store %arg13[%c0_167, %c0_168, %c0_169], %327 {strides = array<i32>} : memref<1x16x512xf32, #tpu.memory_space<vmem>>, vector<1x16x512xf32>,
    return
  }
  func.func @transform_0(%arg0: i32) -> (i32, i32) {
    %c0_i32 = arith.constant 0 : i32
    %c0_i32_0 = arith.constant 0 : i32
    %c0_i32_1 = arith.constant 0 : i32
    return %c0_i32, %c0_i32_0 : i32, i32
  }
  func.func @transform_1(%arg0: i32) -> (i32, i32, i32) {
    %c0_i32 = arith.constant 0 : i32
    %c0_i32_0 = arith.constant 0 : i32
    %c0_i32_1 = arith.constant 0 : i32
    return %arg0, %c0_i32, %c0_i32_0 : i32, i32, i32
  }
  func.func @transform_2(%arg0: i32) -> (i32, i32, i32) {
    %c0_i32 = arith.constant 0 : i32
    %c0_i32_0 = arith.constant 0 : i32
    %c0_i32_1 = arith.constant 0 : i32
    return %arg0, %c0_i32, %c0_i32_0 : i32, i32, i32
  }
  func.func @transform_3(%arg0: i32) -> (i32, i32) {
    %c0_i32 = arith.constant 0 : i32
    %c0_i32_0 = arith.constant 0 : i32
    %c0_i32_1 = arith.constant 0 : i32
    return %c0_i32, %c0_i32_0 : i32, i32
  }
  func.func @transform_4(%arg0: i32) -> (i32, i32) {
    %c0_i32 = arith.constant 0 : i32
    %c0_i32_0 = arith.constant 0 : i32
    %c0_i32_1 = arith.constant 0 : i32
    return %c0_i32, %c0_i32_0 : i32, i32
  }
  func.func @transform_5(%arg0: i32) -> (i32, i32) {
    %c0_i32 = arith.constant 0 : i32
    %c0_i32_0 = arith.constant 0 : i32
    %c0_i32_1 = arith.constant 0 : i32
    return %c0_i32, %c0_i32_0 : i32, i32
  }
  func.func @transform_6(%arg0: i32) -> (i32, i32) {
    %c0_i32 = arith.constant 0 : i32
    %c0_i32_0 = arith.constant 0 : i32
    %c0_i32_1 = arith.constant 0 : i32
    return %c0_i32, %c0_i32_0 : i32, i32
  }
  func.func @transform_7(%arg0: i32) -> (i32, i32) {
    %c0_i32 = arith.constant 0 : i32
    %c0_i32_0 = arith.constant 0 : i32
    %c0_i32_1 = arith.constant 0 : i32
    return %c0_i32, %c0_i32_0 : i32, i32
  }
  func.func @transform_8(%arg0: i32) -> (i32, i32) {
    %c0_i32 = arith.constant 0 : i32
    %c0_i32_0 = arith.constant 0 : i32
    %c0_i32_1 = arith.constant 0 : i32
    return %c0_i32, %c0_i32_0 : i32, i32
  }
  func.func @transform_9(%arg0: i32) -> (i32, i32) {
    %c0_i32 = arith.constant 0 : i32
    %c0_i32_0 = arith.constant 0 : i32
    %c0_i32_1 = arith.constant 0 : i32
    return %c0_i32, %c0_i32_0 : i32, i32
  }
  func.func @transform_10(%arg0: i32) -> (i32, i32) {
    %c0_i32 = arith.constant 0 : i32
    %c0_i32_0 = arith.constant 0 : i32
    %c0_i32_1 = arith.constant 0 : i32
    return %c0_i32, %c0_i32_0 : i32, i32
  }
  func.func @transform_11(%arg0: i32) -> (i32, i32) {
    %c0_i32 = arith.constant 0 : i32
    %c0_i32_0 = arith.constant 0 : i32
    %c0_i32_1 = arith.constant 0 : i32
    return %c0_i32, %c0_i32_0 : i32, i32
  }
  func.func @transform_12(%arg0: i32) -> (i32, i32, i32) {
    %c0_i32 = arith.constant 0 : i32
    %c0_i32_0 = arith.constant 0 : i32
    %c0_i32_1 = arith.constant 0 : i32
    return %arg0, %c0_i32, %c0_i32_0 : i32, i32, i32
  }
}

</mosaic_0001>

<bundles_post_ra>
// kernel: tile.424
= control target key start
LH: loop header
LB: loop body
LE: loop exit
PB: predicated region body
PF: predicated region fallthrough
CT: control target
= control target key end

     0   :  { %vm34_vm0 = vcmask 1043458   ;;  %vm39_vm1 = vcmask 1045508   ;;  %s74_s6 = smov 3  ;;  %vm44_vm2 = vcmask 1047558   ;;  %s77_s9 = smov 12  ;;  %vm3_vm3 = vcmask 261120   ;;  %s652_s0 = inlined_call_operand.vmem [shape: f32[8,16,32], index: 0, kind: input, shape index: {}]   ;;  %s653_s1 = inlined_call_operand.vmem [shape: f32[8,512], index: 1, kind: output, shape index: {}]  }
   0x1   :  { %v320_v0 = vld [vmem:[%s652_s0 + $0xb] ss:$16 sm:%s74_s6]   ;;  %s82_s10 = smov 48  ;;  %s87_s15 = smov 192  ;;  %v2_v15 = vld [vmem:[%s652_s0] ss:$4 sm:$0xff]  }
   0x2   :  { %v321_v1 = vld [vmem:[%s652_s0 + $0xb] ss:$16 sm:%s77_s9]   ;;  %s29_s16 = smov 3  ;;  %s32_s21 = smov 12  ;;  %v302_v22 = vld [vmem:[%s652_s0 + $0x20] ss:$4 sm:$0xff]  }
   0x3   :  { %v322_v2 = vld [vmem:[%s652_s0 + $0xb] ss:$16 sm:%s82_s10]   ;;  %v80_v3 = vsel %vm34_vm0, %v321_v1, %v320_v0  ;;  %v311_v5 = vld [vmem:[%s652_s0 + $0x3] ss:$16 sm:%s29_s16]   ;;  %s37_s22 = smov 48  ;;  %s42_s27 = smov 192 }
   0x4   :  { %v323_v4 = vld [vmem:[%s652_s0 + $0xb] ss:$16 sm:%s87_s15]   ;;  %v85_v6 = vsel %vm39_vm1, %v322_v2, %v80_v3  ;;  %v312_v7 = vld [vmem:[%s652_s0 + $0x3] ss:$16 sm:%s32_s21]   ;;  %s97_s28 = smov 3  ;;  %s100_s4 = smov 12 }
   0x5   :  { %v313_v8 = vld [vmem:[%s652_s0 + $0x3] ss:$16 sm:%s37_s22]   ;;  %v90_v9 = vsel %vm44_vm2, %v323_v4, %v85_v6  ;;  %v35_v10 = vsel %vm34_vm0, %v312_v7, %v311_v5  ;;  %v325_v12 = vld [vmem:[%s652_s0 + $0xf] ss:$16 sm:%s97_s28]   ;;  %s105_s5 = smov 48  ;;  %s371_s6 = smov 96  }
   0x6   :  { %v314_v11 = vld [vmem:[%s652_s0 + $0x3] ss:$16 sm:%s42_s27]   ;;  %91 = vrot.lane.b32.xlu1 %v90_v9, %s371_s6  ;;  %v40_v13 = vsel %vm39_vm1, %v313_v8, %v35_v10  ;;  %s110_s9 = smov 192  ;;  %s51_s10 = smov 3  ;;  %v305_v28 = vld [vmem:[%s652_s0 + $0x40] ss:$4 sm:$0xff]  }
   0x7   :  { %v326_v14 = vld [vmem:[%s652_s0 + $0xf] ss:$16 sm:%s100_s4]   ;;  %v45_v16 = vsel %vm44_vm2, %v314_v11, %v40_v13  ;;  %s54_s17 = smov 12  ;;  %s59_s18 = smov 48  ;;  %v315_v21 = vld [vmem:[%s652_s0 + $0x7] ss:$16 sm:%s51_s10]  }
   0x8   :  { %v103_v17 = vsel %vm34_vm0, %v326_v14, %v325_v12  ;;  %v327_v18 = vld [vmem:[%s652_s0 + $0xf] ss:$16 sm:%s105_s5]   ;;  %4 = vst.msk [vmem:[%s653_s1] ss:$8 sm:$0xf] %vm3_vm3, %v2_v15   ;;  %46 = vrot.lane.b32.xlu0 %v45_v16, %s371_s6  ;;  %s64_s25 = smov 192 }
   0x9   :  { %v328_v19 = vld [vmem:[%s652_s0 + $0xf] ss:$16 sm:%s110_s9]   ;;  %301 = vst.msk [vmem:[%s653_s1 - $0x1f] ss:$8 sm:$0xf0] %vm3_vm3, %v2_v15   ;;  %v108_v20 = vsel %vm39_vm1, %v327_v18, %v103_v17  ;;  %s142_s3 = smov 3 }
   0xa   :  { %v113_v23 = vsel %vm44_vm2, %v328_v19, %v108_v20  ;;  %v316_v24 = vld [vmem:[%s652_s0 + $0x7] ss:$16 sm:%s54_s17]   ;;  %s145_s4 = smov 12  ;;  %303 = vst.msk [vmem:[%s653_s1 + $0x2] ss:$8 sm:$0xf] %vm3_vm3, %v302_v22  }
   0xb   :  { %v317_v25 = vld [vmem:[%s652_s0 + $0x7] ss:$16 sm:%s59_s18]   ;;  %304 = vst.msk [vmem:[%s653_s1 - $0x1d] ss:$8 sm:$0xf0] %vm3_vm3, %v302_v22   ;;  %114 = vrot.lane.b32.xlu1 %v113_v23, %s371_s6  ;;  %v57_v26 = vsel %vm34_vm0, %v316_v24, %v315_v21  ;;  %s150_s12 = smov 48 }
   0xc   :  { %v318_v27 = vld [vmem:[%s652_s0 + $0x7] ss:$16 sm:%s64_s25]   ;;  %s155_s13 = smov 192  ;;  %v62_v29 = vsel %vm39_vm1, %v317_v25, %v57_v26  ;;  %v334_v30 = vld [vmem:[%s652_s0 + $0x6] ss:$16 sm:%s142_s3]   ;;  %s120_s20 = smov 3 }
   0xd   :  { %v335_v31 = vld [vmem:[%s652_s0 + $0x6] ss:$16 sm:%s145_s4]   ;;  %s123_s21 = smov 12  ;;  %306 = vst.msk [vmem:[%s653_s1 + $0x4] ss:$8 sm:$0xf] %vm3_vm3, %v305_v28   ;;  %v67_v32 = vsel %vm44_vm2, %v318_v27, %v62_v29 }
   0xe   :  { %307 = vst.msk [vmem:[%s653_s1 - $0x1b] ss:$8 sm:$0xf0] %vm3_vm3, %v305_v28   ;;  %v148_v33 = vsel %vm34_vm0, %v335_v31, %v334_v30  ;;  %v336_v34 = vld [vmem:[%s652_s0 + $0x6] ss:$16 sm:%s150_s12]   ;;  %s128_s30 = smov 48  ;;  %68 = vrot.lane.b32.xlu0 %v67_v32, %s371_s6 }
   0xf   :  { %v337_v35 = vld [vmem:[%s652_s0 + $0x6] ss:$16 sm:%s155_s13]   ;;  %s133_s2 = smov 192  ;;  %v153_v36 = vsel %vm39_vm1, %v336_v34, %v148_v33  ;;  %v330_v37 = vld [vmem:[%s652_s0 + $0x2] ss:$16 sm:%s120_s20]   ;;  %s188_s4 = smov 3 }
  0x10   :  { %s191_s5 = smov 12  ;;  %v308_v38 = vld [vmem:[%s652_s0 + $0x60] ss:$4 sm:$0xff]   ;;  %v158_v39 = vsel %vm44_vm2, %v337_v35, %v153_v36  ;;  %v331_v40 = vld [vmem:[%s652_s0 + $0x2] ss:$16 sm:%s123_s21]   ;;  %s196_s13 = smov 48 }
  0x11   :  { %v332_v41 = vld [vmem:[%s652_s0 + $0x2] ss:$16 sm:%s128_s30]   ;;  %s201_s14 = smov 192  ;;  %309 = vst.msk [vmem:[%s653_s1 + $0x6] ss:$8 sm:$0xf] %vm3_vm3, %v308_v38   ;;  %v126_v42 = vsel %vm34_vm0, %v331_v40, %v330_v37 }
  0x12   :  { %310 = vst.msk [vmem:[%s653_s1 - $0x19] ss:$8 sm:$0xf0] %vm3_vm3, %v308_v38   ;;  %s372_s19 = smov 64   ;;  %v333_v43 = vld [vmem:[%s652_s0 + $0x2] ss:$16 sm:%s133_s2]   ;;  %v131_v44 = vsel %vm39_vm1, %v332_v41, %v126_v42 }
  0x13   :  { %159 = vrot.lane.b32.xlu1 %v158_v39, %s372_s19  ;;  %s165_s22 = smov 3  ;;  %v344_v45 = vld [vmem:[%s652_s0 + $0xe] ss:$16 sm:%s188_s4]   ;;  %s168_s27 = smov 12  ;;  %v136_v47 = vsel %vm44_vm2, %v333_v43, %v131_v44  ;;  %vm48_vm4 = vcmask 1048320   ;;  %vm139_vm5 = vcmask 785920  }
  0x14   :  { %v345_v46 = vld [vmem:[%s652_s0 + $0xe] ss:$16 sm:%s191_s5]   ;;  %s173_s28 = smov 48  ;;  %s178_s3 = smov 192  ;;  %137 = vrot.lane.b32.xlu0 %v136_v47, %s372_s19  ;;  %vm230_vm6 = vcmask 523520  }
  0x15   :  { %v194_v48 = vsel %vm34_vm0, %v345_v46, %v344_v45  ;;  %v346_v49 = vld [vmem:[%s652_s0 + $0xe] ss:$16 sm:%s196_s13]   ;;  %v339_v52 = vld [vmem:[%s652_s0 + $0xa] ss:$16 sm:%s165_s22]   ;;  %s233_s7 = smov 3  ;;  %s236_s8 = smov 12 }
  0x16   :  { %v347_v50 = vld [vmem:[%s652_s0 + $0xe] ss:$16 sm:%s201_s14]   ;;  %v199_v51 = vsel %vm39_vm1, %v346_v49, %v194_v48  ;;  %v340_v54 = vld [vmem:[%s652_s0 + $0xa] ss:$16 sm:%s168_s27]   ;;  %s241_s13 = smov 48  ;;  %s246_s14 = smov 192 }
  0x17   :  { %v204_v53 = vsel %vm44_vm2, %v347_v50, %v199_v51  ;;  %v341_v55 = vld [vmem:[%s652_s0 + $0xa] ss:$16 sm:%s173_s28]   ;;  %v171_v56 = vsel %vm34_vm0, %v340_v54, %v339_v52  ;;  %s211_s17 = smov 3  ;;  %v353_v59 = vld [vmem:[%s652_s0 + $0x5] ss:$16 sm:%s233_s7]   ;;  %s214_s23 = smov 12 }
  0x18   :  { %205 = vrot.lane.b32.xlu1 %v204_v53, %s372_s19  ;;  %v342_v57 = vld [vmem:[%s652_s0 + $0xa] ss:$16 sm:%s178_s3]   ;;  %v176_v58 = vsel %vm39_vm1, %v341_v55, %v171_v56  ;;  %s219_s24 = smov 48  ;;  %s224_s29 = smov 192 }
  0x19   :  { %v354_v60 = vld [vmem:[%s652_s0 + $0x5] ss:$16 sm:%s236_s8]   ;;  %v181_v61 = vsel %vm44_vm2, %v342_v57, %v176_v58  ;;  %v349_v2 = vld [vmem:[%s652_s0 + $0x1] ss:$16 sm:%s211_s17]   ;;  %s279_s2 = smov 3  ;;  %s282_s6 = smov 12 }
  0x1a   :  { %v239_v62 = vsel %vm34_vm0, %v354_v60, %v353_v59  ;;  %v355_v63 = vld [vmem:[%s652_s0 + $0x5] ss:$16 sm:%s241_s13]   ;;  %182 = vrot.lane.b32.xlu0 %v181_v61, %s372_s19  ;;  %s287_s8 = smov 48  ;;  %s292_s9 = smov 192 }
  0x1b   :  { %v356_v0 = vld [vmem:[%s652_s0 + $0x5] ss:$16 sm:%s246_s14]   ;;  %v244_v1 = vsel %vm39_vm1, %v355_v63, %v239_v62  ;;  %v350_v4 = vld [vmem:[%s652_s0 + $0x1] ss:$16 sm:%s214_s23]   ;;  %s373_s10 = smov 32   ;;  %s256_s13 = smov 3 }
  0x1c   :  { %v249_v3 = vsel %vm44_vm2, %v356_v0, %v244_v1  ;;  %v351_v5 = vld [vmem:[%s652_s0 + $0x1] ss:$16 sm:%s219_s24]   ;;  %v217_v6 = vsel %vm34_vm0, %v350_v4, %v349_v2  ;;  %v363_v9 = vld [vmem:[%s652_s0 + $0xd] ss:$16 sm:%s279_s2]   ;;  %s259_s18 = smov 12  ;;  %s264_s20 = smov 48 }
  0x1d   :  { %250 = vrot.lane.b32.xlu1 %v249_v3, %s373_s10  ;;  %v352_v7 = vld [vmem:[%s652_s0 + $0x1] ss:$16 sm:%s224_s29]   ;;  %v222_v8 = vsel %vm39_vm1, %v351_v5, %v217_v6  ;;  %s269_s25 = smov 192 }
  0x1e   :  { %v364_v10 = vld [vmem:[%s652_s0 + $0xd] ss:$16 sm:%s282_s6]   ;;  %v227_v11 = vsel %vm44_vm2, %v352_v7, %v222_v8  ;;  %v358_v16 = vld [vmem:[%s652_s0 + $0x9] ss:$16 sm:%s256_s13]  }
  0x1f   :  { %v285_v12 = vsel %vm34_vm0, %v364_v10, %v363_v9  ;;  %v365_v13 = vld [vmem:[%s652_s0 + $0xd] ss:$16 sm:%s287_s8]   ;;  %228 = vrot.lane.b32.xlu0 %v227_v11, %s373_s10 }
  0x20   :  { %v366_v14 = vld [vmem:[%s652_s0 + $0xd] ss:$16 sm:%s292_s9]   ;;  %v290_v15 = vsel %vm39_vm1, %v365_v13, %v285_v12  ;;  %v359_v18 = vld [vmem:[%s652_s0 + $0x9] ss:$16 sm:%s259_s18]  }
  0x21   :  { %v295_v17 = vsel %vm44_vm2, %v366_v14, %v290_v15  ;;  %v360_v19 = vld [vmem:[%s652_s0 + $0x9] ss:$16 sm:%s264_s20]   ;;  %v262_v20 = vsel %vm34_vm0, %v359_v18, %v358_v16 }
  0x22   :  { %296 = vrot.lane.b32.xlu1 %v295_v17, %s373_s10  ;;  %v361_v21 = vld [vmem:[%s652_s0 + $0x9] ss:$16 sm:%s269_s25]   ;;  %v267_v22 = vsel %vm39_vm1, %v360_v19, %v262_v20 }
  0x23   :  { %v272_v23 = vsel %vm44_vm2, %v361_v21, %v267_v22 }
  0x24   :  { %273 = vrot.lane.b32.xlu0 %v272_v23, %s373_s10 }
  0x78   :  { %v92_v24 = vpop.permute.xlu1 %91  }
  0x79   :  { %324 = vst.msk [vmem:[%s653_s1 + $0x10] sm:$0xff] %vm48_vm4, %v92_v24  }
  0x7a   :  { %v47_v25 = vpop.permute.xlu0 %46  }
  0x7b   :  { %49 = vst.msk [vmem:[%s653_s1] sm:$0xff] %vm48_vm4, %v47_v25  }
  0x7d   :  { %v115_v26 = vpop.permute.xlu1 %114  }
  0x7e   :  { %329 = vst.msk [vmem:[%s653_s1 + $0x18] sm:$0xff] %vm48_vm4, %v115_v26  }
  0x80   :  { %v69_v27 = vpop.permute.xlu0 %68  }
  0x81   :  { %319 = vst.msk [vmem:[%s653_s1 + $0x8] sm:$0xff] %vm48_vm4, %v69_v27  }
  0x85   :  { %v160_v28 = vpop.permute.xlu1 %159  }
  0x86   :  { %338 = vst.msk [vmem:[%s653_s1 + $0x8] sm:$0xff] %vm139_vm5, %v160_v28   ;;  %v138_v29 = vpop.permute.xlu0 %137  }
  0x87   :  { %140 = vst.msk [vmem:[%s653_s1] sm:$0xff] %vm139_vm5, %v138_v29  }
  0x8a   :  { %v206_v30 = vpop.permute.xlu1 %205  }
  0x8b   :  { %348 = vst.msk [vmem:[%s653_s1 + $0x18] sm:$0xff] %vm139_vm5, %v206_v30  }
  0x8c   :  { %v183_v31 = vpop.permute.xlu0 %182  }
  0x8d   :  { %343 = vst.msk [vmem:[%s653_s1 + $0x10] sm:$0xff] %vm139_vm5, %v183_v31  }
  0x8f   :  { %v251_v32 = vpop.permute.xlu1 %250  }
  0x90   :  { %357 = vst.msk [vmem:[%s653_s1 + $0x8] sm:$0xff] %vm230_vm6, %v251_v32  }
  0x91   :  { %v229_v33 = vpop.permute.xlu0 %228  }
  0x92   :  { %231 = vst.msk [vmem:[%s653_s1] sm:$0xff] %vm230_vm6, %v229_v33  }
  0x94   :  { %v297_v34 = vpop.permute.xlu1 %296  }
  0x95   :  { %367 = vst.msk [vmem:[%s653_s1 + $0x18] sm:$0xff] %vm230_vm6, %v297_v34  }
  0x96   :  { %v274_v35 = vpop.permute.xlu0 %273  }
  0x97   :  { %362 = vst.msk [vmem:[%s653_s1 + $0x10] sm:$0xff] %vm230_vm6, %v274_v35  }

// kernel: tile.444
= control target key start
LH: loop header
LB: loop body
LE: loop exit
PB: predicated region body
PF: predicated region fallthrough
CT: control target
= control target key end

     0   :  { %vm118_vm0 = vcmask 1043458   ;;  %s158_s6 = smov 3  ;;  %vm123_vm1 = vcmask 1045508   ;;  %vm128_vm2 = vcmask 1047558   ;;  %s161_s9 = smov 12  ;;  %vm3_vm3 = vcmask 261120   ;;  %s2648_s0 = inlined_call_operand.vmem [shape: f32[32,16,32], index: 0, kind: input, shape index: {}]   ;;  %s2649_s1 = inlined_call_operand.vmem [shape: f32[32,512], index: 1, kind: output, shape index: {}]  }
   0x1   :  { %v1268_v0 = vld [vmem:[%s2648_s0 + $0x103] ss:$16 sm:%s158_s6]   ;;  %s166_s10 = smov 48  ;;  %s171_s15 = smov 192  ;;  %v1223_v54 = vld [vmem:[%s2648_s0 + $0x80] ss:$4 sm:$0xff]  }
   0x2   :  { %v1269_v1 = vld [vmem:[%s2648_s0 + $0x103] ss:$16 sm:%s161_s9]   ;;  %s113_s16 = smov 3  ;;  %s116_s21 = smov 12  ;;  %vm132_vm4 = vcmask 1048320   ;;  %vm499_vm5 = vcmask 785920  }
   0x3   :  { %v1270_v2 = vld [vmem:[%s2648_s0 + $0x103] ss:$16 sm:%s166_s10]   ;;  %v164_v3 = vsel %vm118_vm0, %v1269_v1, %v1268_v0  ;;  %s121_s22 = smov 48  ;;  %s126_s27 = smov 192  ;;  %v1226_v0 = vld [vmem:[%s2648_s0 + $0xa0] ss:$4 sm:$0xff]  }
   0x4   :  { %v1271_v4 = vld [vmem:[%s2648_s0 + $0x103] ss:$16 sm:%s171_s15]   ;;  %v169_v6 = vsel %vm123_vm1, %v1270_v2, %v164_v3  ;;  %s181_s28 = smov 3  ;;  %s184_s4 = smov 12  ;;  %vm866_vm6 = vcmask 523520  }
   0x5   :  { %v1259_v5 = vld [vmem:[%s2648_s0 + $0x3] ss:$16 sm:%s113_s16]   ;;  %v174_v9 = vsel %vm128_vm2, %v1271_v4, %v169_v6  ;;  %s189_s5 = smov 48  ;;  %s1499_s6 = smov 96   ;;  %v1229_v6 = vld [vmem:[%s2648_s0 + $0xc0] ss:$4 sm:$0xff]  }
   0x6   :  { %v1260_v7 = vld [vmem:[%s2648_s0 + $0x3] ss:$16 sm:%s116_s21]   ;;  %175 = vrot.lane.b32.xlu1 %v174_v9, %s1499_s6  ;;  %s194_s9 = smov 192  ;;  %s135_s10 = smov 3 }
   0x7   :  { %v1261_v8 = vld [vmem:[%s2648_s0 + $0x3] ss:$16 sm:%s121_s22]   ;;  %v119_v10 = vsel %vm118_vm0, %v1260_v7, %v1259_v5  ;;  %s138_s15 = smov 12  ;;  %s143_s16 = smov 48 }
   0x8   :  { %v1262_v11 = vld [vmem:[%s2648_s0 + $0x3] ss:$16 sm:%s126_s27]   ;;  %v124_v13 = vsel %vm123_vm1, %v1261_v8, %v119_v10  ;;  %s148_s19 = smov 192  ;;  %s227_s20 = smov 3 }
   0x9   :  { %v1273_v12 = vld [vmem:[%s2648_s0 + $0x183] ss:$16 sm:%s181_s28]   ;;  %v129_v15 = vsel %vm128_vm2, %v1262_v11, %v124_v13  ;;  %s230_s25 = smov 12  ;;  %s235_s26 = smov 48  ;;  %v1283_v27 = vld [vmem:[%s2648_s0 + $0x87] ss:$16 sm:%s227_s20]  }
   0xa   :  { %v1274_v14 = vld [vmem:[%s2648_s0 + $0x183] ss:$16 sm:%s184_s4]   ;;  %130 = vrot.lane.b32.xlu0 %v129_v15, %s1499_s6  ;;  %s240_s29 = smov 192  ;;  %s204_s30 = smov 3 }
   0xb   :  { %v187_v16 = vsel %vm118_vm0, %v1274_v14, %v1273_v12  ;;  %v1275_v17 = vld [vmem:[%s2648_s0 + $0x183] ss:$16 sm:%s189_s5]   ;;  %v1284_v28 = vld [vmem:[%s2648_s0 + $0x87] ss:$16 sm:%s230_s25]   ;;  %s207_s7 = smov 12  ;;  %s212_s8 = smov 48 }
   0xc   :  { %v1276_v18 = vld [vmem:[%s2648_s0 + $0x183] ss:$16 sm:%s194_s9]   ;;  %v192_v19 = vsel %vm123_vm1, %v1275_v17, %v187_v16  ;;  %v233_v30 = vsel %vm118_vm0, %v1284_v28, %v1283_v27  ;;  %v1285_v31 = vld [vmem:[%s2648_s0 + $0x87] ss:$16 sm:%s235_s26]   ;;  %s217_s13 = smov 192  ;;  %s276_s17 = smov 12 }
   0xd   :  { %v1263_v20 = vld [vmem:[%s2648_s0 + $0x83] ss:$16 sm:%s135_s10]   ;;  %v197_v21 = vsel %vm128_vm2, %v1276_v18, %v192_v19  ;;  %v1286_v32 = vld [vmem:[%s2648_s0 + $0x87] ss:$16 sm:%s240_s29]   ;;  %v238_v33 = vsel %vm123_vm1, %v1285_v31, %v233_v30  ;;  %s281_s22 = smov 48  ;;  %s286_s23 = smov 192 }
   0xe   :  { %v1264_v22 = vld [vmem:[%s2648_s0 + $0x83] ss:$16 sm:%s138_s15]   ;;  %198 = vrot.lane.b32.xlu1 %v197_v21, %s1499_s6  ;;  %v243_v35 = vsel %vm128_vm2, %v1286_v32, %v238_v33  ;;  %s250_s26 = smov 3  ;;  %s253_s2 = smov 12  ;;  %v1232_v16 = vld [vmem:[%s2648_s0 + $0xe0] ss:$4 sm:$0xff]  }
   0xf   :  { %v1265_v23 = vld [vmem:[%s2648_s0 + $0x83] ss:$16 sm:%s143_s16]   ;;  %v141_v24 = vsel %vm118_vm0, %v1264_v22, %v1263_v20  ;;  %v1278_v34 = vld [vmem:[%s2648_s0 + $0x7] ss:$16 sm:%s204_s30]   ;;  %s273_s16 = smov 3  ;;  %s258_s3 = smov 48 }
  0x10   :  { %v1266_v25 = vld [vmem:[%s2648_s0 + $0x83] ss:$16 sm:%s148_s19]   ;;  %v146_v26 = vsel %vm123_vm1, %v1265_v23, %v141_v24  ;;  %v1279_v36 = vld [vmem:[%s2648_s0 + $0x7] ss:$16 sm:%s207_s7]   ;;  %s263_s9 = smov 192  ;;  %s319_s12 = smov 3 }
  0x11   :  { %v151_v29 = vsel %vm128_vm2, %v1266_v25, %v146_v26  ;;  %v1280_v37 = vld [vmem:[%s2648_s0 + $0x7] ss:$16 sm:%s212_s8]   ;;  %v210_v38 = vsel %vm118_vm0, %v1279_v36, %v1278_v34  ;;  %s327_s18 = smov 48  ;;  %s332_s19 = smov 192  ;;  %v1303_v56 = vld [vmem:[%s2648_s0 + $0x8b] ss:$16 sm:%s319_s12]  }
  0x12   :  { %152 = vrot.lane.b32.xlu0 %v151_v29, %s1499_s6  ;;  %244 = vrot.lane.b32.xlu1 %v243_v35, %s1499_s6  ;;  %v1281_v39 = vld [vmem:[%s2648_s0 + $0x7] ss:$16 sm:%s217_s13]   ;;  %v215_v40 = vsel %vm123_vm1, %v1280_v37, %v210_v38  ;;  %s322_s13 = smov 12  ;;  %s299_s29 = smov 12 }
  0x13   :  { %v1293_v41 = vld [vmem:[%s2648_s0 + $0x187] ss:$16 sm:%s273_s16]   ;;  %v220_v43 = vsel %vm128_vm2, %v1281_v39, %v215_v40  ;;  %v1304_v57 = vld [vmem:[%s2648_s0 + $0x8b] ss:$16 sm:%s322_s13]   ;;  %s304_s30 = smov 48  ;;  %s309_s11 = smov 192 }
  0x14   :  { %v1294_v42 = vld [vmem:[%s2648_s0 + $0x187] ss:$16 sm:%s276_s17]   ;;  %1224 = vst.msk [vmem:[%s2649_s1 + $0x20] ss:$8 sm:$0xf] %vm3_vm3, %v1223_v54   ;;  %v325_v59 = vsel %vm118_vm0, %v1304_v57, %v1303_v56  ;;  %s365_s14 = smov 3 }
  0x15   :  { %v279_v44 = vsel %vm118_vm0, %v1294_v42, %v1293_v41  ;;  %v1295_v45 = vld [vmem:[%s2648_s0 + $0x187] ss:$16 sm:%s281_s22]   ;;  %s296_s22 = smov 3  ;;  %1225 = vst.msk [vmem:[%s2649_s1 + $0x1] ss:$8 sm:$0xf0] %vm3_vm3, %v1223_v54  }
  0x16   :  { %v1296_v46 = vld [vmem:[%s2648_s0 + $0x187] ss:$16 sm:%s286_s23]   ;;  %221 = vrot.lane.b32.xlu0 %v220_v43, %s1499_s6  ;;  %v284_v47 = vsel %vm123_vm1, %v1295_v45, %v279_v44  ;;  %s368_s15 = smov 12  ;;  %s378_s23 = smov 192  ;;  %v2_v31 = vld [vmem:[%s2648_s0] ss:$4 sm:$0xff]  }
  0x17   :  { %v1288_v48 = vld [vmem:[%s2648_s0 + $0x107] ss:$16 sm:%s250_s26]   ;;  %v289_v49 = vsel %vm128_vm2, %v1296_v46, %v284_v47  ;;  %v1305_v60 = vld [vmem:[%s2648_s0 + $0x8b] ss:$16 sm:%s327_s18]   ;;  %s350_s10 = smov 48  ;;  %s396_s16 = smov 48 }
  0x18   :  { %v1289_v50 = vld [vmem:[%s2648_s0 + $0x107] ss:$16 sm:%s253_s2]   ;;  %290 = vrot.lane.b32.xlu1 %v289_v49, %s1499_s6  ;;  %v330_v62 = vsel %vm123_vm1, %v1305_v60, %v325_v59  ;;  %1227 = vst.msk [vmem:[%s2649_s1 + $0x22] ss:$8 sm:$0xf] %vm3_vm3, %v1226_v0   ;;  %s424_s2 = smov 192 }
  0x19   :  { %v1290_v51 = vld [vmem:[%s2648_s0 + $0x107] ss:$16 sm:%s258_s3]   ;;  %v256_v52 = vsel %vm118_vm0, %v1289_v50, %v1288_v48  ;;  %v1306_v61 = vld [vmem:[%s2648_s0 + $0x8b] ss:$16 sm:%s332_s19]   ;;  %s355_s19 = smov 192  ;;  %s401_s21 = smov 192 }
  0x1a   :  { %v1291_v53 = vld [vmem:[%s2648_s0 + $0x107] ss:$16 sm:%s263_s9]   ;;  %v261_v55 = vsel %vm123_vm1, %v1290_v51, %v256_v52  ;;  %v1298_v63 = vld [vmem:[%s2648_s0 + $0xb] ss:$16 sm:%s296_s22]   ;;  %v335_v1 = vsel %vm128_vm2, %v1306_v61, %v330_v62  ;;  %s373_s22 = smov 48  ;;  %s345_s9 = smov 12 }
  0x1b   :  { %v266_v58 = vsel %vm128_vm2, %v1291_v53, %v261_v55  ;;  %v1299_v2 = vld [vmem:[%s2648_s0 + $0xb] ss:$16 sm:%s299_s29]   ;;  %1228 = vst.msk [vmem:[%s2649_s1 + $0x3] ss:$8 sm:$0xf0] %vm3_vm3, %v1226_v0   ;;  %s457_s24 = smov 3 }
  0x1c   :  { %267 = vrot.lane.b32.xlu0 %v266_v58, %s1499_s6  ;;  %v1300_v3 = vld [vmem:[%s2648_s0 + $0xb] ss:$16 sm:%s304_s30]   ;;  %336 = vrot.lane.b32.xlu1 %v335_v1, %s1499_s6  ;;  %v302_v4 = vsel %vm118_vm0, %v1299_v2, %v1298_v63  ;;  %s342_s30 = smov 3  ;;  %s460_s25 = smov 12 }
  0x1d   :  { %v1301_v5 = vld [vmem:[%s2648_s0 + $0xb] ss:$16 sm:%s309_s11]   ;;  %v307_v7 = vsel %vm123_vm1, %v1300_v3, %v302_v4  ;;  %1230 = vst.msk [vmem:[%s2649_s1 + $0x24] ss:$8 sm:$0xf] %vm3_vm3, %v1229_v6   ;;  %s465_s3 = smov 48 }
  0x1e   :  { %v1313_v8 = vld [vmem:[%s2648_s0 + $0x18b] ss:$16 sm:%s365_s14]   ;;  %1231 = vst.msk [vmem:[%s2649_s1 + $0x5] ss:$8 sm:$0xf0] %vm3_vm3, %v1229_v6   ;;  %v312_v10 = vsel %vm128_vm2, %v1301_v5, %v307_v7  ;;  %s470_s4 = smov 192 }
  0x1f   :  { %v1314_v9 = vld [vmem:[%s2648_s0 + $0x18b] ss:$16 sm:%s368_s15]   ;;  %1233 = vst.msk [vmem:[%s2649_s1 + $0x26] ss:$8 sm:$0xf] %vm3_vm3, %v1232_v16   ;;  %s391_s15 = smov 12 }
  0x20   :  { %v371_v11 = vsel %vm118_vm0, %v1314_v9, %v1313_v8  ;;  %v1315_v12 = vld [vmem:[%s2648_s0 + $0x18b] ss:$16 sm:%s373_s22]   ;;  %313 = vrot.lane.b32.xlu0 %v312_v10, %s1499_s6  ;;  %s411_s22 = smov 3  ;;  %1234 = vst.msk [vmem:[%s2649_s1 + $0x7] ss:$8 sm:$0xf0] %vm3_vm3, %v1232_v16  }
  0x21   :  { %v1316_v13 = vld [vmem:[%s2648_s0 + $0x18b] ss:$16 sm:%s378_s23]   ;;  %v376_v14 = vsel %vm123_vm1, %v1315_v12, %v371_v11  ;;  %s414_s23 = smov 12  ;;  %v1323_v23 = vld [vmem:[%s2648_s0 + $0x8f] ss:$16 sm:%s411_s22]   ;;  %s434_s12 = smov 3 }
  0x22   :  { %v1308_v15 = vld [vmem:[%s2648_s0 + $0x10b] ss:$16 sm:%s342_s30]   ;;  %v381_v17 = vsel %vm128_vm2, %v1316_v13, %v376_v14  ;;  %s419_s30 = smov 48  ;;  %v1324_v24 = vld [vmem:[%s2648_s0 + $0x8f] ss:$16 sm:%s414_s23]   ;;  %s442_s20 = smov 48 }
  0x23   :  { %v1309_v18 = vld [vmem:[%s2648_s0 + $0x10b] ss:$16 sm:%s345_s9]   ;;  %382 = vrot.lane.b32.xlu1 %v381_v17, %s1499_s6  ;;  %v417_v26 = vsel %vm118_vm0, %v1324_v24, %v1323_v23  ;;  %4 = vst.msk [vmem:[%s2649_s1] ss:$8 sm:$0xf] %vm3_vm3, %v2_v31   ;;  %s447_s29 = smov 192 }
  0x24   :  { %v1310_v19 = vld [vmem:[%s2648_s0 + $0x10b] ss:$16 sm:%s350_s10]   ;;  %v348_v20 = vsel %vm118_vm0, %v1309_v18, %v1308_v15  ;;  %s388_s10 = smov 3  ;;  %v1325_v27 = vld [vmem:[%s2648_s0 + $0x8f] ss:$16 sm:%s419_s30]   ;;  %s515_s13 = smov 192 }
  0x25   :  { %v1311_v21 = vld [vmem:[%s2648_s0 + $0x10b] ss:$16 sm:%s355_s19]   ;;  %v353_v22 = vsel %vm123_vm1, %v1310_v19, %v348_v20  ;;  %v1326_v28 = vld [vmem:[%s2648_s0 + $0x8f] ss:$16 sm:%s424_s2]   ;;  %v422_v29 = vsel %vm123_vm1, %v1325_v27, %v417_v26  ;;  %s437_s19 = smov 12  ;;  %s483_s27 = smov 12 }
  0x26   :  { %v358_v25 = vsel %vm128_vm2, %v1311_v21, %v353_v22  ;;  %v1318_v30 = vld [vmem:[%s2648_s0 + $0xf] ss:$16 sm:%s388_s10]   ;;  %v427_v32 = vsel %vm128_vm2, %v1326_v28, %v422_v29  ;;  %1213 = vst.msk [vmem:[%s2649_s1 - $0x1f] ss:$8 sm:$0xf0] %vm3_vm3, %v2_v31   ;;  %s488_s28 = smov 48 }
  0x27   :  { %359 = vrot.lane.b32.xlu0 %v358_v25, %s1499_s6  ;;  %v1319_v33 = vld [vmem:[%s2648_s0 + $0xf] ss:$16 sm:%s391_s15]   ;;  %428 = vrot.lane.b32.xlu1 %v427_v32, %s1499_s6  ;;  %s493_s9 = smov 192  ;;  %s548_s11 = smov 3 }
  0x28   :  { %v1320_v34 = vld [vmem:[%s2648_s0 + $0xf] ss:$16 sm:%s396_s16]   ;;  %v394_v35 = vsel %vm118_vm0, %v1319_v33, %v1318_v30  ;;  %v1214_v37 = vld [vmem:[%s2648_s0 + $0x20] ss:$4 sm:$0xff]   ;;  %s528_s7 = smov 12  ;;  %s533_s8 = smov 48 }
  0x29   :  { %v1321_v36 = vld [vmem:[%s2648_s0 + $0xf] ss:$16 sm:%s401_s21]   ;;  %v399_v38 = vsel %vm123_vm1, %v1320_v34, %v394_v35  ;;  %1215 = vst.msk [vmem:[%s2649_s1 + $0x2] ss:$8 sm:$0xf] %vm3_vm3, %v1214_v37   ;;  %s538_s16 = smov 192 }
  0x2a   :  { %v1333_v39 = vld [vmem:[%s2648_s0 + $0x18f] ss:$16 sm:%s457_s24]   ;;  %1216 = vst.msk [vmem:[%s2649_s1 - $0x1d] ss:$8 sm:$0xf0] %vm3_vm3, %v1214_v37   ;;  %v404_v41 = vsel %vm128_vm2, %v1321_v36, %v399_v38  ;;  %s574_s14 = smov 12 }
  0x2b   :  { %v1334_v40 = vld [vmem:[%s2648_s0 + $0x18f] ss:$16 sm:%s460_s25]   ;;  %405 = vrot.lane.b32.xlu0 %v404_v41, %s1499_s6  ;;  %v1217_v47 = vld [vmem:[%s2648_s0 + $0x40] ss:$4 sm:$0xff]   ;;  %s1500_s25 = smov 64   ;;  %s579_s15 = smov 48 }
  0x2c   :  { %v463_v42 = vsel %vm118_vm0, %v1334_v40, %v1333_v39  ;;  %v1335_v43 = vld [vmem:[%s2648_s0 + $0x18f] ss:$16 sm:%s465_s3]   ;;  %s502_s3 = smov 3  ;;  %1218 = vst.msk [vmem:[%s2649_s1 + $0x4] ss:$8 sm:$0xf] %vm3_vm3, %v1217_v47  }
  0x2d   :  { %v1336_v44 = vld [vmem:[%s2648_s0 + $0x18f] ss:$16 sm:%s470_s4]   ;;  %v468_v45 = vsel %vm123_vm1, %v1335_v43, %v463_v42  ;;  %s505_s4 = smov 12  ;;  %1219 = vst.msk [vmem:[%s2649_s1 - $0x1b] ss:$8 sm:$0xf0] %vm3_vm3, %v1217_v47  }
  0x2e   :  { %v1328_v46 = vld [vmem:[%s2648_s0 + $0x10f] ss:$16 sm:%s434_s12]   ;;  %v473_v48 = vsel %vm128_vm2, %v1336_v44, %v468_v45  ;;  %s510_s12 = smov 48  ;;  %v1220_v53 = vld [vmem:[%s2648_s0 + $0x60] ss:$4 sm:$0xff]   ;;  %s584_s24 = smov 192 }
  0x2f   :  { %v1329_v49 = vld [vmem:[%s2648_s0 + $0x10f] ss:$16 sm:%s437_s19]   ;;  %474 = vrot.lane.b32.xlu1 %v473_v48, %s1499_s6  ;;  %1221 = vst.msk [vmem:[%s2649_s1 + $0x6] ss:$8 sm:$0xf] %vm3_vm3, %v1220_v53   ;;  %s556_s19 = smov 48 }
  0x30   :  { %v1330_v50 = vld [vmem:[%s2648_s0 + $0x10f] ss:$16 sm:%s442_s20]   ;;  %v440_v51 = vsel %vm118_vm0, %v1329_v49, %v1328_v46  ;;  %s480_s20 = smov 3  ;;  %v1342_v55 = vld [vmem:[%s2648_s0 + $0x82] ss:$16 sm:%s502_s3]   ;;  %s620_s22 = smov 12 }
  0x31   :  { %v1331_v52 = vld [vmem:[%s2648_s0 + $0x10f] ss:$16 sm:%s447_s29]   ;;  %v445_v54 = vsel %vm123_vm1, %v1330_v50, %v440_v51  ;;  %v1343_v56 = vld [vmem:[%s2648_s0 + $0x82] ss:$16 sm:%s505_s4]   ;;  %s607_s29 = smov 192  ;;  %s625_s23 = smov 48 }
  0x32   :  { %1222 = vst.msk [vmem:[%s2649_s1 - $0x19] ss:$8 sm:$0xf0] %vm3_vm3, %v1220_v53   ;;  %v450_v57 = vsel %vm128_vm2, %v1331_v52, %v445_v54  ;;  %v508_v58 = vsel %vm118_vm0, %v1343_v56, %v1342_v55  ;;  %v1344_v59 = vld [vmem:[%s2648_s0 + $0x82] ss:$16 sm:%s510_s12]   ;;  %s551_s12 = smov 12 }
  0x33   :  { %v1345_v60 = vld [vmem:[%s2648_s0 + $0x82] ss:$16 sm:%s515_s13]   ;;  %451 = vrot.lane.b32.xlu0 %v450_v57, %s1499_s6  ;;  %v513_v61 = vsel %vm123_vm1, %v1344_v59, %v508_v58  ;;  %v1247_v63 = vld [vmem:[%s2648_s0 + $0x180] ss:$4 sm:$0xff]   ;;  %s630_s4 = smov 192  ;;  %s666_s2 = smov 12 }
  0x34   :  { %v1338_v62 = vld [vmem:[%s2648_s0 + $0x2] ss:$16 sm:%s480_s20]   ;;  %v518_v0 = vsel %vm128_vm2, %v1345_v60, %v513_v61  ;;  %s561_s20 = smov 192  ;;  %1248 = vst.msk [vmem:[%s2649_s1 + $0x60] ss:$8 sm:$0xf] %vm3_vm3, %v1247_v63  }
  0x35   :  { %v1339_v1 = vld [vmem:[%s2648_s0 + $0x2] ss:$16 sm:%s483_s27]   ;;  %1249 = vst.msk [vmem:[%s2649_s1 + $0x41] ss:$8 sm:$0xf0] %vm3_vm3, %v1247_v63   ;;  %519 = vrot.lane.b32.xlu1 %v518_v0, %s1500_s25  ;;  %s671_s3 = smov 48 }
  0x36   :  { %v1340_v2 = vld [vmem:[%s2648_s0 + $0x2] ss:$16 sm:%s488_s28]   ;;  %v486_v3 = vsel %vm118_vm0, %v1339_v1, %v1338_v62  ;;  %s525_s28 = smov 3  ;;  %v1250_v5 = vld [vmem:[%s2648_s0 + $0x1a0] ss:$4 sm:$0xff]   ;;  %s740_s21 = smov 48 }
  0x37   :  { %v1341_v4 = vld [vmem:[%s2648_s0 + $0x2] ss:$16 sm:%s493_s9]   ;;  %v491_v6 = vsel %vm123_vm1, %v1340_v2, %v486_v3  ;;  %1251 = vst.msk [vmem:[%s2649_s1 + $0x62] ss:$8 sm:$0xf] %vm3_vm3, %v1250_v5   ;;  %s653_s9 = smov 192 }
  0x38   :  { %v1352_v7 = vld [vmem:[%s2648_s0 + $0x182] ss:$16 sm:%s548_s11]   ;;  %1252 = vst.msk [vmem:[%s2649_s1 + $0x43] ss:$8 sm:$0xf0] %vm3_vm3, %v1250_v5   ;;  %v496_v9 = vsel %vm128_vm2, %v1341_v4, %v491_v6  ;;  %s709_s26 = smov 3 }
  0x39   :  { %v1353_v8 = vld [vmem:[%s2648_s0 + $0x182] ss:$16 sm:%s551_s12]   ;;  %497 = vrot.lane.b32.xlu0 %v496_v9, %s1500_s25  ;;  %v1253_v15 = vld [vmem:[%s2648_s0 + $0x1c0] ss:$4 sm:$0xff]   ;;  %s676_s12 = smov 192  ;;  %s778_s11 = smov 3 }
  0x3a   :  { %v554_v10 = vsel %vm118_vm0, %v1353_v8, %v1352_v7  ;;  %v1354_v11 = vld [vmem:[%s2648_s0 + $0x182] ss:$16 sm:%s556_s19]   ;;  %s594_s19 = smov 3  ;;  %1254 = vst.msk [vmem:[%s2649_s1 + $0x64] ss:$8 sm:$0xf] %vm3_vm3, %v1253_v15  }
  0x3b   :  { %v1355_v12 = vld [vmem:[%s2648_s0 + $0x182] ss:$16 sm:%s561_s20]   ;;  %v559_v13 = vsel %vm123_vm1, %v1354_v11, %v554_v10  ;;  %s597_s20 = smov 12  ;;  %1255 = vst.msk [vmem:[%s2649_s1 + $0x45] ss:$8 sm:$0xf0] %vm3_vm3, %v1253_v15  }
  0x3c   :  { %v1347_v14 = vld [vmem:[%s2648_s0 + $0x102] ss:$16 sm:%s525_s28]   ;;  %v564_v16 = vsel %vm128_vm2, %v1355_v12, %v559_v13  ;;  %s602_s28 = smov 48  ;;  %v1256_v21 = vld [vmem:[%s2648_s0 + $0x1e0] ss:$4 sm:$0xff]   ;;  %s786_s17 = smov 48 }
  0x3d   :  { %v1348_v17 = vld [vmem:[%s2648_s0 + $0x102] ss:$16 sm:%s528_s7]   ;;  %565 = vrot.lane.b32.xlu1 %v564_v16, %s1500_s25  ;;  %1257 = vst.msk [vmem:[%s2649_s1 + $0x66] ss:$8 sm:$0xf] %vm3_vm3, %v1256_v21   ;;  %s791_s18 = smov 192 }
  0x3e   :  { %v1349_v18 = vld [vmem:[%s2648_s0 + $0x102] ss:$16 sm:%s533_s8]   ;;  %v531_v19 = vsel %vm118_vm0, %v1348_v17, %v1347_v14  ;;  %s571_s8 = smov 3  ;;  %v1362_v23 = vld [vmem:[%s2648_s0 + $0x86] ss:$16 sm:%s594_s19]   ;;  %s758_s27 = smov 12 }
  0x3f   :  { %v1350_v20 = vld [vmem:[%s2648_s0 + $0x102] ss:$16 sm:%s538_s16]   ;;  %v536_v22 = vsel %vm123_vm1, %v1349_v18, %v531_v19  ;;  %v1363_v24 = vld [vmem:[%s2648_s0 + $0x86] ss:$16 sm:%s597_s20]   ;;  %s699_s16 = smov 192  ;;  %s832_s13 = smov 48 }
  0x40   :  { %1258 = vst.msk [vmem:[%s2649_s1 + $0x47] ss:$8 sm:$0xf0] %vm3_vm3, %v1256_v21   ;;  %v541_v25 = vsel %vm128_vm2, %v1350_v20, %v536_v22  ;;  %v600_v26 = vsel %vm118_vm0, %v1363_v24, %v1362_v23  ;;  %v1364_v27 = vld [vmem:[%s2648_s0 + $0x86] ss:$16 sm:%s602_s28]   ;;  %s640_s28 = smov 3 }
  0x41   :  { %v1365_v28 = vld [vmem:[%s2648_s0 + $0x86] ss:$16 sm:%s607_s29]   ;;  %542 = vrot.lane.b32.xlu0 %v541_v25, %s1500_s25  ;;  %v605_v29 = vsel %vm123_vm1, %v1364_v27, %v600_v26  ;;  %s643_s29 = smov 12  ;;  %v1235_v31 = vld [vmem:[%s2648_s0 + $0x100] ss:$4 sm:$0xff]   ;;  %s877_s6 = smov 48 }
  0x42   :  { %v1357_v30 = vld [vmem:[%s2648_s0 + $0x6] ss:$16 sm:%s571_s8]   ;;  %v610_v32 = vsel %vm128_vm2, %v1365_v28, %v605_v29  ;;  %s648_s8 = smov 48  ;;  %1236 = vst.msk [vmem:[%s2649_s1 + $0x40] ss:$8 sm:$0xf] %vm3_vm3, %v1235_v31  }
  0x43   :  { %v1358_v33 = vld [vmem:[%s2648_s0 + $0x6] ss:$16 sm:%s574_s14]   ;;  %1237 = vst.msk [vmem:[%s2649_s1 + $0x21] ss:$8 sm:$0xf0] %vm3_vm3, %v1235_v31   ;;  %611 = vrot.lane.b32.xlu1 %v610_v32, %s1500_s25  ;;  %s837_s14 = smov 192 }
  0x44   :  { %v1359_v34 = vld [vmem:[%s2648_s0 + $0x6] ss:$16 sm:%s579_s15]   ;;  %v577_v35 = vsel %vm118_vm0, %v1358_v33, %v1357_v30  ;;  %s617_s15 = smov 3  ;;  %v1238_v37 = vld [vmem:[%s2648_s0 + $0x120] ss:$4 sm:$0xff]   ;;  %s882_s10 = smov 192 }
  0x45   :  { %v1360_v36 = vld [vmem:[%s2648_s0 + $0x6] ss:$16 sm:%s584_s24]   ;;  %v582_v38 = vsel %vm123_vm1, %v1359_v34, %v577_v35  ;;  %1239 = vst.msk [vmem:[%s2649_s1 + $0x42] ss:$8 sm:$0xf] %vm3_vm3, %v1238_v37   ;;  %s855_s19 = smov 48 }
  0x46   :  { %v1372_v39 = vld [vmem:[%s2648_s0 + $0x186] ss:$16 sm:%s640_s28]   ;;  %1240 = vst.msk [vmem:[%s2649_s1 + $0x23] ss:$8 sm:$0xf0] %vm3_vm3, %v1238_v37   ;;  %v587_v41 = vsel %vm128_vm2, %v1360_v36, %v582_v38  ;;  %s763_s28 = smov 48 }
  0x47   :  { %v1373_v40 = vld [vmem:[%s2648_s0 + $0x186] ss:$16 sm:%s643_s29]   ;;  %588 = vrot.lane.b32.xlu0 %v587_v41, %s1500_s25  ;;  %v1241_v47 = vld [vmem:[%s2648_s0 + $0x140] ss:$4 sm:$0xff]   ;;  %s814_s29 = smov 192  ;;  %s860_s24 = smov 192 }
  0x48   :  { %v646_v42 = vsel %vm118_vm0, %v1373_v40, %v1372_v39  ;;  %v1374_v43 = vld [vmem:[%s2648_s0 + $0x186] ss:$16 sm:%s648_s8]   ;;  %s686_s8 = smov 3  ;;  %1242 = vst.msk [vmem:[%s2649_s1 + $0x44] ss:$8 sm:$0xf] %vm3_vm3, %v1241_v47  }
  0x49   :  { %v1375_v44 = vld [vmem:[%s2648_s0 + $0x186] ss:$16 sm:%s653_s9]   ;;  %v651_v45 = vsel %vm123_vm1, %v1374_v43, %v646_v42  ;;  %s689_s9 = smov 12  ;;  %1243 = vst.msk [vmem:[%s2649_s1 + $0x25] ss:$8 sm:$0xf0] %vm3_vm3, %v1241_v47  }
  0x4a   :  { %v1367_v46 = vld [vmem:[%s2648_s0 + $0x106] ss:$16 sm:%s617_s15]   ;;  %v656_v48 = vsel %vm128_vm2, %v1375_v44, %v651_v45  ;;  %s694_s15 = smov 48  ;;  %v1244_v53 = vld [vmem:[%s2648_s0 + $0x160] ss:$4 sm:$0xff]   ;;  %s928_s5 = smov 192 }
  0x4b   :  { %v1368_v49 = vld [vmem:[%s2648_s0 + $0x106] ss:$16 sm:%s620_s22]   ;;  %657 = vrot.lane.b32.xlu1 %v656_v48, %s1500_s25  ;;  %1245 = vst.msk [vmem:[%s2649_s1 + $0x46] ss:$8 sm:$0xf] %vm3_vm3, %v1244_v53   ;;  %s745_s22 = smov 192 }
  0x4c   :  { %v1369_v50 = vld [vmem:[%s2648_s0 + $0x106] ss:$16 sm:%s625_s23]   ;;  %v623_v51 = vsel %vm118_vm0, %v1368_v49, %v1367_v46  ;;  %s663_s23 = smov 3  ;;  %v1382_v55 = vld [vmem:[%s2648_s0 + $0x8a] ss:$16 sm:%s686_s8]   ;;  %s824_s8 = smov 3 }
  0x4d   :  { %v1370_v52 = vld [vmem:[%s2648_s0 + $0x106] ss:$16 sm:%s630_s4]   ;;  %v628_v54 = vsel %vm123_vm1, %v1369_v50, %v623_v51  ;;  %v1383_v56 = vld [vmem:[%s2648_s0 + $0x8a] ss:$16 sm:%s689_s9]   ;;  %s722_s9 = smov 192  ;;  %s768_s4 = smov 192 }
  0x4e   :  { %1246 = vst.msk [vmem:[%s2649_s1 + $0x27] ss:$8 sm:$0xf0] %vm3_vm3, %v1244_v53   ;;  %v633_v57 = vsel %vm128_vm2, %v1370_v52, %v628_v54  ;;  %v692_v58 = vsel %vm118_vm0, %v1383_v56, %v1382_v55  ;;  %v1384_v59 = vld [vmem:[%s2648_s0 + $0x8a] ss:$16 sm:%s694_s15]   ;;  %s732_s15 = smov 3 }
  0x4f   :  { %v1385_v60 = vld [vmem:[%s2648_s0 + $0x8a] ss:$16 sm:%s699_s16]   ;;  %634 = vrot.lane.b32.xlu0 %v633_v57, %s1500_s25  ;;  %v697_v61 = vsel %vm123_vm1, %v1384_v59, %v692_v58  ;;  %s735_s16 = smov 12  ;;  %s1501_s7 = smov 32  }
  0x50   :  { %v1377_v62 = vld [vmem:[%s2648_s0 + $0xa] ss:$16 sm:%s663_s23]   ;;  %v702_v63 = vsel %vm128_vm2, %v1385_v60, %v697_v61  ;;  %v1402_v19 = vld [vmem:[%s2648_s0 + $0x8e] ss:$16 sm:%s778_s11]   ;;  %s809_s23 = smov 48  ;;  %s905_s20 = smov 192 }
  0x51   :  { %v1378_v0 = vld [vmem:[%s2648_s0 + $0xa] ss:$16 sm:%s666_s2]   ;;  %703 = vrot.lane.b32.xlu1 %v702_v63, %s1500_s25  ;;  %s712_s2 = smov 12  ;;  %s974_s30 = smov 192 }
  0x52   :  { %v1379_v1 = vld [vmem:[%s2648_s0 + $0xa] ss:$16 sm:%s671_s3]   ;;  %v669_v2 = vsel %vm118_vm0, %v1378_v0, %v1377_v62  ;;  %s717_s3 = smov 48  ;;  %v1404_v23 = vld [vmem:[%s2648_s0 + $0x8e] ss:$16 sm:%s786_s17]   ;;  %s801_s17 = smov 3 }
  0x53   :  { %v1380_v3 = vld [vmem:[%s2648_s0 + $0xa] ss:$16 sm:%s676_s12]   ;;  %v674_v4 = vsel %vm123_vm1, %v1379_v1, %v669_v2  ;;  %s781_s12 = smov 12  ;;  %v1405_v24 = vld [vmem:[%s2648_s0 + $0x8e] ss:$16 sm:%s791_s18]   ;;  %s850_s18 = smov 12 }
  0x54   :  { %v1392_v5 = vld [vmem:[%s2648_s0 + $0x18a] ss:$16 sm:%s732_s15]   ;;  %v679_v7 = vsel %vm128_vm2, %v1380_v3, %v674_v4  ;;  %v1403_v20 = vld [vmem:[%s2648_s0 + $0x8e] ss:$16 sm:%s781_s12]   ;;  %s900_s15 = smov 48  ;;  %s946_s11 = smov 48 }
  0x55   :  { %v1393_v6 = vld [vmem:[%s2648_s0 + $0x18a] ss:$16 sm:%s735_s16]   ;;  %680 = vrot.lane.b32.xlu0 %v679_v7, %s1500_s25  ;;  %v784_v22 = vsel %vm118_vm0, %v1403_v20, %v1402_v19  ;;  %s951_s16 = smov 192  ;;  %s997_s12 = smov 192 }
  0x56   :  { %v738_v8 = vsel %vm118_vm0, %v1393_v6, %v1392_v5  ;;  %v1394_v9 = vld [vmem:[%s2648_s0 + $0x18a] ss:$16 sm:%s740_s21]   ;;  %s755_s21 = smov 3  ;;  %v789_v25 = vsel %vm123_vm1, %v1404_v23, %v784_v22  ;;  %v1398_v28 = vld [vmem:[%s2648_s0 + $0xe] ss:$16 sm:%s758_s27]   ;;  %s915_s27 = smov 3 }
  0x57   :  { %v1395_v10 = vld [vmem:[%s2648_s0 + $0x18a] ss:$16 sm:%s745_s22]   ;;  %v743_v11 = vsel %vm123_vm1, %v1394_v9, %v738_v8  ;;  %v1397_v26 = vld [vmem:[%s2648_s0 + $0xe] ss:$16 sm:%s755_s21]   ;;  %v794_v27 = vsel %vm128_vm2, %v1405_v24, %v789_v25  ;;  %s804_s22 = smov 12  ;;  %s1061_s21 = smov 48 }
  0x58   :  { %v1387_v12 = vld [vmem:[%s2648_s0 + $0x10a] ss:$16 sm:%s709_s26]   ;;  %v748_v13 = vsel %vm128_vm2, %v1395_v10, %v743_v11  ;;  %v1399_v29 = vld [vmem:[%s2648_s0 + $0xe] ss:$16 sm:%s763_s28]   ;;  %v761_v30 = vsel %vm118_vm0, %v1398_v28, %v1397_v26  ;;  %s918_s28 = smov 12  ;;  %s1020_s26 = smov 192 }
  0x59   :  { %v1388_v14 = vld [vmem:[%s2648_s0 + $0x10a] ss:$16 sm:%s712_s2]   ;;  %749 = vrot.lane.b32.xlu1 %v748_v13, %s1500_s25  ;;  %v766_v32 = vsel %vm123_vm1, %v1399_v29, %v761_v30  ;;  %s1038_s2 = smov 48 }
  0x5a   :  { %v1389_v15 = vld [vmem:[%s2648_s0 + $0x10a] ss:$16 sm:%s717_s3]   ;;  %v715_v16 = vsel %vm118_vm0, %v1388_v14, %v1387_v12  ;;  %v1400_v31 = vld [vmem:[%s2648_s0 + $0xe] ss:$16 sm:%s768_s4]   ;;  %s869_s3 = smov 3  ;;  %s872_s4 = smov 12 }
  0x5b   :  { %v1390_v17 = vld [vmem:[%s2648_s0 + $0x10a] ss:$16 sm:%s722_s9]   ;;  %v720_v18 = vsel %vm123_vm1, %v1389_v15, %v715_v16  ;;  %s827_s9 = smov 12  ;;  %v1412_v33 = vld [vmem:[%s2648_s0 + $0x18e] ss:$16 sm:%s824_s8]   ;;  %v771_v35 = vsel %vm128_vm2, %v1400_v31, %v766_v32  ;;  %s992_s8 = smov 48 }
  0x5c   :  { %v725_v21 = vsel %vm128_vm2, %v1390_v17, %v720_v18  ;;  %v1413_v34 = vld [vmem:[%s2648_s0 + $0x18e] ss:$16 sm:%s827_s9]   ;;  %v1421_v47 = vld [vmem:[%s2648_s0 + $0x81] ss:$16 sm:%s869_s3]   ;;  %s1043_s9 = smov 192  ;;  %s1089_s3 = smov 192 }
  0x5d   :  { %726 = vrot.lane.b32.xlu0 %v725_v21, %s1500_s25  ;;  %795 = vrot.lane.b32.xlu1 %v794_v27, %s1500_s25  ;;  %v830_v36 = vsel %vm118_vm0, %v1413_v34, %v1412_v33  ;;  %v1414_v37 = vld [vmem:[%s2648_s0 + $0x18e] ss:$16 sm:%s832_s13]   ;;  %s847_s13 = smov 3 }
  0x5e   :  { %v1415_v38 = vld [vmem:[%s2648_s0 + $0x18e] ss:$16 sm:%s837_s14]   ;;  %v835_v39 = vsel %vm123_vm1, %v1414_v37, %v830_v36  ;;  %v1422_v48 = vld [vmem:[%s2648_s0 + $0x81] ss:$16 sm:%s872_s4]   ;;  %s923_s4 = smov 48  ;;  %s895_s14 = smov 12 }
  0x5f   :  { %v1407_v40 = vld [vmem:[%s2648_s0 + $0x10e] ss:$16 sm:%s801_s17]   ;;  %v840_v41 = vsel %vm128_vm2, %v1415_v38, %v835_v39  ;;  %v875_v50 = vsel %vm118_vm0, %v1422_v48, %v1421_v47  ;;  %v1423_v51 = vld [vmem:[%s2648_s0 + $0x81] ss:$16 sm:%s877_s6]   ;;  %s892_s6 = smov 3  ;;  %s1107_s17 = smov 48 }
  0x60   :  { %v1408_v42 = vld [vmem:[%s2648_s0 + $0x10e] ss:$16 sm:%s804_s22]   ;;  %v1424_v52 = vld [vmem:[%s2648_s0 + $0x81] ss:$16 sm:%s882_s10]   ;;  %v880_v53 = vsel %vm123_vm1, %v1423_v51, %v875_v50  ;;  %s941_s10 = smov 12  ;;  %s1066_s22 = smov 192 }
  0x61   :  { %772 = vrot.lane.b32.xlu0 %v771_v35, %s1500_s25  ;;  %v1409_v43 = vld [vmem:[%s2648_s0 + $0x10e] ss:$16 sm:%s809_s23]   ;;  %841 = vrot.lane.b32.xlu1 %v840_v41, %s1500_s25  ;;  %v807_v44 = vsel %vm118_vm0, %v1408_v42, %v1407_v40  ;;  %v885_v55 = vsel %vm128_vm2, %v1424_v52, %v880_v53  ;;  %s961_s23 = smov 3 }
  0x62   :  { %v1410_v45 = vld [vmem:[%s2648_s0 + $0x10e] ss:$16 sm:%s814_s29]   ;;  %v812_v46 = vsel %vm123_vm1, %v1409_v43, %v807_v44  ;;  %v1417_v54 = vld [vmem:[%s2648_s0 + $0x1] ss:$16 sm:%s847_s13]   ;;  %s969_s29 = smov 48  ;;  %s1153_s13 = smov 48 }
  0x63   :  { %v817_v49 = vsel %vm128_vm2, %v1410_v45, %v812_v46  ;;  %v1418_v56 = vld [vmem:[%s2648_s0 + $0x1] ss:$16 sm:%s850_s18]   ;;  %v1441_v11 = vld [vmem:[%s2648_s0 + $0x85] ss:$16 sm:%s961_s23]   ;;  %s1112_s18 = smov 192  ;;  %s1130_s23 = smov 48 }
  0x64   :  { %v1419_v57 = vld [vmem:[%s2648_s0 + $0x1] ss:$16 sm:%s855_s19]   ;;  %v853_v58 = vsel %vm118_vm0, %v1418_v56, %v1417_v54  ;;  %v1443_v15 = vld [vmem:[%s2648_s0 + $0x85] ss:$16 sm:%s969_s29]   ;;  %s1007_s19 = smov 3  ;;  %s984_s29 = smov 3 }
  0x65   :  { %818 = vrot.lane.b32.xlu0 %v817_v49, %s1500_s25  ;;  %886 = vrot.lane.b32.xlu1 %v885_v55, %s1501_s7  ;;  %v1420_v59 = vld [vmem:[%s2648_s0 + $0x1] ss:$16 sm:%s860_s24]   ;;  %v858_v60 = vsel %vm123_vm1, %v1419_v57, %v853_v58  ;;  %s964_s24 = smov 12  ;;  %s1015_s25 = smov 48 }
  0x66   :  { %v1431_v61 = vld [vmem:[%s2648_s0 + $0x181] ss:$16 sm:%s915_s27]   ;;  %v863_v63 = vsel %vm128_vm2, %v1420_v59, %v858_v60  ;;  %v1442_v12 = vld [vmem:[%s2648_s0 + $0x85] ss:$16 sm:%s964_s24]   ;;  %s1084_s27 = smov 48  ;;  %s1181_s24 = smov 192 }
  0x67   :  { %v1432_v62 = vld [vmem:[%s2648_s0 + $0x181] ss:$16 sm:%s918_s28]   ;;  %v967_v14 = vsel %vm118_vm0, %v1442_v12, %v1441_v11  ;;  %v1444_v16 = vld [vmem:[%s2648_s0 + $0x85] ss:$16 sm:%s974_s30]   ;;  %s1033_s30 = smov 12  ;;  %s1135_s28 = smov 192 }
  0x68   :  { %v921_v0 = vsel %vm118_vm0, %v1432_v62, %v1431_v61  ;;  %v1433_v1 = vld [vmem:[%s2648_s0 + $0x181] ss:$16 sm:%s923_s4]   ;;  %s938_s4 = smov 3  ;;  %v972_v17 = vsel %vm123_vm1, %v1443_v15, %v967_v14  ;;  %v1437_v20 = vld [vmem:[%s2648_s0 + $0x5] ss:$16 sm:%s941_s10]   ;;  %s1204_s10 = smov 192 }
  0x69   :  { %v1434_v2 = vld [vmem:[%s2648_s0 + $0x181] ss:$16 sm:%s928_s5]   ;;  %864 = vrot.lane.b32.xlu0 %v863_v63, %s1501_s7  ;;  %v926_v3 = vsel %vm123_vm1, %v1433_v1, %v921_v0  ;;  %v977_v19 = vsel %vm128_vm2, %v1444_v16, %v972_v17  ;;  %s987_s5 = smov 12 }
  0x6a   :  { %v1426_v4 = vld [vmem:[%s2648_s0 + $0x101] ss:$16 sm:%s892_s6]   ;;  %v931_v5 = vsel %vm128_vm2, %v1434_v2, %v926_v3  ;;  %v1436_v18 = vld [vmem:[%s2648_s0 + $0x5] ss:$16 sm:%s938_s4]   ;;  %s1199_s6 = smov 48 }
  0x6b   :  { %v1427_v6 = vld [vmem:[%s2648_s0 + $0x101] ss:$16 sm:%s895_s14]   ;;  %932 = vrot.lane.b32.xlu1 %v931_v5, %s1501_s7  ;;  %v944_v22 = vsel %vm118_vm0, %v1437_v20, %v1436_v18  ;;  %s1158_s14 = smov 192 }
  0x6c   :  { %v1428_v7 = vld [vmem:[%s2648_s0 + $0x101] ss:$16 sm:%s900_s15]   ;;  %v898_v8 = vsel %vm118_vm0, %v1427_v6, %v1426_v4  ;;  %v1438_v21 = vld [vmem:[%s2648_s0 + $0x5] ss:$16 sm:%s946_s11]   ;;  %s1053_s15 = smov 3  ;;  %s1099_s11 = smov 3 }
  0x6d   :  { %v1429_v9 = vld [vmem:[%s2648_s0 + $0x101] ss:$16 sm:%s905_s20]   ;;  %v903_v10 = vsel %vm123_vm1, %v1428_v7, %v898_v8  ;;  %s1010_s20 = smov 12  ;;  %v1439_v23 = vld [vmem:[%s2648_s0 + $0x5] ss:$16 sm:%s951_s16]   ;;  %v949_v24 = vsel %vm123_vm1, %v1438_v21, %v944_v22  ;;  %s1056_s16 = smov 12 }
  0x6e   :  { %v908_v13 = vsel %vm128_vm2, %v1429_v9, %v903_v10  ;;  %v1451_v25 = vld [vmem:[%s2648_s0 + $0x185] ss:$16 sm:%s1007_s19]   ;;  %v954_v27 = vsel %vm128_vm2, %v1439_v23, %v949_v24  ;;  %v1461_v39 = vld [vmem:[%s2648_s0 + $0x89] ss:$16 sm:%s1053_s15]   ;;  %s1176_s19 = smov 48 }
  0x6f   :  { %909 = vrot.lane.b32.xlu0 %v908_v13, %s1501_s7  ;;  %978 = vrot.lane.b32.xlu1 %v977_v19, %s1501_s7  ;;  %v1452_v26 = vld [vmem:[%s2648_s0 + $0x185] ss:$16 sm:%s1010_s20]  }
  0x70   :  { %v1013_v28 = vsel %vm118_vm0, %v1452_v26, %v1451_v25  ;;  %v1453_v29 = vld [vmem:[%s2648_s0 + $0x185] ss:$16 sm:%s1015_s25]   ;;  %s1030_s25 = smov 3  ;;  %v1462_v40 = vld [vmem:[%s2648_s0 + $0x89] ss:$16 sm:%s1056_s16]  }
  0x71   :  { %v1454_v30 = vld [vmem:[%s2648_s0 + $0x185] ss:$16 sm:%s1020_s26]   ;;  %v1018_v31 = vsel %vm123_vm1, %v1453_v29, %v1013_v28  ;;  %v1059_v42 = vsel %vm118_vm0, %v1462_v40, %v1461_v39  ;;  %v1463_v43 = vld [vmem:[%s2648_s0 + $0x89] ss:$16 sm:%s1061_s21]   ;;  %s1076_s21 = smov 3  ;;  %s1079_s26 = smov 12 }
  0x72   :  { %v1446_v32 = vld [vmem:[%s2648_s0 + $0x105] ss:$16 sm:%s984_s29]   ;;  %v1023_v33 = vsel %vm128_vm2, %v1454_v30, %v1018_v31  ;;  %v1464_v44 = vld [vmem:[%s2648_s0 + $0x89] ss:$16 sm:%s1066_s22]   ;;  %v1064_v45 = vsel %vm123_vm1, %v1463_v43, %v1059_v42  ;;  %s1125_s22 = smov 12 }
  0x73   :  { %955 = vrot.lane.b32.xlu0 %v954_v27, %s1501_s7  ;;  %v1447_v34 = vld [vmem:[%s2648_s0 + $0x105] ss:$16 sm:%s987_s5]   ;;  %1024 = vrot.lane.b32.xlu1 %v1023_v33, %s1501_s7  ;;  %v1069_v47 = vsel %vm128_vm2, %v1464_v44, %v1064_v45 }
  0x74   :  { %v1448_v35 = vld [vmem:[%s2648_s0 + $0x105] ss:$16 sm:%s992_s8]   ;;  %v990_v36 = vsel %vm118_vm0, %v1447_v34, %v1446_v32  ;;  %v1456_v46 = vld [vmem:[%s2648_s0 + $0x9] ss:$16 sm:%s1030_s25]   ;;  %s1145_s8 = smov 3 }
  0x75   :  { %v1449_v37 = vld [vmem:[%s2648_s0 + $0x105] ss:$16 sm:%s997_s12]   ;;  %v995_v38 = vsel %vm123_vm1, %v1448_v35, %v990_v36  ;;  %s1102_s12 = smov 12  ;;  %v1457_v48 = vld [vmem:[%s2648_s0 + $0x9] ss:$16 sm:%s1033_s30]  }
  0x76   :  { %v1000_v41 = vsel %vm128_vm2, %v1449_v37, %v995_v38  ;;  %v1458_v49 = vld [vmem:[%s2648_s0 + $0x9] ss:$16 sm:%s1038_s2]   ;;  %v1036_v50 = vsel %vm118_vm0, %v1457_v48, %v1456_v46  ;;  %v1481_v3 = vld [vmem:[%s2648_s0 + $0x8d] ss:$16 sm:%s1145_s8]   ;;  %s1191_s2 = smov 3 }
  0x77   :  { %1001 = vrot.lane.b32.xlu0 %v1000_v41, %s1501_s7  ;;  %1070 = vrot.lane.b32.xlu1 %v1069_v47, %s1501_s7  ;;  %v1459_v51 = vld [vmem:[%s2648_s0 + $0x9] ss:$16 sm:%s1043_s9]   ;;  %v1041_v52 = vsel %vm123_vm1, %v1458_v49, %v1036_v50  ;;  %s1148_s9 = smov 12 }
  0x78   :  { %v1471_v53 = vld [vmem:[%s2648_s0 + $0x189] ss:$16 sm:%s1099_s11]   ;;  %v1046_v55 = vsel %vm128_vm2, %v1459_v51, %v1041_v52  ;;  %v1482_v4 = vld [vmem:[%s2648_s0 + $0x8d] ss:$16 sm:%s1148_s9]   ;;  %v176_v30 = vpop.permute.xlu1 %175  }
  0x79   :  { %v1472_v54 = vld [vmem:[%s2648_s0 + $0x189] ss:$16 sm:%s1102_s12]   ;;  %v1151_v6 = vsel %vm118_vm0, %v1482_v4, %v1481_v3  ;;  %v1483_v7 = vld [vmem:[%s2648_s0 + $0x8d] ss:$16 sm:%s1153_s13]   ;;  %s1168_s13 = smov 3 }
  0x7a   :  { %v1105_v56 = vsel %vm118_vm0, %v1472_v54, %v1471_v53  ;;  %v1473_v57 = vld [vmem:[%s2648_s0 + $0x189] ss:$16 sm:%s1107_s17]   ;;  %s1122_s17 = smov 3  ;;  %v1484_v8 = vld [vmem:[%s2648_s0 + $0x8d] ss:$16 sm:%s1158_s14]   ;;  %v1156_v9 = vsel %vm123_vm1, %v1483_v7, %v1151_v6 }
  0x7b   :  { %v1474_v58 = vld [vmem:[%s2648_s0 + $0x189] ss:$16 sm:%s1112_s18]   ;;  %1047 = vrot.lane.b32.xlu0 %v1046_v55, %s1501_s7  ;;  %v1110_v59 = vsel %vm123_vm1, %v1473_v57, %v1105_v56  ;;  %v1161_v11 = vsel %vm128_vm2, %v1484_v8, %v1156_v9  ;;  %s1171_s18 = smov 12  ;;  %1272 = vst.msk [vmem:[%s2649_s1 + $0x40] sm:$0xff] %vm132_vm4, %v176_v30  }
  0x7c   :  { %v1466_v60 = vld [vmem:[%s2648_s0 + $0x109] ss:$16 sm:%s1076_s21]   ;;  %v1115_v61 = vsel %vm128_vm2, %v1474_v58, %v1110_v59  ;;  %v1476_v10 = vld [vmem:[%s2648_s0 + $0xd] ss:$16 sm:%s1122_s17]   ;;  %v131_v33 = vpop.permute.xlu0 %130  }
  0x7d   :  { %v1467_v62 = vld [vmem:[%s2648_s0 + $0x109] ss:$16 sm:%s1079_s26]   ;;  %1116 = vrot.lane.b32.xlu1 %v1115_v61, %s1501_s7  ;;  %133 = vst.msk [vmem:[%s2649_s1] sm:$0xff] %vm132_vm4, %v131_v33  }
  0x7e   :  { %v1468_v63 = vld [vmem:[%s2648_s0 + $0x109] ss:$16 sm:%s1084_s27]   ;;  %v1082_v0 = vsel %vm118_vm0, %v1467_v62, %v1466_v60  ;;  %v1477_v12 = vld [vmem:[%s2648_s0 + $0xd] ss:$16 sm:%s1125_s22]  }
  0x7f   :  { %v1469_v1 = vld [vmem:[%s2648_s0 + $0x109] ss:$16 sm:%s1089_s3]   ;;  %v1087_v2 = vsel %vm123_vm1, %v1468_v63, %v1082_v0  ;;  %s1194_s3 = smov 12  ;;  %v1478_v13 = vld [vmem:[%s2648_s0 + $0xd] ss:$16 sm:%s1130_s23]   ;;  %v1128_v14 = vsel %vm118_vm0, %v1477_v12, %v1476_v10 }
  0x80   :  { %v1092_v5 = vsel %vm128_vm2, %v1469_v1, %v1087_v2  ;;  %v1479_v15 = vld [vmem:[%s2648_s0 + $0xd] ss:$16 sm:%s1135_s28]   ;;  %v1133_v16 = vsel %vm123_vm1, %v1478_v13, %v1128_v14  ;;  %v199_v34 = vpop.permute.xlu1 %198  }
  0x81   :  { %1093 = vrot.lane.b32.xlu0 %v1092_v5, %s1501_s7  ;;  %1162 = vrot.lane.b32.xlu1 %v1161_v11, %s1501_s7  ;;  %v1491_v17 = vld [vmem:[%s2648_s0 + $0x18d] ss:$16 sm:%s1191_s2]   ;;  %v1138_v19 = vsel %vm128_vm2, %v1479_v15, %v1133_v16 }
  0x82   :  { %v1492_v18 = vld [vmem:[%s2648_s0 + $0x18d] ss:$16 sm:%s1194_s3]   ;;  %1277 = vst.msk [vmem:[%s2649_s1 + $0x60] sm:$0xff] %vm132_vm4, %v199_v34  }
  0x83   :  { %v1197_v20 = vsel %vm118_vm0, %v1492_v18, %v1491_v17  ;;  %v1493_v21 = vld [vmem:[%s2648_s0 + $0x18d] ss:$16 sm:%s1199_s6]  }
  0x84   :  { %v1494_v22 = vld [vmem:[%s2648_s0 + $0x18d] ss:$16 sm:%s1204_s10]   ;;  %v1202_v23 = vsel %vm123_vm1, %v1493_v21, %v1197_v20  ;;  %v153_v35 = vpop.permute.xlu0 %152   ;;  %v245_v36 = vpop.permute.xlu1 %244  }
  0x85   :  { %1139 = vrot.lane.b32.xlu0 %v1138_v19, %s1501_s7  ;;  %v1486_v24 = vld [vmem:[%s2648_s0 + $0x10d] ss:$16 sm:%s1168_s13]   ;;  %v1207_v25 = vsel %vm128_vm2, %v1494_v22, %v1202_v23  ;;  %1267 = vst.msk [vmem:[%s2649_s1 + $0x20] sm:$0xff] %vm132_vm4, %v153_v35  }
  0x86   :  { %v1487_v26 = vld [vmem:[%s2648_s0 + $0x10d] ss:$16 sm:%s1171_s18]   ;;  %1208 = vrot.lane.b32.xlu1 %v1207_v25, %s1501_s7  ;;  %1287 = vst.msk [vmem:[%s2649_s1 + $0x28] sm:$0xff] %vm132_vm4, %v245_v36  }
  0x87   :  { %v1488_v27 = vld [vmem:[%s2648_s0 + $0x10d] ss:$16 sm:%s1176_s19]   ;;  %v1174_v28 = vsel %vm118_vm0, %v1487_v26, %v1486_v24 }
  0x88   :  { %v1489_v29 = vld [vmem:[%s2648_s0 + $0x10d] ss:$16 sm:%s1181_s24]   ;;  %v1179_v31 = vsel %vm123_vm1, %v1488_v27, %v1174_v28  ;;  %v222_v37 = vpop.permute.xlu0 %221  }
  0x89   :  { %v1184_v32 = vsel %vm128_vm2, %v1489_v29, %v1179_v31  ;;  %1282 = vst.msk [vmem:[%s2649_s1 + $0x8] sm:$0xff] %vm132_vm4, %v222_v37  }
  0x8a   :  { %1185 = vrot.lane.b32.xlu0 %v1184_v32, %s1501_s7  ;;  %v291_v38 = vpop.permute.xlu1 %290  }
  0x8b   :  { %1297 = vst.msk [vmem:[%s2649_s1 + $0x68] sm:$0xff] %vm132_vm4, %v291_v38  }
  0x8e   :  { %v268_v39 = vpop.permute.xlu0 %267   ;;  %v337_v40 = vpop.permute.xlu1 %336  }
  0x8f   :  { %1292 = vst.msk [vmem:[%s2649_s1 + $0x48] sm:$0xff] %vm132_vm4, %v268_v39   ;;  %1307 = vst.msk [vmem:[%s2649_s1 + $0x30] sm:$0xff] %vm132_vm4, %v337_v40  }
  0x92   :  { %v314_v41 = vpop.permute.xlu0 %313  }
  0x93   :  { %1302 = vst.msk [vmem:[%s2649_s1 + $0x10] sm:$0xff] %vm132_vm4, %v314_v41  }
  0x95   :  { %v383_v42 = vpop.permute.xlu1 %382  }
  0x96   :  { %1317 = vst.msk [vmem:[%s2649_s1 + $0x70] sm:$0xff] %vm132_vm4, %v383_v42  }
  0x99   :  { %v360_v43 = vpop.permute.xlu0 %359   ;;  %v429_v44 = vpop.permute.xlu1 %428  }
  0x9a   :  { %1312 = vst.msk [vmem:[%s2649_s1 + $0x50] sm:$0xff] %vm132_vm4, %v360_v43   ;;  %1327 = vst.msk [vmem:[%s2649_s1 + $0x38] sm:$0xff] %vm132_vm4, %v429_v44  }
  0x9d   :  { %v406_v45 = vpop.permute.xlu0 %405  }
  0x9e   :  { %1322 = vst.msk [vmem:[%s2649_s1 + $0x18] sm:$0xff] %vm132_vm4, %v406_v45  }
  0xa1   :  { %v475_v46 = vpop.permute.xlu1 %474  }
  0xa2   :  { %1337 = vst.msk [vmem:[%s2649_s1 + $0x78] sm:$0xff] %vm132_vm4, %v475_v46  }
  0xa5   :  { %v452_v47 = vpop.permute.xlu0 %451  }
  0xa6   :  { %1332 = vst.msk [vmem:[%s2649_s1 + $0x58] sm:$0xff] %vm132_vm4, %v452_v47  }
  0xa7   :  { %v520_v48 = vpop.permute.xlu1 %519  }
  0xa8   :  { %1346 = vst.msk [vmem:[%s2649_s1 + $0x20] sm:$0xff] %vm499_vm5, %v520_v48  }
  0xab   :  { %v498_v49 = vpop.permute.xlu0 %497  }
  0xac   :  { %500 = vst.msk [vmem:[%s2649_s1] sm:$0xff] %vm499_vm5, %v498_v49  }
  0xaf   :  { %v566_v50 = vpop.permute.xlu1 %565  }
  0xb0   :  { %1356 = vst.msk [vmem:[%s2649_s1 + $0x60] sm:$0xff] %vm499_vm5, %v566_v50  }
  0xb3   :  { %v543_v51 = vpop.permute.xlu0 %542  }
  0xb4   :  { %1351 = vst.msk [vmem:[%s2649_s1 + $0x40] sm:$0xff] %vm499_vm5, %v543_v51  }
  0xb5   :  { %v612_v52 = vpop.permute.xlu1 %611  }
  0xb6   :  { %1366 = vst.msk [vmem:[%s2649_s1 + $0x28] sm:$0xff] %vm499_vm5, %v612_v52  }
  0xb9   :  { %v589_v53 = vpop.permute.xlu0 %588  }
  0xba   :  { %1361 = vst.msk [vmem:[%s2649_s1 + $0x8] sm:$0xff] %vm499_vm5, %v589_v53  }
  0xbd   :  { %v658_v54 = vpop.permute.xlu1 %657  }
  0xbe   :  { %1376 = vst.msk [vmem:[%s2649_s1 + $0x68] sm:$0xff] %vm499_vm5, %v658_v54  }
  0xc1   :  { %v635_v55 = vpop.permute.xlu0 %634  }
  0xc2   :  { %1371 = vst.msk [vmem:[%s2649_s1 + $0x48] sm:$0xff] %vm499_vm5, %v635_v55  }
  0xc3   :  { %v704_v56 = vpop.permute.xlu1 %703  }
  0xc4   :  { %1386 = vst.msk [vmem:[%s2649_s1 + $0x30] sm:$0xff] %vm499_vm5, %v704_v56  }
  0xc7   :  { %v681_v57 = vpop.permute.xlu0 %680  }
  0xc8   :  { %1381 = vst.msk [vmem:[%s2649_s1 + $0x10] sm:$0xff] %vm499_vm5, %v681_v57  }
  0xcb   :  { %v750_v58 = vpop.permute.xlu1 %749  }
  0xcc   :  { %1396 = vst.msk [vmem:[%s2649_s1 + $0x70] sm:$0xff] %vm499_vm5, %v750_v58  }
  0xcf   :  { %v727_v59 = vpop.permute.xlu0 %726   ;;  %v796_v60 = vpop.permute.xlu1 %795  }
  0xd0   :  { %1391 = vst.msk [vmem:[%s2649_s1 + $0x50] sm:$0xff] %vm499_vm5, %v727_v59   ;;  %1406 = vst.msk [vmem:[%s2649_s1 + $0x38] sm:$0xff] %vm499_vm5, %v796_v60  }
  0xd3   :  { %v773_v61 = vpop.permute.xlu0 %772   ;;  %v842_v62 = vpop.permute.xlu1 %841  }
  0xd4   :  { %1401 = vst.msk [vmem:[%s2649_s1 + $0x18] sm:$0xff] %vm499_vm5, %v773_v61   ;;  %1416 = vst.msk [vmem:[%s2649_s1 + $0x78] sm:$0xff] %vm499_vm5, %v842_v62  }
  0xd7   :  { %v819_v63 = vpop.permute.xlu0 %818   ;;  %v887_v0 = vpop.permute.xlu1 %886  }
  0xd8   :  { %1411 = vst.msk [vmem:[%s2649_s1 + $0x58] sm:$0xff] %vm499_vm5, %v819_v63  }
  0xd9   :  { %1425 = vst.msk [vmem:[%s2649_s1 + $0x20] sm:$0xff] %vm866_vm6, %v887_v0  }
  0xdb   :  { %v865_v1 = vpop.permute.xlu0 %864  }
  0xdc   :  { %867 = vst.msk [vmem:[%s2649_s1] sm:$0xff] %vm866_vm6, %v865_v1  }
  0xdd   :  { %v933_v2 = vpop.permute.xlu1 %932  }
  0xde   :  { %1435 = vst.msk [vmem:[%s2649_s1 + $0x60] sm:$0xff] %vm866_vm6, %v933_v2  }
  0xe1   :  { %v910_v3 = vpop.permute.xlu0 %909   ;;  %v979_v4 = vpop.permute.xlu1 %978  }
  0xe2   :  { %1430 = vst.msk [vmem:[%s2649_s1 + $0x40] sm:$0xff] %vm866_vm6, %v910_v3   ;;  %1445 = vst.msk [vmem:[%s2649_s1 + $0x28] sm:$0xff] %vm866_vm6, %v979_v4  }
  0xe5   :  { %v956_v5 = vpop.permute.xlu0 %955   ;;  %v1025_v6 = vpop.permute.xlu1 %1024  }
  0xe6   :  { %1440 = vst.msk [vmem:[%s2649_s1 + $0x8] sm:$0xff] %vm866_vm6, %v956_v5   ;;  %1455 = vst.msk [vmem:[%s2649_s1 + $0x68] sm:$0xff] %vm866_vm6, %v1025_v6  }
  0xe9   :  { %v1002_v7 = vpop.permute.xlu0 %1001   ;;  %v1071_v8 = vpop.permute.xlu1 %1070  }
  0xea   :  { %1450 = vst.msk [vmem:[%s2649_s1 + $0x48] sm:$0xff] %vm866_vm6, %v1002_v7   ;;  %1465 = vst.msk [vmem:[%s2649_s1 + $0x30] sm:$0xff] %vm866_vm6, %v1071_v8  }
  0xed   :  { %v1048_v9 = vpop.permute.xlu0 %1047  }
  0xee   :  { %1460 = vst.msk [vmem:[%s2649_s1 + $0x10] sm:$0xff] %vm866_vm6, %v1048_v9  }
  0xef   :  { %v1117_v10 = vpop.permute.xlu1 %1116  }
  0xf0   :  { %1475 = vst.msk [vmem:[%s2649_s1 + $0x70] sm:$0xff] %vm866_vm6, %v1117_v10  }
  0xf3   :  { %v1094_v11 = vpop.permute.xlu0 %1093   ;;  %v1163_v12 = vpop.permute.xlu1 %1162  }
  0xf4   :  { %1470 = vst.msk [vmem:[%s2649_s1 + $0x50] sm:$0xff] %vm866_vm6, %v1094_v11   ;;  %1485 = vst.msk [vmem:[%s2649_s1 + $0x38] sm:$0xff] %vm866_vm6, %v1163_v12  }
  0xf7   :  { %v1140_v13 = vpop.permute.xlu0 %1139  }
  0xf8   :  { %1480 = vst.msk [vmem:[%s2649_s1 + $0x18] sm:$0xff] %vm866_vm6, %v1140_v13   ;;  %v1209_v14 = vpop.permute.xlu1 %1208  }
  0xf9   :  { %1495 = vst.msk [vmem:[%s2649_s1 + $0x78] sm:$0xff] %vm866_vm6, %v1209_v14  }
  0xfc   :  { %v1186_v15 = vpop.permute.xlu0 %1185  }
  0xfd   :  { %1490 = vst.msk [vmem:[%s2649_s1 + $0x58] sm:$0xff] %vm866_vm6, %v1186_v15  }

// kernel: refinement_forward.1
= control target key start
LH: loop header
LB: loop body
LE: loop exit
PB: predicated region body
PF: predicated region fallthrough
CT: control target
= control target key end

     0   :  { %s6493_s23 = smov 0   ;;  %s11127_s0 = inlined_call_operand.<no memory space> [shape: f32[1,1], index: 0, kind: input, shape index: {}]   ;;  %s11128_s1 = inlined_call_operand.vmem [shape: f32[2,16,128], index: 1, kind: input, shape index: {}]   ;;  %s11129_s2 = inlined_call_operand.vmem [shape: f32[2,16,512], index: 2, kind: input, shape index: {}]   ;;  %s11130_s3 = inlined_call_operand.vmem [shape: f32[128,512], index: 3, kind: input, shape index: {}]   ;;  %s11131_s4 = inlined_call_operand.vmem [shape: f32[1,512], index: 4, kind: input, shape index: {}]   ;;  %s11132_s5 = inlined_call_operand.vmem [shape: f32[36,512], index: 5, kind: input, shape index: {}]   ;;  %s11133_s6 = inlined_call_operand.vmem [shape: f32[8,512], index: 6, kind: input, shape index: {}]   ;;  %s11134_s7 = inlined_call_operand.vmem [shape: f32[64,32], index: 7, kind: input, shape index: {}]   ;;  %s11135_s8 = inlined_call_operand.vmem [shape: f32[4,32], index: 8, kind: input, shape index: {}]   ;;  %s11136_s9 = inlined_call_operand.vmem [shape: f32[64,1024], index: 9, kind: input, shape index: {}]   ;;  %s11137_s10 = inlined_call_operand.vmem [shape: f32[2,1024], index: 10, kind: input, shape index: {}]   ;;  %s11138_s11 = inlined_call_operand.vmem [shape: f32[512,32], index: 11, kind: input, shape index: {}]   ;;  %s11139_s12 = inlined_call_operand.vmem [shape: f32[2,16,512], index: 12, kind: output, shape index: {}]  }
   0x1   :  { %17 = sst [smem:[#allocation4]] %s11127_s0 }
   0x2 LB: > { %s5831_s24 = sadd.s32 4294967295, %s6417_s23   ;;  %p5835_p0 = scmp.ge.s32.totalorder %s6417_s23, 1  ;;  %s6417_s23 = sphi %s6493_s23, %s23_s23  }
   0x3   : > { %p373_p1 = scmp.lt.s32.totalorder %s6417_s23, 3 }
   0x5   : > { %p374_p2 = pnand %p5835_p0, %p373_p1 }
   0x7   : > { %377 = sbr.rel (%p374_p2) target bundleno = 1778 (0x6f2), region = 68 }
   0xe   : > { %v446_v0 = vld [vmem:[%s11130_s3 + $0x8] sm:$0xff]  ;;  %v448_v2 = vld [vmem:[%s11130_s3 + $0x18] sm:$0xff]  ;;  %v445_v5 = vld [vmem:[%s11130_s3] sm:$0xff]  ;;  %v11140_v7 = vmov 0.0   ;;  %p6663_p3 = scmp.lt.s32.totalorder %s5831_s24, 1  ;;  %vm694_vm0 = vcmask 1041408  }
   0xf   : > { %v450_v1 = vld [vmem:[%s11130_s3 + $0x28] sm:$0xff]  ;;  %v452_v4 = vld [vmem:[%s11130_s3 + $0x38] sm:$0xff]  ;;  %v449_v6 = vld [vmem:[%s11130_s3 + $0x20] sm:$0xff]  ;;  %595 = vmatprep.mubr.f32.mxu0 %v11140_v7  ;;  %435 = vst [vmem:[#allocation2] sm:$0x3] %v11140_v7  ;;  %672 = vmatprep.mubr.f32.mxu1 %v11140_v7  ;;  %vm1296_vm1 = vcmask 1045504  }
  0x10   : > { %v6072_v3 = vpack.c.bf16 %v450_v1, %v446_v0  ;;  %436 = vst [vmem:[#allocation2 + $0x8] sm:$0x3] %v11140_v7  ;;  %437 = vst [vmem:[#allocation2 + $0x10] sm:$0x3] %v11140_v7  ;;  %v6104_v8 = vpack.c.bf16 %v452_v4, %v448_v2  ;;  %v6074_v9 = vpack.c.bf16 %v449_v6, %v445_v5  ;;  %v447_v10 = vld [vmem:[%s11130_s3 + $0x10] sm:$0xff]  ;;  %v454_v12 = vld [vmem:[%s11130_s3 + $0x48] sm:$0xff] }
  0x11   : > { %438 = vst [vmem:[#allocation2 + $0x18] sm:$0x3] %v11140_v7  ;;  %439 = vst [vmem:[#allocation2 + $0x40] sm:$0xc] %v11140_v7  ;;  %v451_v11 = vld [vmem:[%s11130_s3 + $0x30] sm:$0xff]  ;;  %v458_v14 = vld [vmem:[%s11130_s3 + $0x68] sm:$0xff] }
  0x12   : > { %440 = vst [vmem:[#allocation2 + $0x48] sm:$0xc] %v11140_v7  ;;  %441 = vst [vmem:[#allocation2 + $0x50] sm:$0xc] %v11140_v7  ;;  %6073 = vmatprep.subr.bf16.mxu0 %v6072_v3  ;;  %v6106_v13 = vpack.c.bf16 %v451_v11, %v447_v10  ;;  %v456_v15 = vld [vmem:[%s11130_s3 + $0x58] sm:$0xff]  ;;  %6105 = vmatprep.subr.bf16.mxu1 %v6104_v8  ;;  %v6076_v17 = vpack.c.bf16 %v458_v14, %v454_v12  ;;  %v453_v19 = vld [vmem:[%s11130_s3 + $0x40] sm:$0xff] }
  0x13   : > { %442 = vst [vmem:[#allocation2 + $0x58] sm:$0xc] %v11140_v7  ;;  %v460_v16 = vld [vmem:[%s11130_s3 + $0x78] sm:$0xff]  ;;  %6075 = vmatpush1.bf16.msra.mxu0 %v6074_v9  ;;  %v457_v20 = vld [vmem:[%s11130_s3 + $0x60] sm:$0xff]  ;;  %v455_v21 = vld [vmem:[%s11130_s3 + $0x50] sm:$0xff]  ;;  %s12347_s24 = smov (!%p6663_p3, %s5831_s24), 1 }
  0x14   : > { %v6108_v18 = vpack.c.bf16 %v460_v16, %v456_v15  ;;  %6107 = vmatpush1.bf16.msra.mxu1 %v6106_v13  ;;  %v6078_v22 = vpack.c.bf16 %v457_v20, %v453_v19  ;;  %v459_v23 = vld [vmem:[%s11130_s3 + $0x70] sm:$0xff]  ;;  %v462_v24 = vld [vmem:[%s11130_s3 + $0x88] sm:$0xff]  ;;  %6077 = vmatprep.subr.bf16.mxu0 %v6076_v17  ;;  %v464_v28 = vld [vmem:[%s11130_s3 + $0x98] sm:$0xff]  ;;  %s5897_s16 = sshll.u32 %s12347_s24, 4  ;;  %s5898_s20 = sshll.u32 %s12347_s24, 6  ;;  %vm2130_vm2 = vcmask 1043456  }
  0x15   : > { %v466_v25 = vld [vmem:[%s11130_s3 + $0xa8] sm:$0xff]  ;;  %v6110_v26 = vpack.c.bf16 %v459_v23, %v455_v21  ;;  %v468_v29 = vld [vmem:[%s11130_s3 + $0xb8] sm:$0xff]  ;;  %v461_v30 = vld [vmem:[%s11130_s3 + $0x80] sm:$0xff]  ;;  %s424_s19 = scalar_lea.vmem %s11128_s1, %s5897_s16  ;;  %s429_s26 = scalar_lea.vmem %s11129_s2, %s5898_s20  ;;  %vm1014_vm3 = vcmask 1046528   ;;  %vm6424_vm7 = vmmov 0   ;;  %vm2659_vm8 = vcmask 261120  }
  0x16   : > { %6109 = vmatprep.subr.bf16.mxu1 %v6108_v18  ;;  %v6080_v27 = vpack.c.bf16 %v466_v25, %v462_v24  ;;  %v6112_v31 = vpack.c.bf16 %v468_v29, %v464_v28  ;;  %v465_v32 = vld [vmem:[%s11130_s3 + $0xa0] sm:$0xff]  ;;  %v463_v33 = vld [vmem:[%s11130_s3 + $0x90] sm:$0xff]  ;;  %v470_v36 = vld [vmem:[%s11130_s3 + $0xc8] sm:$0xff]  ;;  %s6420_s13 = smov 32   ;;  %s6421_s14 = smov 96  }
  0x17   : > { %v467_v34 = vld [vmem:[%s11130_s3 + $0xb0] sm:$0xff]  ;;  %6079 = vmatpush1.bf16.msra.mxu0 %v6078_v22  ;;  %v6082_v35 = vpack.c.bf16 %v465_v32, %v461_v30  ;;  %v474_v37 = vld [vmem:[%s11130_s3 + $0xe8] sm:$0xff]  ;;  %v472_v38 = vld [vmem:[%s11130_s3 + $0xd8] sm:$0xff] }
  0x18   : > { %6111 = vmatpush1.bf16.msra.mxu1 %v6110_v26  ;;  %6081 = vmatprep.subr.bf16.mxu0 %v6080_v27  ;;  %v6114_v39 = vpack.c.bf16 %v467_v34, %v463_v33  ;;  %v6084_v40 = vpack.c.bf16 %v474_v37, %v470_v36  ;;  %v476_v41 = vld [vmem:[%s11130_s3 + $0xf8] sm:$0xff]  ;;  %v469_v42 = vld [vmem:[%s11130_s3 + $0xc0] sm:$0xff]  ;;  %v471_v45 = vld [vmem:[%s11130_s3 + $0xd0] sm:$0xff] }
  0x19   : > { %v473_v43 = vld [vmem:[%s11130_s3 + $0xe0] sm:$0xff]  ;;  %6113 = vmatprep.subr.bf16.mxu1 %v6112_v31  ;;  %v6116_v44 = vpack.c.bf16 %v476_v41, %v472_v38  ;;  %v475_v46 = vld [vmem:[%s11130_s3 + $0xf0] sm:$0xff]  ;;  %v478_v47 = vld [vmem:[%s11130_s3 + $0x108] sm:$0xff] }
  0x1a   : > { %v482_v48 = vld [vmem:[%s11130_s3 + $0x128] sm:$0xff]  ;;  %v480_v49 = vld [vmem:[%s11130_s3 + $0x118] sm:$0xff]  ;;  %v6086_v51 = vpack.c.bf16 %v473_v43, %v469_v42  ;;  %v6118_v52 = vpack.c.bf16 %v475_v46, %v471_v45  ;;  %v477_v54 = vld [vmem:[%s11130_s3 + $0x100] sm:$0xff] }
  0x1b   : > { %v484_v50 = vld [vmem:[%s11130_s3 + $0x138] sm:$0xff]  ;;  %6083 = vmatpush1.bf16.msra.mxu0 %v6082_v35  ;;  %v6088_v53 = vpack.c.bf16 %v482_v48, %v478_v47  ;;  %v481_v55 = vld [vmem:[%s11130_s3 + $0x120] sm:$0xff]  ;;  %v479_v56 = vld [vmem:[%s11130_s3 + $0x110] sm:$0xff] }
  0x1c   : > { %6115 = vmatpush1.bf16.msra.mxu1 %v6114_v39  ;;  %6085 = vmatprep.subr.bf16.mxu0 %v6084_v40  ;;  %v6120_v57 = vpack.c.bf16 %v484_v50, %v480_v49  ;;  %v483_v58 = vld [vmem:[%s11130_s3 + $0x130] sm:$0xff]  ;;  %v486_v59 = vld [vmem:[%s11130_s3 + $0x148] sm:$0xff]  ;;  %v488_v61 = vld [vmem:[%s11130_s3 + $0x158] sm:$0xff]  ;;  %v6090_v63 = vpack.c.bf16 %v481_v55, %v477_v54 }
  0x1d   : > { %6117 = vmatprep.subr.bf16.mxu1 %v6116_v44  ;;  %v490_v60 = vld [vmem:[%s11130_s3 + $0x168] sm:$0xff]  ;;  %v492_v62 = vld [vmem:[%s11130_s3 + $0x178] sm:$0xff]  ;;  %v6122_v0 = vpack.c.bf16 %v483_v58, %v479_v56  ;;  %v485_v2 = vld [vmem:[%s11130_s3 + $0x140] sm:$0xff]  ;;  %v11142_v56 = vlaneseq }
  0x1e   : > { %v6092_v1 = vpack.c.bf16 %v490_v60, %v486_v59  ;;  %v489_v3 = vld [vmem:[%s11130_s3 + $0x160] sm:$0xff]  ;;  %v487_v4 = vld [vmem:[%s11130_s3 + $0x150] sm:$0xff]  ;;  %v6124_v5 = vpack.c.bf16 %v492_v62, %v488_v61  ;;  %v494_v8 = vld [vmem:[%s11130_s3 + $0x188] sm:$0xff] }
  0x1f   : > { %6087 = vmatpush1.bf16.msra.mxu0 %v6086_v51  ;;  %v491_v6 = vld [vmem:[%s11130_s3 + $0x170] sm:$0xff]  ;;  %v498_v9 = vld [vmem:[%s11130_s3 + $0x1a8] sm:$0xff]  ;;  %v496_v10 = vld [vmem:[%s11130_s3 + $0x198] sm:$0xff]  ;;  %v6094_v12 = vpack.c.bf16 %v489_v3, %v485_v2 }
  0x20   : > { %6119 = vmatpush1.bf16.msra.mxu1 %v6118_v52  ;;  %6089 = vmatprep.subr.bf16.mxu0 %v6088_v53  ;;  %v500_v11 = vld [vmem:[%s11130_s3 + $0x1b8] sm:$0xff]  ;;  %v6126_v13 = vpack.c.bf16 %v491_v6, %v487_v4  ;;  %v6096_v14 = vpack.c.bf16 %v498_v9, %v494_v8  ;;  %v493_v15 = vld [vmem:[%s11130_s3 + $0x180] sm:$0xff]  ;;  %v495_v17 = vld [vmem:[%s11130_s3 + $0x190] sm:$0xff] }
  0x21   : > { %6121 = vmatprep.subr.bf16.mxu1 %v6120_v57  ;;  %v497_v16 = vld [vmem:[%s11130_s3 + $0x1a0] sm:$0xff]  ;;  %v6128_v18 = vpack.c.bf16 %v500_v11, %v496_v10  ;;  %v499_v19 = vld [vmem:[%s11130_s3 + $0x1b0] sm:$0xff]  ;;  %v502_v20 = vld [vmem:[%s11130_s3 + $0x1c8] sm:$0xff]  ;;  %v6772_v57 = vshrl.u32 %v11142_v56, 7 }
  0x22   : > { %v506_v21 = vld [vmem:[%s11130_s3 + $0x1e8] sm:$0xff]  ;;  %v504_v22 = vld [vmem:[%s11130_s3 + $0x1d8] sm:$0xff]  ;;  %v6098_v24 = vpack.c.bf16 %v497_v16, %v493_v15  ;;  %v6130_v25 = vpack.c.bf16 %v499_v19, %v495_v17  ;;  %v501_v27 = vld [vmem:[%s11130_s3 + $0x1c0] sm:$0xff] }
  0x23   : > { %6091 = vmatpush1.bf16.msra.mxu0 %v6090_v63  ;;  %v508_v23 = vld [vmem:[%s11130_s3 + $0x1f8] sm:$0xff]  ;;  %v6100_v26 = vpack.c.bf16 %v506_v21, %v502_v20  ;;  %v505_v28 = vld [vmem:[%s11130_s3 + $0x1e0] sm:$0xff]  ;;  %v503_v30 = vld [vmem:[%s11130_s3 + $0x1d0] sm:$0xff]  ;;  %11474 = vst [vmem:[#allocation5_spill] sm:$0xff] %v6772_v57  ;;  %v6775_v58 = vsub.s32 0, %v6772_v57  ;;  %v6781_v60 = vsub.s32 1, %v6772_v57 }
  0x24   : > { %6123 = vmatpush1.bf16.msra.mxu1 %v6122_v0  ;;  %6093 = vmatprep.subr.bf16.mxu0 %v6092_v1  ;;  %v6132_v29 = vpack.c.bf16 %v508_v23, %v504_v22  ;;  %v507_v31 = vld [vmem:[%s11130_s3 + $0x1f0] sm:$0xff]  ;;  %v6102_v32 = vpack.c.bf16 %v505_v28, %v501_v27  ;;  %v443_v34 = vld [vmem:[%s424_s19] sm:$0xff]  ;;  %v444_v35 = vld [vmem:[%s424_s19 + $0x8] sm:$0xff]  ;;  %v6784_v61 = vsub.s32 2, %v6772_v57  ;;  %v6787_v62 = vsub.s32 3, %v6772_v57  ;;  %s6422_s19 = smov 64  }
  0x25   : > { %6125 = vmatprep.subr.bf16.mxu1 %v6124_v5  ;;  %v6134_v33 = vpack.c.bf16 %v507_v31, %v503_v30  ;;  %v6727_v36 = vld [vmem:[%s429_s26] sm:$0xff]  ;;  %v6738_v41 = vld [vmem:[%s429_s26 + $0x10] sm:$0xff]  ;;  %v6749_v46 = vld [vmem:[%s429_s26 + $0x8] sm:$0xff]  ;;  %11475 = vst [vmem:[#allocation6_spill] sm:$0xff] %v6775_v58 }
  0x26   : > { %v6729_v37 = vld [vmem:[%s429_s26 + $0x20] sm:$0xff]  ;;  %v11148_v38 = vrot.slane %v6727_v36, 6  ;;  %v6740_v42 = vld [vmem:[%s429_s26 + $0x30] sm:$0xff]  ;;  %v11146_v43 = vrot.slane %v6738_v41, 6  ;;  %v6751_v47 = vld [vmem:[%s429_s26 + $0x28] sm:$0xff]  ;;  %v11147_v48 = vrot.slane %v6749_v46, 6 }
  0x27   : > { %6095 = vmatpush1.bf16.msra.mxu0 %v6094_v12  ;;  %v11154_v39 = vrot.slane %v6729_v37, 6  ;;  %v11152_v44 = vrot.slane %v6740_v42, 6  ;;  %v11153_v49 = vrot.slane %v6751_v47, 6  ;;  %v6760_v51 = vld [vmem:[%s429_s26 + $0x18] sm:$0xff]  ;;  %v509_v59 = vld [vmem:[%s11131_s4] sm:$0xf] }
  0x28   : > { %6127 = vmatpush1.bf16.msra.mxu1 %v6126_v13  ;;  %6097 = vmatprep.subr.bf16.mxu0 %v6096_v14  ;;  %v6762_v52 = vld [vmem:[%s429_s26 + $0x38] sm:$0xff]  ;;  %v11144_v53 = vrot.slane %v6760_v51, 6  ;;  %11476 = vst [vmem:[#allocation7_spill] sm:$0xff] %v6781_v60  ;;  %11477 = vst [vmem:[#allocation8_spill] sm:$0xff] %v6784_v61  ;;  %v514_v63 = vrot.slane %v509_v59, %v6775_v58  ;;  %v518_v0 = vrot.slane %v509_v59, %v6781_v60 }
  0x29   : > { %6129 = vmatprep.subr.bf16.mxu1 %v6128_v18  ;;  %v3246_v40 = vsel %vm694_vm0, %v11148_v38, %v11154_v39  ;;  %v3250_v45 = vsel %vm694_vm0, %v11146_v43, %v11152_v44  ;;  %v3248_v50 = vsel %vm694_vm0, %v11147_v48, %v11153_v49  ;;  %v11151_v54 = vrot.slane %v6762_v52, 6  ;;  %11478 = vst [vmem:[#allocation9_spill] sm:$0xff] %v6787_v62  ;;  %v5855_v13 = vld [vmem:[%s11132_s5 + $0x25] ss:$8 sm:$0xf] }
  0x2a   : > { %3269 = vst [vmem:[#allocation2 + $0x20] sm:$0xff] %v3246_v40  ;;  %3271 = vst [vmem:[#allocation2 + $0x30] sm:$0xff] %v3250_v45  ;;  %v522_v1 = vrot.slane %v509_v59, %v6784_v61  ;;  %v526_v2 = vrot.slane %v509_v59, %v6787_v62  ;;  %v5858_v17 = vld [vmem:[%s11132_s5 + $0x40] ss:$8 sm:$0xf]  ;;  %v6817_v40 = vrot.slane %v5855_v13, %v6784_v61  ;;  %v11498_v57 = vrot.slane %v6729_v37, 6 }
  0x2b   : > { %6099 = vmatpush1.bf16.msra.mxu0 %v6098_v24  ;;  %3270 = vst [vmem:[#allocation2 + $0x28] sm:$0xff] %v3248_v50  ;;  %v3252_v55 = vsel %vm694_vm0, %v11144_v53, %v11151_v54  ;;  %v2177_v28 = vrot.slane %v5858_v17, %v6775_v58 }
  0x2c   : > { %6131 = vmatpush1.bf16.msra.mxu1 %v6130_v25  ;;  %6101 = vmatprep.subr.bf16.mxu0 %v6100_v26  ;;  %3272 = vst [vmem:[#allocation2 + $0x38] sm:$0xff] %v3252_v55  ;;  %v6800_v25 = vrot.slane %v5855_v13, %v6775_v58 }
  0x2d   : > { %6133 = vmatprep.subr.bf16.mxu1 %v6132_v29 }
  0x2f   : > { %6103 = vmatpush1.bf16.msra.mxu0 %v6102_v32 }
  0x30   : > { %6135 = vmatpush1.bf16.msra.mxu1 %v6134_v33 }
  0x32   : > { %596 = vmatmul.mubr.f32.vlgmr.msra.gmra.mrb[0].mxu0 %v443_v34 }
  0x33   : > { %673 = vmatmul.mubr.f32.vlgmr.msra.gmra.mrb[0].mxu1 %v443_v34  ;;  %601 = vmatprep.mubr.f32.mxu0 %v11140_v7 }
  0x34   : > { %678 = vmatprep.mubr.f32.mxu1 %v11140_v7 }
  0x36   : > { %602 = vmatmul.mubr.f32.gmra.mrb[2].mxu0 %v444_v35 }
  0x37   : > { %679 = vmatmul.mubr.f32.gmra.mrb[2].mxu1 %v444_v35 }
 0x105   : > { %v597_v3 = vpop.f32.mrb[0].mxu0 }
 0x106   : > { %v598_v4 = vadd.f32 %v597_v3, %v514_v63  ;;  %v599_v5 = vpop.f32.mrb[1].mxu0  ;;  %v674_v6 = vpop.f32.mrb[0].mxu1 }
 0x107   : > { %v600_v8 = vadd.f32 %v599_v5, %v518_v0  ;;  %v675_v9 = vadd.f32 %v674_v6, %v522_v1  ;;  %v676_v10 = vpop.f32.mrb[1].mxu1 }
 0x108   : > { %v695_v11 = vrot.slane %v598_v4, 6  ;;  %v677_v12 = vadd.f32 %v676_v10, %v526_v2 }
 0x109   : > { %v696_v14 = vrot.slane %v600_v8, 6  ;;  %v697_v15 = vrot.slane %v675_v9, 6  ;;  %v603_v16 = vpop.f32.mrb[2].mxu0 }
 0x10a   : > { %719 = vst [vmem:[#allocation2] sm:$0xfc] %v695_v11  ;;  %v698_v18 = vrot.slane %v677_v12, 6  ;;  %v604_v19 = vadd.f32 %v603_v16, %v514_v63  ;;  %v680_v20 = vpop.f32.mrb[2].mxu1  ;;  %v605_v21 = vpop.f32.mrb[3].mxu0  ;;  %v2189_v16 = vrot.slane %v5858_v17, %v6787_v62 }
 0x10b   : > { %720 = vst [vmem:[#allocation2 + $0x8] sm:$0xfc] %v696_v14  ;;  %721 = vst [vmem:[#allocation2 + $0x10] sm:$0xfc] %v697_v15  ;;  %v681_v22 = vadd.f32 %v680_v20, %v522_v1  ;;  %v606_v23 = vadd.f32 %v605_v21, %v518_v0  ;;  %v682_v24 = vpop.f32.mrb[3].mxu1  ;;  %v2181_v0 = vrot.slane %v5858_v17, %v6781_v60 }
 0x10c   : > { %722 = vst [vmem:[#allocation2 + $0x18] sm:$0xfc] %v698_v18  ;;  %v699_v26 = vrot.slane %v604_v19, 6  ;;  %v683_v27 = vadd.f32 %v682_v24, %v526_v2  ;;  %v6827_v1 = vrot.slane %v5855_v13, %v6781_v60  ;;  %v6830_v2 = vrot.slane %v5855_v13, %v6787_v62 }
 0x10d   : > { %v703_v29 = vrot.slane %v681_v22, 6  ;;  %v701_v30 = vrot.slane %v606_v23, 6 }
 0x10e   : > { %v6804_v31 = vsel %vm694_vm0, %v695_v11, %v699_v26  ;;  %727 = vst [vmem:[#allocation2 + $0x40] sm:$0x3] %v699_v26  ;;  %v705_v32 = vrot.slane %v683_v27, 6 }
 0x10f   : > { %v6807_v33 = vsel %vm694_vm0, %v697_v15, %v703_v29  ;;  %729 = vst [vmem:[#allocation2 + $0x50] sm:$0x3] %v703_v29  ;;  %v6810_v34 = vsel %vm694_vm0, %v696_v14, %v701_v30  ;;  %728 = vst [vmem:[#allocation2 + $0x48] sm:$0x3] %v701_v30  ;;  %v6814_v35 = vmul.f32 %v6800_v25, %v6804_v31 }
 0x110   : > { %v6820_v45 = vsel %vm694_vm0, %v698_v18, %v705_v32  ;;  %730 = vst [vmem:[#allocation2 + $0x58] sm:$0x3] %v705_v32  ;;  %v2198_v50 = vmul.f32 %v2177_v28, %v6804_v31  ;;  %v6846_v12 = vmul.f32 %v6817_v40, %v6807_v33  ;;  %v2185_v15 = vrot.slane %v5858_v17, %v6784_v61 }
 0x111   : > { %v6823_v55 = vld [vmem:[#allocation2] sm:$0xff]  ;;  %v11143_v8 = vrot.slane %v6814_v35, 2  ;;  %v6856_v27 = vmul.f32 %v6827_v1, %v6810_v34  ;;  %v2199_v29 = vmul.f32 %v2181_v0, %v6810_v34 }
 0x112   : > { %11479 = vst [vmem:[#allocation10_spill] sm:$0xff] %v6823_v55  ;;  %v2167_v59 = vld [vmem:[#allocation2] sm:$0xf0]  ;;  %743 = vrot.lane.b32.xlu0 %v6823_v55, %s6420_s13  ;;  %v6834_v3 = vld [vmem:[#allocation2 + $0x8] sm:$0xff]  ;;  %v6836_v4 = vld [vmem:[#allocation2 + $0x10] sm:$0xff]  ;;  %v2219_v11 = vrot.slane %v2198_v50, 4 }
 0x113   : > { %v1909_v63 = vld [vmem:[#allocation2] sm:$0xfc]  ;;  %11480 = vst [vmem:[#allocation11_spill] sm:$0xff] %v6834_v3  ;;  %11481 = vst [vmem:[#allocation12_spill] sm:$0xff] %v6836_v4  ;;  %v2194_v5 = vmul.f32 %v2177_v28, %v2167_v59  ;;  %v1911_v9 = vld [vmem:[#allocation2 + $0x10] sm:$0xfc]  ;;  %749 = vrot.lane.b32.xlu1 %v6834_v3, %s6420_s13  ;;  %v6873_v59 = vmul.f32 %v6830_v2, %v6820_v45 }
 0x114   : > { %v1940_v6 = vmul.f32 %v6800_v25, %v1909_v63  ;;  %v6842_v10 = vld [vmem:[#allocation2 + $0x18] sm:$0xff]  ;;  %v2168_v13 = vld [vmem:[#allocation2 + $0x8] sm:$0xf0]  ;;  %v1942_v20 = vmul.f32 %v6817_v40, %v1911_v9  ;;  %v2169_v23 = vld [vmem:[#allocation2 + $0x10] sm:$0xf0]  ;;  %v11145_v63 = vrot.slane %v6846_v12, 2 }
 0x115   : > { %v1910_v14 = vld [vmem:[#allocation2 + $0x8] sm:$0xfc]  ;;  %v2218_v18 = vrot.slane %v2194_v5, 4  ;;  %v2195_v21 = vmul.f32 %v2181_v0, %v2168_v13  ;;  %v1912_v22 = vld [vmem:[#allocation2 + $0x18] sm:$0xfc]  ;;  %v2196_v5 = vmul.f32 %v2185_v15, %v2169_v23  ;;  %v11150_v7 = vrot.slane %v6856_v27, 2 }
 0x116   : > { %v1964_v19 = vrot.slane %v1940_v6, 2  ;;  %v6851_v24 = vld [vmem:[#allocation2 + $0x40] sm:$0xf]  ;;  %v1941_v26 = vmul.f32 %v6827_v1, %v1910_v14  ;;  %v1943_v30 = vmul.f32 %v6830_v2, %v1912_v22  ;;  %755 = vrot.lane.b32.xlu0 %v6836_v4, %s6420_s13  ;;  %v2201_v6 = vmul.f32 %v2189_v16, %v6820_v45  ;;  %v6880_v14 = vld [vmem:[#allocation2 + $0x48] sm:$0xf] }
 0x117   : > { %v2202_v17 = vmul.f32 %v2177_v28, %v6851_v24  ;;  %v6869_v50 = vsel %vm2130_vm2, %v2218_v18, %v2219_v11  ;;  %761 = vrot.lane.b32.xlu1 %v6842_v10, %s6420_s13  ;;  %v2200_v28 = vmul.f32 %v2185_v15, %v6807_v33  ;;  %v1970_v13 = vrot.slane %v1942_v20, 2  ;;  %v6884_v53 = vld [vmem:[#allocation2 + $0x50] sm:$0xf]  ;;  %v6919_v38 = vld [vmem:[#allocation2 + $0x40] sm:$0x3] }
 0x118   : > { %v6866_v32 = vsel %vm1296_vm1, %v1964_v19, %v11143_v8  ;;  %11483 = vst [vmem:[#allocation14_spill] sm:$0xff] %v6869_v50  ;;  %v2221_v18 = vrot.slane %v2195_v21, 4  ;;  %v1967_v19 = vrot.slane %v1941_v26, 2  ;;  %v2203_v22 = vmul.f32 %v2181_v0, %v6880_v14  ;;  %v6898_v26 = vld [vmem:[#allocation2 + $0x58] sm:$0xf] }
 0x119   : > { %11482 = vst [vmem:[#allocation13_spill] sm:$0xff] %v6866_v32  ;;  %v2230_v9 = vrot.slane %v2202_v17, 4  ;;  %v2222_v56 = vrot.slane %v2199_v29, 4  ;;  %v1973_v8 = vrot.slane %v1943_v30, 2  ;;  %v6894_v20 = vsel %vm1296_vm1, %v1970_v13, %v11145_v63  ;;  %v2170_v29 = vld [vmem:[#allocation2 + $0x18] sm:$0xf0] }
 0x11a   : > { %782 = vrot.lane.b32.xlu0 %v6823_v55, %s6421_s14  ;;  %11485 = vst [vmem:[#allocation16_spill] sm:$0xff] %v6894_v20  ;;  %v11149_v0 = vrot.slane %v6873_v59, 2  ;;  %v2204_v21 = vmul.f32 %v2185_v15, %v6884_v53  ;;  %v2232_v30 = vrot.slane %v2203_v22, 4  ;;  %v2225_v13 = vrot.slane %v2200_v28, 4  ;;  %v6960_v54 = vld [vmem:[#allocation2 + $0x58] sm:$0x1] }
 0x11b   : > { %v6889_v23 = vsel %vm2130_vm2, %v2219_v11, %v2230_v9  ;;  %788 = vrot.lane.b32.xlu1 %v6834_v3, %s6421_s14  ;;  %v6905_v11 = vsel %vm1296_vm1, %v1967_v19, %v11150_v7  ;;  %v6908_v17 = vsel %vm2130_vm2, %v2221_v18, %v2222_v56  ;;  %v2224_v9 = vrot.slane %v2196_v5, 4  ;;  %v6923_v18 = vld [vmem:[#allocation2 + $0x40] sm:$0xf]  ;;  %v6958_v7 = vld [vmem:[#allocation2 + $0x50] sm:$0x1]  ;;  %11496 = vst [vmem:[#allocation27_spill] sm:$0xff] %v6960_v54 }
 0x11c   : > { %11484 = vst [vmem:[#allocation15_spill] sm:$0xff] %v6889_v23  ;;  %11486 = vst [vmem:[#allocation17_spill] sm:$0xff] %v6905_v11  ;;  %v6913_v15 = vsel %vm1296_vm1, %v1973_v8, %v11149_v0  ;;  %v2234_v63 = vrot.slane %v2204_v21, 4  ;;  %v2197_v43 = vmul.f32 %v2189_v16, %v2170_v29  ;;  %v6916_v48 = vsel %vm2130_vm2, %v2222_v56, %v2232_v30  ;;  %v6931_v21 = vld [vmem:[#allocation2 + $0x48] sm:$0x3] }
 0x11d   : > { %11487 = vst [vmem:[#allocation18_spill] sm:$0xff] %v6908_v17  ;;  %11488 = vst [vmem:[#allocation19_spill] sm:$0xff] %v6913_v15  ;;  %v2205_v22 = vmul.f32 %v2189_v16, %v6898_v26  ;;  %v6926_v5 = vsel %vm2130_vm2, %v2224_v9, %v2225_v13  ;;  %v2228_v19 = vrot.slane %v2201_v6, 4  ;;  %v6935_v56 = vld [vmem:[#allocation2 + $0x48] sm:$0xf] }
 0x11e   : > { %11489 = vst [vmem:[#allocation20_spill] sm:$0xff] %v6916_v48  ;;  %794 = vrot.lane.b32.xlu0 %v6836_v4, %s6421_s14  ;;  %11490 = vst [vmem:[#allocation21_spill] sm:$0xff] %v6926_v5  ;;  %v6929_v8 = vsel %vm2130_vm2, %v2225_v13, %v2234_v63  ;;  %v2227_v28 = vrot.slane %v2197_v43, 4  ;;  %v6937_v29 = vld [vmem:[#allocation2 + $0x48] sm:$0x1] }
 0x11f   : > { %11491 = vst [vmem:[#allocation22_spill] sm:$0xff] %v6929_v8  ;;  %800 = vrot.lane.b32.xlu1 %v6842_v10, %s6421_s14  ;;  %v2236_v16 = vrot.slane %v2205_v22, 4  ;;  %11492 = vst [vmem:[#allocation23_spill] sm:$0xff] %v6937_v29  ;;  %v6939_v30 = vld [vmem:[#allocation2 + $0x40] sm:$0x1]  ;;  %v11507_v29 = vrot.slane %v6749_v46, 6 }
 0x120   : > { %11493 = vst [vmem:[#allocation24_spill] sm:$0xff] %v6939_v30  ;;  %v5845_v9 = vld [vmem:[%s11132_s5 + $0x4] ss:$8 sm:$0xf]  ;;  %v6947_v63 = vld [vmem:[#allocation2 + $0x50] sm:$0x3]  ;;  %v6956_v22 = vsel %vm2130_vm2, %v2227_v28, %v2228_v19 }
 0x121   : > { %v5848_v43 = vld [vmem:[%s11132_s5 + $0x7] ss:$8 sm:$0xf]  ;;  %v6949_v6 = vld [vmem:[#allocation2 + $0x58] sm:$0x3]  ;;  %11494 = vst [vmem:[#allocation25_spill] sm:$0xff] %v6956_v22  ;;  %v6963_v39 = vsel %vm2130_vm2, %v2228_v19, %v2236_v16  ;;  %v1073_v15 = vrot.slane %v5845_v9, %v6775_v58  ;;  %v1077_v20 = vrot.slane %v5845_v9, %v6781_v60 }
 0x122   : > { %v6951_v13 = vld [vmem:[#allocation2 + $0x58] sm:$0xf]  ;;  %v6953_v0 = vld [vmem:[#allocation2 + $0x50] sm:$0xf]  ;;  %11495 = vst [vmem:[#allocation26_spill] sm:$0xff] %v6958_v7  ;;  %11497 = vst [vmem:[#allocation28_spill] sm:$0xff] %v6963_v39  ;;  %1672 = vrot.lane.b32.xlu0 %v6823_v55, %s6422_s19  ;;  %v1355_v32 = vrot.slane %v5848_v43, %v6775_v58 }
 0x123   : > { %v1063_v44 = vld [vmem:[#allocation2 + $0x40] sm:$0x3]  ;;  %v1064_v17 = vld [vmem:[#allocation2 + $0x48] sm:$0x3]  ;;  %v1065_v8 = vld [vmem:[#allocation2 + $0x50] sm:$0x3]  ;;  %747 = vrot.lane.b32.xlu1 %v6923_v18, %s6420_s13 }
 0x124   : > { %v1345_v49 = vld [vmem:[#allocation2 + $0x40] sm:$0x7]  ;;  %v1346_v23 = vld [vmem:[#allocation2 + $0x48] sm:$0x7]  ;;  %v11500_v22 = vrot.slane %v6751_v47, 6  ;;  %v11504_v16 = vrot.slane %v6740_v42, 6  ;;  %v1359_v42 = vrot.slane %v5848_v43, %v6781_v60 }
 0x125   : > { %3273 = vst [vmem:[#allocation2 + $0x40] sm:$0x3] %v11498_v57  ;;  %v6969_v28 = vld [vmem:[#allocation2 + $0x8] sm:$0xfe]  ;;  %v1066_v5 = vld [vmem:[#allocation2 + $0x58] sm:$0x3] }
 0x126   : > { %11499 = vst [vmem:[#allocation29_spill] sm:$0xff] %v6969_v28  ;;  %3274 = vst [vmem:[#allocation2 + $0x48] sm:$0x3] %v11500_v22  ;;  %v1347_v50 = vld [vmem:[#allocation2 + $0x50] sm:$0x7]  ;;  %v11505_v39 = vrot.slane %v6762_v52, 6  ;;  %v6994_v52 = vrot.slane %v5848_v43, %v6784_v61  ;;  %1684 = vrot.lane.b32.xlu0 %v6836_v4, %s6422_s19  ;;  %v7004_v28 = vmul.f32 %v1077_v20, %v1064_v17 }
 0x127   : > { %v1348_v48 = vld [vmem:[#allocation2 + $0x58] sm:$0x7]  ;;  %v6975_v37 = vld [vmem:[#allocation2 + $0x10] sm:$0xfe]  ;;  %v6979_v19 = vld [vmem:[#allocation2] sm:$0xfe]  ;;  %753 = vrot.lane.b32.xlu1 %v6935_v56, %s6420_s13 }
 0x128   : > { %11501 = vst [vmem:[#allocation30_spill] sm:$0xff] %v6975_v37  ;;  %v6977_v57 = vld [vmem:[#allocation2 + $0x18] sm:$0xfe]  ;;  %11503 = vst [vmem:[#allocation32_spill] sm:$0xff] %v6979_v19  ;;  %v1059_v47 = vld [vmem:[#allocation2] sm:$0xfc] }
 0x129   : > { %11502 = vst [vmem:[#allocation31_spill] sm:$0xff] %v6977_v57  ;;  %3275 = vst [vmem:[#allocation2 + $0x50] sm:$0x3] %v11504_v16  ;;  %v1341_v22 = vld [vmem:[#allocation2] sm:$0xf8]  ;;  %v11506_v7 = vrot.slane %v6727_v36, 6  ;;  %v1081_v16 = vrot.slane %v5845_v9, %v6784_v61  ;;  %v7002_v36 = vmul.f32 %v1355_v32, %v1345_v49  ;;  %v7020_v49 = vmul.f32 %v6994_v52, %v1347_v50 }
 0x12a   : > { %3276 = vst [vmem:[#allocation2 + $0x58] sm:$0x3] %v11505_v39  ;;  %v1060_v11 = vld [vmem:[#allocation2 + $0x8] sm:$0xfc]  ;;  %v1061_v30 = vld [vmem:[#allocation2 + $0x10] sm:$0xfc]  ;;  %v1085_v39 = vrot.slane %v5845_v9, %v6787_v62  ;;  %v1367_v9 = vrot.slane %v5848_v43, %v6787_v62  ;;  %1678 = vrot.lane.b32.xlu0 %v6834_v3, %s6422_s19  ;;  %v1090_v43 = vmul.f32 %v1073_v15, %v1059_v47 }
 0x12b   : > { %v1342_v54 = vld [vmem:[#allocation2 + $0x8] sm:$0xf8]  ;;  %3265 = vst [vmem:[#allocation2] sm:$0xfc] %v11506_v7  ;;  %v1062_v19 = vld [vmem:[#allocation2 + $0x18] sm:$0xfc]  ;;  %v7000_v7 = vmul.f32 %v1073_v15, %v1063_v44  ;;  %v7015_v4 = vmul.f32 %v1081_v16, %v1065_v8  ;;  %757 = vrot.lane.b32.xlu1 %v6807_v33, %s6420_s13  ;;  %v1376_v62 = vmul.f32 %v1355_v32, %v6804_v31 }
 0x12c   : > { %3266 = vst [vmem:[#allocation2 + $0x8] sm:$0xfc] %v11507_v29  ;;  %v1343_v57 = vld [vmem:[#allocation2 + $0x10] sm:$0xf8]  ;;  %v1344_v37 = vld [vmem:[#allocation2 + $0x18] sm:$0xf8]  ;;  %v7013_v29 = vmul.f32 %v1359_v42, %v1346_v23  ;;  %v7017_v44 = vmul.f32 %v1085_v39, %v1066_v5  ;;  %v7022_v17 = vmul.f32 %v1367_v9, %v1348_v48  ;;  %v1373_v3 = vmul.f32 %v1359_v42, %v1342_v54 }
 0x12d   : > { %11508 = vst [vmem:[#allocation33_spill] sm:$0xff] %v7000_v7  ;;  %11509 = vst [vmem:[#allocation34_spill] sm:$0xff] %v7002_v36  ;;  %v11511_v55 = vrot.slane %v6738_v41, 6  ;;  %v11512_v46 = vrot.slane %v6760_v51, 6  ;;  %v1095_v41 = vmul.f32 %v1077_v20, %v6810_v34  ;;  %v1372_v51 = vmul.f32 %v1355_v32, %v1341_v22 }
 0x12e   : > { %11510 = vst [vmem:[#allocation35_spill] sm:$0xff] %v7004_v28  ;;  %11513 = vst [vmem:[#allocation36_spill] sm:$0xff] %v7013_v29  ;;  %v1377_v23 = vmul.f32 %v1359_v42, %v6810_v34  ;;  %v1094_v5 = vmul.f32 %v1073_v15, %v6804_v31  ;;  %1690 = vrot.lane.b32.xlu0 %v6842_v10, %s6422_s19  ;;  %v1399_v8 = vrot.slane %v1373_v3, 2  ;;  %v1397_v54 = vrot.slane %v1376_v62, 2 }
 0x12f   : > { %3267 = vst [vmem:[#allocation2 + $0x10] sm:$0xfc] %v11511_v55  ;;  %3268 = vst [vmem:[#allocation2 + $0x18] sm:$0xfc] %v11512_v46  ;;  %v1091_v46 = vmul.f32 %v1077_v20, %v1060_v11  ;;  %v1114_v55 = vrot.slane %v1090_v43, 1  ;;  %v1118_v50 = vrot.slane %v1095_v41, 1  ;;  %765 = vrot.lane.b32.xlu1 %v6951_v13, %s6420_s13  ;;  %v1092_v47 = vmul.f32 %v1081_v16, %v1061_v30 }
 0x130   : > { %11514 = vst [vmem:[#allocation37_spill] sm:$0xff] %v7015_v4  ;;  %11515 = vst [vmem:[#allocation38_spill] sm:$0xff] %v7017_v44  ;;  %v1396_v60 = vrot.slane %v1372_v51, 2  ;;  %v1400_v20 = vrot.slane %v1377_v23, 2  ;;  %v1115_v11 = vrot.slane %v1094_v5, 1  ;;  %v11519_v15 = vrot.slane %v7004_v28, 1 }
 0x131   : > { %11516 = vst [vmem:[#allocation39_spill] sm:$0xff] %v7020_v49  ;;  %11517 = vst [vmem:[#allocation40_spill] sm:$0xff] %v7022_v17  ;;  %v1117_v48 = vrot.slane %v1091_v46, 1  ;;  %v1093_v42 = vmul.f32 %v1085_v39, %v1062_v19  ;;  %v1096_v41 = vmul.f32 %v1081_v16, %v6807_v33  ;;  %v11522_v51 = vrot.slane %v7013_v29, 2 }
 0x132   : > { %v7050_v32 = vsel %vm1014_vm3, %v1118_v50, %v11519_v15  ;;  %v7054_v3 = vsel %vm1296_vm1, %v1399_v8, %v1400_v20  ;;  %v7062_v62 = vsel %vm1014_vm3, %v1114_v55, %v1115_v11  ;;  %v11525_v30 = vrot.slane %v7000_v7, 1  ;;  %759 = vrot.lane.b32.xlu0 %v6953_v0, %s6420_s13 }
 0x133   : > { %v7045_v22 = vsel %vm1014_vm3, %v1117_v48, %v1118_v50  ;;  %11520 = vst [vmem:[#allocation42_spill] sm:$0xff] %v7050_v32  ;;  %11521 = vst [vmem:[#allocation43_spill] sm:$0xff] %v7054_v3  ;;  %v7059_v23 = vsel %vm1296_vm1, %v1400_v20, %v11522_v51  ;;  %v7072_v19 = vsel %vm1296_vm1, %v1396_v60, %v1397_v54  ;;  %v11528_v16 = vrot.slane %v7002_v36, 2  ;;  %v11580_v32 = vld [vmem:[#allocation23_spill] sm:$0xff]  ;;  %v11589_v36 = vld [vmem:[#allocation24_spill] sm:$0xff] }
 0x134   : > { %11518 = vst [vmem:[#allocation41_spill] sm:$0xff] %v7045_v22  ;;  %11523 = vst [vmem:[#allocation44_spill] sm:$0xff] %v7059_v23  ;;  %v7067_v5 = vsel %vm1014_vm3, %v1115_v11, %v11525_v30  ;;  %v1097_v50 = vmul.f32 %v1085_v39, %v6820_v45  ;;  %v1120_v55 = vrot.slane %v1092_v47, 1  ;;  %784 = vrot.lane.b32.xlu1 %v6804_v31, %s6421_s14  ;;  %v1121_v8 = vrot.slane %v1096_v41, 1 }
 0x135   : > { %11524 = vst [vmem:[#allocation45_spill] sm:$0xff] %v7062_v62  ;;  %11526 = vst [vmem:[#allocation46_spill] sm:$0xff] %v7067_v5  ;;  %v7077_v48 = vsel %vm1296_vm1, %v1397_v54, %v11528_v16  ;;  %v1123_v43 = vrot.slane %v1093_v42, 1  ;;  %v1374_v46 = vmul.f32 %v6994_v52, %v1343_v57  ;;  %v1375_v20 = vmul.f32 %v1367_v9, %v1344_v37 }
 0x136   : > { %11527 = vst [vmem:[#allocation47_spill] sm:$0xff] %v7072_v19  ;;  %11529 = vst [vmem:[#allocation48_spill] sm:$0xff] %v7077_v48  ;;  %v1124_v11 = vrot.slane %v1097_v50, 1  ;;  %v1378_v60 = vmul.f32 %v6994_v52, %v6807_v33  ;;  %v1379_v15 = vmul.f32 %v1367_v9, %v6820_v45  ;;  %v1949_v54 = vmul.f32 %v6827_v1, %v6931_v21 }
 0x137   : > { %v7089_v39 = vsel %vm1014_vm3, %v1120_v55, %v1121_v8  ;;  %v11531_v47 = vrot.slane %v7015_v4, 1  ;;  %v1402_v42 = vrot.slane %v1374_v46, 2  ;;  %v1405_v57 = vrot.slane %v1375_v20, 2  ;;  %786 = vrot.lane.b32.xlu0 %v6923_v18, %s6421_s14 }
 0x138   : > { %11530 = vst [vmem:[#allocation49_spill] sm:$0xff] %v7089_v39  ;;  %v7099_v37 = vsel %vm1014_vm3, %v1123_v43, %v1124_v11  ;;  %v11534_v52 = vrot.slane %v7017_v44, 1  ;;  %v1948_v21 = vmul.f32 %v6800_v25, %v6919_v38  ;;  %v1950_v9 = vmul.f32 %v6817_v40, %v6947_v63  ;;  %792 = vrot.lane.b32.xlu1 %v6935_v56, %s6421_s14 }
 0x139   : > { %v7094_v41 = vsel %vm1014_vm3, %v1121_v8, %v11531_v47  ;;  %11533 = vst [vmem:[#allocation51_spill] sm:$0xff] %v7099_v37  ;;  %v1951_v18 = vmul.f32 %v6830_v2, %v6949_v6  ;;  %v1403_v51 = vrot.slane %v1378_v60, 2  ;;  %v1406_v30 = vrot.slane %v1379_v15, 2 }
 0x13a   : > { %11532 = vst [vmem:[#allocation50_spill] sm:$0xff] %v7094_v41  ;;  %v7104_v1 = vsel %vm1014_vm3, %v1124_v11, %v11534_v52  ;;  %v1978_v16 = vrot.slane %v1949_v54, 2  ;;  %v1976_v50 = vrot.slane %v1948_v21, 2  ;;  %v1980_v55 = vrot.slane %v1950_v9, 2  ;;  %v11551_v54 = vld [vmem:[#allocation9_spill] sm:$0xff] }
 0x13b   : > { %11535 = vst [vmem:[#allocation52_spill] sm:$0xff] %v7104_v1  ;;  %v1982_v8 = vrot.slane %v1951_v18, 2  ;;  %798 = vrot.lane.b32.xlu0 %v6953_v0, %s6421_s14  ;;  %v7117_v38 = vsel %vm1296_vm1, %v1402_v42, %v1403_v51  ;;  %v7120_v25 = vsel %vm1296_vm1, %v1405_v57, %v1406_v30  ;;  %v11538_v40 = vrot.slane %v7020_v49, 2  ;;  %v5850_v49 = vld [vmem:[%s11133_s6 + $0x1] ss:$8 sm:$0xf] }
 0x13c   : > { %11536 = vst [vmem:[#allocation53_spill] sm:$0xff] %v7117_v38  ;;  %11537 = vst [vmem:[#allocation54_spill] sm:$0xff] %v7120_v25  ;;  %v11540_v2 = vrot.slane %v7022_v17, 2  ;;  %796 = vrot.lane.b32.xlu1 %v6807_v33, %s6421_s14  ;;  %v11542_v0 = vrot.slane %v6856_v27, 2  ;;  %v11544_v43 = vrot.slane %v6814_v35, 2  ;;  %v11546_v20 = vrot.slane %v6846_v12, 2 }
 0x13d   : > { %v7125_v56 = vsel %vm1296_vm1, %v1403_v51, %v11538_v40  ;;  %v11548_v60 = vrot.slane %v6873_v59, 2  ;;  %v5852_v35 = vld [vmem:[%s11132_s5 + $0x22] ss:$8 sm:$0xf]  ;;  %v11552_v42 = vlaneseq }
 0x13e   : > { %11539 = vst [vmem:[#allocation55_spill] sm:$0xff] %v7125_v56  ;;  %v7130_v63 = vsel %vm1296_vm1, %v1406_v30, %v11540_v2  ;;  %v7137_v6 = vsel %vm1296_vm1, %v11542_v0, %v1978_v16  ;;  %v7142_v46 = vsel %vm1296_vm1, %v11544_v43, %v1976_v50  ;;  %v7147_v11 = vsel %vm1296_vm1, %v11546_v20, %v1980_v55  ;;  %v819_v12 = vld [vmem:[%s11132_s5] ss:$8 sm:$0xf] }
 0x13f   : > { %11541 = vst [vmem:[#allocation56_spill] sm:$0xff] %v7130_v63  ;;  %11543 = vst [vmem:[#allocation57_spill] sm:$0xff] %v7137_v6  ;;  %v7152_v15 = vsel %vm1296_vm1, %v11548_v60, %v1982_v8  ;;  %1676 = vrot.lane.b32.xlu0 %v6851_v24, %s6422_s19  ;;  %v5842_v24 = vld [vmem:[%s11132_s5 + $0x1] ss:$8 sm:$0xf]  ;;  %v1754_v59 = vrot.slane %v5852_v35, %v6775_v58  ;;  %v1766_v47 = vrot.slane %v5852_v35, %v11551_v54 }
 0x140   : > { %11545 = vst [vmem:[#allocation58_spill] sm:$0xff] %v7142_v46  ;;  %11547 = vst [vmem:[#allocation59_spill] sm:$0xff] %v7147_v11  ;;  %804 = vrot.lane.b32.xlu1 %v6951_v13, %s6421_s14  ;;  %v5844_v27 = vld [vmem:[%s11132_s5 + $0x3] ss:$8 sm:$0xf]  ;;  %v7202_v57 = vand.u32 127, %v11552_v42  ;;  %v7208_v21 = vrot.slane %v5842_v24, %v6784_v61  ;;  %v7211_v9 = vrot.slane %v5842_v24, %v6775_v58 }
 0x141   : > { %11549 = vst [vmem:[#allocation60_spill] sm:$0xff] %v7152_v15  ;;  %v7223_v16 = vrot.slane %v5842_v24, %v11551_v54  ;;  %v7226_v50 = vrot.slane %v819_v12, %v6784_v61  ;;  %v7229_v55 = vrot.slane %v5844_v27, %v6784_v61  ;;  %v7235_v40 = vrot.slane %v819_v12, %v6775_v58  ;;  %v5843_v60 = vld [vmem:[%s11132_s5 + $0x2] ss:$8 sm:$0xf] }
 0x142   : > { %v7238_v2 = vrot.slane %v819_v12, %v11551_v54  ;;  %v7241_v0 = vrot.slane %v5844_v27, %v6775_v58  ;;  %v7244_v43 = vrot.slane %v5844_v27, %v11551_v54  ;;  %vm769_vm4 = vcmp.lt.s32.totalorder %v7202_v57, 32  ;;  %v5849_v15 = vld [vmem:[%s11132_s5 + $0x20] ss:$8 sm:$0xf] }
 0x143   : > { %745 = vrot.lane.b32.xlu0 %v6804_v31, %s6420_s13  ;;  %11553 = vst [vmem:[#allocation61_spill] sm:$0xff] %v7226_v50  ;;  %11554 = vst [vmem:[#allocation62_spill] sm:$0xff] %v7229_v55  ;;  %v11562_v46 = vld [vmem:[#allocation10_spill] sm:$0xff]  ;;  %v11564_v63 = vld [vmem:[#allocation12_spill] sm:$0xff]  ;;  %v7281_v25 = vmul.f32 %v1766_v47, %v6842_v10  ;;  %v7284_v38 = vmul.f32 %v1766_v47, %v6820_v45  ;;  %v7291_v41 = vrot.slane %v5843_v60, %v6775_v58 }
 0x144   : > { %1674 = vrot.lane.b32.xlu1 %v6804_v31, %s6422_s19  ;;  %11556 = vst [vmem:[#allocation64_spill] sm:$0xff] %v7235_v40  ;;  %11557 = vst [vmem:[#allocation65_spill] sm:$0xff] %v7244_v43  ;;  %v7272_v11 = vmul.f32 %v1754_v59, %v11562_v46  ;;  %v11566_v56 = vld [vmem:[#allocation11_spill] sm:$0xff]  ;;  %v7305_v47 = vrot.slane %v5849_v15, %v6775_v58  ;;  %v7320_v39 = vrot.slane %v5843_v60, %v6784_v61 }
 0x145   : > { %11567 = vst [vmem:[#allocation11_spill] sm:$0xff] %v7281_v25  ;;  %11568 = vst [vmem:[#allocation70_spill] sm:$0xff] %v7284_v38  ;;  %v7335_v3 = vrot.slane %v5849_v15, %v6784_v61  ;;  %v7338_v19 = vrot.slane %v5849_v15, %v11551_v54  ;;  %v7376_v28 = vmul.f32 %v7211_v9, %v11589_v36  ;;  %v5854_v25 = vld [vmem:[%s11132_s5 + $0x24] ss:$8 sm:$0xf]  ;;  %vm806_vm5 = vcmp.lt.s32.totalorder %v7202_v57, 96 }
 0x146   : > { %11563 = vst [vmem:[#allocation10_spill] sm:$0xff] %v7272_v11  ;;  %v11593_v36 = vld [vmem:[#allocation27_spill] sm:$0xff]  ;;  %vm1696_vm6 = vcmp.lt.s32.totalorder %v7202_v57, 64 }
 0x147   : > { %751 = vrot.lane.b32.xlu0 %v6810_v34, %s6420_s13  ;;  %11579 = vst [vmem:[#allocation73_spill] sm:$0xff] %v7338_v19  ;;  %11590 = vst [vmem:[#allocation24_spill] sm:$0xff] %v7376_v28  ;;  %v7393_v28 = vmul.f32 %v7223_v16, %v11593_v36  ;;  %v5859_v11 = vld [vmem:[%s11132_s5 + $0x41] ss:$8 sm:$0xf] }
 0x148   : > { %1686 = vrot.lane.b32.xlu1 %v6807_v33, %s6422_s19 }
 0x149   : > { %11594 = vst [vmem:[#allocation27_spill] sm:$0xff] %v7393_v28 }
 0x14b   : > { %763 = vrot.lane.b32.xlu0 %v6820_v45, %s6420_s13 }
 0x14c   : > { %1682 = vrot.lane.b32.xlu1 %v6880_v14, %s6422_s19  ;;  %v1762_v14 = vrot.slane %v5852_v35, %v6784_v61 }
 0x14f   : > { %790 = vrot.lane.b32.xlu0 %v6810_v34, %s6421_s14 }
 0x150   : > { %1680 = vrot.lane.b32.xlu1 %v6810_v34, %s6422_s19 }
 0x153   : > { %802 = vrot.lane.b32.xlu0 %v6820_v45, %s6421_s14 }
 0x154   : > { %1692 = vrot.lane.b32.xlu1 %v6820_v45, %s6422_s19 }
 0x157   : > { %1688 = vrot.lane.b32.xlu0 %v6884_v53, %s6422_s19  ;;  %v5847_v53 = vld [vmem:[%s11132_s5 + $0x6] ss:$8 sm:$0xf] }
 0x158   : > { %1694 = vrot.lane.b32.xlu1 %v6898_v26, %s6422_s19  ;;  %v11550_v26 = vld [vmem:[#allocation7_spill] sm:$0xff]  ;;  %v7232_v8 = vrot.slane %v5847_v53, %v6784_v61  ;;  %v7247_v20 = vrot.slane %v5847_v53, %v6775_v58  ;;  %v7266_v42 = vrot.slane %v5847_v53, %v11551_v54 }
 0x159   : > { %v1758_v13 = vrot.slane %v5852_v35, %v11550_v26  ;;  %v7205_v52 = vrot.slane %v5842_v24, %v11550_v26  ;;  %v7214_v18 = vrot.slane %v819_v12, %v11550_v26  ;;  %v7217_v51 = vrot.slane %v5844_v27, %v11550_v26  ;;  %v5846_v35 = vld [vmem:[%s11132_s5 + $0x5] ss:$8 sm:$0xf] }
 0x15a   : > { %v7220_v30 = vrot.slane %v5847_v53, %v11550_v26  ;;  %11555 = vst [vmem:[#allocation63_spill] sm:$0xff] %v7232_v8  ;;  %v7256_v12 = vmul.f32 %v1754_v59, %v6804_v31  ;;  %v7259_v24 = vmul.f32 %v1762_v14, %v6807_v33  ;;  %11561 = vst [vmem:[#allocation69_spill] sm:$0xff] %v7266_v42  ;;  %v11569_v53 = vld [vmem:[#allocation29_spill] sm:$0xff]  ;;  %v11573_v59 = vld [vmem:[#allocation31_spill] sm:$0xff] }
 0x15b   : > { %v7262_v27 = vmul.f32 %v1758_v13, %v6810_v34  ;;  %v7278_v6 = vmul.f32 %v1758_v13, %v11566_v56  ;;  %v7288_v1 = vmul.f32 %v7205_v52, %v11569_v53  ;;  %11570 = vst [vmem:[#allocation29_spill] sm:$0xff] %v7291_v41  ;;  %v7294_v46 = vrot.slane %v5846_v35, %v6775_v58  ;;  %v5851_v53 = vld [vmem:[%s11132_s5 + $0x21] ss:$8 sm:$0xf] }
 0x15c   : > { %11558 = vst [vmem:[#allocation66_spill] sm:$0xff] %v7256_v12  ;;  %11559 = vst [vmem:[#allocation67_spill] sm:$0xff] %v7259_v24  ;;  %v7275_v12 = vmul.f32 %v1762_v14, %v11564_v63  ;;  %v11572_v63 = vld [vmem:[#allocation30_spill] sm:$0xff]  ;;  %v7300_v10 = vmul.f32 %v7223_v16, %v11573_v59  ;;  %v11574_v14 = vld [vmem:[#allocation32_spill] sm:$0xff]  ;;  %v7311_v37 = vrot.slane %v5843_v60, %v11550_v26 }
 0x15d   : > { %11560 = vst [vmem:[#allocation68_spill] sm:$0xff] %v7262_v27  ;;  %11571 = vst [vmem:[#allocation71_spill] sm:$0xff] %v7294_v46  ;;  %v898_v56 = vmul.f32 %v7208_v21, %v11572_v63  ;;  %v896_v13 = vmul.f32 %v7211_v9, %v11574_v14  ;;  %v7314_v63 = vrot.slane %v5846_v35, %v11550_v26  ;;  %v5853_v14 = vld [vmem:[%s11132_s5 + $0x23] ss:$8 sm:$0xf] }
 0x15e   : > { %11565 = vst [vmem:[#allocation12_spill] sm:$0xff] %v7275_v12  ;;  %v7317_v59 = vrot.slane %v5849_v15, %v11550_v26  ;;  %11575 = vst [vmem:[#allocation30_spill] sm:$0xff] %v7320_v39  ;;  %v7326_v27 = vrot.slane %v5843_v60, %v11551_v54  ;;  %v7329_v23 = vrot.slane %v5846_v35, %v6784_v61  ;;  %v5856_v12 = vld [vmem:[%s11132_s5 + $0x26] ss:$8 sm:$0xf] }
 0x15f   : > { %v7332_v48 = vrot.slane %v5846_v35, %v11551_v54  ;;  %v7342_v5 = vmul.f32 %v7205_v52, %v11580_v32  ;;  %v7345_v62 = vrot.slane %v5851_v53, %v11550_v26  ;;  %v7348_v60 = vrot.slane %v5851_v53, %v6784_v61  ;;  %v1531_v32 = vld [vmem:[%s11133_s6] ss:$8 sm:$0xf] }
 0x160   : > { %11576 = vst [vmem:[#allocation31_spill] sm:$0xff] %v7326_v27  ;;  %11577 = vst [vmem:[#allocation32_spill] sm:$0xff] %v7329_v23  ;;  %v7351_v22 = vrot.slane %v5853_v14, %v6775_v58  ;;  %v7354_v35 = vrot.slane %v5853_v14, %v11550_v26  ;;  %v7357_v17 = vrot.slane %v5851_v53, %v6775_v58 }
 0x161   : > { %11578 = vst [vmem:[#allocation72_spill] sm:$0xff] %v7332_v48  ;;  %11581 = vst [vmem:[#allocation23_spill] sm:$0xff] %v7345_v62  ;;  %v7360_v15 = vrot.slane %v5851_v53, %v11551_v54  ;;  %v7369_v44 = vrot.slane %v5853_v14, %v6784_v61  ;;  %v7372_v4 = vrot.slane %v5853_v14, %v11551_v54  ;;  %v11591_v53 = vld [vmem:[#allocation26_spill] sm:$0xff] }
 0x162   : > { %11582 = vst [vmem:[#allocation74_spill] sm:$0xff] %v7348_v60  ;;  %11583 = vst [vmem:[#allocation75_spill] sm:$0xff] %v7351_v22  ;;  %v7380_v7 = vmul.f32 %v7208_v21, %v11591_v53  ;;  %v7397_v53 = vmul.f32 %v7205_v52, %v6810_v34  ;;  %v7411_v36 = vrot.slane %v1531_v32, %v6775_v58 }
 0x163   : > { %11584 = vst [vmem:[#allocation76_spill] sm:$0xff] %v7354_v35  ;;  %11585 = vst [vmem:[#allocation77_spill] sm:$0xff] %v7357_v17  ;;  %v7415_v34 = vmul.f32 %v7223_v16, %v6820_v45 }
 0x164   : > { %11586 = vst [vmem:[#allocation78_spill] sm:$0xff] %v7360_v15  ;;  %11587 = vst [vmem:[#allocation79_spill] sm:$0xff] %v7369_v44  ;;  %v5857_v44 = vld [vmem:[%s11132_s5 + $0x27] ss:$8 sm:$0xf] }
 0x165   : > { %11588 = vst [vmem:[#allocation80_spill] sm:$0xff] %v7372_v4  ;;  %11592 = vst [vmem:[#allocation26_spill] sm:$0xff] %v7380_v7  ;;  %v7401_v7 = vmul.f32 %v7208_v21, %v6807_v33  ;;  %v7419_v33 = vmul.f32 %v7211_v9, %v6804_v31  ;;  %v7424_v21 = vrot.slane %v5850_v49, %v6775_v58 }
 0x166   : > { %11595 = vst [vmem:[#allocation81_spill] sm:$0xff] %v7397_v53  ;;  %11597 = vst [vmem:[#allocation83_spill] sm:$0xff] %v7411_v36  ;;  %v7427_v53 = vrot.slane %v5854_v25, %v11550_v26  ;;  %v7438_v31 = vrot.slane %v5857_v44, %v11550_v26  ;;  %v7441_v9 = vrot.slane %v5859_v11, %v6775_v58 }
 0x167   : > { %11596 = vst [vmem:[#allocation82_spill] sm:$0xff] %v7401_v7  ;;  %11598 = vst [vmem:[#allocation84_spill] sm:$0xff] %v7415_v34  ;;  %v7430_v7 = vrot.slane %v5856_v12, %v6775_v58 }
 0x168   : > { %11599 = vst [vmem:[#allocation85_spill] sm:$0xff] %v7419_v33  ;;  %11600 = vst [vmem:[#allocation86_spill] sm:$0xff] %v7424_v21  ;;  %v7444_v33 = vrot.slane %v1531_v32, %v11550_v26  ;;  %v7447_v21 = vrot.slane %v5850_v49, %v11550_v26 }
 0x169   : > { %11601 = vst [vmem:[#allocation87_spill] sm:$0xff] %v7427_v53  ;;  %11602 = vst [vmem:[#allocation88_spill] sm:$0xff] %v7430_v7 }
 0x16a   : > { %11603 = vst [vmem:[#allocation89_spill] sm:$0xff] %v7438_v31  ;;  %11604 = vst [vmem:[#allocation90_spill] sm:$0xff] %v7441_v9  ;;  %v7461_v9 = vrot.slane %v5850_v49, %v11551_v54 }
 0x16b   : > { %11605 = vst [vmem:[#allocation91_spill] sm:$0xff] %v7444_v33  ;;  %11606 = vst [vmem:[#allocation92_spill] sm:$0xff] %v7447_v21  ;;  %v7466_v21 = vrot.slane %v5854_v25, %v6784_v61 }
 0x16c   : > { %11610 = vst [vmem:[#allocation96_spill] sm:$0xff] %v7461_v9 }
 0x16d   : > { %11611 = vst [vmem:[#allocation97_spill] sm:$0xff] %v7466_v21 }
 0x184   : > { %v744_v38 = vpop.permute.xlu0 %743 }
 0x185   : > { %v750_v24 = vpop.permute.xlu1 %749 }
 0x186   : > { %v776_v28 = vsel %vm769_vm4, %v744_v38, %v750_v24 }
 0x187   : > { %v7491_v9 = vmul.f32 %v7220_v30, %v776_v28 }
 0x188   : > { %v756_v29 = vpop.permute.xlu0 %755 }
 0x189   : > { %v773_v14 = vsel %vm769_vm4, %v750_v24, %v756_v29  ;;  %v762_v4 = vpop.permute.xlu1 %761  ;;  %v7475_v24 = vrot.slane %v5859_v11, %v11550_v26 }
 0x18a   : > { %v843_v15 = vmul.f32 %v7226_v50, %v773_v14  ;;  %v779_v52 = vsel %vm769_vm4, %v762_v4, %v744_v38  ;;  %v770_v33 = vsel %vm769_vm4, %v756_v29, %v762_v4  ;;  %v7484_v4 = vrot.slane %v5856_v12, %v6784_v61 }
 0x18b   : > { %v841_v45 = vmul.f32 %v7235_v40, %v779_v52  ;;  %v7458_v40 = vrot.slane %v5850_v49, %v6784_v61  ;;  %11614 = vst [vmem:[#allocation100_spill] sm:$0xff] %v7475_v24  ;;  %v7481_v49 = vrot.slane %v5854_v25, %v11551_v54  ;;  %v842_v29 = vmul.f32 %v7214_v18, %v776_v28 }
 0x18c   : > { %v7432_v36 = vadd.f32 %v898_v56, %v843_v15  ;;  %v7435_v16 = vpop.permute.xlu0 %782  ;;  %v7450_v56 = vrot.slane %v1531_v32, %v6784_v61  ;;  %v7453_v15 = vrot.slane %v1531_v32, %v11551_v54  ;;  %v7472_v32 = vrot.slane %v5857_v44, %v6784_v61  ;;  %11617 = vst [vmem:[#allocation103_spill] sm:$0xff] %v7484_v4 }
 0x18d   : > { %v789_v34 = vpop.permute.xlu1 %788  ;;  %v908_v50 = vadd.f32 %v896_v13, %v841_v45  ;;  %11609 = vst [vmem:[#allocation95_spill] sm:$0xff] %v7458_v40  ;;  %v7478_v13 = vrot.slane %v5854_v25, %v6775_v58  ;;  %11616 = vst [vmem:[#allocation102_spill] sm:$0xff] %v7481_v49  ;;  %v7488_v45 = vmul.f32 %v7217_v51, %v776_v28  ;;  %v5860_v49 = vld [vmem:[%s11133_s6 + $0x2] ss:$8 sm:$0xf] }
 0x18e   : > { %11607 = vst [vmem:[#allocation93_spill] sm:$0xff] %v7450_v56  ;;  %11608 = vst [vmem:[#allocation94_spill] sm:$0xff] %v7453_v15  ;;  %v7469_v56 = vrot.slane %v5856_v12, %v11550_v26  ;;  %v7494_v15 = vrot.slane %v5856_v12, %v11551_v54  ;;  %v7500_v25 = vmul.f32 %v7232_v8, %v773_v14 }
 0x18f   : > { %11613 = vst [vmem:[#allocation99_spill] sm:$0xff] %v7472_v32  ;;  %11615 = vst [vmem:[#allocation101_spill] sm:$0xff] %v7478_v13  ;;  %v7497_v13 = vmul.f32 %v7229_v55, %v773_v14  ;;  %v844_v4 = vmul.f32 %v7238_v2, %v770_v33  ;;  %v7507_v24 = vrot.slane %v5857_v44, %v6775_v58 }
 0x190   : > { %11612 = vst [vmem:[#allocation98_spill] sm:$0xff] %v7469_v56  ;;  %v795_v38 = vpop.permute.xlu0 %794  ;;  %11618 = vst [vmem:[#allocation104_spill] sm:$0xff] %v7494_v15  ;;  %v7510_v28 = vmul.f32 %v7244_v43, %v770_v33  ;;  %v7514_v12 = vrot.slane %v5857_v44, %v11551_v54  ;;  %v7517_v14 = vrot.slane %v5859_v11, %v6784_v61 }
 0x191   : > { %v801_v40 = vpop.permute.xlu1 %800  ;;  %11619 = vst [vmem:[#allocation105_spill] sm:$0xff] %v7500_v25  ;;  %11620 = vst [vmem:[#allocation106_spill] sm:$0xff] %v7507_v24  ;;  %v7520_v15 = vrot.slane %v5859_v11, %v11551_v54  ;;  %v7523_v32 = vmul.f32 %v7241_v0, %v779_v52  ;;  %v7526_v56 = vmul.f32 %v7247_v20, %v779_v52 }
 0x192   : > { %11621 = vst [vmem:[#allocation107_spill] sm:$0xff] %v7510_v28  ;;  %11622 = vst [vmem:[#allocation108_spill] sm:$0xff] %v7514_v12  ;;  %v7529_v24 = vmul.f32 %v7266_v42, %v770_v33  ;;  %v813_v44 = vsel %vm806_vm5, %v7435_v16, %v789_v34  ;;  %v909_v8 = vadd.f32 %v7288_v1, %v842_v29 }
 0x193   : > { %11623 = vst [vmem:[#allocation109_spill] sm:$0xff] %v7517_v14  ;;  %11624 = vst [vmem:[#allocation110_spill] sm:$0xff] %v7520_v15  ;;  %v7540_v43 = vrot.slane %v5860_v49, %v11550_v26  ;;  %v911_v42 = vadd.f32 %v7300_v10, %v844_v4  ;;  %v810_v55 = vsel %vm806_vm5, %v789_v34, %v795_v38  ;;  %v5861_v34 = vld [vmem:[%s11133_s6 + $0x3] ss:$8 sm:$0xf] }
 0x194   : > { %11625 = vst [vmem:[#allocation111_spill] sm:$0xff] %v7523_v32  ;;  %11626 = vst [vmem:[#allocation112_spill] sm:$0xff] %v7526_v56  ;;  %v1673_v12 = vpop.permute.xlu0 %1672  ;;  %v943_v29 = vmul.f32 %v7291_v41, %v813_v44  ;;  %v7550_v11 = vmul.f32 %v7294_v46, %v813_v44  ;;  %v807_v14 = vsel %vm806_vm5, %v795_v38, %v801_v40 }
 0x195   : > { %11627 = vst [vmem:[#allocation113_spill] sm:$0xff] %v7529_v24  ;;  %v7537_v15 = vpop.permute.xlu1 %747  ;;  %11628 = vst [vmem:[#allocation114_spill] sm:$0xff] %v7540_v43  ;;  %v7561_v4 = vrot.slane %v5860_v49, %v6775_v58  ;;  %v7564_v1 = vmul.f32 %v7305_v47, %v813_v44  ;;  %v944_v43 = vmul.f32 %v7311_v37, %v810_v55 }
 0x196   : > { %11629 = vst [vmem:[#allocation115_spill] sm:$0xff] %v7550_v11  ;;  %v816_v38 = vsel %vm806_vm5, %v801_v40, %v7435_v16  ;;  %v7573_v33 = vrot.slane %v5860_v49, %v6784_v61  ;;  %v7576_v26 = vmul.f32 %v7314_v63, %v810_v55  ;;  %v7579_v24 = vmul.f32 %v7317_v59, %v810_v55 }
 0x197   : > { %11630 = vst [vmem:[#allocation116_spill] sm:$0xff] %v7561_v4  ;;  %11631 = vst [vmem:[#allocation117_spill] sm:$0xff] %v7564_v1  ;;  %v945_v44 = vmul.f32 %v7320_v39, %v807_v14  ;;  %v7583_v4 = vrot.slane %v5860_v49, %v11551_v54  ;;  %v7585_v56 = vadd.f32 %v943_v29, %v908_v50 }
 0x198   : > { %v1685_v10 = vpop.permute.xlu0 %1684  ;;  %11632 = vst [vmem:[#allocation118_spill] sm:$0xff] %v7573_v33  ;;  %11633 = vst [vmem:[#allocation119_spill] sm:$0xff] %v7576_v26  ;;  %v7589_v16 = vrot.slane %v5861_v34, %v6775_v58  ;;  %v7592_v33 = vrot.slane %v5861_v34, %v6784_v61  ;;  %v946_v28 = vmul.f32 %v7326_v27, %v816_v38  ;;  %v11658_v26 = vld [vmem:[#allocation64_spill] sm:$0xff] }
 0x199   : > { %v7570_v52 = vpop.permute.xlu1 %753  ;;  %11634 = vst [vmem:[#allocation120_spill] sm:$0xff] %v7579_v24  ;;  %11635 = vst [vmem:[#allocation121_spill] sm:$0xff] %v7583_v4  ;;  %v7596_v55 = vmul.f32 %v7329_v23, %v807_v14  ;;  %v7599_v25 = vmul.f32 %v7332_v48, %v816_v38  ;;  %v7606_v40 = vadd.f32 %v944_v43, %v909_v8  ;;  %v11650_v24 = vld [vmem:[#allocation79_spill] sm:$0xff] }
 0x19a   : > { %11636 = vst [vmem:[#allocation122_spill] sm:$0xff] %v7585_v56  ;;  %11637 = vst [vmem:[#allocation123_spill] sm:$0xff] %v7589_v16  ;;  %v778_v50 = vsel %vm769_vm4, %v7537_v15, %v7570_v52  ;;  %v7609_v34 = vmul.f32 %v7335_v3, %v807_v14  ;;  %v7612_v61 = vmul.f32 %v7338_v19, %v816_v38 }
 0x19b   : > { %11638 = vst [vmem:[#allocation124_spill] sm:$0xff] %v7592_v33  ;;  %11639 = vst [vmem:[#allocation125_spill] sm:$0xff] %v7596_v55  ;;  %v7619_v16 = vadd.f32 %v945_v44, %v7432_v36  ;;  %v850_v8 = vmul.f32 %v7214_v18, %v778_v50  ;;  %v7625_v43 = vmul.f32 %v7217_v51, %v778_v50 }
 0x19c   : > { %11640 = vst [vmem:[#allocation126_spill] sm:$0xff] %v7599_v25  ;;  %v1679_v49 = vpop.permute.xlu0 %1678  ;;  %11641 = vst [vmem:[#allocation127_spill] sm:$0xff] %v7609_v34  ;;  %v7628_v14 = vmul.f32 %v7220_v30, %v778_v50  ;;  %v7634_v54 = vadd.f32 %v946_v28, %v911_v42  ;;  %v11648_v34 = vld [vmem:[#allocation78_spill] sm:$0xff] }
 0x19d   : > { %11642 = vst [vmem:[#allocation128_spill] sm:$0xff] %v7612_v61  ;;  %v7614_v58 = vpop.permute.xlu1 %757  ;;  %v1703_v29 = vsel %vm1696_vm6, %v1673_v12, %v1679_v49  ;;  %11643 = vst [vmem:[#allocation129_spill] sm:$0xff] %v7625_v43  ;;  %v7632_v38 = vsel %vm1696_vm6, %v1679_v49, %v1685_v10 }
 0x19e   : > { %11644 = vst [vmem:[#allocation130_spill] sm:$0xff] %v7634_v54  ;;  %v1733_v4 = vmul.f32 %v7345_v62, %v1703_v29  ;;  %v1734_v28 = vmul.f32 %v7348_v60, %v7632_v38  ;;  %v7654_v36 = vmul.f32 %v7427_v53, %v1703_v29  ;;  %v7658_v1 = vmul.f32 %v7466_v21, %v7632_v38  ;;  %v11655_v62 = vld [vmem:[#allocation90_spill] sm:$0xff] }
 0x1a0   : > { %v1691_v33 = vpop.permute.xlu0 %1690  ;;  %11646 = vst [vmem:[#allocation132_spill] sm:$0xff] %v7654_v36  ;;  %11647 = vst [vmem:[#allocation133_spill] sm:$0xff] %v7658_v1  ;;  %v1780_v61 = vadd.f32 %v7278_v6, %v1733_v4  ;;  %v7681_v6 = vmul.f32 %v7438_v31, %v1703_v29  ;;  %v11654_v4 = vld [vmem:[#allocation12_spill] sm:$0xff] }
 0x1a1   : > { %v7643_v50 = vsel %vm1696_vm6, %v1685_v10, %v1691_v33  ;;  %v7647_v49 = vsel %vm1696_vm6, %v1691_v33, %v1673_v12  ;;  %v766_v42 = vpop.permute.xlu1 %765  ;;  %v917_v10 = vadd.f32 %v7342_v5, %v850_v8  ;;  %v1811_v33 = vmul.f32 %v7354_v35, %v7632_v38  ;;  %v11649_v5 = vld [vmem:[#allocation10_spill] sm:$0xff] }
 0x1a2   : > { %11645 = vst [vmem:[#allocation131_spill] sm:$0xff] %v7647_v49  ;;  %v1732_v44 = vmul.f32 %v7357_v17, %v7647_v49  ;;  %v1810_v17 = vmul.f32 %v7351_v22, %v1703_v29  ;;  %v1735_v25 = vmul.f32 %v11648_v34, %v7643_v50  ;;  %v781_v21 = vsel %vm769_vm4, %v766_v42, %v7537_v15 }
 0x1a3   : > { %v1812_v12 = vmul.f32 %v11650_v24, %v7643_v50  ;;  %v7678_v35 = vmul.f32 %v7430_v7, %v1703_v29  ;;  %11653 = vst [vmem:[#allocation135_spill] sm:$0xff] %v7681_v6  ;;  %v1781_v34 = vadd.f32 %v11654_v4, %v1734_v28  ;;  %v7686_v15 = vmul.f32 %v11655_v62, %v1703_v29  ;;  %v11660_v4 = vld [vmem:[#allocation11_spill] sm:$0xff] }
 0x1a4   : > { %v760_v55 = vpop.permute.xlu0 %759  ;;  %v1779_v8 = vadd.f32 %v11649_v5, %v1732_v44  ;;  %v11657_v5 = vld [vmem:[#allocation80_spill] sm:$0xff]  ;;  %v849_v11 = vmul.f32 %v11658_v26, %v781_v21  ;;  %v7697_v28 = vadd.f32 %v1811_v33, %v1780_v61  ;;  %v1782_v22 = vadd.f32 %v11660_v4, %v1735_v25  ;;  %v11665_v61 = vld [vmem:[#allocation61_spill] sm:$0xff]  ;;  %v11666_v33 = vld [vmem:[#allocation62_spill] sm:$0xff] }
 0x1a5   : > { %11652 = vst [vmem:[#allocation134_spill] sm:$0xff] %v7678_v35  ;;  %11656 = vst [vmem:[#allocation12_spill] sm:$0xff] %v7686_v15  ;;  %v1813_v24 = vmul.f32 %v11657_v5, %v7647_v49  ;;  %v772_v7 = vsel %vm769_vm4, %v760_v55, %v766_v42  ;;  %v775_v31 = vsel %vm769_vm4, %v7570_v52, %v760_v55  ;;  %v11673_v35 = vld [vmem:[#allocation69_spill] sm:$0xff]  ;;  %v11679_v6 = vld [vmem:[#allocation27_spill] sm:$0xff] }
 0x1a6   : > { %v7675_v60 = vpop.permute.xlu1 %784  ;;  %11659 = vst [vmem:[#allocation64_spill] sm:$0xff] %v7697_v28  ;;  %v7701_v29 = vmul.f32 %v7241_v0, %v781_v21  ;;  %v7704_v44 = vmul.f32 %v7247_v20, %v781_v21  ;;  %v7706_v1 = vadd.f32 %v1810_v17, %v1779_v8  ;;  %v7708_v36 = vadd.f32 %v1812_v12, %v1781_v34  ;;  %v11668_v28 = vld [vmem:[#allocation24_spill] sm:$0xff]  ;;  %v11669_v8 = vld [vmem:[#allocation65_spill] sm:$0xff]  ;;  %v11671_v12 = vld [vmem:[#allocation63_spill] sm:$0xff] }
 0x1a7   : > { %11651 = vst [vmem:[#allocation10_spill] sm:$0xff] %v7675_v60  ;;  %v851_v55 = vmul.f32 %v11665_v61, %v775_v31  ;;  %v852_v25 = vmul.f32 %v7238_v2, %v772_v7  ;;  %v7715_v4 = vmul.f32 %v11666_v33, %v775_v31  ;;  %v916_v17 = vadd.f32 %v11668_v28, %v849_v11 }
 0x1a8   : > { %11661 = vst [vmem:[#allocation11_spill] sm:$0xff] %v7701_v29  ;;  %11662 = vst [vmem:[#allocation136_spill] sm:$0xff] %v7704_v44  ;;  %v7721_v34 = vmul.f32 %v11669_v8, %v772_v7  ;;  %v7727_v62 = vadd.f32 %v1813_v24, %v1782_v22  ;;  %v7732_v54 = vmul.f32 %v11673_v35, %v772_v7  ;;  %v11676_v22 = vld [vmem:[#allocation98_spill] sm:$0xff] }
 0x1a9   : > { %v787_v5 = vpop.permute.xlu0 %786  ;;  %11663 = vst [vmem:[#allocation137_spill] sm:$0xff] %v7706_v1  ;;  %11664 = vst [vmem:[#allocation138_spill] sm:$0xff] %v7708_v36  ;;  %v7724_v1 = vmul.f32 %v11671_v12, %v775_v31  ;;  %v7743_v24 = vmul.f32 %v11676_v22, %v7632_v38  ;;  %v11678_v36 = vld [vmem:[#allocation26_spill] sm:$0xff] }
 0x1aa   : > { %v793_v42 = vpop.permute.xlu1 %792  ;;  %11667 = vst [vmem:[#allocation61_spill] sm:$0xff] %v7715_v4  ;;  %11670 = vst [vmem:[#allocation62_spill] sm:$0xff] %v7721_v34 }
 0x1ab   : > { %v815_v21 = vsel %vm806_vm5, %v787_v5, %v793_v42  ;;  %11672 = vst [vmem:[#allocation24_spill] sm:$0xff] %v7727_v62  ;;  %11677 = vst [vmem:[#allocation69_spill] sm:$0xff] %v7743_v24  ;;  %v918_v62 = vadd.f32 %v11678_v36, %v851_v55 }
 0x1ac   : > { %v951_v52 = vmul.f32 %v7291_v41, %v815_v21  ;;  %v7735_v11 = vmul.f32 %v7294_v46, %v815_v21  ;;  %v919_v41 = vadd.f32 %v11679_v6, %v852_v25  ;;  %v7756_v32 = vmul.f32 %v7305_v47, %v815_v21  ;;  %v11682_v25 = vld [vmem:[#allocation33_spill] sm:$0xff] }
 0x1ad   : > { %v799_v53 = vpop.permute.xlu0 %798  ;;  %v11686_v21 = vrot.slane %v7625_v43, 1 }
 0x1ae   : > { %v963_v60 = vadd.f32 %v951_v52, %v916_v17  ;;  %11674 = vst [vmem:[#allocation65_spill] sm:$0xff] %v7735_v11  ;;  %v812_v31 = vsel %vm806_vm5, %v793_v42, %v799_v53  ;;  %v7739_v28 = vpop.permute.xlu1 %796  ;;  %v11680_v42 = vrot.slane %v7701_v29, 1  ;;  %v11683_v17 = vrot.slane %v11682_v25, 1 }
 0x1af   : > { %11675 = vst [vmem:[#allocation63_spill] sm:$0xff] %v7739_v28  ;;  %v952_v52 = vmul.f32 %v7311_v37, %v812_v31  ;;  %v7759_v6 = vmul.f32 %v7314_v63, %v812_v31  ;;  %v11256_v46 = vrot.slane %v7735_v11, 1 }
 0x1b0   : > { %v1055_v56 = vadd.f32 %v11680_v42, %v963_v60  ;;  %v11684_v42 = vld [vmem:[#allocation99_spill] sm:$0xff] }
 0x1b1   : > { %v964_v36 = vadd.f32 %v952_v52, %v917_v10  ;;  %v7761_v55 = vpop.permute.xlu0 %1676  ;;  %v7769_v28 = vmul.f32 %v11684_v42, %v7632_v38  ;;  %v11689_v42 = vld [vmem:[#allocation101_spill] sm:$0xff] }
 0x1b2   : > { %11681 = vst [vmem:[#allocation26_spill] sm:$0xff] %v7761_v55  ;;  %v1154_v7 = vadd.f32 %v11683_v17, %v1055_v56  ;;  %v805_v29 = vpop.permute.xlu1 %804  ;;  %v11687_v56 = vld [vmem:[#allocation100_spill] sm:$0xff] }
 0x1b3   : > { %11685 = vst [vmem:[#allocation27_spill] sm:$0xff] %v7769_v28  ;;  %v1056_v10 = vadd.f32 %v11686_v21, %v964_v36  ;;  %v809_v52 = vsel %vm806_vm5, %v799_v53, %v805_v29  ;;  %v818_v22 = vsel %vm806_vm5, %v805_v29, %v787_v5  ;;  %v7779_v17 = vmul.f32 %v11687_v56, %v7632_v38  ;;  %v11691_v21 = vld [vmem:[#allocation35_spill] sm:$0xff]  ;;  %v11706_v28 = vld [vmem:[#allocation38_spill] sm:$0xff] }
 0x1b4   : > { %v1245_v25 = vadd.f32 %v11256_v46, %v1154_v7  ;;  %v953_v60 = vmul.f32 %v7320_v39, %v809_v52  ;;  %v954_v24 = vmul.f32 %v7326_v27, %v818_v22  ;;  %v7787_v36 = vmul.f32 %v11689_v42, %v7647_v49  ;;  %v11696_v42 = vld [vmem:[#allocation102_spill] sm:$0xff] }
 0x1b5   : > { %11688 = vst [vmem:[#allocation33_spill] sm:$0xff] %v7779_v17  ;;  %v11692_v53 = vrot.slane %v11691_v21, 1  ;;  %v11264_v5 = vrot.slane %v7759_v6, 1  ;;  %v7793_v29 = vmul.f32 %v7329_v23, %v809_v52  ;;  %v7796_v38 = vmul.f32 %v7332_v48, %v818_v22  ;;  %v7798_v7 = vpop.permute.xlu0 %745  ;;  %v11698_v23 = vld [vmem:[#allocation34_spill] sm:$0xff] }
 0x1b6   : > { %11690 = vst [vmem:[#allocation139_spill] sm:$0xff] %v7787_v36  ;;  %v11695_v46 = vrot.slane %v7704_v44, 2  ;;  %v965_v27 = vadd.f32 %v953_v60, %v918_v62  ;;  %v966_v39 = vadd.f32 %v954_v24, %v919_v41  ;;  %v7804_v11 = vmul.f32 %v11696_v42, %v7643_v50  ;;  %v11727_v36 = vld [vmem:[#allocation40_spill] sm:$0xff] }
 0x1b7   : > { %v1155_v15 = vadd.f32 %v11692_v53, %v1056_v10  ;;  %11693 = vst [vmem:[#allocation35_spill] sm:$0xff] %v7793_v29  ;;  %11694 = vst [vmem:[#allocation140_spill] sm:$0xff] %v7796_v38  ;;  %v7810_v53 = vmul.f32 %v7317_v59, %v812_v31  ;;  %v11699_v43 = vrot.slane %v11698_v23, 2  ;;  %v11700_v62 = vrot.slane %v7715_v4, 1  ;;  %v11737_v4 = vld [vmem:[#allocation94_spill] sm:$0xff] }
 0x1b8   : > { %v1337_v56 = vadd.f32 %v11695_v46, %v1245_v25  ;;  %11697 = vst [vmem:[#allocation141_spill] sm:$0xff] %v7804_v11  ;;  %v11701_v46 = vrot.slane %v7721_v34, 1  ;;  %v11702_v25 = vrot.slane %v7628_v14, 2  ;;  %v11703_v23 = vrot.slane %v7756_v32, 2 }
 0x1b9   : > { %v1246_v21 = vadd.f32 %v11264_v5, %v1155_v15  ;;  %v1057_v41 = vadd.f32 %v11700_v62, %v965_v27  ;;  %v752_v5 = vpop.permute.xlu0 %751  ;;  %v11267_v31 = vrot.slane %v7810_v53, 2  ;;  %v7838_v48 = vmul.f32 %v7335_v3, %v809_v52 }
 0x1ba   : > { %v1436_v44 = vadd.f32 %v11699_v43, %v1337_v56  ;;  %v1058_v24 = vadd.f32 %v11701_v46, %v966_v39  ;;  %v11704_v56 = vld [vmem:[#allocation37_spill] sm:$0xff]  ;;  %v11707_v39 = vrot.slane %v11706_v28, 1  ;;  %v11713_v28 = vrot.slane %v7796_v38, 1 }
 0x1bb   : > { %v1338_v10 = vadd.f32 %v11702_v25, %v1246_v21  ;;  %v11705_v27 = vrot.slane %v11704_v56, 1  ;;  %v774_v21 = vsel %vm769_vm4, %v752_v5, %v7614_v58  ;;  %v11708_v25 = vld [vmem:[#allocation36_spill] sm:$0xff]  ;;  %11710 = vst [vmem:[#allocation34_spill] sm:$0xff] %v7838_v48  ;;  %v7848_v56 = vmul.f32 %v7338_v19, %v818_v22 }
 0x1bc   : > { %v1527_v43 = vadd.f32 %v11703_v23, %v1436_v44  ;;  %v1157_v46 = vadd.f32 %v11707_v39, %v1058_v24  ;;  %v11709_v60 = vrot.slane %v11708_v25, 2  ;;  %v7841_v44 = vmul.f32 %v11666_v33, %v774_v21  ;;  %v11717_v39 = vld [vmem:[#allocation83_spill] sm:$0xff] }
 0x1bd   : > { %v1156_v62 = vadd.f32 %v11705_v27, %v1057_v41  ;;  %v11712_v41 = vrot.slane %v7793_v29, 1  ;;  %11714 = vst [vmem:[#allocation38_spill] sm:$0xff] %v7848_v56  ;;  %v11715_v27 = vld [vmem:[#allocation103_spill] sm:$0xff]  ;;  %v11718_v22 = vrot.slane %v7724_v1, 2  ;;  %v11279_v33 = vrot.slane %v7848_v56, 2 }
 0x1be   : > { %v1437_v15 = vadd.f32 %v11709_v60, %v1338_v10  ;;  %11711 = vst [vmem:[#allocation37_spill] sm:$0xff] %v7841_v44  ;;  %v1248_v24 = vadd.f32 %v11713_v28, %v1157_v46  ;;  %v777_v10 = vsel %vm769_vm4, %v7798_v7, %v752_v5  ;;  %v1563_v46 = vmul.f32 %v11717_v39, %v1527_v43  ;;  %v11720_v5 = vld [vmem:[#allocation104_spill] sm:$0xff]  ;;  %v7872_v60 = vpop.permute.xlu1 %1674 }
 0x1bf   : > { %v1247_v23 = vadd.f32 %v11712_v41, %v1156_v62  ;;  %v7859_v62 = vmul.f32 %v11715_v27, %v7643_v50  ;;  %v11719_v41 = vrot.slane %v7732_v54, 2  ;;  %v7868_v17 = vmul.f32 %v11720_v5, %v7647_v49 }
 0x1c0   : > { %v1528_v52 = vadd.f32 %v11267_v31, %v1437_v15  ;;  %v11722_v15 = vld [vmem:[#allocation91_spill] sm:$0xff]  ;;  %v7875_v27 = vmul.f32 %v7217_v51, %v777_v10  ;;  %v11723_v43 = vrot.slane %v7841_v44, 1  ;;  %v7894_v51 = vld [vmem:[#allocation2] sm:$0xff]  ;;  %v846_v29 = vmul.f32 %v7214_v18, %v777_v10 }
 0x1c1   : > { %11716 = vst [vmem:[#allocation36_spill] sm:$0xff] %v7859_v62  ;;  %v1339_v25 = vadd.f32 %v11718_v22, %v1247_v23  ;;  %v1340_v28 = vadd.f32 %v11719_v41, %v1248_v24  ;;  %11721 = vst [vmem:[#allocation83_spill] sm:$0xff] %v7868_v17  ;;  %v11724_v23 = vrot.slane %v7497_v13, 1  ;;  %v7882_v24 = vld [vmem:[#allocation2 + $0x8] sm:$0xff]  ;;  %v11725_v41 = vld [vmem:[#allocation39_spill] sm:$0xff]  ;;  %v847_v13 = vmul.f32 %v11665_v61, %v774_v21 }
 0x1c2   : > { %v1564_v31 = vmul.f32 %v11722_v15, %v1528_v52  ;;  %v11726_v5 = vrot.slane %v11725_v41, 2  ;;  %v11728_v52 = vrot.slane %v11727_v36, 2  ;;  %3295 = vrot.lane.b32.xlu1 %v7882_v24, %s6420_s13  ;;  %v11731_v36 = vld [vmem:[#allocation108_spill] sm:$0xff]  ;;  %3289 = vrot.lane.b32.xlu0 %v7894_v51, %s6420_s13  ;;  %v11734_v61 = vrot.slane %v7838_v48, 2  ;;  %v7916_v62 = vld [vmem:[#allocation2 + $0x10] sm:$0xff]  ;;  %v11736_v44 = vld [vmem:[#allocation93_spill] sm:$0xff]  ;;  %v7932_v18 = vpop.permute.xlu1 %1686 }
 0x1c3   : > { %v1023_v22 = vsel %vm1014_vm3, %v11724_v23, %v11723_v43  ;;  %v764_v43 = vpop.permute.xlu0 %763  ;;  %v11281_v19 = vrot.slane %v7875_v27, 1  ;;  %v1278_v34 = vmul.f32 %v11671_v12, %v774_v21  ;;  %v11738_v21 = vld [vmem:[#allocation109_spill] sm:$0xff] }
 0x1c4   : > { %v1438_v11 = vadd.f32 %v11726_v5, %v1339_v25  ;;  %v1439_v42 = vadd.f32 %v11728_v52, %v1340_v28  ;;  %v7890_v38 = vadd.f32 %v1023_v22, %v7619_v16  ;;  %v11729_v25 = vld [vmem:[#allocation106_spill] sm:$0xff]  ;;  %v7904_v28 = vmul.f32 %v11731_v36, %v7643_v50  ;;  %v7908_v16 = vld [vmem:[#allocation2 + $0x18] sm:$0xff]  ;;  %v11765_v17 = vld [vmem:[#allocation45_spill] sm:$0xff] }
 0x1c5   : > { %v7900_v5 = vmul.f32 %v11729_v25, %v7647_v49  ;;  %v11733_v22 = vld [vmem:[#allocation86_spill] sm:$0xff]  ;;  %v1277_v49 = vmul.f32 %v7220_v30, %v777_v10  ;;  %v11735_v25 = vld [vmem:[#allocation92_spill] sm:$0xff]  ;;  %v780_v30 = vsel %vm769_vm4, %v764_v43, %v7798_v7  ;;  %v7939_v10 = vmul.f32 %v11738_v21, %v7643_v50 }
 0x1c6   : > { %11732 = vst [vmem:[#allocation39_spill] sm:$0xff] %v7904_v28  ;;  %v1596_v41 = vadd.f32 %v11733_v22, %v1563_v46  ;;  %v1529_v52 = vadd.f32 %v11734_v61, %v1438_v11  ;;  %v1530_v23 = vadd.f32 %v11279_v33, %v1439_v42  ;;  %v1597_v36 = vadd.f32 %v11735_v25, %v1564_v31  ;;  %v11740_v7 = vld [vmem:[#allocation82_spill] sm:$0xff]  ;;  %v11742_v33 = vld [vmem:[#allocation96_spill] sm:$0xff] }
 0x1c7   : > { %11730 = vst [vmem:[#allocation91_spill] sm:$0xff] %v7900_v5  ;;  %v771_v11 = vsel %vm769_vm4, %v7614_v58, %v764_v43  ;;  %3307 = vrot.lane.b32.xlu1 %v7908_v16, %s6420_s13  ;;  %11739 = vst [vmem:[#allocation40_spill] sm:$0xff] %v7939_v10  ;;  %3301 = vrot.lane.b32.xlu0 %v7916_v62, %s6420_s13  ;;  %v7944_v43 = vadd.f32 %v11740_v7, %v847_v13  ;;  %v11743_v31 = vrot.slane %v7488_v45, 1  ;;  %v11744_v10 = vld [vmem:[#allocation81_spill] sm:$0xff]  ;;  %v11766_v5 = vld [vmem:[#allocation71_spill] sm:$0xff] }
 0x1c8   : > { %v1565_v46 = vmul.f32 %v11736_v44, %v1529_v52  ;;  %v1566_v48 = vmul.f32 %v11737_v4, %v1530_v23  ;;  %v1608_v58 = vmax.f32 %v1596_v41, 0.0  ;;  %v1301_v23 = vrot.slane %v1277_v49, 2  ;;  %v11741_v52 = vld [vmem:[#allocation95_spill] sm:$0xff]  ;;  %v11773_v4 = vld [vmem:[#allocation113_spill] sm:$0xff] }
 0x1c9   : > { %v994_v61 = vmul.f32 %v7241_v0, %v780_v30  ;;  %v1020_v50 = vsel %vm1014_vm3, %v11743_v31, %v11281_v19  ;;  %v7955_v28 = vmul.f32 %v11669_v8, %v771_v11  ;;  %v1609_v41 = vmax.f32 %v1597_v36, 0.0 }
 0x1ca   : > { %v1598_v42 = vadd.f32 %v11741_v52, %v1565_v46  ;;  %v1599_v12 = vadd.f32 %v11742_v33, %v1566_v48  ;;  %v913_v13 = vadd.f32 %v11744_v10, %v846_v29  ;;  %v1304_v7 = vrot.slane %v1278_v34, 2 }
 0x1cb   : > { %v1016_v49 = vrot.slane %v994_v61, 1  ;;  %3331 = vrot.lane.b32.xlu1 %v7882_v24, %s6421_s14  ;;  %v845_v0 = vmul.f32 %v11658_v26, %v780_v30  ;;  %v848_v48 = vmul.f32 %v7238_v2, %v771_v11  ;;  %v1276_v46 = vmul.f32 %v7247_v20, %v780_v30  ;;  %3325 = vrot.lane.b32.xlu0 %v7894_v51, %s6421_s14  ;;  %v11746_v26 = vld [vmem:[#allocation111_spill] sm:$0xff]  ;;  %v7981_v61 = vpop.permute.xlu1 %1682 }
 0x1cc   : > { %v7964_v45 = vmul.f32 %v11673_v35, %v771_v11  ;;  %v7968_v8 = vrot.slane %v1608_v58, 1  ;;  %v1048_v34 = vadd.f32 %v1020_v50, %v7606_v40  ;;  %v11745_v29 = vrot.slane %v7491_v9, 2  ;;  %v11748_v11 = vld [vmem:[#allocation122_spill] sm:$0xff]  ;;  %11749 = vst [vmem:[#allocation86_spill] sm:$0xff] %v7981_v61  ;;  %v791_v58 = vpop.permute.xlu0 %790  ;;  %v11751_v40 = vld [vmem:[#allocation105_spill] sm:$0xff] }
 0x1cd   : > { %v11747_v31 = vrot.slane %v11746_v26, 1  ;;  %v1610_v20 = vmax.f32 %v1598_v42, 0.0  ;;  %v1611_v30 = vmax.f32 %v1599_v12, 0.0  ;;  %v11285_v35 = vrot.slane %v7955_v28, 1 }
 0x1ce   : > { %v7974_v36 = vsel %vm1296_vm1, %v11745_v29, %v1301_v23  ;;  %v7983_v19 = vrot.slane %v1609_v41, 1  ;;  %v11752_v9 = vrot.slane %v11751_v40, 2  ;;  %v11753_v29 = vrot.slane %v7628_v14, 2  ;;  %v11755_v41 = vld [vmem:[#allocation85_spill] sm:$0xff] }
 0x1cf   : > { %v1017_v2 = vsel %vm1014_vm3, %v11747_v31, %v1016_v49  ;;  %v11754_v42 = vrot.slane %v7724_v1, 2  ;;  %3343 = vrot.lane.b32.xlu1 %v7908_v16, %s6421_s14  ;;  %v912_v31 = vadd.f32 %v11755_v41, %v845_v0  ;;  %v1298_v40 = vrot.slane %v1276_v46, 2  ;;  %3337 = vrot.lane.b32.xlu0 %v7916_v62, %s6421_s14  ;;  %v8009_v14 = vld [vmem:[#allocation2 + $0x20] sm:$0xff]  ;;  %v11762_v41 = vld [vmem:[#allocation107_spill] sm:$0xff] }
 0x1d0   : > { %v1047_v10 = vadd.f32 %v1017_v2, %v11748_v11  ;;  %11750 = vst [vmem:[#allocation92_spill] sm:$0xff] %v7983_v19  ;;  %v7988_v50 = vsel %vm1296_vm1, %v11752_v9, %v1304_v7  ;;  %v7993_v26 = vsel %vm1296_vm1, %v1301_v23, %v11753_v29  ;;  %v11756_v2 = vld [vmem:[#allocation84_spill] sm:$0xff]  ;;  %v1307_v9 = vrot.slane %v7964_v45, 2  ;;  %v11757_v23 = vld [vmem:[#allocation41_spill] sm:$0xff]  ;;  %v11758_v29 = vld [vmem:[#allocation63_spill] sm:$0xff] }
 0x1d1   : > { %v7998_v12 = vsel %vm1296_vm1, %v1304_v7, %v11754_v42  ;;  %v8004_v11 = vadd.f32 %v11756_v2, %v848_v48  ;;  %v1705_v1 = vsel %vm1696_vm6, %v7761_v55, %v7981_v61  ;;  %v1147_v7 = vadd.f32 %v11757_v23, %v1048_v34  ;;  %v11759_v48 = vld [vmem:[#allocation10_spill] sm:$0xff]  ;;  %v11764_v55 = vld [vmem:[#allocation29_spill] sm:$0xff] }
 0x1d2   : > { %v811_v0 = vsel %vm806_vm5, %v791_v58, %v11758_v29  ;;  %v814_v46 = vsel %vm806_vm5, %v11759_v48, %v791_v58  ;;  %v8022_v45 = vrot.slane %v1610_v20, 1  ;;  %v8024_v42 = vrot.slane %v1611_v30, 1  ;;  %v11767_v20 = vld [vmem:[#allocation112_spill] sm:$0xff]  ;;  %v11772_v61 = vld [vmem:[#allocation130_spill] sm:$0xff] }
 0x1d3   : > { %v11763_v2 = vrot.slane %v11762_v41, 1  ;;  %v947_v34 = vmul.f32 %v11764_v55, %v814_v46  ;;  %v948_v23 = vmul.f32 %v7311_v37, %v811_v0  ;;  %v1146_v21 = vadd.f32 %v11765_v17, %v1047_v10  ;;  %3291 = vrot.lane.b32.xlu1 %v8009_v14, %s6420_s13  ;;  %v11769_v41 = vld [vmem:[#allocation87_spill] sm:$0xff]  ;;  %4214 = vrot.lane.b32.xlu0 %v7894_v51, %s6422_s19  ;;  %v8049_v17 = vld [vmem:[#allocation2 + $0x48] sm:$0xf] }
 0x1d4   : > { %11760 = vst [vmem:[#allocation93_spill] sm:$0xff] %v8022_v45  ;;  %11761 = vst [vmem:[#allocation82_spill] sm:$0xff] %v8024_v42  ;;  %v1185_v33 = vmul.f32 %v11766_v5, %v814_v46  ;;  %v1186_v58 = vmul.f32 %v7314_v63, %v811_v0  ;;  %v11768_v30 = vrot.slane %v11767_v20, 2  ;;  %v8042_v45 = vmul.f32 %v11769_v41, %v1705_v1 }
 0x1d5   : > { %v1026_v19 = vsel %vm1014_vm3, %v11763_v2, %v11285_v35  ;;  %v11770_v2 = vld [vmem:[#allocation11_spill] sm:$0xff]  ;;  %v959_v35 = vadd.f32 %v947_v34, %v912_v31  ;;  %v960_v63 = vadd.f32 %v948_v23, %v913_v13  ;;  %v1467_v20 = vmul.f32 %v7305_v47, %v814_v46  ;;  %v1681_v13 = vpop.permute.xlu1 %1680 }
 0x1d6   : > { %v1299_v42 = vsel %vm1296_vm1, %v11768_v30, %v1298_v40  ;;  %v11771_v55 = vrot.slane %v11770_v2, 1  ;;  %v1206_v5 = vrot.slane %v1185_v33, 1  ;;  %v1209_v10 = vrot.slane %v1186_v58, 1  ;;  %v11778_v33 = vld [vmem:[#allocation136_spill] sm:$0xff]  ;;  %v11782_v58 = vld [vmem:[#allocation119_spill] sm:$0xff] }
 0x1d7   : > { %v8053_v30 = vadd.f32 %v1026_v19, %v11772_v61  ;;  %v11774_v56 = vrot.slane %v11773_v4, 2  ;;  %v11777_v34 = vrot.slane %v7875_v27, 1  ;;  %v11779_v23 = vrot.slane %v11778_v33, 2  ;;  %v11780_v19 = vld [vmem:[#allocation115_spill] sm:$0xff]  ;;  %3299 = vrot.lane.b32.xlu1 %v8049_v17, %s6420_s13  ;;  %v11784_v27 = vld [vmem:[#allocation46_spill] sm:$0xff]  ;;  %4226 = vrot.lane.b32.xlu0 %v7916_v62, %s6422_s19 }
 0x1d8   : > { %v1028_v37 = vsel %vm1014_vm3, %v1016_v49, %v11771_v55  ;;  %v11775_v49 = vld [vmem:[#allocation129_spill] sm:$0xff]  ;;  %v11781_v61 = vrot.slane %v11780_v19, 1  ;;  %v1488_v19 = vrot.slane %v1467_v20, 2 }
 0x1d9   : > { %v8058_v2 = vsel %vm1296_vm1, %v11774_v56, %v1307_v9  ;;  %v11776_v31 = vrot.slane %v11775_v49, 1  ;;  %v1051_v55 = vadd.f32 %v1028_v37, %v959_v35  ;;  %v1310_v47 = vsel %vm1296_vm1, %v1298_v40, %v11779_v23  ;;  %v8080_v40 = vld [vmem:[#allocation2 + $0x30] sm:$0xff]  ;;  %v11791_v20 = vld [vmem:[#allocation89_spill] sm:$0xff] }
 0x1da   : > { %v1207_v4 = vsel %vm1014_vm3, %v11781_v61, %v1206_v5  ;;  %v11783_v56 = vrot.slane %v11782_v58, 1  ;;  %v11790_v61 = vld [vmem:[#allocation88_spill] sm:$0xff] }
 0x1db   : > { %v1030_v51 = vsel %vm1014_vm3, %v11777_v34, %v11776_v31  ;;  %v1150_v49 = vadd.f32 %v11784_v27, %v1051_v55  ;;  %v1237_v35 = vadd.f32 %v1207_v4, %v1146_v21  ;;  %v1468_v31 = vmul.f32 %v7317_v59, %v811_v0  ;;  %3303 = vrot.lane.b32.xlu1 %v8080_v40, %s6420_s13 }
 0x1dc   : > { %v1052_v46 = vadd.f32 %v1030_v51, %v960_v63  ;;  %v1210_v52 = vsel %vm1014_vm3, %v11783_v56, %v1209_v10  ;;  %v11785_v63 = vld [vmem:[#allocation42_spill] sm:$0xff]  ;;  %v11786_v51 = vld [vmem:[#allocation65_spill] sm:$0xff]  ;;  %v1704_v55 = vsel %vm1696_vm6, %v7872_v60, %v1681_v13  ;;  %v11788_v21 = vrot.slane %v7759_v6, 1  ;;  %v11793_v56 = vld [vmem:[#allocation43_spill] sm:$0xff]  ;;  %4220 = vrot.lane.b32.xlu0 %v7882_v24, %s6422_s19 }
 0x1dd   : > { %v1238_v37 = vadd.f32 %v1210_v52, %v1147_v7  ;;  %v11787_v33 = vrot.slane %v11786_v51, 1  ;;  %v1329_v7 = vadd.f32 %v1299_v42, %v1237_v35  ;;  %v11789_v0 = vrot.slane %v7732_v54, 2  ;;  %v8110_v54 = vld [vmem:[#allocation2 + $0x58] sm:$0xf]  ;;  %v11797_v51 = vld [vmem:[#allocation90_spill] sm:$0xff] }
 0x1de   : > { %v1151_v34 = vadd.f32 %v11785_v63, %v1052_v46  ;;  %v1220_v59 = vsel %vm1014_vm3, %v1209_v10, %v11788_v21  ;;  %v8102_v4 = vmul.f32 %v11791_v20, %v1705_v1  ;;  %v11792_v10 = vld [vmem:[#allocation47_spill] sm:$0xff]  ;;  %v1491_v27 = vrot.slane %v1468_v31, 2 }
 0x1df   : > { %v1218_v23 = vsel %vm1014_vm3, %v1206_v5, %v11787_v33  ;;  %v1330_v62 = vadd.f32 %v7974_v36, %v1238_v37  ;;  %v8096_v46 = vsel %vm1296_vm1, %v1307_v9, %v11789_v0  ;;  %v8099_v5 = vmul.f32 %v11790_v61, %v1705_v1  ;;  %v11796_v63 = vld [vmem:[#allocation23_spill] sm:$0xff]  ;;  %3311 = vrot.lane.b32.xlu1 %v8110_v54, %s6420_s13  ;;  %v11801_v0 = vld [vmem:[#allocation120_spill] sm:$0xff] }
 0x1e0   : > { %v1241_v52 = vadd.f32 %v1218_v23, %v1150_v49  ;;  %v1242_v58 = vadd.f32 %v1220_v59, %v1151_v34  ;;  %v1428_v42 = vadd.f32 %v11792_v10, %v1329_v7  ;;  %v11794_v49 = vld [vmem:[#allocation117_spill] sm:$0xff]  ;;  %v1737_v34 = vmul.f32 %v11796_v63, %v1704_v55  ;;  %v11798_v23 = vld [vmem:[#allocation48_spill] sm:$0xff]  ;;  %4232 = vrot.lane.b32.xlu0 %v7908_v16, %s6422_s19 }
 0x1e1   : > { %v1429_v36 = vadd.f32 %v11793_v56, %v1330_v62  ;;  %v11795_v35 = vrot.slane %v11794_v49, 2  ;;  %v8119_v33 = vmul.f32 %v11797_v51, %v1705_v1  ;;  %v8125_v24 = vsel %vm1696_vm6, %v1681_v13, %v7932_v18 }
 0x1e2   : > { %v1333_v6 = vadd.f32 %v1310_v47, %v1241_v52  ;;  %v1334_v9 = vadd.f32 %v7993_v26, %v1242_v58  ;;  %v1854_v47 = vmul.f32 %v11769_v41, %v1704_v55  ;;  %v11799_v26 = vld [vmem:[#allocation44_spill] sm:$0xff]  ;;  %v11800_v52 = vrot.slane %v7756_v32, 2 }
 0x1e3   : > { %v1489_v37 = vsel %vm1296_vm1, %v11795_v35, %v1488_v19  ;;  %v8132_v41 = vmul.f32 %v11790_v61, %v1704_v55  ;;  %v1887_v1 = vrot.slane %v8042_v45, 2  ;;  %v11802_v58 = vrot.slane %v11801_v0, 2  ;;  %v3285_v35 = vld [vmem:[#allocation2 + $0x40] sm:$0xf]  ;;  %3327 = vrot.lane.b32.xlu1 %v8009_v14, %s6421_s14 }
 0x1e4   : > { %v1432_v31 = vadd.f32 %v11798_v23, %v1333_v6  ;;  %v1519_v21 = vadd.f32 %v1489_v37, %v1428_v42  ;;  %v1433_v59 = vadd.f32 %v11799_v26, %v1334_v9  ;;  %v1500_v7 = vsel %vm1296_vm1, %v1488_v19, %v11800_v52  ;;  %v11803_v19 = vld [vmem:[#allocation74_spill] sm:$0xff]  ;;  %v11804_v42 = vld [vmem:[#allocation68_spill] sm:$0xff]  ;;  %3293 = vrot.lane.b32.xlu0 %v3285_v35, %s6420_s13 }
 0x1e5   : > { %v1877_v62 = vrot.slane %v1854_v47, 2  ;;  %v1492_v13 = vsel %vm1296_vm1, %v11802_v58, %v1491_v27  ;;  %v1738_v61 = vmul.f32 %v11803_v19, %v8125_v24  ;;  %v1784_v56 = vadd.f32 %v11804_v42, %v1737_v34  ;;  %v11805_v9 = vld [vmem:[#allocation132_spill] sm:$0xff]  ;;  %v11810_v58 = vld [vmem:[#allocation17_spill] sm:$0xff]  ;;  %v11812_v42 = vld [vmem:[#allocation75_spill] sm:$0xff] }
 0x1e6   : > { %v1523_v6 = vadd.f32 %v1500_v7, %v1432_v31  ;;  %v1555_v10 = vmul.f32 %v11717_v39, %v1519_v21  ;;  %v1520_v32 = vadd.f32 %v1492_v13, %v1429_v36  ;;  %v11806_v49 = vrot.slane %v11805_v9, 2  ;;  %v11807_v23 = vld [vmem:[#allocation64_spill] sm:$0xff] }
 0x1e7   : > { %v2059_v37 = vrot.slane %v8099_v5, 2  ;;  %v2145_v16 = vrot.slane %v8102_v4, 4  ;;  %v2313_v36 = vrot.slane %v8119_v33, 4  ;;  %v11808_v21 = vld [vmem:[#allocation76_spill] sm:$0xff]  ;;  %v2048_v26 = vrot.slane %v8132_v41, 2  ;;  %3335 = vrot.lane.b32.xlu1 %v8049_v17, %s6421_s14  ;;  %v11907_v5 = vld [vmem:[#allocation83_spill] sm:$0xff] }
 0x1e8   : > { %v1878_v45 = vsel %vm1296_vm1, %v11806_v49, %v1877_v62  ;;  %v1559_v63 = vmul.f32 %v11717_v39, %v1523_v6  ;;  %v1588_v47 = vadd.f32 %v11733_v22, %v1555_v10  ;;  %v1815_v34 = vmul.f32 %v11808_v21, %v8125_v24  ;;  %v11811_v10 = vld [vmem:[#allocation67_spill] sm:$0xff]  ;;  %v11819_v17 = vld [vmem:[#allocation32_spill] sm:$0xff] }
 0x1e9   : > { %v1902_v31 = vadd.f32 %v1878_v45, %v11807_v23  ;;  %v11809_v52 = vrot.slane %v7810_v53, 2  ;;  %v1556_v6 = vmul.f32 %v11722_v15, %v1520_v32  ;;  %v8170_v19 = vadd.f32 %v11811_v10, %v1738_v61  ;;  %v803_v53 = vpop.permute.xlu0 %802  ;;  %v3287_v45 = vld [vmem:[#allocation2 + $0x50] sm:$0xf]  ;;  %v11813_v32 = vld [vmem:[#allocation134_spill] sm:$0xff]  ;;  %v11875_v4 = vld [vmem:[#allocation96_spill] sm:$0xff] }
 0x1ea   : > { %v1592_v7 = vadd.f32 %v11733_v22, %v1559_v63  ;;  %v1600_v0 = vmax.f32 %v1588_v47, 0.0  ;;  %v8173_v9 = vmul.f32 %v11812_v42, %v1704_v55  ;;  %v1823_v49 = vadd.f32 %v1815_v34, %v1784_v56  ;;  %v11815_v56 = vld [vmem:[#allocation49_spill] sm:$0xff]  ;;  %3305 = vrot.lane.b32.xlu0 %v3287_v45, %s6420_s13 }
 0x1eb   : > { %v1502_v39 = vsel %vm1296_vm1, %v1491_v27, %v11809_v52  ;;  %v8165_v13 = vadd.f32 %v11810_v58, %v1902_v31  ;;  %v8176_v22 = vmul.f32 %v11791_v20, %v1704_v55  ;;  %v8179_v63 = vmul.f32 %v11797_v51, %v1704_v55  ;;  %v11818_v52 = vld [vmem:[#allocation31_spill] sm:$0xff]  ;;  %v11822_v58 = vld [vmem:[#allocation72_spill] sm:$0xff]  ;;  %3339 = vrot.lane.b32.xlu1 %v8080_v40, %s6421_s14 }
 0x1ec   : > { %v1524_v27 = vadd.f32 %v1502_v39, %v1433_v59  ;;  %v1604_v23 = vmax.f32 %v1592_v7, 0.0  ;;  %v1888_v47 = vsel %vm1296_vm1, %v1877_v62, %v1887_v1  ;;  %v11814_v61 = vrot.slane %v11813_v32, 2  ;;  %v11816_v59 = vld [vmem:[#allocation51_spill] sm:$0xff]  ;;  %v11817_v1 = vld [vmem:[#allocation30_spill] sm:$0xff] }
 0x1ed   : > { %v1148_v21 = vadd.f32 %v11815_v56, %v7890_v38  ;;  %v1149_v34 = vadd.f32 %v11816_v59, %v8053_v30  ;;  %v1624_v55 = vrot.slane %v1600_v0, 1  ;;  %v808_v51 = vsel %vm806_vm5, %v11758_v29, %v803_v53  ;;  %v11825_v59 = vld [vmem:[#allocation37_spill] sm:$0xff] }
 0x1ee   : > { %v8187_v31 = vsel %vm1296_vm1, %v11814_v61, %v2048_v26  ;;  %v1625_v20 = vrot.slane %v1604_v23, 1  ;;  %v817_v62 = vsel %vm806_vm5, %v803_v53, %v11759_v48  ;;  %v8203_v38 = vadd.f32 %v11735_v25, %v1556_v6  ;;  %v11823_v61 = vld [vmem:[#allocation61_spill] sm:$0xff]  ;;  %3329 = vrot.lane.b32.xlu0 %v3285_v35, %s6421_s14 }
 0x1ef   : > { %v949_v30 = vmul.f32 %v11817_v1, %v808_v51  ;;  %v950_v39 = vmul.f32 %v11818_v52, %v817_v62  ;;  %v1187_v7 = vmul.f32 %v11819_v17, %v808_v51  ;;  %v1188_v48 = vmul.f32 %v11822_v58, %v817_v62  ;;  %3347 = vrot.lane.b32.xlu1 %v8110_v54, %s6421_s14 }
 0x1f0   : > { %v8209_v0 = vsel %vm1014_vm3, %v1624_v55, %v1625_v20  ;;  %v8213_v29 = vsel %vm1014_vm3, %v1625_v20, %v7968_v8  ;;  %v1469_v10 = vmul.f32 %v7335_v3, %v808_v51  ;;  %v1560_v6 = vmul.f32 %v11722_v15, %v1524_v27  ;;  %v11827_v20 = vld [vmem:[#allocation62_spill] sm:$0xff] }
 0x1f1   : > { %11820 = vst [vmem:[#allocation81_spill] sm:$0xff] %v8209_v0  ;;  %11821 = vst [vmem:[#allocation111_spill] sm:$0xff] %v8213_v29  ;;  %v961_v42 = vadd.f32 %v949_v30, %v7944_v43  ;;  %v962_v53 = vadd.f32 %v950_v39, %v8004_v11  ;;  %v1212_v23 = vrot.slane %v1187_v7, 1  ;;  %v1906_v32 = vadd.f32 %v1888_v47, %v1823_v49  ;;  %v11830_v49 = vld [vmem:[#allocation125_spill] sm:$0xff]  ;;  %v11832_v39 = vld [vmem:[#allocation126_spill] sm:$0xff] }
 0x1f2   : > { %v11824_v56 = vrot.slane %v11823_v61, 1  ;;  %v11826_v8 = vrot.slane %v11825_v59, 1  ;;  %v11828_v1 = vrot.slane %v11827_v20, 1  ;;  %v11829_v3 = vrot.slane %v7955_v28, 1  ;;  %v11834_v61 = vld [vmem:[#allocation50_spill] sm:$0xff]  ;;  %3341 = vrot.lane.b32.xlu0 %v3287_v45, %s6421_s14 }
 0x1f3   : > { %v1215_v43 = vrot.slane %v1188_v48, 1  ;;  %v2135_v11 = vrot.slane %v8176_v22, 4  ;;  %v11831_v47 = vrot.slane %v11830_v49, 1  ;;  %v2302_v52 = vrot.slane %v8179_v63, 4  ;;  %v11837_v63 = vld [vmem:[#allocation35_spill] sm:$0xff]  ;;  %v11844_v45 = vld [vmem:[#allocation54_spill] sm:$0xff]  ;;  %4216 = vrot.lane.b32.xlu1 %v8009_v14, %s6422_s19 }
 0x1f4   : > { %v1032_v55 = vsel %vm1014_vm3, %v11826_v8, %v11824_v56  ;;  %v1034_v15 = vsel %vm1014_vm3, %v11829_v3, %v11828_v1  ;;  %v11833_v17 = vrot.slane %v11832_v39, 1  ;;  %v1494_v58 = vrot.slane %v1469_v10, 2  ;;  %v11835_v56 = vld [vmem:[#allocation52_spill] sm:$0xff]  ;;  %v11836_v8 = vld [vmem:[#allocation73_spill] sm:$0xff]  ;;  %v11842_v49 = vld [vmem:[#allocation127_spill] sm:$0xff] }
 0x1f5   : > { %v1053_v27 = vadd.f32 %v1032_v55, %v961_v42  ;;  %v1054_v51 = vadd.f32 %v1034_v15, %v962_v53  ;;  %v1213_v30 = vsel %vm1014_vm3, %v11831_v47, %v1212_v23  ;;  %v1470_v42 = vmul.f32 %v11836_v8, %v817_v62  ;;  %v1693_v53 = vpop.permute.xlu1 %1692  ;;  %v11839_v3 = vld [vmem:[#allocation140_spill] sm:$0xff]  ;;  %v11845_v39 = vld [vmem:[#allocation135_spill] sm:$0xff]  ;;  %v11851_v14 = vld [vmem:[#allocation78_spill] sm:$0xff] }
 0x1f6   : > { %v1216_v7 = vsel %vm1014_vm3, %v11833_v17, %v1215_v43  ;;  %v1239_v28 = vadd.f32 %v1213_v30, %v1148_v21  ;;  %v1601_v55 = vmax.f32 %v8203_v38, 0.0  ;;  %v11838_v20 = vrot.slane %v11837_v63, 1 }
 0x1f7   : > { %v1152_v48 = vadd.f32 %v11834_v61, %v1053_v27  ;;  %v1153_v35 = vadd.f32 %v11835_v56, %v1054_v51  ;;  %v1240_v59 = vadd.f32 %v1216_v7, %v1149_v34  ;;  %v11840_v21 = vrot.slane %v11839_v3, 1  ;;  %v11841_v51 = vld [vmem:[#allocation53_spill] sm:$0xff]  ;;  %4228 = vrot.lane.b32.xlu1 %v8080_v40, %s6422_s19  ;;  %v8327_v40 = vpop.permute.xlu0 %1688 }
 0x1f8   : > { %v1222_v1 = vsel %vm1014_vm3, %v1212_v23, %v11838_v20  ;;  %v1331_v15 = vadd.f32 %v7988_v50, %v1239_v28  ;;  %v1593_v34 = vadd.f32 %v11735_v25, %v1560_v6  ;;  %v11843_v47 = vrot.slane %v11842_v49, 2 }
 0x1f9   : > { %v1224_v10 = vsel %vm1014_vm3, %v1215_v43, %v11840_v21  ;;  %v1243_v62 = vadd.f32 %v1222_v1, %v1152_v48  ;;  %v1332_v54 = vadd.f32 %v8058_v2, %v1240_v59  ;;  %v8264_v43 = vsel %vm1696_vm6, %v7932_v18, %v1693_v53  ;;  %v11849_v48 = vld [vmem:[#allocation55_spill] sm:$0xff]  ;;  %v11854_v1 = vld [vmem:[#allocation77_spill] sm:$0xff] }
 0x1fa   : > { %v1244_v27 = vadd.f32 %v1224_v10, %v1153_v35  ;;  %v1430_v38 = vadd.f32 %v11841_v51, %v1331_v15  ;;  %v1495_v23 = vsel %vm1296_vm1, %v11843_v47, %v1494_v58  ;;  %v8269_v50 = vsel %vm1696_vm6, %v1693_v53, %v7872_v60  ;;  %v11847_v60 = vld [vmem:[#allocation97_spill] sm:$0xff]  ;;  %v11850_v35 = vld [vmem:[#allocation56_spill] sm:$0xff]  ;;  %v11860_v47 = vld [vmem:[#allocation79_spill] sm:$0xff] }
 0x1fb   : > { %v1335_v25 = vadd.f32 %v7998_v12, %v1243_v62  ;;  %v1431_v6 = vadd.f32 %v11844_v45, %v1332_v54  ;;  %v1497_v30 = vrot.slane %v1470_v42, 2  ;;  %v11846_v18 = vrot.slane %v11845_v39, 4  ;;  %v11848_v12 = vld [vmem:[#allocation57_spill] sm:$0xff]  ;;  %v11852_v42 = vld [vmem:[#allocation34_spill] sm:$0xff]  ;;  %v11857_v62 = vld [vmem:[#allocation128_spill] sm:$0xff] }
 0x1fc   : > { %v1336_v2 = vadd.f32 %v8096_v46, %v1244_v27  ;;  %v1521_v7 = vadd.f32 %v1495_v23, %v1430_v38  ;;  %v8285_v28 = vmul.f32 %v11847_v60, %v8125_v24  ;;  %v1997_v46 = vadd.f32 %v11848_v12, %v1906_v32  ;;  %v11855_v32 = vld [vmem:[#allocation12_spill] sm:$0xff]  ;;  %v11859_v38 = vld [vmem:[#allocation95_spill] sm:$0xff] }
 0x1fd   : > { %v8281_v17 = vsel %vm2130_vm2, %v11846_v18, %v2135_v11  ;;  %v1605_v61 = vmax.f32 %v1593_v34, 0.0  ;;  %v1434_v56 = vadd.f32 %v11849_v48, %v1335_v25  ;;  %v1739_v8 = vmul.f32 %v11851_v14, %v8264_v43  ;;  %v11861_v25 = vld [vmem:[#allocation98_spill] sm:$0xff]  ;;  %v11863_v39 = vld [vmem:[#allocation99_spill] sm:$0xff] }
 0x1fe   : > { %v1435_v59 = vadd.f32 %v11850_v35, %v1336_v2  ;;  %v11853_v53 = vrot.slane %v11852_v42, 2  ;;  %v1557_v20 = vmul.f32 %v11736_v44, %v1521_v7  ;;  %v1736_v3 = vmul.f32 %v11854_v1, %v8269_v50  ;;  %v11864_v7 = vld [vmem:[#allocation38_spill] sm:$0xff] }
 0x1ff   : > { %v1880_v21 = vrot.slane %v8285_v28, 2  ;;  %v11856_v10 = vrot.slane %v11855_v32, 4  ;;  %v8307_v34 = vsel %vm2130_vm2, %v2302_v52, %v2313_v36  ;;  %v11858_v27 = vrot.slane %v11857_v62, 2 }
 0x200   : > { %v1504_v63 = vsel %vm1296_vm1, %v1494_v58, %v11853_v53  ;;  %v1590_v49 = vadd.f32 %v11859_v38, %v1557_v20  ;;  %v1816_v23 = vmul.f32 %v11860_v47, %v8264_v43  ;;  %v2028_v33 = vmul.f32 %v11861_v25, %v8125_v24  ;;  %v11870_v20 = vld [vmem:[#allocation94_spill] sm:$0xff] }
 0x201   : > { %v8302_v15 = vsel %vm2130_vm2, %v11856_v10, %v2302_v52  ;;  %v1498_v58 = vsel %vm1296_vm1, %v11858_v27, %v1497_v30  ;;  %v1525_v54 = vadd.f32 %v1504_v63, %v1434_v56  ;;  %v8319_v2 = vrot.slane %v1601_v55, 1  ;;  %v11862_v52 = vld [vmem:[#allocation70_spill] sm:$0xff] }
 0x202   : > { %v1522_v51 = vadd.f32 %v1498_v58, %v1431_v6  ;;  %v1786_v45 = vadd.f32 %v11862_v52, %v1739_v8  ;;  %v8325_v18 = vmul.f32 %v11863_v39, %v8125_v24  ;;  %v8329_v6 = vrot.slane %v1605_v61, 1  ;;  %v11866_v56 = vld [vmem:[#allocation66_spill] sm:$0xff]  ;;  %v11869_v61 = vld [vmem:[#allocation80_spill] sm:$0xff] }
 0x203   : > { %v1561_v36 = vmul.f32 %v11736_v44, %v1525_v54  ;;  %v11865_v12 = vrot.slane %v11864_v7, 2  ;;  %v8335_v35 = vadd.f32 %v11866_v56, %v1736_v3  ;;  %v11867_v44 = vld [vmem:[#allocation133_spill] sm:$0xff]  ;;  %v1602_v53 = vmax.f32 %v1590_v49, 0.0  ;;  %v11871_v3 = vld [vmem:[#allocation86_spill] sm:$0xff] }
 0x204   : > { %v11868_v55 = vrot.slane %v11867_v44, 2  ;;  %v1817_v63 = vmul.f32 %v11869_v61, %v8269_v50  ;;  %v1558_v1 = vmul.f32 %v11870_v20, %v1522_v51  ;;  %v2051_v32 = vrot.slane %v2028_v33, 2  ;;  %v11873_v49 = vld [vmem:[#allocation101_spill] sm:$0xff]  ;;  %v11874_v52 = vld [vmem:[#allocation102_spill] sm:$0xff]  ;;  %v11882_v61 = vld [vmem:[#allocation100_spill] sm:$0xff] }
 0x205   : > { %v1506_v48 = vsel %vm1296_vm1, %v1497_v30, %v11865_v12  ;;  %v1594_v42 = vadd.f32 %v11859_v38, %v1561_v36  ;;  %v1824_v30 = vadd.f32 %v1816_v23, %v8170_v19  ;;  %v1702_v10 = vsel %vm1696_vm6, %v11871_v3, %v8327_v40  ;;  %v11879_v12 = vld [vmem:[#allocation27_spill] sm:$0xff] }
 0x206   : > { %v1881_v14 = vsel %vm1296_vm1, %v11868_v55, %v1880_v21  ;;  %v1526_v8 = vadd.f32 %v1506_v48, %v1435_v59  ;;  %v8351_v27 = vadd.f32 %v1817_v63, %v1786_v45  ;;  %v11872_v59 = vld [vmem:[#allocation138_spill] sm:$0xff]  ;;  %v2138_v54 = vrot.slane %v8325_v18, 4  ;;  %v11881_v55 = vld [vmem:[#allocation16_spill] sm:$0xff] }
 0x207   : > { %v1606_v62 = vmax.f32 %v1594_v42, 0.0  ;;  %v1903_v58 = vadd.f32 %v1881_v14, %v11872_v59  ;;  %v2146_v51 = vsel %vm2130_vm2, %v2135_v11, %v2145_v16  ;;  %v1859_v19 = vmul.f32 %v11847_v60, %v1702_v10  ;;  %v11876_v16 = vld [vmem:[#allocation69_spill] sm:$0xff] }
 0x208   : > { %v2032_v38 = vmul.f32 %v11861_v25, %v1702_v10  ;;  %v8364_v47 = vmul.f32 %v11873_v49, %v8269_v50  ;;  %v1562_v23 = vmul.f32 %v11870_v20, %v1526_v8  ;;  %v1630_v33 = vrot.slane %v1602_v53, 1  ;;  %v11885_v59 = vld [vmem:[#allocation141_spill] sm:$0xff] }
 0x209   : > { %v1631_v36 = vrot.slane %v1606_v62, 1  ;;  %v8369_v45 = vmul.f32 %v11874_v52, %v8264_v43  ;;  %v8372_v22 = vadd.f32 %v11875_v4, %v1558_v1  ;;  %v11877_v11 = vrot.slane %v11876_v16, 2  ;;  %v11883_v1 = vld [vmem:[#allocation139_spill] sm:$0xff]  ;;  %v11889_v16 = vld [vmem:[#allocation24_spill] sm:$0xff] }
 0x20a   : > { %v2061_v25 = vrot.slane %v2032_v38, 2  ;;  %v1874_v18 = vrot.slane %v8364_v47, 2  ;;  %v11880_v48 = vrot.slane %v11879_v12, 4  ;;  %v1994_v14 = vadd.f32 %v11881_v55, %v1903_v58  ;;  %v11890_v12 = vld [vmem:[#allocation104_spill] sm:$0xff]  ;;  %v2451_v47 = vld [vmem:[%s11138_s11] sm:$0xff] }
 0x20b   : > { %v2052_v60 = vsel %vm1296_vm1, %v11877_v11, %v2051_v32  ;;  %v8379_v7 = vsel %vm1014_vm3, %v1630_v33, %v1631_v36  ;;  %v1883_v44 = vrot.slane %v8369_v45, 2  ;;  %v1889_v8 = vrot.slane %v1859_v19, 2  ;;  %v11887_v19 = vld [vmem:[#allocation103_spill] sm:$0xff] }
 0x20c   : > { %11878 = vst [vmem:[#allocation122_spill] sm:$0xff] %v8379_v7  ;;  %v2139_v56 = vsel %vm2130_vm2, %v11880_v48, %v2138_v54  ;;  %v2062_v42 = vsel %vm1296_vm1, %v2051_v32, %v2061_v25  ;;  %v2116_v53 = vmul.f32 %v11863_v39, %v1702_v10  ;;  %v2286_v63 = vmul.f32 %v11882_v61, %v1702_v10  ;;  %v11888_v10 = vld [vmem:[#allocation137_spill] sm:$0xff] }
 0x20d   : > { %v2080_v20 = vadd.f32 %v2062_v42, %v1997_v46  ;;  %v11884_v3 = vrot.slane %v11883_v1, 2  ;;  %v11886_v38 = vrot.slane %v11885_v59, 2  ;;  %v8401_v32 = vmul.f32 %v11887_v19, %v8264_v43  ;;  %v11891_v42 = vld [vmem:[#allocation106_spill] sm:$0xff] }
 0x20e   : > { %v8404_v39 = vadd.f32 %v11875_v4, %v1562_v23  ;;  %v8408_v46 = vmul.f32 %v11882_v61, %v8125_v24  ;;  %v8414_v48 = vmul.f32 %v11890_v12, %v8269_v50  ;;  %v8419_v1 = vmul.f32 %v11891_v42, %v8269_v50  ;;  %v11892_v4 = vld [vmem:[#allocation13_spill] sm:$0xff] }
 0x20f   : > { %v1875_v62 = vsel %vm1296_vm1, %v11884_v3, %v1874_v18  ;;  %v1884_v58 = vsel %vm1296_vm1, %v11886_v38, %v1883_v44  ;;  %v2164_v25 = vadd.f32 %v2146_v51, %v2080_v20  ;;  %v2054_v55 = vrot.slane %v8401_v32, 2  ;;  %v11893_v3 = vld [vmem:[#allocation19_spill] sm:$0xff]  ;;  %v11894_v51 = vld [vmem:[#allocation20_spill] sm:$0xff] }
 0x210   : > { %v1901_v33 = vadd.f32 %v1875_v62, %v11888_v10  ;;  %v1904_v11 = vadd.f32 %v1884_v58, %v11889_v16  ;;  %v1890_v24 = vsel %vm1296_vm1, %v1880_v21, %v1889_v8  ;;  %v2147_v23 = vrot.slane %v2116_v53, 4  ;;  %v11895_v38 = vld [vmem:[#allocation36_spill] sm:$0xff] }
 0x211   : > { %v2251_v20 = vadd.f32 %v11894_v51, %v2164_v25  ;;  %v2315_v59 = vrot.slane %v2286_v63, 4  ;;  %v11896_v58 = vrot.slane %v11895_v38, 2  ;;  %v2132_v10 = vrot.slane %v8419_v1, 4  ;;  %v11897_v8 = vld [vmem:[#allocation108_spill] sm:$0xff]  ;;  %v11898_v25 = vld [vmem:[#allocation91_spill] sm:$0xff] }
 0x212   : > { %v1992_v61 = vadd.f32 %v11892_v4, %v1901_v33  ;;  %v1995_v62 = vadd.f32 %v11893_v3, %v1904_v11  ;;  %v8432_v16 = vadd.f32 %v2052_v60, %v8165_v13  ;;  %v8437_v53 = vmul.f32 %v11897_v8, %v8264_v43 }
 0x213   : > { %v2055_v32 = vsel %vm1296_vm1, %v11896_v58, %v2054_v55  ;;  %v2305_v33 = vrot.slane %v8408_v46, 4  ;;  %v1907_v11 = vadd.f32 %v1890_v24, %v1824_v30  ;;  %v2057_v63 = vrot.slane %v8414_v48, 2  ;;  %v11903_v24 = vld [vmem:[#allocation14_spill] sm:$0xff]  ;;  %v11905_v58 = vld [vmem:[#allocation93_spill] sm:$0xff] }
 0x214   : > { %v2075_v28 = vadd.f32 %v8187_v31, %v1992_v61  ;;  %v2077_v21 = vadd.f32 %v2055_v32, %v1994_v14  ;;  %v11899_v4 = vrot.slane %v11898_v25, 4  ;;  %v1822_v13 = vadd.f32 %v8173_v9, %v8335_v35  ;;  %v11900_v31 = vld [vmem:[#allocation109_spill] sm:$0xff]  ;;  %v1695_v61 = vpop.permute.xlu1 %1694  ;;  %v11901_v9 = vld [vmem:[#allocation131_spill] sm:$0xff]  ;;  %v11902_v35 = vld [vmem:[#allocation110_spill] sm:$0xff] }
 0x215   : > { %v8448_v14 = vmul.f32 %v11900_v31, %v8264_v43  ;;  %v2148_v51 = vsel %vm2130_vm2, %v2138_v54, %v2147_v23  ;;  %v2316_v30 = vsel %vm2130_vm2, %v2305_v33, %v2315_v59  ;;  %v2060_v48 = vsel %vm1296_vm1, %v2048_v26, %v2059_v37  ;;  %v11904_v54 = vld [vmem:[#allocation21_spill] sm:$0xff]  ;;  %v11909_v26 = vld [vmem:[#allocation26_spill] sm:$0xff] }
 0x216   : > { %v2133_v3 = vsel %vm2130_vm2, %v11899_v4, %v2132_v10  ;;  %v2161_v1 = vadd.f32 %v2139_v56, %v2077_v21  ;;  %v8461_v56 = vmul.f32 %v11902_v35, %v11901_v9  ;;  %v2141_v43 = vrot.slane %v8437_v53, 4  ;;  %v11910_v21 = vld [vmem:[#allocation59_spill] sm:$0xff]  ;;  %v2460_v53 = vld [vmem:[%s11138_s11 + $0x48] sm:$0xff] }
 0x217   : > { %v2159_v60 = vadd.f32 %v2133_v3, %v2075_v28  ;;  %v8470_v59 = vsel %vm1014_vm3, %v1631_v36, %v11905_v58  ;;  %v11908_v32 = vrot.slane %v11907_v5, 2  ;;  %v1699_v37 = vsel %vm1696_vm6, %v8327_v40, %v1695_v61  ;;  %v11935_v46 = vld [vmem:[#allocation18_spill] sm:$0xff] }
 0x218   : > { %v2248_v23 = vadd.f32 %v11904_v54, %v2161_v1  ;;  %11906 = vst [vmem:[#allocation105_spill] sm:$0xff] %v8470_v59  ;;  %v1708_v28 = vsel %vm1696_vm6, %v1695_v61, %v11909_v26  ;;  %v1998_v25 = vadd.f32 %v11910_v21, %v1907_v11  ;;  %v8482_v4 = vadd.f32 %v2316_v30, %v2251_v20  ;;  %v11911_v61 = vld [vmem:[#allocation40_spill] sm:$0xff]  ;;  %v11912_v21 = vld [vmem:[#allocation58_spill] sm:$0xff] }
 0x219   : > { %v8465_v38 = vadd.f32 %v11903_v24, %v2159_v60  ;;  %v2058_v41 = vsel %vm1296_vm1, %v11908_v32, %v2057_v63  ;;  %v2308_v3 = vrot.slane %v8448_v14, 4  ;;  %v1857_v36 = vmul.f32 %v11873_v49, %v1708_v28  ;;  %v2499_v32 = vld [vmem:[%s11138_s11 + $0x180] sm:$0xff] }
 0x21a   : > { %v1860_v60 = vmul.f32 %v11874_v52, %v1699_v37  ;;  %v2033_v1 = vmul.f32 %v11887_v19, %v1699_v37  ;;  %v2034_v9 = vmul.f32 %v11890_v12, %v1708_v28  ;;  %v2114_v40 = vmul.f32 %v11891_v42, %v1708_v28 }
 0x21b   : > { %v2117_v24 = vmul.f32 %v11897_v8, %v1699_v37  ;;  %v8491_v54 = vadd.f32 %v2058_v41, %v1995_v62  ;;  %v2307_v11 = vrot.slane %v11911_v61, 4  ;;  %v1885_v20 = vrot.slane %v1857_v36, 2  ;;  %v2468_v8 = vld [vmem:[%s11138_s11 + $0x88] sm:$0xff] }
 0x21c   : > { %v1891_v30 = vrot.slane %v1860_v60, 2  ;;  %v8496_v14 = vmul.f32 %v11902_v35, %v8269_v50  ;;  %v2063_v49 = vrot.slane %v2033_v1, 2  ;;  %v2065_v52 = vrot.slane %v2034_v9, 2  ;;  %v2467_v50 = vld [vmem:[%s11138_s11 + $0x80] sm:$0xff]  ;;  %v2500_v41 = vld [vmem:[%s11138_s11 + $0x188] sm:$0xff]  ;;  %v11913_v60 = vld [vmem:[#allocation60_spill] sm:$0xff] }
 0x21d   : > { %v2143_v58 = vrot.slane %v2114_v40, 4  ;;  %v2309_v19 = vsel %vm2130_vm2, %v2307_v11, %v2308_v3  ;;  %v1886_v12 = vsel %vm1296_vm1, %v1874_v18, %v1885_v20  ;;  %v2287_v62 = vmul.f32 %v11900_v31, %v1699_v37  ;;  %v2452_v31 = vld [vmem:[%s11138_s11 + $0x8] sm:$0xff]  ;;  %v2501_v20 = vld [vmem:[%s11138_s11 + $0x190] sm:$0xff] }
 0x21e   : > { %v1892_v42 = vsel %vm1296_vm1, %v1883_v44, %v1891_v30  ;;  %v1905_v5 = vadd.f32 %v1886_v12, %v1822_v13  ;;  %v2064_v45 = vsel %vm1296_vm1, %v2054_v55, %v2063_v49  ;;  %v2149_v44 = vrot.slane %v2117_v24, 4  ;;  %v2483_v55 = vld [vmem:[%s11138_s11 + $0x100] sm:$0xff]  ;;  %v2486_v12 = vld [vmem:[%s11138_s11 + $0x118] sm:$0xff] }
 0x21f   : > { %v1908_v18 = vadd.f32 %v1892_v42, %v8351_v27  ;;  %v2331_v37 = vadd.f32 %v2309_v19, %v2248_v23  ;;  %v2066_v13 = vsel %vm1296_vm1, %v2057_v63, %v2065_v52  ;;  %v2081_v26 = vadd.f32 %v2064_v45, %v1998_v25  ;;  %v2484_v23 = vld [vmem:[%s11138_s11 + $0x108] sm:$0xff]  ;;  %v2469_v63 = vld [vmem:[%s11138_s11 + $0x90] sm:$0xff] }
 0x220   : > { %v2144_v27 = vsel %vm2130_vm2, %v2132_v10, %v2143_v58  ;;  %v1996_v36 = vadd.f32 %v11912_v21, %v1905_v5  ;;  %v2288_v9 = vmul.f32 %v11902_v35, %v1708_v28  ;;  %v2317_v40 = vrot.slane %v2287_v62, 4  ;;  %v2470_v10 = vld [vmem:[%s11138_s11 + $0x98] sm:$0xff]  ;;  %v2453_v35 = vld [vmem:[%s11138_s11 + $0x10] sm:$0xff]  ;;  %v11914_v42 = vld [vmem:[#allocation22_spill] sm:$0xff] }
 0x221   : > { %v1999_v1 = vadd.f32 %v11913_v60, %v1908_v18  ;;  %v2165_v25 = vadd.f32 %v2148_v51, %v2081_v26  ;;  %v6136_v24 = vpack.c.bf16 %v2468_v8, %v2467_v50  ;;  %v6138_v61 = vpack.c.bf16 %v2452_v31, %v2451_v47  ;;  %v2454_v28 = vld [vmem:[%s11138_s11 + $0x18] sm:$0xff]  ;;  %v2485_v19 = vld [vmem:[%s11138_s11 + $0x110] sm:$0xff]  ;;  %v2471_v8 = vld [vmem:[%s11138_s11 + $0xa0] sm:$0xff] }
 0x222   : > { %v6168_v11 = vpack.c.bf16 %v2500_v41, %v2499_v32  ;;  %v2079_v30 = vadd.f32 %v2060_v48, %v1996_v36  ;;  %v2150_v51 = vsel %vm2130_vm2, %v2141_v43, %v2149_v44  ;;  %v2318_v52 = vsel %vm2130_vm2, %v2308_v3, %v2317_v40  ;;  %v2502_v58 = vld [vmem:[%s11138_s11 + $0x198] sm:$0xff]  ;;  %v2472_v47 = vld [vmem:[%s11138_s11 + $0xa8] sm:$0xff]  ;;  %v2503_v31 = vld [vmem:[%s11138_s11 + $0x1a0] sm:$0xff] }
 0x223   : > { %v2082_v49 = vadd.f32 %v2066_v13, %v1999_v1  ;;  %v1603_v48 = vmax.f32 %v8372_v22, 0.0  ;;  %v2252_v62 = vadd.f32 %v11914_v42, %v2165_v25  ;;  %6137 = vmatprep.subr.bf16.mxu0 %v6136_v24  ;;  %v6170_v50 = vpack.c.bf16 %v2484_v23, %v2483_v55  ;;  %v2455_v22 = vld [vmem:[%s11138_s11 + $0x20] sm:$0xff]  ;;  %v2504_v32 = vld [vmem:[%s11138_s11 + $0x1a8] sm:$0xff]  ;;  %v2489_v42 = vld [vmem:[%s11138_s11 + $0x130] sm:$0xff] }
 0x224   : > { %6169 = vmatprep.subr.bf16.mxu1 %v6168_v11  ;;  %v6140_v3 = vpack.c.bf16 %v2470_v10, %v2469_v63  ;;  %v2163_v5 = vadd.f32 %v2144_v27, %v2079_v30  ;;  %v2319_v45 = vrot.slane %v2288_v9, 4  ;;  %6139 = vmatpush3.bf16.msra.mxu0 %v6138_v61  ;;  %v6142_v44 = vpack.c.bf16 %v2454_v28, %v2453_v35  ;;  %v2456_v55 = vld [vmem:[%s11138_s11 + $0x28] sm:$0xff]  ;;  %v2487_v21 = vld [vmem:[%s11138_s11 + $0x120] sm:$0xff]  ;;  %v11916_v9 = vld [vmem:[#allocation28_spill] sm:$0xff] }
 0x225   : > { %v2166_v18 = vadd.f32 %v2150_v51, %v2082_v49  ;;  %v1607_v41 = vmax.f32 %v8404_v39, 0.0  ;;  %v2335_v13 = vadd.f32 %v2318_v52, %v2252_v62  ;;  %6171 = vmatpush3.bf16.msra.mxu1 %v6170_v50  ;;  %v6172_v26 = vpack.c.bf16 %v2502_v58, %v2501_v20  ;;  %v2488_v36 = vld [vmem:[%s11138_s11 + $0x128] sm:$0xff]  ;;  %v11915_v39 = vld [vmem:[#allocation15_spill] sm:$0xff]  ;;  %v2474_v10 = vld [vmem:[%s11138_s11 + $0xb8] sm:$0xff] }
 0x226   : > { %6141 = vmatprep.subr.bf16.mxu0 %v6140_v3  ;;  %v6174_v27 = vpack.c.bf16 %v2486_v12, %v2485_v19  ;;  %v2311_v60 = vrot.slane %v8496_v14, 4  ;;  %v2250_v1 = vadd.f32 %v11915_v39, %v2163_v5  ;;  %v6144_v23 = vpack.c.bf16 %v2472_v47, %v2471_v8  ;;  %v2473_v63 = vld [vmem:[%s11138_s11 + $0xb0] sm:$0xff]  ;;  %v11917_v24 = vld [vmem:[#allocation118_spill] sm:$0xff]  ;;  %v2506_v20 = vld [vmem:[%s11138_s11 + $0x1b8] sm:$0xff] }
 0x227   : > { %v2253_v40 = vadd.f32 %v11916_v9, %v2166_v18  ;;  %v2329_v25 = vadd.f32 %v8302_v15, %v8465_v38  ;;  %v2364_v61 = vmul.f32 %v11917_v24, %v2331_v37  ;;  %v2368_v11 = vmul.f32 %v11917_v24, %v2335_v13  ;;  %6173 = vmatprep.subr.bf16.mxu1 %v6172_v26  ;;  %v2505_v28 = vld [vmem:[%s11138_s11 + $0x1b0] sm:$0xff]  ;;  %v2458_v51 = vld [vmem:[%s11138_s11 + $0x38] sm:$0xff]  ;;  %v2507_v26 = vld [vmem:[%s11138_s11 + $0x1c0] sm:$0xff] }
 0x228   : > { %v6176_v35 = vpack.c.bf16 %v2504_v32, %v2503_v31  ;;  %v2320_v30 = vsel %vm2130_vm2, %v2311_v60, %v2319_v45  ;;  %v2333_v15 = vadd.f32 %v8307_v34, %v2250_v1  ;;  %6143 = vmatpush3.bf16.msra.mxu0 %v6142_v44  ;;  %v6146_v38 = vpack.c.bf16 %v2456_v55, %v2455_v22  ;;  %v2457_v49 = vld [vmem:[%s11138_s11 + $0x30] sm:$0xff]  ;;  %v11918_v19 = vld [vmem:[#allocation124_spill] sm:$0xff]  ;;  %v2476_v44 = vld [vmem:[%s11138_s11 + $0xc8] sm:$0xff] }
 0x229   : > { %v6178_v37 = vpack.c.bf16 %v2488_v36, %v2487_v21  ;;  %v8621_v52 = vrot.slane %v1603_v48, 1  ;;  %v2336_v58 = vadd.f32 %v2320_v30, %v2253_v40  ;;  %v8624_v12 = vadd.f32 %v11918_v19, %v2368_v11  ;;  %6175 = vmatpush3.bf16.msra.mxu1 %v6174_v27  ;;  %6145 = vmatprep.subr.bf16.mxu0 %v6144_v23  ;;  %v2490_v62 = vld [vmem:[%s11138_s11 + $0x138] sm:$0xff]  ;;  %v2475_v48 = vld [vmem:[%s11138_s11 + $0xc0] sm:$0xff]  ;;  %v11920_v3 = vld [vmem:[#allocation39_spill] sm:$0xff] }
 0x22a   : > { %v6148_v34 = vpack.c.bf16 %v2474_v10, %v2473_v63  ;;  %v1634_v50 = vrot.slane %v1607_v41, 1  ;;  %v11921_v8 = vrot.slane %v11920_v3, 4  ;;  %v11922_v5 = vld [vmem:[#allocation116_spill] sm:$0xff]  ;;  %6177 = vmatprep.subr.bf16.mxu1 %v6176_v35  ;;  %v6180_v45 = vpack.c.bf16 %v2506_v20, %v2505_v28  ;;  %v8647_v22 = vld [vmem:[%s11138_s11 + $0x40] sm:$0xff]  ;;  %v11923_v31 = vld [vmem:[#allocation114_spill] sm:$0xff] }
 0x22b   : > { %11919 = vst [vmem:[#allocation85_spill] sm:$0xff] %v8624_v12  ;;  %v2366_v18 = vmul.f32 %v11922_v5, %v2333_v15  ;;  %v2362_v41 = vmul.f32 %v11922_v5, %v2329_v25  ;;  %v8657_v13 = vadd.f32 %v11918_v19, %v2364_v61  ;;  %v2508_v27 = vld [vmem:[%s11138_s11 + $0x1c8] sm:$0xff]  ;;  %v2491_v55 = vld [vmem:[%s11138_s11 + $0x140] sm:$0xff]  ;;  %v6150_v36 = vpack.c.bf16 %v2458_v51, %v2457_v49  ;;  %v2477_v9 = vld [vmem:[%s11138_s11 + $0xd0] sm:$0xff] }
 0x22c   : > { %v2142_v47 = vsel %vm2130_vm2, %v11921_v8, %v2141_v43  ;;  %v2367_v43 = vmul.f32 %v11923_v31, %v8482_v4  ;;  %v11925_v4 = vld [vmem:[#allocation123_spill] sm:$0xff]  ;;  %6147 = vmatpush3.bf16.msra.mxu0 %v6146_v38  ;;  %v6182_v39 = vpack.c.bf16 %v2490_v62, %v2489_v42  ;;  %v2492_v1 = vld [vmem:[%s11138_s11 + $0x148] sm:$0xff]  ;;  %v2478_v40 = vld [vmem:[%s11138_s11 + $0xd8] sm:$0xff]  ;;  %v2310_v23 = vrot.slane %v8461_v56, 4 }
 0x22d   : > { %v2162_v32 = vadd.f32 %v2142_v47, %v8491_v54  ;;  %11924 = vst [vmem:[#allocation84_spill] sm:$0xff] %v8657_v13  ;;  %v8669_v21 = vadd.f32 %v11925_v4, %v2366_v18  ;;  %v11292_v54 = vmax.f32 %v8624_v12, 0.0  ;;  %v11927_v63 = vld [vmem:[#allocation121_spill] sm:$0xff]  ;;  %6179 = vmatpush3.bf16.msra.mxu1 %v6178_v37  ;;  %6149 = vmatprep.subr.bf16.mxu0 %v6148_v34  ;;  %v2509_v61 = vld [vmem:[%s11138_s11 + $0x1d0] sm:$0xff]  ;;  %v2510_v11 = vld [vmem:[%s11138_s11 + $0x1d8] sm:$0xff] }
 0x22e   : > { %v2369_v10 = vmul.f32 %v11927_v63, %v2336_v58  ;;  %v6152_v25 = vpack.c.bf16 %v2476_v44, %v2475_v48  ;;  %v6154_v24 = vpack.c.bf16 %v2460_v53, %v8647_v22  ;;  %6181 = vmatprep.subr.bf16.mxu1 %v6180_v45  ;;  %v6184_v28 = vpack.c.bf16 %v2508_v27, %v2507_v26  ;;  %v11929_v20 = vld [vmem:[#allocation92_spill] sm:$0xff]  ;;  %v11931_v51 = vld [vmem:[#allocation7_spill] sm:$0xff]  ;;  %v2479_v18 = vld [vmem:[%s11138_s11 + $0xe0] sm:$0xff] }
 0x22f   : > { %11926 = vst [vmem:[#allocation41_spill] sm:$0xff] %v8669_v21  ;;  %v11294_v35 = vmax.f32 %v8669_v21, 0.0  ;;  %v8694_v56 = vsel %vm1014_vm3, %v8319_v2, %v8329_v6  ;;  %v8699_v30 = vsel %vm1014_vm3, %v8329_v6, %v11929_v20  ;;  %v6186_v15 = vpack.c.bf16 %v2492_v1, %v2491_v55  ;;  %v6402_v49 = vld [vmem:[%s11133_s6 + $0x3] ss:$8 sm:$0xf] }
 0x230   : > { %11928 = vst [vmem:[#allocation63_spill] sm:$0xff] %v8694_v56  ;;  %11930 = vst [vmem:[#allocation10_spill] sm:$0xff] %v8699_v30  ;;  %v6156_v38 = vpack.c.bf16 %v2478_v40, %v2477_v9  ;;  %v2160_v37 = vadd.f32 %v8281_v17, %v8432_v16  ;;  %v2378_v58 = vrot.slane %v6402_v49, %v11931_v51  ;;  %6151 = vmatpush3.bf16.msra.mxu0 %v6150_v36  ;;  %v2461_v6 = vld [vmem:[%s11138_s11 + $0x50] sm:$0xff]  ;;  %v2462_v19 = vld [vmem:[%s11138_s11 + $0x58] sm:$0xff] }
 0x231   : > { %v2421_v2 = vadd.f32 %v11292_v54, %v8470_v59  ;;  %v6188_v17 = vpack.c.bf16 %v2510_v11, %v2509_v61  ;;  %v11932_v16 = vld [vmem:[#allocation33_spill] sm:$0xff]  ;;  %v8722_v62 = vadd.f32 %v11925_v4, %v2362_v41  ;;  %v11293_v48 = vmax.f32 %v8657_v13, 0.0  ;;  %6183 = vmatpush3.bf16.msra.mxu1 %v6182_v39  ;;  %6153 = vmatprep.subr.bf16.mxu0 %v6152_v25  ;;  %v2493_v3 = vld [vmem:[%s11138_s11 + $0x150] sm:$0xff]  ;;  %v2494_v8 = vld [vmem:[%s11138_s11 + $0x158] sm:$0xff] }
 0x232   : > { %v11933_v34 = vrot.slane %v11932_v16, 4  ;;  %v2247_v47 = vadd.f32 %v11935_v46, %v2160_v37  ;;  %v8732_v5 = vadd.f32 %v2378_v58, %v2367_v43  ;;  %6185 = vmatprep.subr.bf16.mxu1 %v6184_v28  ;;  %v2480_v45 = vld [vmem:[%s11138_s11 + $0xe8] sm:$0xff]  ;;  %v8746_v22 = vsel %vm1014_vm3, %v8621_v52, %v1634_v50  ;;  %v11940_v41 = vld [vmem:[#allocation25_spill] sm:$0xff]  ;;  %v2465_v46 = vld [vmem:[%s11138_s11 + $0x70] sm:$0xff] }
 0x233   : > { %11934 = vst [vmem:[#allocation107_spill] sm:$0xff] %v8722_v62  ;;  %v11295_v44 = vmax.f32 %v8722_v62, 0.0  ;;  %11937 = vst [vmem:[#allocation45_spill] sm:$0xff] %v8746_v22  ;;  %v11938_v53 = vld [vmem:[#allocation82_spill] sm:$0xff]  ;;  %v2249_v26 = vadd.f32 %v11940_v41, %v2162_v32  ;;  %v6158_v27 = vpack.c.bf16 %v2462_v19, %v2461_v6  ;;  %v2511_v55 = vld [vmem:[%s11138_s11 + $0x1e0] sm:$0xff]  ;;  %v2312_v52 = vsel %vm2130_vm2, %v2310_v23, %v2311_v60 }
 0x234   : > { %v2306_v42 = vsel %vm2130_vm2, %v11933_v34, %v2305_v33  ;;  %11936 = vst [vmem:[#allocation29_spill] sm:$0xff] %v8732_v5  ;;  %v2419_v33 = vadd.f32 %v11294_v35, %v8213_v29  ;;  %v8750_v43 = vsel %vm1014_vm3, %v1634_v50, %v11938_v53  ;;  %v2512_v4 = vld [vmem:[%s11138_s11 + $0x1e8] sm:$0xff]  ;;  %v11941_v39 = vld [vmem:[#allocation9_spill] sm:$0xff]  ;;  %6155 = vmatpush3.bf16.msra.mxu0 %v6154_v24  ;;  %v11290_v61 = vmax.f32 %v8732_v5, 0.0  ;;  %v2513_v6 = vld [vmem:[%s11138_s11 + $0x1f0] sm:$0xff] }
 0x235   : > { %11939 = vst [vmem:[#allocation71_spill] sm:$0xff] %v8750_v43  ;;  %v2330_v36 = vadd.f32 %v2306_v42, %v2247_v47  ;;  %v2386_v1 = vrot.slane %v6402_v49, %v11941_v39  ;;  %v6190_v50 = vpack.c.bf16 %v2494_v8, %v2493_v3  ;;  %v2415_v32 = vadd.f32 %v11295_v44, %v8209_v0  ;;  %v2463_v14 = vld [vmem:[%s11138_s11 + $0x60] sm:$0xff]  ;;  %v2464_v60 = vld [vmem:[%s11138_s11 + $0x68] sm:$0xff]  ;;  %v2514_v19 = vld [vmem:[%s11138_s11 + $0x1f8] sm:$0xff] }
 0x236   : > { %v2332_v9 = vadd.f32 %v2312_v52, %v2249_v26  ;;  %v2417_v40 = vadd.f32 %v11293_v48, %v8379_v7  ;;  %6187 = vmatpush3.bf16.msra.mxu1 %v6186_v15  ;;  %6157 = vmatprep.subr.bf16.mxu0 %v6156_v38  ;;  %v6160_v25 = vpack.c.bf16 %v2480_v45, %v2479_v18  ;;  %v2495_v23 = vld [vmem:[%s11138_s11 + $0x160] sm:$0xff]  ;;  %v2496_v20 = vld [vmem:[%s11138_s11 + $0x168] sm:$0xff]  ;;  %v2481_v15 = vld [vmem:[%s11138_s11 + $0xf0] sm:$0xff] }
 0x237   : > { %v2363_v24 = vmul.f32 %v11923_v31, %v2330_v36  ;;  %v8780_v11 = vadd.f32 %v2386_v1, %v2369_v10  ;;  %6189 = vmatprep.subr.bf16.mxu1 %v6188_v17  ;;  %v6192_v28 = vpack.c.bf16 %v2512_v4, %v2511_v55  ;;  %v2482_v38 = vld [vmem:[%s11138_s11 + $0xf8] sm:$0xff]  ;;  %v2423_v37 = vadd.f32 %v2419_v33, %v2415_v32  ;;  %v2497_v18 = vld [vmem:[%s11138_s11 + $0x170] sm:$0xff]  ;;  %v2739_v48 = vld [vmem:[%s11136_s9 + $0x8] sm:$0xff] }
 0x238   : > { %v2365_v31 = vmul.f32 %v11927_v63, %v2332_v9  ;;  %v2437_v49 = vadd.f32 %v2421_v2, %v2417_v40  ;;  %6159 = vmatpush3.bf16.msra.mxu0 %v6158_v27  ;;  %v6162_v16 = vpack.c.bf16 %v2464_v60, %v2463_v14  ;;  %v6194_v63 = vpack.c.bf16 %v2496_v20, %v2495_v23  ;;  %v2466_v47 = vld [vmem:[%s11138_s11 + $0x78] sm:$0xff]  ;;  %v2738_v44 = vld [vmem:[%s11136_s9] sm:$0xff]  ;;  %v2740_v29 = vld [vmem:[%s11136_s9 + $0x10] sm:$0xff] }
 0x239   : > { %11942 = vst [vmem:[#allocation112_spill] sm:$0xff] %v8780_v11  ;;  %v8792_v10 = vadd.f32 %v2378_v58, %v2363_v24  ;;  %v11288_v17 = vmax.f32 %v8780_v11, 0.0  ;;  %v2424_v34 = vrot.slane %v2423_v37, 4  ;;  %6161 = vmatprep.subr.bf16.mxu0 %v6160_v25  ;;  %v2420_v2 = vadd.f32 %v11290_v61, %v8699_v30  ;;  %v2498_v45 = vld [vmem:[%s11138_s11 + $0x178] sm:$0xff]  ;;  %v2748_v0 = vld [vmem:[%s11136_s9 + $0x50] sm:$0xff] }
 0x23a   : > { %v8801_v42 = vadd.f32 %v2386_v1, %v2365_v31  ;;  %v2438_v3 = vrot.slane %v2437_v49, 4  ;;  %6191 = vmatpush3.bf16.msra.mxu1 %v6190_v50  ;;  %v6164_v8 = vpack.c.bf16 %v2482_v38, %v2481_v15  ;;  %v6196_v33 = vpack.c.bf16 %v2514_v19, %v2513_v6  ;;  %v2749_v35 = vld [vmem:[%s11136_s9 + $0x58] sm:$0xff] }
 0x23b   : > { %11943 = vst [vmem:[#allocation87_spill] sm:$0xff] %v8792_v10  ;;  %v11291_v58 = vmax.f32 %v8792_v10, 0.0  ;;  %6193 = vmatprep.subr.bf16.mxu1 %v6192_v28  ;;  %v2425_v53 = vadd.f32 %v2424_v34, %v2423_v37  ;;  %v2422_v26 = vadd.f32 %v11288_v17, %v8750_v43  ;;  %v6166_v4 = vpack.c.bf16 %v2466_v47, %v2465_v46  ;;  %v2656_v46 = vld [vmem:[%s11134_s7 + $0x8] sm:$0xff] }
 0x23c   : > { %11944 = vst [vmem:[#allocation11_spill] sm:$0xff] %v8801_v42  ;;  %v11289_v41 = vmax.f32 %v8801_v42, 0.0  ;;  %v2439_v55 = vadd.f32 %v2438_v3, %v2437_v49  ;;  %6163 = vmatpush3.bf16.msra.mxu0 %v6162_v16  ;;  %v6198_v50 = vpack.c.bf16 %v2498_v45, %v2497_v18  ;;  %v11296_v23 = vmov 0.0|0.0   ;;  %v2658_v18 = vld [vmem:[%s11134_s7 + $0x18] sm:$0xff] }
 0x23d   : > { %v2416_v27 = vadd.f32 %v11291_v58, %v8694_v56  ;;  %v2426_v36 = vrot.slane %v2425_v53, 2  ;;  %6165 = vmatprep.subr.bf16.mxu0 %v6164_v8  ;;  %v2655_v8 = vld [vmem:[%s11134_s7] sm:$0xff] }
 0x23e   : > { %v2418_v52 = vadd.f32 %v11289_v41, %v8746_v22  ;;  %6195 = vmatpush3.bf16.msra.mxu1 %v6194_v63  ;;  %v2440_v40 = vrot.slane %v2439_v55, 2  ;;  %v6201_v47 = vpack.c.bf16 %v2656_v46, %v2655_v8  ;;  %v9012_v30 = vld [vmem:[%s11132_s5 + $0x45] ss:$8 sm:$0xf] }
 0x23f   : > { %v2430_v1 = vadd.f32 %v2420_v2, %v2416_v27  ;;  %6197 = vmatprep.subr.bf16.mxu1 %v6196_v33  ;;  %v2427_v25 = vadd.f32 %v2426_v36, %v2425_v53  ;;  %v11945_v2 = vmov 0.0   ;;  %v2657_v33 = vld [vmem:[%s11134_s7 + $0x10] sm:$0xff]  ;;  %v8846_v53 = vld [vmem:[#allocation2 + $0x40] sm:$0xf]  ;;  %v8852_v27 = vld [vmem:[#allocation2 + $0x48] sm:$0xf] }
 0x240   : > { %v2444_v32 = vadd.f32 %v2422_v26, %v2418_v52  ;;  %6167 = vmatpush3.bf16.msra.mxu0 %v6166_v4  ;;  %v2441_v20 = vadd.f32 %v2440_v40, %v2439_v55  ;;  %v6204_v45 = vpack.c.bf16 %v2658_v18, %v2657_v33  ;;  %11946 = vst [vmem:[#allocation130_spill] sm:$0xff] %v8846_v53  ;;  %v8850_v26 = vld [vmem:[#allocation2 + $0x28] sm:$0xff]  ;;  %11948 = vst [vmem:[#allocation129_spill] sm:$0xff] %v8852_v27  ;;  %v8858_v55 = vld [vmem:[#allocation2 + $0x38] sm:$0xff]  ;;  %v8876_v52 = vpop.permute.xlu1 %3295 }
 0x241   : > { %v2431_v9 = vrot.slane %v2430_v1, 4  ;;  %6200 = vmatprep.subr.bf16.mxu0 %v11296_v23  ;;  %v2428_v15 = vrot.slane %v2427_v25, 1  ;;  %4218 = vrot.lane.b32.xlu0 %v8846_v53, %s6422_s19  ;;  %11947 = vst [vmem:[#allocation113_spill] sm:$0xff] %v8850_v26  ;;  %11949 = vst [vmem:[#allocation136_spill] sm:$0xff] %v8858_v55  ;;  %v8868_v4 = vld [vmem:[#allocation2 + $0x58] sm:$0xf] }
 0x242   : > { %v2445_v14 = vrot.slane %v2444_v32, 4  ;;  %6199 = vmatpush3.bf16.msra.mxu1 %v6198_v50  ;;  %v2442_v6 = vrot.slane %v2441_v20, 1  ;;  %4224 = vrot.lane.b32.xlu1 %v8852_v27, %s6422_s19  ;;  %11950 = vst [vmem:[#allocation115_spill] sm:$0xff] %v8868_v4  ;;  %v8874_v36 = vld [vmem:[#allocation2 + $0x50] sm:$0xf]  ;;  %11973 = vst [vmem:[#allocation67_spill] sm:$0xff] %v9012_v30 }
 0x243   : > { %v2432_v60 = vadd.f32 %v2431_v9, %v2430_v1  ;;  %v2429_v19 = vadd.f32 %v2428_v15, %v2427_v25  ;;  %11951 = vst [vmem:[#allocation119_spill] sm:$0xff] %v8874_v36  ;;  %v8880_v1 = vpop.permute.xlu0 %3289  ;;  %v8885_v50 = vld [vmem:[%s11132_s5 + $0x42] ss:$8 sm:$0xf] }
 0x244   : > { %v2446_v24 = vadd.f32 %v2445_v14, %v2444_v32  ;;  %v2443_v63 = vadd.f32 %v2442_v6, %v2441_v20  ;;  %11952 = vst [vmem:[#allocation46_spill] sm:$0xff] %v8880_v1  ;;  %11953 = vst [vmem:[#allocation42_spill] sm:$0xff] %v8885_v50  ;;  %v8890_v32 = vld [vmem:[%s11132_s5 + $0x43] ss:$8 sm:$0xf]  ;;  %v8892_v9 = vpop.permute.xlu1 %3307 }
 0x245   : > { %v2433_v28 = vrot.slane %v2432_v60, 2  ;;  %3297 = vrot.lane.b32.xlu0 %v8850_v26, %s6420_s13  ;;  %11954 = vst [vmem:[#allocation65_spill] sm:$0xff] %v8890_v32  ;;  %11955 = vst [vmem:[#allocation88_spill] sm:$0xff] %v8892_v9  ;;  %v8898_v40 = vsel %vm769_vm4, %v8892_v9, %v8880_v1  ;;  %v11956_v25 = vld [vmem:[#allocation6_spill] sm:$0xff] }
 0x246   : > { %v2447_v38 = vrot.slane %v2446_v24, 2  ;;  %4222 = vrot.lane.b32.xlu1 %v8850_v26, %s6422_s19  ;;  %v8902_v14 = vrot.slane %v8885_v50, %v11956_v25  ;;  %v8913_v20 = vld [vmem:[%s11132_s5 + $0x44] ss:$8 sm:$0xf] }
 0x247   : > { %v2434_v37 = vadd.f32 %v2433_v28, %v2432_v60  ;;  %v8906_v60 = vrot.slane %v8890_v32, %v11956_v25  ;;  %v8908_v28 = vpop.permute.xlu0 %3301  ;;  %11958 = vst [vmem:[#allocation47_spill] sm:$0xff] %v8913_v20  ;;  %v9046_v13 = vld [vmem:[%s11132_s5 + $0x60] ss:$8 sm:$0xf] }
 0x248   : > { %v2448_v31 = vadd.f32 %v2447_v38, %v2446_v24  ;;  %v3408_v24 = vld [vmem:[#allocation2] sm:$0xfe]  ;;  %11957 = vst [vmem:[#allocation89_spill] sm:$0xff] %v8908_v28  ;;  %v3384_v38 = vmul.f32 %v8902_v14, %v8898_v40  ;;  %v8930_v6 = vsel %vm769_vm4, %v8876_v52, %v8908_v28 }
 0x249   : > { %v2435_v49 = vrot.slane %v2434_v37, 1  ;;  %3309 = vrot.lane.b32.xlu0 %v8858_v55, %s6420_s13  ;;  %v3439_v15 = vmul.f32 %v8906_v60, %v3408_v24  ;;  %v9094_v28 = vld [vmem:[%s11132_s5 + $0x61] ss:$8 sm:$0xf]  ;;  %s685_s13 = sld [smem:[#allocation4]] }
 0x24a   : > { %v2449_v16 = vrot.slane %v2448_v31, 1  ;;  %4234 = vrot.lane.b32.xlu1 %v8858_v55, %s6422_s19 }
 0x24b   : > { %v2436_v34 = vadd.f32 %v2435_v49, %v2434_v37  ;;  %v11959_v37 = vld [vmem:[#allocation8_spill] sm:$0xff] }
 0x24c   : > { %v2450_v3 = vadd.f32 %v2449_v16, %v2448_v31  ;;  %v8920_v31 = vrot.slane %v8885_v50, %v11959_v37  ;;  %v8924_v49 = vrot.slane %v8890_v32, %v11959_v37  ;;  %v8934_v16 = vrot.slane %v8913_v20, %v11956_v25  ;;  %v3886_v32 = vld [vmem:[#allocation2 + $0x40] sm:$0x7] }
 0x24d   : > { %2579 = vmatprep.mubr.f32.mxu0 %v2436_v34  ;;  %3333 = vrot.lane.b32.xlu0 %v8850_v26, %s6421_s14  ;;  %v8936_v34 = vpop.permute.xlu1 %3331  ;;  %v9018_v12 = vrot.slane %v9012_v30, %v11959_v37 }
 0x24e   : > { %2580 = vmatmul.mubr.f32.vlgmr.msra.gmra.mrb[4].mxu0 %v2429_v19  ;;  %2649 = vmatprep.mubr.f32.mxu1 %v2450_v3  ;;  %11960 = vst [vmem:[#allocation43_spill] sm:$0xff] %v8920_v31  ;;  %v3410_v19 = vld [vmem:[#allocation2 + $0x10] sm:$0xfe]  ;;  %11961 = vst [vmem:[#allocation117_spill] sm:$0xff] %v8936_v34  ;;  %v8938_v3 = vpop.permute.xlu0 %3325  ;;  %v3386_v46 = vmul.f32 %v8920_v31, %v8930_v6 }
 0x24f   : > { %2650 = vmatmul.mubr.f32.vlgmr.msra.gmra.mrb[4].mxu1 %v2443_v63  ;;  %6202 = vmatpush3.bf16.msra.mxu0 %v6201_v47  ;;  %11962 = vst [vmem:[#allocation23_spill] sm:$0xff] %v8938_v3  ;;  %v3451_v63 = vadd.f32 %v3439_v15, %v3384_v38  ;;  %v3441_v8 = vmul.f32 %v8924_v49, %v3410_v19  ;;  %s3224_s28 = ssub.f32 1.0, %s685_s13 }
 0x250   : > { %2879 = vmatprep.mubr.f32.mxu1 %v11945_v2  ;;  %6203 = vmatprep.subr.bf16.mxu0 %v11296_v23  ;;  %v8947_v47 = vsel %vm806_vm5, %v8938_v3, %v8936_v34  ;;  %v2746_v23 = vld [vmem:[%s11136_s9 + $0x40] sm:$0xff]  ;;  %v6216_v3 = vpack.c.bf16 %v2748_v0, %v2740_v29 }
 0x251   : > { %6058 = vmatprep.mubr.msk.f32.mxu0 %vm6424_vm7, %v11945_v2  ;;  %4236 = vrot.lane.b32.xlu1 %v8868_v4, %s6422_s19  ;;  %v3486_v33 = vmul.f32 %v8934_v16, %v8947_v47  ;;  %v3453_v24 = vadd.f32 %v3441_v8, %v3386_v46  ;;  %v8957_v15 = vpop.permute.xlu1 %3343  ;;  %v6208_v5 = vpack.c.bf16 %v2746_v23, %v2738_v44  ;;  %v3605_v4 = vld [vmem:[#allocation2 + $0x40] sm:$0x3] }
 0x252   : > { %3345 = vrot.lane.b32.xlu0 %v8858_v55, %s6421_s14  ;;  %11964 = vst [vmem:[#allocation48_spill] sm:$0xff] %v8957_v15  ;;  %v8959_v38 = vpop.permute.xlu0 %3337  ;;  %v3535_v44 = vmul.f32 %v9018_v12, %v8930_v6  ;;  %v3516_v23 = vrot.slane %v9012_v30, %v11956_v25  ;;  %s11092_s14 = scalar_lea.vmem %s11139_s12, %s5898_s20 }
 0x253   : > { %6205 = vmatpush3.bf16.msra.mxu0 %v6204_v45  ;;  %v8951_v18 = vadd.f32 %v3486_v33, %v3451_v63  ;;  %v8955_v45 = vrot.slane %v8913_v20, %v11959_v37  ;;  %11965 = vst [vmem:[#allocation44_spill] sm:$0xff] %v8959_v38  ;;  %v8965_v19 = vsel %vm806_vm5, %v8959_v38, %v8957_v15  ;;  %v9074_v38 = vld [vmem:[%s11132_s5 + $0x62] ss:$8 sm:$0xf] }
 0x254   : > { %v3563_v62 = vrot.slane %v3535_v44, 1  ;;  %v3533_v34 = vmul.f32 %v3516_v23, %v8898_v40  ;;  %v3987_v30 = vrot.slane %v9074_v38, %v11956_v25 }
 0x255   : > { %11963 = vst [vmem:[#allocation90_spill] sm:$0xff] %v8955_v45  ;;  %v3488_v17 = vmul.f32 %v8955_v45, %v8965_v19  ;;  %v8983_v54 = vpop.permute.xlu1 %3291 }
 0x256   : > { %4230 = vrot.lane.b32.xlu0 %v8874_v36, %s6422_s19  ;;  %v8971_v33 = vpop.permute.xlu0 %4214  ;;  %11971 = vst [vmem:[#allocation76_spill] sm:$0xff] %v8983_v54 }
 0x257   : > { %v8969_v63 = vadd.f32 %v3488_v17, %v3453_v24  ;;  %11966 = vst [vmem:[#allocation120_spill] sm:$0xff] %v8971_v33  ;;  %v2747_v17 = vld [vmem:[%s11136_s9 + $0x48] sm:$0xff]  ;;  %v2741_v24 = vld [vmem:[%s11136_s9 + $0x18] sm:$0xff] }
 0x258   : > { %v6206_v42 = vpack.c.bf16 %v2747_v17, %v2739_v48  ;;  %v6214_v43 = vpack.c.bf16 %v2749_v35, %v2741_v24  ;;  %v9025_v48 = vld [vmem:[%s11132_s5 + $0x46] ss:$8 sm:$0xf]  ;;  %v9066_v33 = vld [vmem:[%s11132_s5 + $0x47] ss:$8 sm:$0xf] }
 0x259   : > { %v9005_v22 = vpop.permute.xlu1 %3299 }
 0x25a   : > { %v8973_v41 = vpop.permute.xlu0 %4226  ;;  %6207 = vmatprep.subr.bf16.mxu1 %v6206_v42  ;;  %6215 = vmatprep.subr.bf16.mxu0 %v6214_v43  ;;  %v3615_v43 = vrot.slane %v9025_v48, %v11956_v25 }
 0x25b   : > { %11967 = vst [vmem:[#allocation74_spill] sm:$0xff] %v8973_v41  ;;  %6209 = vmatpush1.bf16.msra.mxu1 %v6208_v5 }
 0x25d   : > { %v9014_v56 = vpop.permute.xlu1 %3303 }
 0x25e   : > { %v8975_v8 = vpop.permute.xlu0 %4220  ;;  %11974 = vst [vmem:[#allocation75_spill] sm:$0xff] %v9014_v56 }
 0x25f   : > { %11968 = vst [vmem:[#allocation68_spill] sm:$0xff] %v8975_v8  ;;  %v3601_v8 = vld [vmem:[#allocation2] sm:$0xfc] }
 0x260   : > { %v3632_v20 = vmul.f32 %v3615_v43, %v3601_v8 }
 0x261   : > { %v9027_v5 = vpop.permute.xlu1 %3311 }
 0x262   : > { %v8977_v46 = vpop.permute.xlu0 %4232  ;;  %11976 = vst [vmem:[#allocation49_spill] sm:$0xff] %v9027_v5 }
 0x263   : > { %11969 = vst [vmem:[#allocation132_spill] sm:$0xff] %v8977_v46 }
 0x265   : > { %v9068_v44 = vpop.permute.xlu1 %3327 }
 0x266   : > { %v8979_v61 = vpop.permute.xlu0 %3293  ;;  %11978 = vst [vmem:[#allocation30_spill] sm:$0xff] %v9068_v44 }
 0x267   : > { %11970 = vst [vmem:[#allocation64_spill] sm:$0xff] %v8979_v61 }
 0x26a   : > { %v8981_v58 = vpop.permute.xlu0 %3305 }
 0x26e   : > { %v9003_v11 = vpop.permute.xlu0 %3329 }
 0x26f   : > { %11972 = vst [vmem:[#allocation17_spill] sm:$0xff] %v9003_v11 }
 0x272   : > { %v9007_v10 = vpop.permute.xlu0 %3341 }
 0x2b3   : > { %v9020_v35 = vpop.permute.xlu0 %4218 }
 0x2b4   : > { %11975 = vst [vmem:[#allocation134_spill] sm:$0xff] %v9020_v35  ;;  %v9058_v35 = vld [vmem:[#allocation2 + $0x20] sm:$0xff] }
 0x2b7   : > { %v9033_v42 = vpop.permute.xlu0 %3297 }
 0x2b8   : > { %11977 = vst [vmem:[#allocation51_spill] sm:$0xff] %v9033_v42  ;;  %v9041_v17 = vsel %vm769_vm4, %v9033_v42, %v9014_v56  ;;  %v9061_v56 = vmul.f32 %v9058_v35, %v3615_v43 }
 0x2b9   : > { %v9050_v59 = vmul.f32 %v9018_v12, %v9041_v17 }
 0x2bb   : > { %v9083_v15 = vpop.permute.xlu0 %3309  ;;  %v11980_v36 = vrot.slane %v9050_v59, 1 }
 0x2bc   : > { %11979 = vst [vmem:[#allocation31_spill] sm:$0xff] %v9083_v15 }
 0x321   : > { %v5932_v24 = vpop.f32.mrb[4].mxu0 }
 0x322   : > { %v5933_v7 = vpop.f32.mrb[5].mxu0  ;;  %v5967_v21 = vpop.f32.mrb[4].mxu1 }
 0x323   : > { %v5934_v42 = vadd.f32 %v5933_v7, %v5932_v24  ;;  %v5968_v46 = vpop.f32.mrb[5].mxu1  ;;  %v9080_v7 = vsel %vm769_vm4, %v9027_v5, %v8979_v61  ;;  %v3706_v24 = vrot.slane %v9066_v33, %v11956_v25  ;;  %v3565_v5 = vsel %vm1014_vm3, %v3563_v62, %v11980_v36  ;;  %v9117_v61 = vpop.permute.xlu1 %3335 }
 0x324   : > { %v5969_v41 = vadd.f32 %v5968_v46, %v5967_v21  ;;  %v3797_v21 = vrot.slane %v9046_v13, %v11956_v25  ;;  %v3323_v46 = vsel %vm769_vm4, %v9083_v15, %v8983_v54  ;;  %v9104_v0 = vmul.f32 %v3516_v23, %v9080_v7  ;;  %11981 = vst [vmem:[#allocation32_spill] sm:$0xff] %v9117_v61 }
 0x325   : > { %v9107_v29 = vadd.f32 %v3565_v5, %v8969_v63  ;;  %v3443_v15 = vmul.f32 %v9058_v35, %v8906_v60  ;;  %v3537_v54 = vmul.f32 %v3516_v23, %v3323_v46  ;;  %v3896_v62 = vrot.slane %v9094_v28, %v11956_v25 }
 0x326   : > { %v2652_v9 = vadd.f32 %v5969_v41, %v5934_v42  ;;  %v3557_v41 = vrot.slane %v3533_v34, 1  ;;  %v3388_v42 = vmul.f32 %v8902_v14, %v3323_v46  ;;  %v3657_v36 = vrot.slane %v9061_v56, 1 }
 0x327   : > { %v3814_v8 = vmul.f32 %v3797_v21, %v8898_v40  ;;  %v9119_v63 = vmul.f32 %v3615_v43, %v3605_v4  ;;  %v9127_v34 = vsel %vm806_vm5, %v9003_v11, %v9117_v61  ;;  %v3558_v5 = vrot.slane %v3537_v54, 1  ;;  %v3882_v43 = vld [vmem:[#allocation2] sm:$0xf8] }
 0x328   : > { %6059 = vmatmul.mubr.msk.f32.vlgmr.msra.gmra.mrb[6].mxu0 %vm2659_vm8, %v2652_v9  ;;  %v3723_v9 = vmul.f32 %v3706_v24, %v8947_v47  ;;  %v3656_v23 = vrot.slane %v3632_v20, 1  ;;  %v4004_v56 = vmul.f32 %v3987_v30, %v8947_v47  ;;  %v9132_v4 = vmul.f32 %v3797_v21, %v9080_v7 }
 0x329   : > { %6217 = vmatpush1.bf16.msra.mxu0 %v6216_v3  ;;  %2950 = vmatprep.mubr.f32.mxu0 %v11945_v2  ;;  %v9135_v3 = vmul.f32 %v3706_v24, %v9127_v34  ;;  %v9137_v2 = vpop.permute.xlu0 %3333  ;;  %v3455_v50 = vadd.f32 %v3443_v15, %v3388_v42  ;;  %v3559_v11 = vsel %vm1014_vm3, %v3557_v41, %v3558_v5  ;;  %v3838_v47 = vrot.slane %v3814_v8, 2 }
 0x32a   : > { %11982 = vst [vmem:[#allocation72_spill] sm:$0xff] %v9137_v2  ;;  %v3818_v61 = vmul.f32 %v3797_v21, %v3323_v46  ;;  %v3356_v54 = vsel %vm806_vm5, %v9068_v44, %v9137_v2  ;;  %v3917_v20 = vmul.f32 %v9058_v35, %v3896_v62  ;;  %v3589_v27 = vadd.f32 %v3559_v11, %v8951_v18 }
 0x32b   : > { %v3747_v53 = vrot.slane %v3723_v9, 1  ;;  %v3913_v55 = vmul.f32 %v3896_v62, %v3882_v43  ;;  %v3490_v26 = vmul.f32 %v8934_v16, %v3356_v54  ;;  %v3658_v15 = vsel %vm1014_vm3, %v3656_v23, %v3657_v36 }
 0x32c   : > { %v4028_v41 = vrot.slane %v4004_v56, 2  ;;  %v9150_v46 = vmul.f32 %v3896_v62, %v3886_v32  ;;  %v11983_v42 = vrot.slane %v9104_v0, 1  ;;  %v11355_v8 = vrot.slane %v9135_v3, 1 }
 0x32d   : > { %v3839_v40 = vrot.slane %v3818_v61, 2  ;;  %v3502_v2 = vadd.f32 %v3490_v26, %v3455_v50  ;;  %v3727_v11 = vmul.f32 %v3706_v24, %v3356_v54  ;;  %v9157_v18 = vmul.f32 %v3987_v30, %v9127_v34 }
 0x32e   : > { %v3570_v44 = vsel %vm1014_vm3, %v3558_v5, %v11983_v42  ;;  %v11984_v9 = vrot.slane %v9119_v63, 1  ;;  %v3688_v56 = vadd.f32 %v3658_v15, %v3589_v27  ;;  %v4008_v43 = vmul.f32 %v3987_v30, %v3356_v54 }
 0x32f   : > { %v3938_v32 = vrot.slane %v3917_v20, 2  ;;  %v3937_v62 = vrot.slane %v3913_v55, 2  ;;  %v3593_v21 = vadd.f32 %v3570_v44, %v3502_v2  ;;  %v3748_v1 = vrot.slane %v3727_v11, 1 }
 0x330   : > { %v3669_v23 = vsel %vm1014_vm3, %v3657_v36, %v11984_v9  ;;  %v11354_v5 = vrot.slane %v9150_v46, 2  ;;  %v4029_v42 = vrot.slane %v4008_v43, 2  ;;  %v3840_v61 = vsel %vm1296_vm1, %v3838_v47, %v3839_v40 }
 0x331   : > { %v3692_v26 = vadd.f32 %v3669_v23, %v3593_v21  ;;  %v3749_v50 = vsel %vm1014_vm3, %v3747_v53, %v3748_v1  ;;  %v3760_v24 = vsel %vm1014_vm3, %v3748_v1, %v11355_v8  ;;  %v11353_v36 = vrot.slane %v9157_v18, 2  ;;  %v3603_v21 = vld [vmem:[#allocation2 + $0x10] sm:$0xfc] }
 0x332   : > { %v11985_v30 = vrot.slane %v9132_v4, 2  ;;  %v3779_v2 = vadd.f32 %v3749_v50, %v3688_v56  ;;  %v4030_v55 = vsel %vm1296_vm1, %v4028_v41, %v4029_v42  ;;  %v3939_v54 = vsel %vm1296_vm1, %v3937_v62, %v3938_v32  ;;  %v9188_v23 = vld [vmem:[#allocation2 + $0x30] sm:$0xff]  ;;  %v3412_v62 = vld [vmem:[#allocation2 + $0x40] sm:$0x1] }
 0x333   : > { %v3783_v44 = vadd.f32 %v3760_v24, %v3692_v26  ;;  %v3950_v53 = vsel %vm1296_vm1, %v3938_v32, %v11354_v5  ;;  %v3623_v1 = vrot.slane %v9025_v48, %v11959_v37  ;;  %v9184_v41 = vrot.slane %v9046_v13, %v11959_v37 }
 0x334   : > { %v3851_v27 = vsel %vm1296_vm1, %v3839_v40, %v11985_v30  ;;  %v3870_v20 = vadd.f32 %v3840_v61, %v3779_v2  ;;  %v4041_v40 = vsel %vm1296_vm1, %v4029_v42, %v11353_v36  ;;  %v3714_v42 = vrot.slane %v9066_v33, %v11959_v37 }
 0x335   : > { %v3874_v47 = vadd.f32 %v3851_v27, %v3783_v44  ;;  %v9191_v56 = vmul.f32 %v9188_v23, %v3623_v1  ;;  %v3634_v32 = vmul.f32 %v3623_v1, %v3603_v21  ;;  %v9199_v61 = vrot.slane %v9094_v28, %v11959_v37 }
 0x336   : > { %v3969_v15 = vadd.f32 %v3939_v54, %v3870_v20  ;;  %v3816_v26 = vmul.f32 %v9184_v41, %v8930_v6  ;;  %v9205_v50 = vrot.slane %v9074_v38, %v11959_v37  ;;  %v3447_v30 = vmul.f32 %v8906_v60, %v3412_v62 }
 0x337   : > { %v3973_v11 = vadd.f32 %v3950_v53, %v3874_v47  ;;  %v3663_v24 = vrot.slane %v9191_v56, 1  ;;  %v3392_v27 = vmul.f32 %v8902_v14, %v9080_v7  ;;  %v3662_v2 = vrot.slane %v3634_v32, 1  ;;  %v9228_v7 = vpop.permute.xlu1 %3339 }
 0x338   : > { %v9186_v9 = vadd.f32 %v4030_v55, %v3969_v15  ;;  %v3884_v55 = vld [vmem:[#allocation2 + $0x10] sm:$0xf8]  ;;  %v3725_v44 = vmul.f32 %v3714_v42, %v8965_v19  ;;  %v9214_v54 = vmul.f32 %v9184_v41, %v9041_v17  ;;  %v9218_v6 = vmul.f32 %v9188_v23, %v9199_v61  ;;  %11986 = vst [vmem:[#allocation61_spill] sm:$0xff] %v9228_v7 }
 0x339   : > { %v9193_v43 = vadd.f32 %v4041_v40, %v3973_v11  ;;  %v3844_v20 = vrot.slane %v3816_v26, 2  ;;  %v4006_v53 = vmul.f32 %v9205_v50, %v8965_v19  ;;  %v3459_v60 = vadd.f32 %v3447_v30, %v3392_v27  ;;  %v9232_v40 = vpop.permute.xlu0 %3345  ;;  %v3607_v27 = vld [vmem:[#allocation2 + $0x50] sm:$0x3] }
 0x33a   : > { %v9226_v14 = vsel %vm769_vm4, %v9005_v22, %v8981_v58  ;;  %v3664_v47 = vsel %vm1014_vm3, %v3662_v2, %v3663_v24  ;;  %v3915_v15 = vmul.f32 %v9199_v61, %v3884_v55  ;;  %11987 = vst [vmem:[#allocation37_spill] sm:$0xff] %v9232_v40  ;;  %v3494_v21 = vmul.f32 %v8934_v16, %v9127_v34 }
 0x33b   : > { %v3445_v19 = vmul.f32 %v9188_v23, %v8924_v49  ;;  %v3390_v11 = vmul.f32 %v8920_v31, %v9041_v17  ;;  %v3350_v56 = vsel %vm806_vm5, %v9228_v7, %v9232_v40  ;;  %v3753_v32 = vrot.slane %v3725_v44, 1 }
 0x33c   : > { %v3845_v62 = vrot.slane %v9214_v54, 2  ;;  %v3729_v26 = vmul.f32 %v3714_v42, %v3350_v56  ;;  %v9246_v30 = vmul.f32 %v9205_v50, %v3350_v56  ;;  %v9250_v16 = vmul.f32 %v9018_v12, %v9226_v14 }
 0x33d   : > { %v3690_v34 = vadd.f32 %v3664_v47, %v9107_v29  ;;  %v3944_v17 = vrot.slane %v9218_v6, 2  ;;  %v3943_v2 = vrot.slane %v3915_v15, 2  ;;  %v4034_v36 = vrot.slane %v4006_v53, 2  ;;  %v9262_v47 = vpop.permute.xlu1 %3347 }
 0x33e   : > { %11988 = vst [vmem:[#allocation62_spill] sm:$0xff] %v9250_v16  ;;  %v3754_v55 = vrot.slane %v3729_v26, 1  ;;  %v3506_v5 = vadd.f32 %v3494_v21, %v3459_v60  ;;  %v3457_v44 = vadd.f32 %v3445_v19, %v3390_v11  ;;  %v3846_v54 = vsel %vm1296_vm1, %v3844_v20, %v3845_v62 }
 0x33f   : > { %v3492_v8 = vmul.f32 %v8955_v45, %v3350_v56  ;;  %v11364_v7 = vrot.slane %v9246_v30, 2  ;;  %v11363_v12 = vrot.slane %v9250_v16, 1  ;;  %v9259_v31 = vmul.f32 %v3623_v1, %v3607_v27  ;;  %v5879_v27 = vld [vmem:[%s11132_s5 + $0x64] ss:$8 sm:$0xf] }
 0x340   : > { %v3755_v40 = vsel %vm1014_vm3, %v3753_v32, %v3754_v55  ;;  %v3945_v6 = vsel %vm1296_vm1, %v3943_v2, %v3944_v17  ;;  %v11990_v60 = vrot.slane %v9104_v0, 1  ;;  %v9270_v20 = vsel %vm806_vm5, %v9007_v10, %v9262_v47  ;;  %v4457_v16 = vld [vmem:[#allocation2 + $0x58] sm:$0x3] }
 0x341   : > { %11989 = vst [vmem:[#allocation125_spill] sm:$0xff] %v9259_v31  ;;  %v3781_v29 = vadd.f32 %v3755_v40, %v3690_v34  ;;  %11991 = vst [vmem:[#allocation126_spill] sm:$0xff] %v9270_v20  ;;  %v3504_v21 = vadd.f32 %v3492_v8, %v3457_v44  ;;  %v4036_v1 = vsel %vm1296_vm1, %v4034_v36, %v11364_v7  ;;  %v11362_v40 = vrot.slane %v9259_v31, 1  ;;  %v12018_v31 = vld [vmem:[#allocation130_spill] sm:$0xff] }
 0x342   : > { %v3597_v15 = vadd.f32 %v11990_v60, %v3506_v5  ;;  %v9277_v19 = vmul.f32 %v3714_v42, %v9270_v20  ;;  %v11993_v0 = vrot.slane %v9050_v59, 1  ;;  %v9288_v8 = vmul.f32 %v9184_v41, %v9226_v14  ;;  %v3888_v59 = vld [vmem:[#allocation2 + $0x50] sm:$0x7] }
 0x343   : > { %v3872_v53 = vadd.f32 %v3846_v54, %v3781_v29  ;;  %v11995_v36 = vrot.slane %v9119_v63, 1  ;;  %v3673_v34 = vsel %vm1014_vm3, %v3663_v24, %v11362_v40  ;;  %v11996_v41 = vrot.slane %v9135_v3, 1 }
 0x344   : > { %11992 = vst [vmem:[#allocation50_spill] sm:$0xff] %v9277_v19  ;;  %v3574_v5 = vsel %vm1014_vm3, %v11993_v0, %v11363_v12  ;;  %11994 = vst [vmem:[#allocation52_spill] sm:$0xff] %v9288_v8  ;;  %v11361_v42 = vrot.slane %v9277_v19, 1  ;;  %v11360_v44 = vrot.slane %v9288_v8, 2  ;;  %v9303_v63 = vmul.f32 %v9199_v61, %v3888_v59  ;;  %v6405_v0 = vld [vmem:[#allocation2] sm:$0xff] }
 0x345   : > { %v3971_v11 = vadd.f32 %v3945_v6, %v3872_v53  ;;  %v3595_v32 = vadd.f32 %v3574_v5, %v3504_v21  ;;  %v3696_v26 = vadd.f32 %v11995_v36, %v3597_v15  ;;  %v4295_v24 = vrot.slane %v5879_v27, %v11956_v25 }
 0x346   : > { %11997 = vst [vmem:[#allocation73_spill] sm:$0xff] %v9303_v63  ;;  %v3764_v29 = vsel %vm1014_vm3, %v3754_v55, %v11361_v42  ;;  %v4303_v6 = vrot.slane %v5879_v27, %v11959_v37  ;;  %v9311_v53 = vrot.slane %v5879_v27, %v11931_v51  ;;  %v11998_v15 = vrot.slane %v9132_v4, 2  ;;  %v9331_v4 = vld [vmem:[%s11132_s5 + $0x82] ss:$8 sm:$0xf] }
 0x347   : > { %v9284_v56 = vadd.f32 %v4036_v1, %v3971_v11  ;;  %v3694_v2 = vadd.f32 %v3673_v34, %v3595_v32  ;;  %v3787_v54 = vadd.f32 %v11996_v41, %v3696_v26  ;;  %v11359_v3 = vrot.slane %v9303_v63, 2  ;;  %v6406_v11 = vld [vmem:[#allocation2 + $0x10] sm:$0xff]  ;;  %v6407_v34 = vld [vmem:[#allocation2 + $0x8] sm:$0xff] }
 0x348   : > { %v9318_v61 = vmul.f32 %v9205_v50, %v9270_v20  ;;  %v3855_v55 = vsel %vm1296_vm1, %v3845_v62, %v11360_v44  ;;  %v9324_v1 = vrot.slane %v5879_v27, %v11941_v39  ;;  %v9326_v5 = vmul.f32 %v6405_v0, %v4295_v24  ;;  %v9338_v50 = vld [vmem:[%s11132_s5 + $0x67] ss:$8 sm:$0xf]  ;;  %v9354_v27 = vld [vmem:[%s11133_s6 + $0x4] ss:$8 sm:$0xf] }
 0x349   : > { %v3785_v60 = vadd.f32 %v3764_v29, %v3694_v2  ;;  %v3878_v21 = vadd.f32 %v11998_v15, %v3787_v54  ;;  %v9333_v32 = vmul.f32 %v6406_v11, %v4303_v6  ;;  %v9342_v62 = vrot.slane %v9025_v48, %v11931_v51  ;;  %12003 = vst [vmem:[#allocation54_spill] sm:$0xff] %v9354_v27  ;;  %v6408_v15 = vld [vmem:[#allocation2 + $0x18] sm:$0xff] }
 0x34a   : > { %11999 = vst [vmem:[#allocation35_spill] sm:$0xff] %v9318_v61  ;;  %12000 = vst [vmem:[#allocation140_spill] sm:$0xff] %v9326_v5  ;;  %v9346_v36 = vrot.slane %v9094_v28, %v11931_v51  ;;  %v9349_v59 = vmul.f32 %v6407_v34, %v9311_v53  ;;  %v12004_v2 = vrot.slane %v9150_v46, 2  ;;  %v11368_v54 = vrot.slane %v9318_v61, 2 }
 0x34b   : > { %12001 = vst [vmem:[#allocation53_spill] sm:$0xff] %v9333_v32  ;;  %v3876_v26 = vadd.f32 %v3855_v55, %v3785_v60  ;;  %v3954_v29 = vsel %vm1296_vm1, %v3944_v17, %v11359_v3  ;;  %v9363_v60 = vmul.f32 %v6408_v15, %v9324_v1  ;;  %v4717_v55 = vrot.slane %v9331_v4, %v11956_v25  ;;  %v4450_v17 = vld [vmem:[#allocation2] sm:$0xfc]  ;;  %v12008_v15 = vld [vmem:[#allocation46_spill] sm:$0xff]  ;;  %v4454_v3 = vld [vmem:[#allocation2 + $0x40] sm:$0x3] }
 0x34c   : > { %12002 = vst [vmem:[#allocation127_spill] sm:$0xff] %v9349_v59  ;;  %v3977_v41 = vadd.f32 %v12004_v2, %v3878_v21  ;;  %v9369_v0 = vrot.slane %v9025_v48, %v11941_v39  ;;  %v9373_v46 = vrot.slane %v9094_v28, %v11941_v39  ;;  %v4707_v21 = vld [vmem:[#allocation2] sm:$0xf0]  ;;  %v9376_v11 = vmul.f32 %v9058_v35, %v4295_v24 }
 0x34d   : > { %12005 = vst [vmem:[#allocation135_spill] sm:$0xff] %v9363_v60  ;;  %v4464_v34 = vrot.slane %v9338_v50, %v11956_v25  ;;  %v9381_v2 = vmul.f32 %v9188_v23, %v4303_v6  ;;  %v9387_v48 = vsel %vm769_vm4, %v12008_v15, %v8876_v52  ;;  %v12009_v28 = vld [vmem:[#allocation113_spill] sm:$0xff]  ;;  %v4080_v42 = vrot.slane %v9354_v27, %v11956_v25 }
 0x34e   : > { %12006 = vst [vmem:[#allocation97_spill] sm:$0xff] %v9376_v11  ;;  %v9391_v44 = vmul.f32 %v9342_v62, %v12009_v28  ;;  %v9395_v24 = vmul.f32 %v9346_v36, %v12009_v28  ;;  %v9400_v6 = vld [vmem:[%s11133_s6 + $0x5] ss:$8 sm:$0xf]  ;;  %v3975_v40 = vadd.f32 %v3954_v29, %v3876_v26  ;;  %v4472_v52 = vrot.slane %v9338_v50, %v11959_v37 }
 0x34f   : > { %12007 = vst [vmem:[#allocation57_spill] sm:$0xff] %v9381_v2  ;;  %v4721_v15 = vrot.slane %v9331_v4, %v11931_v51  ;;  %v12011_v12 = vrot.slane %v9157_v18, 2  ;;  %v12012_v63 = vrot.slane %v9246_v30, 2  ;;  %v4734_v2 = vmul.f32 %v4717_v55, %v4707_v21  ;;  %v4452_v26 = vld [vmem:[#allocation2 + $0x10] sm:$0xfc]  ;;  %v12014_v29 = vld [vmem:[#allocation136_spill] sm:$0xff] }
 0x350   : > { %12010 = vst [vmem:[#allocation55_spill] sm:$0xff] %v9395_v24  ;;  %v9416_v8 = vmul.f32 %v9058_v35, %v4717_v55  ;;  %v9420_v19 = vmul.f32 %v9369_v0, %v12014_v29  ;;  %v9424_v60 = vmul.f32 %v9373_v46, %v12014_v29  ;;  %v4481_v18 = vmul.f32 %v4464_v34, %v4450_v17  ;;  %v4456_v30 = vld [vmem:[#allocation2 + $0x50] sm:$0x3]  ;;  %v12059_v24 = vld [vmem:[#allocation89_spill] sm:$0xff] }
 0x351   : > { %v4068_v7 = vadd.f32 %v12011_v12, %v3977_v41  ;;  %v4045_v11 = vsel %vm1296_vm1, %v12012_v63, %v11368_v54  ;;  %v4485_v12 = vmul.f32 %v9058_v35, %v4464_v34  ;;  %v4489_v41 = vmul.f32 %v4464_v34, %v4454_v3 }
 0x352   : > { %12013 = vst [vmem:[#allocation56_spill] sm:$0xff] %v9416_v8  ;;  %12015 = vst [vmem:[#allocation78_spill] sm:$0xff] %v9420_v19  ;;  %v4113_v63 = vrot.slane %v9400_v6, %v11956_v25  ;;  %v9431_v21 = vrot.slane %v9354_v27, %v11959_v37  ;;  %v4097_v54 = vmul.f32 %v4080_v42, %v9186_v9  ;;  %v4758_v34 = vrot.slane %v4734_v2, 4  ;;  %v4708_v9 = vld [vmem:[#allocation2 + $0x8] sm:$0xf0]  ;;  %v12058_v19 = vld [vmem:[#allocation88_spill] sm:$0xff] }
 0x353   : > { %12016 = vst [vmem:[#allocation34_spill] sm:$0xff] %v9424_v60  ;;  %v4101_v61 = vmul.f32 %v4080_v42, %v9193_v43  ;;  %v4066_v5 = vadd.f32 %v4045_v11, %v3975_v40  ;;  %v9436_v32 = vmul.f32 %v4717_v55, %v12018_v31  ;;  %v4483_v17 = vmul.f32 %v4472_v52, %v4452_v26  ;;  %v3411_v60 = vld [vmem:[#allocation2 + $0x18] sm:$0xfe] }
 0x354   : > { %12017 = vst [vmem:[#allocation77_spill] sm:$0xff] %v9431_v21  ;;  %v4487_v35 = vmul.f32 %v9188_v23, %v4472_v52  ;;  %v4105_v3 = vmul.f32 %v4080_v42, %v4068_v7  ;;  %v11377_v59 = vrot.slane %v9416_v8, 4  ;;  %v4491_v25 = vmul.f32 %v4472_v52, %v4456_v30  ;;  %v3415_v8 = vld [vmem:[#allocation2 + $0x58] sm:$0x1] }
 0x355   : > { %12019 = vst [vmem:[#allocation12_spill] sm:$0xff] %v9436_v32  ;;  %v4505_v27 = vrot.slane %v4481_v18, 2  ;;  %v4506_v45 = vrot.slane %v4485_v12, 2  ;;  %v4517_v20 = vrot.slane %v4489_v41, 2  ;;  %v9443_v43 = vrot.slane %v9400_v6, %v11959_v37 }
 0x356   : > { %v4130_v31 = vadd.f32 %v4113_v63, %v4097_v54  ;;  %v4134_v40 = vadd.f32 %v4113_v63, %v4101_v61  ;;  %v4099_v55 = vmul.f32 %v9431_v21, %v9284_v56  ;;  %v4103_v7 = vmul.f32 %v9431_v21, %v4066_v5  ;;  %v12024_v5 = vld [vmem:[#allocation129_spill] sm:$0xff] }
 0x357   : > { %12020 = vst [vmem:[#allocation128_spill] sm:$0xff] %v9443_v43  ;;  %v4511_v11 = vrot.slane %v4483_v17, 2  ;;  %v4512_v2 = vrot.slane %v4487_v35, 2  ;;  %v4138_v52 = vadd.f32 %v4113_v63, %v4105_v3  ;;  %v9453_v18 = vsel %vm2130_vm2, %v4758_v34, %v11377_v59  ;;  %v4451_v63 = vld [vmem:[#allocation2 + $0x8] sm:$0xfc] }
 0x358   : > { %12021 = vst [vmem:[#allocation95_spill] sm:$0xff] %v9453_v18  ;;  %v4521_v12 = vrot.slane %v4491_v25, 2  ;;  %v9455_v54 = vmul.f32 %v4721_v15, %v4708_v9  ;;  %v9458_v61 = vsel %vm1296_vm1, %v4505_v27, %v4506_v45  ;;  %v9461_v56 = vsel %vm1296_vm1, %v4506_v45, %v4517_v20 }
 0x359   : > { %12022 = vst [vmem:[#allocation79_spill] sm:$0xff] %v9458_v61  ;;  %12023 = vst [vmem:[#allocation98_spill] sm:$0xff] %v9461_v56  ;;  %v9464_v41 = vmul.f32 %v4721_v15, %v12024_v5  ;;  %v4468_v30 = vrot.slane %v9338_v50, %v11931_v51  ;;  %v4142_v17 = vmax.f32 %v4130_v31, 0.0  ;;  %v4146_v35 = vmax.f32 %v4134_v40, 0.0  ;;  %v4455_v40 = vld [vmem:[#allocation2 + $0x48] sm:$0x3] }
 0x35a   : > { %v4132_v3 = vadd.f32 %v9443_v43, %v4099_v55  ;;  %v4136_v25 = vadd.f32 %v9443_v43, %v4103_v7  ;;  %v9471_v34 = vsel %vm1296_vm1, %v4511_v11, %v4512_v2  ;;  %v4150_v20 = vmax.f32 %v4138_v52, 0.0 }
 0x35b   : > { %12025 = vst [vmem:[#allocation70_spill] sm:$0xff] %v9471_v34  ;;  %v9476_v9 = vsel %vm1296_vm1, %v4512_v2, %v4521_v12  ;;  %v4761_v5 = vrot.slane %v9455_v54, 4  ;;  %v9481_v31 = vmul.f32 %v9311_v53, %v12009_v28  ;;  %v4739_v55 = vmul.f32 %v4721_v15, %v12009_v28  ;;  %v12029_v53 = vld [vmem:[#allocation42_spill] sm:$0xff]  ;;  %v12030_v15 = vld [vmem:[#allocation65_spill] sm:$0xff] }
 0x35c   : > { %12026 = vst [vmem:[#allocation99_spill] sm:$0xff] %v9476_v9  ;;  %v4772_v7 = vrot.slane %v9464_v41, 4  ;;  %v4482_v11 = vmul.f32 %v4468_v30, %v4451_v63  ;;  %v4486_v59 = vmul.f32 %v4468_v30, %v12009_v28  ;;  %v9488_v52 = vmul.f32 %v9324_v1, %v12014_v29 }
 0x35d   : > { %12027 = vst [vmem:[#allocation38_spill] sm:$0xff] %v9481_v31  ;;  %v4166_v2 = vrot.slane %v4142_v17, 1  ;;  %v4167_v12 = vrot.slane %v4146_v35, 1  ;;  %v4144_v26 = vmax.f32 %v4132_v3, 0.0  ;;  %v4148_v54 = vmax.f32 %v4136_v25, 0.0  ;;  %v12031_v35 = vld [vmem:[#allocation64_spill] sm:$0xff] }
 0x35e   : > { %12028 = vst [vmem:[#allocation66_spill] sm:$0xff] %v9488_v52  ;;  %v4490_v45 = vmul.f32 %v4468_v30, %v4455_v40  ;;  %v9492_v27 = vrot.slane %v12029_v53, %v11931_v51  ;;  %v9496_v42 = vrot.slane %v12030_v15, %v11931_v51  ;;  %v4178_v41 = vrot.slane %v4150_v20, 1  ;;  %v3413_v17 = vld [vmem:[#allocation2 + $0x48] sm:$0x1]  ;;  %v12032_v25 = vld [vmem:[#allocation67_spill] sm:$0xff] }
 0x35f   : > { %v4762_v63 = vrot.slane %v4739_v55, 4  ;;  %v4476_v28 = vrot.slane %v9338_v50, %v11941_v39  ;;  %v4725_v1 = vrot.slane %v9331_v4, %v11959_v37  ;;  %v9506_v30 = vsel %vm769_vm4, %v12031_v35, %v9005_v22  ;;  %v4453_v55 = vld [vmem:[#allocation2 + $0x18] sm:$0xfc]  ;;  %v12034_v22 = vld [vmem:[#allocation47_spill] sm:$0xff]  ;;  %v3409_v31 = vld [vmem:[#allocation2 + $0x8] sm:$0xfe] }
 0x360   : > { %v4729_v3 = vrot.slane %v9331_v4, %v11941_v39  ;;  %v9512_v20 = vrot.slane %v12032_v25, %v11931_v51  ;;  %v9516_v50 = vrot.slane %v12029_v53, %v11941_v39  ;;  %v9520_v40 = vrot.slane %v12030_v15, %v11941_v39  ;;  %v12037_v15 = vld [vmem:[#allocation49_spill] sm:$0xff] }
 0x361   : > { %v9524_v35 = vrot.slane %v12034_v22, %v11931_v51  ;;  %v4172_v43 = vrot.slane %v4144_v26, 1  ;;  %v9526_v4 = vrot.slane %v4148_v54, 1  ;;  %v9529_v21 = vsel %vm1014_vm3, %v4166_v2, %v4167_v12  ;;  %v12039_v2 = vld [vmem:[#allocation32_spill] sm:$0xff] }
 0x362   : > { %12033 = vst [vmem:[#allocation133_spill] sm:$0xff] %v9516_v50  ;;  %12036 = vst [vmem:[#allocation94_spill] sm:$0xff] %v9529_v21  ;;  %v3448_v18 = vmul.f32 %v9496_v42, %v3413_v17  ;;  %v3393_v53 = vmul.f32 %v9492_v27, %v9506_v30  ;;  %v9538_v32 = vsel %vm769_vm4, %v8981_v58, %v12037_v15  ;;  %v4508_v26 = vrot.slane %v4482_v11, 2  ;;  %v4709_v11 = vld [vmem:[#allocation2 + $0x10] sm:$0xf0] }
 0x363   : > { %12035 = vst [vmem:[#allocation80_spill] sm:$0xff] %v9526_v4  ;;  %v9541_v34 = vsel %vm1014_vm3, %v4167_v12, %v4178_v41  ;;  %v4509_v54 = vrot.slane %v4486_v59, 2  ;;  %v4519_v61 = vrot.slane %v4490_v45, 2  ;;  %v9547_v17 = vsel %vm806_vm5, %v12039_v2, %v9007_v10 }
 0x364   : > { %12038 = vst [vmem:[#allocation86_spill] sm:$0xff] %v9541_v34  ;;  %v9549_v21 = vmul.f32 %v4476_v28, %v4453_v55  ;;  %v9552_v56 = vmul.f32 %v4476_v28, %v12014_v29  ;;  %v9554_v9 = vmul.f32 %v4476_v28, %v4457_v16  ;;  %v9558_v58 = vrot.slane %v12032_v25, %v11941_v39  ;;  %v12043_v25 = vld [vmem:[#allocation17_spill] sm:$0xff]  ;;  %v12051_v34 = vld [vmem:[#allocation119_spill] sm:$0xff] }
 0x365   : > { %v9562_v59 = vrot.slane %v12034_v22, %v11941_v39  ;;  %v3450_v45 = vmul.f32 %v9520_v40, %v3415_v8  ;;  %v3395_v10 = vmul.f32 %v9516_v50, %v9538_v32  ;;  %v9569_v12 = vsel %vm1014_vm3, %v4172_v43, %v9526_v4 }
 0x366   : > { %12041 = vst [vmem:[#allocation101_spill] sm:$0xff] %v9569_v12  ;;  %v3460_v16 = vadd.f32 %v3448_v18, %v3393_v53  ;;  %v9573_v41 = vmul.f32 %v9512_v20, %v9506_v30  ;;  %v3495_v28 = vmul.f32 %v9524_v35, %v9547_v17  ;;  %v9581_v8 = vsel %vm806_vm5, %v9262_v47, %v12043_v25  ;;  %v3606_v53 = vld [vmem:[#allocation2 + $0x48] sm:$0x3]  ;;  %v4710_v25 = vld [vmem:[#allocation2 + $0x18] sm:$0xf0] }
 0x367   : > { %12040 = vst [vmem:[#allocation138_spill] sm:$0xff] %v9562_v59  ;;  %v9584_v55 = vsel %vm1296_vm1, %v4508_v26, %v4509_v54  ;;  %v9587_v43 = vsel %vm1296_vm1, %v4509_v54, %v4519_v61  ;;  %v9590_v18 = vsel %vm2130_vm2, %v4761_v5, %v4762_v63  ;;  %v9593_v22 = vsel %vm2130_vm2, %v4762_v63, %v4772_v7  ;;  %v3608_v12 = vld [vmem:[#allocation2 + $0x58] sm:$0x3] }
 0x368   : > { %12042 = vst [vmem:[#allocation102_spill] sm:$0xff] %v9573_v41  ;;  %12044 = vst [vmem:[#allocation96_spill] sm:$0xff] %v9584_v55  ;;  %v9596_v2 = vmul.f32 %v4725_v1, %v4709_v11  ;;  %v9599_v47 = vmul.f32 %v9188_v23, %v4725_v1  ;;  %v9603_v26 = vmul.f32 %v9558_v58, %v9538_v32  ;;  %v4515_v61 = vrot.slane %v9552_v56, 2  ;;  %v2763_v23 = vld [vmem:[%s11136_s9 + $0xc8] sm:$0xff] }
 0x369   : > { %12045 = vst [vmem:[#allocation69_spill] sm:$0xff] %v9587_v43  ;;  %12046 = vst [vmem:[#allocation27_spill] sm:$0xff] %v9590_v18  ;;  %v4523_v5 = vrot.slane %v9554_v9, 2  ;;  %v3462_v54 = vadd.f32 %v3450_v45, %v3395_v10  ;;  %v3497_v7 = vmul.f32 %v9562_v59, %v9581_v8  ;;  %v9611_v63 = vrot.slane %v9066_v33, %v11931_v51  ;;  %v12053_v45 = vld [vmem:[#allocation115_spill] sm:$0xff]  ;;  %v2755_v18 = vld [vmem:[%s11136_s9 + $0x88] sm:$0xff] }
 0x36a   : > { %12047 = vst [vmem:[#allocation16_spill] sm:$0xff] %v9593_v22  ;;  %12048 = vst [vmem:[#allocation100_spill] sm:$0xff] %v9596_v2  ;;  %v9615_v11 = vmul.f32 %v9342_v62, %v3606_v53  ;;  %v3507_v15 = vadd.f32 %v3495_v28, %v3460_v16  ;;  %v9618_v4 = vmul.f32 %v4725_v1, %v12051_v34  ;;  %v2757_v16 = vld [vmem:[%s11136_s9 + $0x98] sm:$0xff]  ;;  %v2754_v53 = vld [vmem:[%s11136_s9 + $0x80] sm:$0xff] }
 0x36b   : > { %12049 = vst [vmem:[#allocation139_spill] sm:$0xff] %v9599_v47  ;;  %12050 = vst [vmem:[#allocation141_spill] sm:$0xff] %v9603_v26  ;;  %v4737_v56 = vmul.f32 %v4729_v3, %v4710_v25  ;;  %v4741_v9 = vmul.f32 %v4729_v3, %v12014_v29  ;;  %v4745_v10 = vmul.f32 %v4729_v3, %v12053_v45  ;;  %v2765_v28 = vld [vmem:[%s11136_s9 + $0xd8] sm:$0xff]  ;;  %v2762_v25 = vld [vmem:[%s11136_s9 + $0xc0] sm:$0xff] }
 0x36c   : > { %12052 = vst [vmem:[#allocation103_spill] sm:$0xff] %v9618_v4  ;;  %v9633_v34 = vrot.slane %v9046_v13, %v11931_v51  ;;  %v9637_v29 = vrot.slane %v9066_v33, %v11941_v39  ;;  %v6210_v3 = vpack.c.bf16 %v2763_v23, %v2755_v18  ;;  %v9650_v45 = vmul.f32 %v9369_v0, %v3608_v12  ;;  %v2756_v18 = vld [vmem:[%s11136_s9 + $0x90] sm:$0xff]  ;;  %v2743_v1 = vld [vmem:[%s11136_s9 + $0x28] sm:$0xff] }
 0x36d   : > { %v3509_v33 = vadd.f32 %v3497_v7, %v3462_v54  ;;  %v6218_v22 = vpack.c.bf16 %v2765_v28, %v2757_v16  ;;  %v6212_v43 = vpack.c.bf16 %v2762_v25, %v2754_v53  ;;  %v2764_v23 = vld [vmem:[%s11136_s9 + $0xd0] sm:$0xff]  ;;  %v12055_v12 = vrot.slane %v9573_v41, 1  ;;  %v2751_v16 = vld [vmem:[%s11136_s9 + $0x68] sm:$0xff]  ;;  %v2745_v28 = vld [vmem:[%s11136_s9 + $0x38] sm:$0xff] }
 0x36e   : > { %12054 = vst [vmem:[#allocation137_spill] sm:$0xff] %v9637_v29  ;;  %v9666_v54 = vmul.f32 %v9611_v63, %v9547_v17  ;;  %6211 = vmatprep.subr.bf16.mxu1 %v6210_v3  ;;  %v6220_v7 = vpack.c.bf16 %v2764_v23, %v2756_v18  ;;  %v2753_v53 = vld [vmem:[%s11136_s9 + $0x78] sm:$0xff]  ;;  %v4767_v25 = vrot.slane %v4737_v56, 4  ;;  %v4776_v23 = vrot.slane %v4745_v10, 4  ;;  %v12084_v47 = vld [vmem:[#allocation90_spill] sm:$0xff] }
 0x36f   : > { %v3598_v52 = vadd.f32 %v12055_v12, %v3507_v15  ;;  %v4768_v15 = vrot.slane %v4741_v9, 4  ;;  %6219 = vmatprep.subr.bf16.mxu0 %v6218_v22  ;;  %6213 = vmatpush1.bf16.msra.mxu1 %v6212_v43  ;;  %v6222_v12 = vpack.c.bf16 %v2751_v16, %v2743_v1  ;;  %v6230_v55 = vpack.c.bf16 %v2753_v53, %v2745_v28  ;;  %v3887_v53 = vld [vmem:[#allocation2 + $0x48] sm:$0x7]  ;;  %v12074_v28 = vld [vmem:[#allocation43_spill] sm:$0xff] }
 0x370   : > { %12056 = vst [vmem:[#allocation24_spill] sm:$0xff] %v9666_v54  ;;  %v9681_v41 = vrot.slane %v9046_v13, %v11941_v39  ;;  %6221 = vmatpush1.bf16.msra.mxu0 %v6220_v7  ;;  %v3313_v22 = vsel %vm769_vm4, %v12059_v24, %v12058_v19  ;;  %v11393_v43 = vrot.slane %v9650_v45, 1  ;;  %v12060_v56 = vrot.slane %v9603_v26, 1  ;;  %v12096_v4 = vld [vmem:[#allocation6_spill] sm:$0xff] }
 0x371   : > { %v9692_v10 = vmul.f32 %v9637_v29, %v9581_v8  ;;  %6223 = vmatprep.subr.bf16.mxu1 %v6222_v12  ;;  %6231 = vmatprep.subr.bf16.mxu0 %v6230_v55  ;;  %v12062_v13 = vrot.slane %v9549_v21, 2  ;;  %v9701_v7 = vmul.f32 %v9633_v34, %v9506_v30  ;;  %v12065_v19 = vrot.slane %v9615_v11, 1 }
 0x372   : > { %12057 = vst [vmem:[#allocation104_spill] sm:$0xff] %v9681_v41  ;;  %v3600_v9 = vadd.f32 %v12060_v56, %v3509_v33  ;;  %v11394_v33 = vrot.slane %v9666_v54, 1  ;;  %v9707_v16 = vsel %vm1296_vm1, %v4515_v61, %v4523_v5  ;;  %v9711_v55 = vsel %vm2130_vm2, %v4767_v25, %v4768_v15  ;;  %v12069_v5 = vld [vmem:[#allocation23_spill] sm:$0xff] }
 0x373   : > { %12061 = vst [vmem:[#allocation106_spill] sm:$0xff] %v9692_v10  ;;  %v9697_v1 = vsel %vm1296_vm1, %v12062_v13, %v4515_v61  ;;  %12064 = vst [vmem:[#allocation19_spill] sm:$0xff] %v9701_v7  ;;  %v3697_v24 = vadd.f32 %v12065_v19, %v3598_v52  ;;  %v3440_v21 = vmul.f32 %v9496_v42, %v3409_v31  ;;  %v3414_v61 = vld [vmem:[#allocation2 + $0x50] sm:$0x1]  ;;  %v12070_v13 = vld [vmem:[#allocation48_spill] sm:$0xff] }
 0x374   : > { %12063 = vst [vmem:[#allocation13_spill] sm:$0xff] %v9697_v1  ;;  %12066 = vst [vmem:[#allocation20_spill] sm:$0xff] %v9707_v16  ;;  %v9715_v12 = vsel %vm2130_vm2, %v4768_v15, %v4776_v23  ;;  %v3385_v30 = vmul.f32 %v9492_v27, %v9387_v48  ;;  %v3442_v52 = vmul.f32 %v9520_v40, %v3411_v60  ;;  %v12106_v1 = vld [vmem:[#allocation62_spill] sm:$0xff] }
 0x375   : > { %12067 = vst [vmem:[#allocation36_spill] sm:$0xff] %v9711_v55  ;;  %12068 = vst [vmem:[#allocation108_spill] sm:$0xff] %v9715_v12  ;;  %v3387_v56 = vmul.f32 %v9516_v50, %v3313_v22  ;;  %v3358_v25 = vsel %vm806_vm5, %v12070_v13, %v12069_v5  ;;  %v9727_v31 = vmul.f32 %v9681_v41, %v9538_v32  ;;  %v3889_v13 = vld [vmem:[#allocation2 + $0x58] sm:$0x7] }
 0x376   : > { %v3699_v15 = vadd.f32 %v11393_v43, %v3600_v9  ;;  %v9734_v60 = vrot.slane %v9074_v38, %v11931_v51  ;;  %v9738_v3 = vmul.f32 %v9346_v36, %v3887_v53  ;;  %v3788_v5 = vadd.f32 %v11394_v33, %v3697_v24  ;;  %v3604_v50 = vld [vmem:[#allocation2 + $0x18] sm:$0xfc] }
 0x377   : > { %12071 = vst [vmem:[#allocation91_spill] sm:$0xff] %v9727_v31  ;;  %v9744_v32 = vmul.f32 %v9512_v20, %v9387_v48  ;;  %v9748_v9 = vrot.slane %v9074_v38, %v11941_v39  ;;  %v3449_v18 = vmul.f32 %v8924_v49, %v3414_v61  ;;  %v3394_v43 = vmul.f32 %v12074_v28, %v9226_v14  ;;  %v12083_v38 = vld [vmem:[#allocation126_spill] sm:$0xff] }
 0x378   : > { %12072 = vst [vmem:[#allocation109_spill] sm:$0xff] %v9734_v60  ;;  %v9755_v53 = vmul.f32 %v9633_v34, %v9387_v48  ;;  %v3454_v19 = vadd.f32 %v3442_v52, %v3387_v56  ;;  %v9758_v24 = vmul.f32 %v9558_v58, %v3313_v22  ;;  %v9761_v33 = vmul.f32 %v9681_v41, %v3313_v22 }
 0x379   : > { %12073 = vst [vmem:[#allocation131_spill] sm:$0xff] %v9748_v9  ;;  %v3489_v23 = vmul.f32 %v9562_v59, %v3358_v25  ;;  %v9766_v49 = vmul.f32 %v9373_v46, %v3889_v13  ;;  %v12078_v14 = vrot.slane %v9692_v10, 1  ;;  %v9771_v48 = vmul.f32 %v9637_v29, %v3358_v25  ;;  %v12118_v59 = vld [vmem:[#allocation140_spill] sm:$0xff] }
 0x37a   : > { %12075 = vst [vmem:[#allocation110_spill] sm:$0xff] %v9755_v53  ;;  %12076 = vst [vmem:[#allocation14_spill] sm:$0xff] %v9758_v24  ;;  %v12080_v56 = vrot.slane %v9701_v7, 2  ;;  %v9778_v22 = vmul.f32 %v9734_v60, %v9547_v17  ;;  %v9780_v2 = vadd.f32 %v3440_v21, %v3385_v30  ;;  %v9783_v13 = vmul.f32 %v9748_v9, %v3358_v25  ;;  %v12085_v30 = vld [vmem:[#allocation44_spill] sm:$0xff]  ;;  %v3602_v7 = vld [vmem:[#allocation2 + $0x8] sm:$0xfc]  ;;  %v9932_v24 = vpop.permute.xlu1 %4216 }
 0x37b   : > { %12077 = vst [vmem:[#allocation21_spill] sm:$0xff] %v9761_v33  ;;  %v3790_v28 = vadd.f32 %v12078_v14, %v3699_v15  ;;  %12079 = vst [vmem:[#allocation93_spill] sm:$0xff] %v9771_v48  ;;  %v5878_v15 = vld [vmem:[%s11132_s5 + $0x63] ss:$8 sm:$0xf]  ;;  %v3461_v14 = vadd.f32 %v3449_v18, %v3394_v43  ;;  %v3496_v52 = vmul.f32 %v12084_v47, %v12083_v38  ;;  %v12087_v18 = vrot.slane %v9727_v31, 2 }
 0x37c   : > { %v3879_v61 = vadd.f32 %v12080_v56, %v3788_v5  ;;  %12081 = vst [vmem:[#allocation83_spill] sm:$0xff] %v9778_v22  ;;  %12082 = vst [vmem:[#allocation26_spill] sm:$0xff] %v9783_v13  ;;  %v12086_v56 = vld [vmem:[#allocation117_spill] sm:$0xff]  ;;  %v9803_v47 = vmul.f32 %v9748_v9, %v9581_v8  ;;  %v9805_v38 = vadd.f32 %v3489_v23, %v3454_v19  ;;  %v12090_v21 = vrot.slane %v9738_v3, 2  ;;  %v12094_v5 = vld [vmem:[#allocation68_spill] sm:$0xff] }
 0x37d   : > { %v3352_v25 = vsel %vm806_vm5, %v12086_v56, %v12085_v30  ;;  %v3881_v43 = vadd.f32 %v12087_v18, %v3790_v28  ;;  %v9813_v56 = vrot.slane %v5878_v15, %v11931_v51  ;;  %v9816_v28 = vrot.slane %v5878_v15, %v11959_v37  ;;  %v5880_v8 = vld [vmem:[%s11132_s5 + $0x65] ss:$8 sm:$0xf]  ;;  %12119 = vst [vmem:[#allocation92_spill] sm:$0xff] %v9932_v24 }
 0x37e   : > { %12088 = vst [vmem:[#allocation59_spill] sm:$0xff] %v9803_v47  ;;  %12089 = vst [vmem:[#allocation40_spill] sm:$0xff] %v9805_v38  ;;  %v3978_v17 = vadd.f32 %v12090_v21, %v3879_v61  ;;  %v3508_v23 = vadd.f32 %v3496_v52, %v3461_v14  ;;  %v3487_v19 = vmul.f32 %v9524_v35, %v3352_v25  ;;  %v12093_v18 = vld [vmem:[#allocation74_spill] sm:$0xff]  ;;  %v12095_v21 = vld [vmem:[#allocation120_spill] sm:$0xff]  ;;  %v12100_v13 = vrot.slane %v9766_v49, 2 }
 0x37f   : > { %12091 = vst [vmem:[#allocation58_spill] sm:$0xff] %v9813_v56  ;;  %12092 = vst [vmem:[#allocation60_spill] sm:$0xff] %v9816_v28  ;;  %v9826_v61 = vsel %vm1696_vm6, %v12094_v5, %v12093_v18  ;;  %v9832_v30 = vsel %vm1696_vm6, %v12095_v21, %v12094_v5  ;;  %v9835_v55 = vrot.slane %v5878_v15, %v12096_v4  ;;  %v12099_v52 = vld [vmem:[#allocation132_spill] sm:$0xff]  ;;  %v12105_v48 = vrot.slane %v9778_v22, 2  ;;  %v12116_v38 = vld [vmem:[#allocation125_spill] sm:$0xff] }
 0x380   : > { %v9838_v12 = vrot.slane %v5878_v15, %v11941_v39  ;;  %v9844_v14 = vsel %vm1696_vm6, %v12099_v52, %v12095_v21  ;;  %v3980_v16 = vadd.f32 %v12100_v13, %v3881_v43  ;;  %v9850_v5 = vrot.slane %v5880_v8, %v12096_v4  ;;  %v12103_v15 = vld [vmem:[#allocation54_spill] sm:$0xff] }
 0x381   : > { %12097 = vst [vmem:[#allocation22_spill] sm:$0xff] %v9835_v55  ;;  %v9853_v9 = vrot.slane %v5880_v8, %v11931_v51  ;;  %v9857_v10 = vrot.slane %v12103_v15, %v11931_v51  ;;  %v4069_v31 = vadd.f32 %v12105_v48, %v3978_v17  ;;  %v9862_v21 = vmul.f32 %v9611_v63, %v3352_v25 }
 0x382   : > { %12098 = vst [vmem:[#allocation15_spill] sm:$0xff] %v9838_v12  ;;  %12101 = vst [vmem:[#allocation28_spill] sm:$0xff] %v9850_v5  ;;  %v4274_v13 = vmul.f32 %v9813_v56, %v9832_v30  ;;  %v4275_v43 = vmul.f32 %v9816_v28, %v9826_v61  ;;  %v12107_v33 = vrot.slane %v12106_v1, 1  ;;  %v9871_v29 = vrot.slane %v5880_v8, %v11959_v37  ;;  %v9887_v1 = vld [vmem:[%s11132_s5 + $0x66] ss:$8 sm:$0xf] }
 0x383   : > { %12102 = vst [vmem:[#allocation118_spill] sm:$0xff] %v9853_v9  ;;  %12104 = vst [vmem:[#allocation124_spill] sm:$0xff] %v9857_v10  ;;  %v9874_v54 = vrot.slane %v5880_v8, %v11941_v39  ;;  %v9880_v48 = vsel %vm1696_vm6, %v12093_v18, %v12099_v52  ;;  %v4273_v17 = vmul.f32 %v9835_v55, %v9844_v14  ;;  %v12112_v18 = vrot.slane %v9803_v47, 2  ;;  %v9903_v55 = vld [vmem:[%s11132_s5 + $0x80] ss:$8 sm:$0xf] }
 0x384   : > { %v3599_v26 = vadd.f32 %v12107_v33, %v3508_v23  ;;  %12108 = vst [vmem:[#allocation39_spill] sm:$0xff] %v9871_v29  ;;  %12110 = vst [vmem:[#allocation114_spill] sm:$0xff] %v9880_v48  ;;  %v9890_v33 = vmul.f32 %v9734_v60, %v3352_v25  ;;  %v4276_v8 = vmul.f32 %v9838_v12, %v9880_v48  ;;  %v12115_v12 = vld [vmem:[#allocation53_spill] sm:$0xff] }
 0x385   : > { %12109 = vst [vmem:[#allocation116_spill] sm:$0xff] %v9874_v54  ;;  %v9896_v23 = vrot.slane %v12103_v15, %v11941_v39  ;;  %v4071_v52 = vadd.f32 %v12112_v18, %v3980_v16  ;;  %v4351_v22 = vmul.f32 %v9850_v5, %v9832_v30  ;;  %v4352_v25 = vmul.f32 %v9853_v9, %v9826_v61  ;;  %v9917_v16 = vld [vmem:[%s11132_s5 + $0x81] ss:$8 sm:$0xf] }
 0x386   : > { %v9911_v28 = vrot.slane %v9400_v6, %v11931_v51  ;;  %v4106_v15 = vmul.f32 %v9857_v10, %v4069_v31  ;;  %v12114_v18 = vld [vmem:[#allocation127_spill] sm:$0xff]  ;;  %v4322_v56 = vadd.f32 %v12115_v12, %v4275_v43  ;;  %v12117_v5 = vrot.slane %v12116_v38, 1 }
 0x387   : > { %12111 = vst [vmem:[#allocation123_spill] sm:$0xff] %v9896_v23  ;;  %v4321_v47 = vadd.f32 %v12114_v18, %v4274_v13  ;;  %v9925_v9 = vrot.slane %v9887_v1, %v11931_v51  ;;  %v4320_v53 = vadd.f32 %v12118_v59, %v4273_v17  ;;  %v4353_v31 = vmul.f32 %v9871_v29, %v9880_v48  ;;  %v9951_v43 = vld [vmem:[%s11132_s5 + $0x83] ss:$8 sm:$0xf] }
 0x388   : > { %12113 = vst [vmem:[#allocation121_spill] sm:$0xff] %v9911_v28  ;;  %v3698_v60 = vadd.f32 %v12117_v5, %v3599_v26  ;;  %v4354_v10 = vmul.f32 %v9874_v54, %v9844_v14  ;;  %v9936_v12 = vrot.slane %v9903_v55, %v12096_v4  ;;  %v12121_v26 = vld [vmem:[#allocation135_spill] sm:$0xff]  ;;  %v9941_v5 = vrot.slane %v9400_v6, %v11941_v39  ;;  %v3883_v17 = vld [vmem:[#allocation2 + $0x8] sm:$0xf8] }
 0x389   : > { %v4323_v38 = vadd.f32 %v12121_v26, %v4276_v8  ;;  %v4108_v59 = vmul.f32 %v9896_v23, %v4071_v52  ;;  %v9946_v13 = vrot.slane %v9917_v16, %v11931_v51  ;;  %v9954_v18 = vadd.f32 %v3487_v19, %v9780_v2  ;;  %v12123_v23 = vld [vmem:[#allocation50_spill] sm:$0xff]  ;;  %v9989_v52 = vpop.permute.xlu1 %4228 }
 0x38a   : > { %12120 = vst [vmem:[#allocation33_spill] sm:$0xff] %v9936_v12  ;;  %12122 = vst [vmem:[#allocation18_spill] sm:$0xff] %v9941_v5  ;;  %v4139_v6 = vadd.f32 %v9911_v28, %v4106_v15  ;;  %v3633_v26 = vmul.f32 %v9342_v62, %v3602_v7  ;;  %v9960_v29 = vadd.f32 %v4352_v25, %v4321_v47  ;;  %v12124_v54 = vrot.slane %v12123_v23, 1  ;;  %v3885_v47 = vld [vmem:[#allocation2 + $0x18] sm:$0xf8]  ;;  %v6409_v15 = vld [vmem:[#allocation2 + $0x28] sm:$0xff] }
 0x38b   : > { %v9966_v41 = vmul.f32 %v9925_v9, %v9832_v30  ;;  %v9968_v2 = vadd.f32 %v4353_v31, %v4322_v56  ;;  %v9972_v19 = vmul.f32 %v9936_v12, %v9832_v30  ;;  %v9976_v62 = vrot.slane %v9951_v43, %v12096_v4 }
 0x38c   : > { %v3789_v24 = vadd.f32 %v12124_v54, %v3698_v60  ;;  %v3914_v7 = vmul.f32 %v9346_v36, %v3883_v17  ;;  %v9979_v23 = vadd.f32 %v4351_v22, %v4320_v53  ;;  %v9981_v54 = vadd.f32 %v4354_v10, %v4323_v38  ;;  %v12129_v17 = vld [vmem:[#allocation52_spill] sm:$0xff] }
 0x38d   : > { %12125 = vst [vmem:[#allocation82_spill] sm:$0xff] %v9968_v2  ;;  %12126 = vst [vmem:[#allocation25_spill] sm:$0xff] %v9972_v19  ;;  %v4141_v60 = vadd.f32 %v9941_v5, %v4108_v59  ;;  %v9986_v56 = vmul.f32 %v9946_v13, %v9832_v30  ;;  %v4151_v25 = vmax.f32 %v4139_v6, 0.0  ;;  %v3444_v31 = vmul.f32 %v6409_v15, %v9496_v42  ;;  %v6410_v10 = vld [vmem:[#allocation2 + $0x38] sm:$0xff]  ;;  %v12149_v59 = vld [vmem:[#allocation34_spill] sm:$0xff] }
 0x38e   : > { %12127 = vst [vmem:[#allocation46_spill] sm:$0xff] %v9976_v62  ;;  %12128 = vst [vmem:[#allocation113_spill] sm:$0xff] %v9979_v23  ;;  %v3659_v8 = vrot.slane %v3633_v26, 1  ;;  %v3635_v36 = vmul.f32 %v9369_v0, %v3604_v50  ;;  %v12130_v53 = vrot.slane %v12129_v17, 2  ;;  %v9997_v38 = vmul.f32 %v6410_v10, %v9520_v40  ;;  %v12142_v23 = vld [vmem:[#allocation76_spill] sm:$0xff]  ;;  %v12156_v19 = vld [vmem:[#allocation61_spill] sm:$0xff] }
 0x38f   : > { %v3916_v6 = vmul.f32 %v9373_v46, %v3885_v47  ;;  %v10004_v42 = vmul.f32 %v9976_v62, %v9832_v30  ;;  %v3940_v26 = vrot.slane %v3914_v7, 2  ;;  %v10008_v0 = vrot.slane %v9887_v1, %v11959_v37 }
 0x390   : > { %v9994_v22 = vadd.f32 %v12130_v53, %v3789_v24  ;;  %v4153_v50 = vmax.f32 %v4141_v60, 0.0  ;;  %v12134_v40 = vrot.slane %v9615_v11, 1  ;;  %v12135_v15 = vrot.slane %v9391_v44, 1  ;;  %v12139_v53 = vld [vmem:[#allocation55_spill] sm:$0xff] }
 0x391   : > { %12132 = vst [vmem:[#allocation130_spill] sm:$0xff] %v10004_v42  ;;  %12133 = vst [vmem:[#allocation129_spill] sm:$0xff] %v10008_v0  ;;  %v10020_v47 = vrot.slane %v9903_v55, %v11931_v51  ;;  %v10022_v30 = vrot.slane %v4151_v25, 1  ;;  %v12138_v60 = vrot.slane %v9738_v3, 2  ;;  %v12140_v11 = vrot.slane %v12139_v53, 2  ;;  %v10048_v3 = vpop.permute.xlu1 %4224 }
 0x392   : > { %12131 = vst [vmem:[#allocation136_spill] sm:$0xff] %v9994_v22  ;;  %v10016_v46 = vsel %vm1014_vm3, %v12135_v15, %v12134_v40  ;;  %v12137_v7 = vmov %v12135_v15  ;;  %v3665_v40 = vrot.slane %v3635_v36, 1  ;;  %v12141_v15 = vld [vmem:[#allocation51_spill] sm:$0xff]  ;;  %v3946_v25 = vrot.slane %v3916_v6, 2 }
 0x393   : > { %12136 = vst [vmem:[#allocation42_spill] sm:$0xff] %v10022_v30  ;;  %v10027_v17 = vsel %vm1014_vm3, %v3659_v8, %v12137_v7  ;;  %v10034_v10 = vsel %vm1296_vm1, %v12140_v11, %v12138_v60  ;;  %v3320_v24 = vsel %vm769_vm4, %v12142_v23, %v12141_v15  ;;  %v10042_v44 = vrot.slane %v9917_v16, %v11959_v37 }
 0x394   : > { %v10046_v8 = vrot.slane %v9951_v43, %v11931_v51  ;;  %v12144_v7 = vmov %v12140_v11  ;;  %v12145_v60 = vrot.slane %v9650_v45, 1  ;;  %v12146_v11 = vld [vmem:[#allocation78_spill] sm:$0xff]  ;;  %v12148_v15 = vrot.slane %v9766_v49, 2 }
 0x395   : > { %12143 = vst [vmem:[#allocation65_spill] sm:$0xff] %v10042_v44  ;;  %v10053_v36 = vsel %vm1296_vm1, %v3940_v26, %v12144_v7  ;;  %v12147_v23 = vrot.slane %v12146_v11, 1  ;;  %v12150_v42 = vrot.slane %v12149_v59, 2  ;;  %v10071_v53 = vmul.f32 %v10008_v0, %v9826_v61  ;;  %v10082_v7 = vld [vmem:[%s11133_s6 + $0x6] ss:$8 sm:$0xf] }
 0x396   : > { %v10073_v26 = vrot.slane %v4153_v50, 1  ;;  %v10077_v45 = vmul.f32 %v10020_v47, %v9826_v61  ;;  %12153 = vst [vmem:[#allocation47_spill] sm:$0xff] %v10082_v7  ;;  %v10086_v49 = vrot.slane %v9887_v1, %v12096_v4  ;;  %v3389_v50 = vmul.f32 %v9492_v27, %v3320_v24  ;;  %v12161_v11 = vld [vmem:[#allocation31_spill] sm:$0xff] }
 0x397   : > { %v10060_v6 = vsel %vm1014_vm3, %v12147_v23, %v12145_v60  ;;  %v10067_v22 = vsel %vm1296_vm1, %v12150_v42, %v12148_v15  ;;  %12151 = vst [vmem:[#allocation64_spill] sm:$0xff] %v10071_v53  ;;  %v10090_v42 = vrot.slane %v9887_v1, %v11941_v39  ;;  %v3538_v60 = vmul.f32 %v9512_v20, %v3320_v24 }
 0x398   : > { %12152 = vst [vmem:[#allocation67_spill] sm:$0xff] %v10073_v26  ;;  %12154 = vst [vmem:[#allocation49_spill] sm:$0xff] %v10086_v49  ;;  %v10097_v15 = vsel %vm1014_vm3, %v3665_v40, %v12147_v23  ;;  %v10101_v62 = vrot.slane %v9903_v55, %v11959_v37  ;;  %v12157_v26 = vld [vmem:[#allocation72_spill] sm:$0xff]  ;;  %v12158_v1 = vrot.slane %v12149_v59, 2  ;;  %v10114_v20 = vmul.f32 %v10042_v44, %v9826_v61  ;;  %v12162_v23 = vld [vmem:[#allocation75_spill] sm:$0xff] }
 0x399   : > { %v3353_v30 = vsel %vm806_vm5, %v12157_v26, %v12156_v19  ;;  %v10118_v40 = vmul.f32 %v10046_v8, %v9826_v61  ;;  %v3314_v2 = vsel %vm769_vm4, %v12162_v23, %v12161_v11  ;;  %v10127_v59 = vrot.slane %v10082_v7, %v11931_v51 }
 0x39a   : > { %12155 = vst [vmem:[#allocation32_spill] sm:$0xff] %v10101_v62  ;;  %v10110_v27 = vsel %vm1296_vm1, %v3946_v25, %v12158_v1  ;;  %12159 = vst [vmem:[#allocation17_spill] sm:$0xff] %v10114_v20  ;;  %v10131_v25 = vrot.slane %v9903_v55, %v11941_v39  ;;  %v10136_v61 = vmul.f32 %v10086_v49, %v9844_v14  ;;  %v3561_v19 = vrot.slane %v3538_v60, 1  ;;  %v4223_v55 = vpop.permute.xlu1 %4222 }
 0x39b   : > { %12160 = vst [vmem:[#allocation119_spill] sm:$0xff] %v10118_v40  ;;  %12163 = vst [vmem:[#allocation115_spill] sm:$0xff] %v10127_v59  ;;  %v10140_v1 = vmul.f32 %v10090_v42, %v9880_v48  ;;  %v10144_v11 = vrot.slane %v9917_v16, %v12096_v4  ;;  %v3456_v23 = vadd.f32 %v3444_v31, %v3389_v50  ;;  %v12172_v53 = vrot.slane %v9744_v32, 1 }
 0x39c   : > { %12164 = vst [vmem:[#allocation88_spill] sm:$0xff] %v10136_v61  ;;  %v3491_v44 = vmul.f32 %v9524_v35, %v3353_v30  ;;  %v10149_v26 = vmul.f32 %v10101_v62, %v9880_v48  ;;  %v10152_v51 = vmul.f32 %v9558_v58, %v3314_v2  ;;  %v10158_v4 = vrot.slane %v9917_v16, %v11941_v39  ;;  %v12167_v35 = vld [vmem:[#allocation134_spill] sm:$0xff] }
 0x39d   : > { %12165 = vst [vmem:[#allocation89_spill] sm:$0xff] %v10144_v11  ;;  %v3819_v31 = vmul.f32 %v9633_v34, %v3320_v24  ;;  %v10165_v50 = vsel %vm1696_vm6, %v12167_v35, %v10048_v3  ;;  %v10169_v58 = vmul.f32 %v10131_v25, %v9844_v14  ;;  %v10173_v60 = vrot.slane %v9951_v43, %v11941_v39 }
 0x39e   : > { %12166 = vst [vmem:[#allocation23_spill] sm:$0xff] %v10149_v26  ;;  %12168 = vst [vmem:[#allocation48_spill] sm:$0xff] %v10165_v50  ;;  %v10179_v34 = vmul.f32 %v10144_v11, %v9844_v14  ;;  %v10183_v24 = vrot.slane %v9951_v43, %v11959_v37  ;;  %v3562_v20 = vsel %vm1014_vm3, %v12172_v53, %v3561_v19  ;;  %v3567_v59 = vrot.slane %v10152_v51, 1  ;;  %v12173_v11 = vld [vmem:[#allocation102_spill] sm:$0xff] }
 0x39f   : > { %12169 = vst [vmem:[#allocation43_spill] sm:$0xff] %v10173_v60  ;;  %v3503_v62 = vadd.f32 %v3491_v44, %v3456_v23  ;;  %v3728_v5 = vmul.f32 %v9611_v63, %v3353_v30  ;;  %v10193_v16 = vmul.f32 %v9925_v9, %v10165_v50  ;;  %v12174_v61 = vrot.slane %v12173_v11, 1  ;;  %v12176_v44 = vld [vmem:[#allocation133_spill] sm:$0xff]  ;;  %v4235_v63 = vpop.permute.xlu1 %4234 }
 0x3a0   : > { %12170 = vst [vmem:[#allocation126_spill] sm:$0xff] %v10179_v34  ;;  %12171 = vst [vmem:[#allocation90_spill] sm:$0xff] %v10183_v24  ;;  %v10200_v32 = vmul.f32 %v10158_v4, %v9880_v48  ;;  %v3842_v53 = vrot.slane %v3819_v31, 2  ;;  %v3391_v23 = vmul.f32 %v12176_v44, %v3314_v2  ;;  %v10206_v51 = vmul.f32 %v10173_v60, %v9844_v14  ;;  %v12180_v48 = vld [vmem:[#allocation104_spill] sm:$0xff]  ;;  %v12185_v44 = vld [vmem:[#allocation110_spill] sm:$0xff] }
 0x3a1   : > { %v3572_v43 = vsel %vm1014_vm3, %v3561_v19, %v12174_v61  ;;  %v3590_v37 = vadd.f32 %v3562_v20, %v9954_v18  ;;  %v10211_v11 = vmul.f32 %v9946_v13, %v10165_v50  ;;  %v12178_v19 = vld [vmem:[#allocation30_spill] sm:$0xff]  ;;  %v12179_v61 = vld [vmem:[#allocation37_spill] sm:$0xff]  ;;  %v3821_v49 = vmul.f32 %v12180_v48, %v3314_v2 }
 0x3a2   : > { %12175 = vst [vmem:[#allocation44_spill] sm:$0xff] %v10200_v32  ;;  %12177 = vst [vmem:[#allocation117_spill] sm:$0xff] %v10206_v51  ;;  %v10217_v31 = vsel %vm806_vm5, %v12179_v61, %v12178_v19  ;;  %v3594_v24 = vadd.f32 %v3572_v43, %v3503_v62  ;;  %v3751_v26 = vrot.slane %v3728_v5, 1  ;;  %v10223_v14 = vrot.slane %v10082_v7, %v11941_v39  ;;  %v12182_v18 = vld [vmem:[#allocation14_spill] sm:$0xff]  ;;  %v12187_v62 = vld [vmem:[#allocation92_spill] sm:$0xff] }
 0x3a3   : > { %v12183_v20 = vrot.slane %v12182_v18, 1  ;;  %v4428_v0 = vrot.slane %v10193_v16, 2  ;;  %v10231_v19 = vmul.f32 %v9936_v12, %v10165_v50  ;;  %v12186_v48 = vrot.slane %v12185_v44, 2  ;;  %v12188_v18 = vld [vmem:[#allocation138_spill] sm:$0xff]  ;;  %v12191_v50 = vld [vmem:[#allocation109_spill] sm:$0xff]  ;;  %v12192_v39 = vld [vmem:[#allocation40_spill] sm:$0xff]  ;;  %v4237_v51 = vpop.permute.xlu1 %4236 }
 0x3a4   : > { %12181 = vst [vmem:[#allocation74_spill] sm:$0xff] %v10223_v14  ;;  %v3458_v2 = vadd.f32 %v9997_v38, %v3391_v23  ;;  %v10241_v43 = vsel %vm1696_vm6, %v12187_v62, %v4223_v55  ;;  %v3493_v16 = vmul.f32 %v12188_v18, %v10217_v31  ;;  %v3689_v44 = vadd.f32 %v10027_v17, %v3590_v37  ;;  %v4231_v18 = vpop.permute.xlu0 %4230 }
 0x3a5   : > { %v3568_v40 = vsel %vm1014_vm3, %v12183_v20, %v3567_v59  ;;  %12184 = vst [vmem:[#allocation68_spill] sm:$0xff] %v10231_v19  ;;  %v3843_v5 = vsel %vm1296_vm1, %v12186_v48, %v3842_v53  ;;  %v12189_v20 = vld [vmem:[#allocation19_spill] sm:$0xff]  ;;  %v4009_v48 = vmul.f32 %v12191_v50, %v3353_v30  ;;  %v3848_v23 = vrot.slane %v3821_v49, 2 }
 0x3a6   : > { %v12190_v7 = vrot.slane %v12189_v20, 2  ;;  %v3592_v38 = vadd.f32 %v3568_v40, %v12192_v39  ;;  %v3693_v14 = vadd.f32 %v10016_v46, %v3594_v24  ;;  %v12193_v12 = vrot.slane %v9862_v21, 1  ;;  %v12194_v20 = vld [vmem:[#allocation24_spill] sm:$0xff]  ;;  %v12197_v46 = vld [vmem:[#allocation137_spill] sm:$0xff]  ;;  %v12200_v24 = vld [vmem:[#allocation15_spill] sm:$0xff] }
 0x3a7   : > { %v12195_v28 = vrot.slane %v12194_v20, 1  ;;  %v4395_v30 = vmul.f32 %v9925_v9, %v10241_v43  ;;  %v10265_v39 = vsel %vm1696_vm6, %v4231_v18, %v4237_v51  ;;  %v10270_v21 = vsel %vm1696_vm6, %v4223_v55, %v9989_v52  ;;  %v12198_v40 = vld [vmem:[#allocation141_spill] sm:$0xff] }
 0x3a8   : > { %v3853_v34 = vsel %vm1296_vm1, %v3842_v53, %v12190_v7  ;;  %v3752_v19 = vsel %vm1014_vm3, %v12193_v12, %v3751_v26  ;;  %v12196_v53 = vld [vmem:[#allocation58_spill] sm:$0xff]  ;;  %v3505_v12 = vadd.f32 %v3493_v16, %v3458_v2  ;;  %v3730_v17 = vmul.f32 %v12197_v46, %v10217_v31  ;;  %v12201_v55 = vld [vmem:[#allocation21_spill] sm:$0xff] }
 0x3a9   : > { %v3762_v7 = vsel %vm1014_vm3, %v3751_v26, %v12195_v28  ;;  %v4278_v37 = vmul.f32 %v12196_v53, %v10241_v43  ;;  %v10277_v28 = vsel %vm1696_vm6, %v9989_v52, %v4235_v63  ;;  %v3780_v49 = vadd.f32 %v3752_v19, %v3689_v44  ;;  %v12203_v19 = vld [vmem:[#allocation91_spill] sm:$0xff] }
 0x3aa   : > { %v4032_v9 = vrot.slane %v4009_v48, 2  ;;  %v12199_v26 = vrot.slane %v12198_v40, 1  ;;  %v4280_v20 = vmul.f32 %v12200_v24, %v10277_v28  ;;  %v12202_v53 = vrot.slane %v12201_v55, 2  ;;  %v12205_v40 = vld [vmem:[#allocation38_spill] sm:$0xff]  ;;  %v12207_v55 = vld [vmem:[#allocation60_spill] sm:$0xff] }
 0x3ab   : > { %v3784_v16 = vadd.f32 %v3762_v7, %v3693_v14  ;;  %v4397_v46 = vmul.f32 %v10090_v42, %v10277_v28  ;;  %v4401_v52 = vmul.f32 %v10090_v42, %v10265_v39  ;;  %v12204_v44 = vrot.slane %v12203_v19, 2 }
 0x3ac   : > { %v3576_v50 = vsel %vm1014_vm3, %v3567_v59, %v12199_v26  ;;  %v3849_v2 = vsel %vm1296_vm1, %v12202_v53, %v3848_v23  ;;  %v4325_v59 = vadd.f32 %v12205_v40, %v4278_v37  ;;  %v12206_v26 = vld [vmem:[#allocation118_spill] sm:$0xff]  ;;  %v4418_v61 = vrot.slane %v4395_v30, 2  ;;  %v12211_v30 = vld [vmem:[#allocation116_spill] sm:$0xff] }
 0x3ad   : > { %v3857_v48 = vsel %vm1296_vm1, %v3848_v23, %v12204_v44  ;;  %v4356_v24 = vmul.f32 %v12206_v26, %v10270_v21  ;;  %v10299_v53 = vmul.f32 %v12207_v55, %v10270_v21  ;;  %v3596_v14 = vadd.f32 %v3576_v50, %v3505_v12  ;;  %v12210_v44 = vld [vmem:[#allocation66_spill] sm:$0xff]  ;;  %v12212_v55 = vld [vmem:[#allocation83_spill] sm:$0xff] }
 0x3ae   : > { %v3757_v7 = vrot.slane %v3730_v17, 1  ;;  %v10304_v42 = vsel %vm1696_vm6, %v4235_v63, %v12187_v62  ;;  %v3871_v19 = vadd.f32 %v3843_v5, %v3780_v49  ;;  %v12209_v23 = vrot.slane %v9890_v33, 2 }
 0x3af   : > { %12208 = vst [vmem:[#allocation120_spill] sm:$0xff] %v10299_v53  ;;  %v4327_v40 = vadd.f32 %v12210_v44, %v4280_v20  ;;  %v4358_v26 = vmul.f32 %v12211_v30, %v10304_v42  ;;  %v3875_v60 = vadd.f32 %v3853_v34, %v3784_v16  ;;  %v12213_v53 = vrot.slane %v12212_v55, 2  ;;  %v12215_v20 = vld [vmem:[#allocation93_spill] sm:$0xff]  ;;  %v12217_v16 = vld [vmem:[#allocation106_spill] sm:$0xff] }
 0x3b0   : > { %v4033_v37 = vsel %vm1296_vm1, %v12209_v23, %v4032_v9  ;;  %v4424_v17 = vrot.slane %v4397_v46, 2  ;;  %v4432_v50 = vrot.slane %v4401_v52, 2  ;;  %v4364_v32 = vadd.f32 %v4356_v24, %v4325_v59 }
 0x3b1   : > { %v4043_v12 = vsel %vm1296_vm1, %v4032_v9, %v12213_v53  ;;  %v12214_v63 = vrot.slane %v9966_v41, 2  ;;  %v4429_v33 = vsel %vm1296_vm1, %v4418_v61, %v4428_v0  ;;  %v3691_v62 = vadd.f32 %v10097_v15, %v3592_v38 }
 0x3b2   : > { %v3695_v49 = vadd.f32 %v10060_v6, %v3596_v14  ;;  %v12216_v23 = vrot.slane %v12215_v20, 1  ;;  %v12218_v44 = vrot.slane %v12217_v16, 1  ;;  %v10330_v41 = vsel %vm1696_vm6, %v10048_v3, %v4231_v18  ;;  %v12227_v16 = vld [vmem:[#allocation124_spill] sm:$0xff] }
 0x3b3   : > { %v4419_v5 = vsel %vm1296_vm1, %v12214_v63, %v4418_v61  ;;  %v4366_v46 = vadd.f32 %v4358_v26, %v4327_v40  ;;  %v4569_v0 = vmul.f32 %v10020_v47, %v10270_v21  ;;  %v4573_v6 = vmul.f32 %v10020_v47, %v10330_v41  ;;  %v12222_v63 = vld [vmem:[#allocation69_spill] sm:$0xff] }
 0x3b4   : > { %v3758_v34 = vsel %vm1014_vm3, %v12216_v23, %v3757_v7  ;;  %v3766_v9 = vsel %vm1014_vm3, %v3757_v7, %v12218_v44  ;;  %v10339_v15 = vsel %vm1696_vm6, %v4237_v51, %v12167_v35  ;;  %v12219_v61 = vrot.slane %v10140_v1, 2  ;;  %v12220_v35 = vld [vmem:[#allocation131_spill] sm:$0xff]  ;;  %v12225_v23 = vld [vmem:[#allocation20_spill] sm:$0xff] }
 0x3b5   : > { %v4571_v3 = vmul.f32 %v10131_v25, %v10304_v42  ;;  %v4433_v18 = vsel %vm1296_vm1, %v4424_v17, %v4432_v50  ;;  %v4575_v52 = vmul.f32 %v10131_v25, %v10339_v15  ;;  %v3970_v59 = vadd.f32 %v10053_v36, %v3871_v19 }
 0x3b6   : > { %v4425_v38 = vsel %vm1296_vm1, %v12219_v61, %v4424_v17  ;;  %v4652_v47 = vmul.f32 %v9946_v13, %v10241_v43  ;;  %v3782_v57 = vadd.f32 %v3758_v34, %v3691_v62  ;;  %v4011_v51 = vmul.f32 %v12220_v35, %v10217_v31 }
 0x3b7   : > { %v3974_v1 = vadd.f32 %v10034_v10, %v3875_v60  ;;  %v4443_v24 = vadd.f32 %v4419_v5, %v9960_v29  ;;  %v4447_v53 = vadd.f32 %v4429_v33, %v4364_v32  ;;  %v3786_v14 = vadd.f32 %v3766_v9, %v3695_v49  ;;  %v12221_v32 = vld [vmem:[#allocation96_spill] sm:$0xff]  ;;  %v12224_v49 = vld [vmem:[#allocation13_spill] sm:$0xff] }
 0x3b8   : > { %v4592_v7 = vrot.slane %v4569_v0, 2  ;;  %v4602_v40 = vrot.slane %v4573_v6, 2  ;;  %v4445_v30 = vadd.f32 %v4425_v38, %v9981_v54  ;;  %v4449_v25 = vadd.f32 %v4433_v18, %v4366_v46  ;;  %v12229_v0 = vld [vmem:[#allocation26_spill] sm:$0xff] }
 0x3b9   : > { %v4598_v26 = vrot.slane %v4571_v3, 2  ;;  %v4654_v36 = vmul.f32 %v10158_v4, %v10277_v28  ;;  %v4606_v13 = vrot.slane %v4575_v52, 2  ;;  %v4658_v19 = vmul.f32 %v10158_v4, %v10265_v39 }
 0x3ba   : > { %v4061_v31 = vadd.f32 %v4033_v37, %v3970_v59  ;;  %v4675_v55 = vrot.slane %v4652_v47, 4  ;;  %v3873_v10 = vadd.f32 %v3849_v2, %v3782_v57  ;;  %v4038_v60 = vrot.slane %v4011_v51, 2  ;;  %v12232_v57 = vld [vmem:[#allocation44_spill] sm:$0xff] }
 0x3bb   : > { %v4065_v29 = vadd.f32 %v4043_v12, %v3974_v1  ;;  %v4534_v17 = vadd.f32 %v12221_v32, %v4443_v24  ;;  %v3877_v50 = vadd.f32 %v3857_v48, %v3786_v14  ;;  %v4538_v5 = vadd.f32 %v12222_v63, %v4447_v53  ;;  %v12235_v14 = vld [vmem:[#allocation121_spill] sm:$0xff]  ;;  %v12240_v63 = vld [vmem:[#allocation120_spill] sm:$0xff] }
 0x3bc   : > { %v12223_v54 = vrot.slane %v10077_v45, 2  ;;  %v4603_v62 = vsel %vm1296_vm1, %v4592_v7, %v4602_v40  ;;  %v4536_v20 = vadd.f32 %v12224_v49, %v4445_v30  ;;  %v4540_v4 = vadd.f32 %v12225_v23, %v4449_v25  ;;  %v12236_v40 = vld [vmem:[#allocation59_spill] sm:$0xff]  ;;  %v12238_v25 = vld [vmem:[#allocation117_spill] sm:$0xff] }
 0x3bd   : > { %v12226_v37 = vrot.slane %v10169_v58, 2  ;;  %v4681_v12 = vrot.slane %v4654_v36, 4  ;;  %v4607_v34 = vsel %vm1296_vm1, %v4598_v26, %v4606_v13  ;;  %v4689_v48 = vrot.slane %v4658_v19, 4  ;;  %v12239_v36 = vld [vmem:[#allocation68_spill] sm:$0xff] }
 0x3be   : > { %v4593_v33 = vsel %vm1296_vm1, %v12223_v54, %v4592_v7  ;;  %v4098_v44 = vmul.f32 %v12227_v16, %v4061_v31  ;;  %v12228_v45 = vrot.slane %v9986_v56, 4  ;;  %v3972_v46 = vadd.f32 %v10110_v27, %v3873_v10 }
 0x3bf   : > { %v4599_v2 = vsel %vm1296_vm1, %v12226_v37, %v4598_v26  ;;  %v12230_v6 = vrot.slane %v12229_v0, 2  ;;  %v3976_v58 = vadd.f32 %v10067_v22, %v3877_v50  ;;  %v4617_v38 = vadd.f32 %v4593_v33, %v4534_v17  ;;  %v12234_v22 = vld [vmem:[#allocation43_spill] sm:$0xff] }
 0x3c0   : > { %v4676_v9 = vsel %vm2130_vm2, %v12228_v45, %v4675_v55  ;;  %v4621_v3 = vadd.f32 %v4603_v62, %v4538_v5  ;;  %v12231_v18 = vrot.slane %v10211_v11, 4  ;;  %v4822_v59 = vmul.f32 %v10046_v8, %v10270_v21  ;;  %v12241_v5 = vld [vmem:[#allocation57_spill] sm:$0xff] }
 0x3c1   : > { %v4039_v61 = vsel %vm1296_vm1, %v12230_v6, %v4038_v60  ;;  %v4826_v56 = vmul.f32 %v10046_v8, %v10330_v41  ;;  %v4619_v47 = vadd.f32 %v4599_v2, %v4536_v20  ;;  %v4623_v27 = vadd.f32 %v4607_v34, %v4540_v4  ;;  %v12242_v20 = vld [vmem:[#allocation33_spill] sm:$0xff]  ;;  %v12244_v2 = vld [vmem:[#allocation123_spill] sm:$0xff] }
 0x3c2   : > { %v4686_v52 = vsel %vm2130_vm2, %v4675_v55, %v12231_v18  ;;  %v12233_v35 = vrot.slane %v12232_v57, 4  ;;  %v4824_v1 = vmul.f32 %v12234_v22, %v10304_v42  ;;  %v4690_v24 = vsel %vm2130_vm2, %v4681_v12, %v4689_v48  ;;  %v12243_v4 = vld [vmem:[#allocation129_spill] sm:$0xff]  ;;  %v12245_v48 = vld [vmem:[#allocation16_spill] sm:$0xff]  ;;  %v12248_v6 = vld [vmem:[#allocation119_spill] sm:$0xff] }
 0x3c3   : > { %v4828_v11 = vmul.f32 %v12234_v22, %v10339_v15  ;;  %v4102_v53 = vmul.f32 %v12227_v16, %v4065_v29  ;;  %v4131_v7 = vadd.f32 %v12235_v14, %v4098_v44  ;;  %v12237_v8 = vrot.slane %v12236_v40, 2  ;;  %v12246_v44 = vld [vmem:[#allocation27_spill] sm:$0xff] }
 0x3c4   : > { %v4682_v51 = vsel %vm2130_vm2, %v12233_v35, %v4681_v12  ;;  %v4850_v26 = vrot.slane %v12238_v25, 4  ;;  %v4600_v13 = vrot.slane %v12239_v36, 2  ;;  %v4063_v19 = vadd.f32 %v4039_v61, %v3972_v46  ;;  %v12247_v46 = vld [vmem:[#allocation108_spill] sm:$0xff] }
 0x3c5   : > { %v4047_v30 = vsel %vm1296_vm1, %v4038_v60, %v12237_v8  ;;  %v4704_v31 = vadd.f32 %v4686_v52, %v4621_v3  ;;  %v4700_v55 = vadd.f32 %v4676_v9, %v4617_v38  ;;  %v4845_v10 = vrot.slane %v4822_v59, 4  ;;  %v12250_v38 = vld [vmem:[#allocation36_spill] sm:$0xff]  ;;  %v12251_v52 = vld [vmem:[#allocation22_spill] sm:$0xff] }
 0x3c6   : > { %v4855_v32 = vrot.slane %v4826_v56, 4  ;;  %v4702_v17 = vadd.f32 %v4682_v51, %v4619_v47  ;;  %v4706_v50 = vadd.f32 %v4690_v24, %v4623_v27  ;;  %v4326_v29 = vadd.f32 %v12241_v5, %v12240_v63  ;;  %v12252_v27 = vld [vmem:[#allocation39_spill] sm:$0xff]  ;;  %v12253_v51 = vld [vmem:[#allocation49_spill] sm:$0xff]  ;;  %v12254_v24 = vld [vmem:[#allocation28_spill] sm:$0xff] }
 0x3c7   : > { %v4067_v54 = vadd.f32 %v4047_v30, %v3976_v58  ;;  %v4851_v33 = vrot.slane %v4824_v1, 4  ;;  %v4859_v62 = vrot.slane %v4828_v11, 4  ;;  %v4135_v49 = vadd.f32 %v12235_v14, %v4102_v53  ;;  %v12255_v8 = vld [vmem:[#allocation18_spill] sm:$0xff]  ;;  %v12257_v63 = vld [vmem:[#allocation64_spill] sm:$0xff] }
 0x3c8   : > { %v4143_v60 = vmax.f32 %v4131_v7, 0.0  ;;  %v10409_v23 = vmul.f32 %v12242_v20, %v10241_v43  ;;  %v4396_v37 = vmul.f32 %v12243_v4, %v10270_v21  ;;  %v4100_v12 = vmul.f32 %v12244_v2, %v4063_v19  ;;  %v10442_v25 = vld [vmem:[%s11133_s6 + $0x7] ss:$8 sm:$0xf] }
 0x3c9   : > { %v4400_v34 = vmul.f32 %v12243_v4, %v10330_v41  ;;  %v4791_v16 = vadd.f32 %v12245_v48, %v4704_v31  ;;  %v4787_v45 = vadd.f32 %v12246_v44, %v4700_v55  ;;  %v4856_v9 = vsel %vm2130_vm2, %v4845_v10, %v4855_v32  ;;  %v12256_v32 = vld [vmem:[#allocation97_spill] sm:$0xff] }
 0x3ca   : > { %v4793_v0 = vadd.f32 %v12247_v46, %v4706_v50  ;;  %v12249_v61 = vrot.slane %v12248_v6, 4  ;;  %v4789_v3 = vadd.f32 %v12250_v38, %v4702_v17  ;;  %v4104_v18 = vmul.f32 %v12244_v2, %v4067_v54  ;;  %v12260_v2 = vld [vmem:[#allocation7_spill] sm:$0xff]  ;;  %v12262_v48 = vld [vmem:[#allocation9_spill] sm:$0xff] }
 0x3cb   : > { %v4277_v59 = vmul.f32 %v12251_v52, %v10304_v42  ;;  %v4860_v56 = vsel %vm2130_vm2, %v4851_v33, %v4859_v62  ;;  %v4852_v47 = vsel %vm2130_vm2, %v4850_v26, %v4851_v33  ;;  %v4357_v57 = vmul.f32 %v12252_v27, %v10277_v28  ;;  %v12265_v52 = vld [vmem:[#allocation88_spill] sm:$0xff] }
 0x3cc   : > { %v4846_v58 = vsel %vm2130_vm2, %v12249_v61, %v4845_v10  ;;  %v4421_v35 = vrot.slane %v4396_v37, 2  ;;  %v4394_v22 = vmul.f32 %v12253_v51, %v10304_v42  ;;  %v4398_v1 = vmul.f32 %v12253_v51, %v10339_v15 }
 0x3cd   : > { %v4355_v11 = vmul.f32 %v12254_v24, %v10241_v43  ;;  %v4430_v53 = vrot.slane %v4400_v34, 2  ;;  %v4874_v14 = vadd.f32 %v4856_v9, %v4791_v16  ;;  %v4870_v7 = vadd.f32 %v4846_v58, %v4787_v45  ;;  %v12263_v9 = vld [vmem:[#allocation32_spill] sm:$0xff]  ;;  %v12264_v58 = vld [vmem:[#allocation65_spill] sm:$0xff] }
 0x3ce   : > { %v4589_v40 = vrot.slane %v10409_v23, 2  ;;  %v4133_v30 = vadd.f32 %v12255_v8, %v4100_v12  ;;  %v4876_v26 = vadd.f32 %v4860_v56, %v4793_v0  ;;  %v4872_v19 = vadd.f32 %v4852_v47, %v4789_v3  ;;  %v12259_v23 = vld [vmem:[#allocation115_spill] sm:$0xff]  ;;  %v12261_v12 = vld [vmem:[#allocation74_spill] sm:$0xff] }
 0x3cf   : > { %v4147_v31 = vmax.f32 %v4135_v49, 0.0  ;;  %v4169_v55 = vrot.slane %v4143_v60, 1  ;;  %v4137_v10 = vadd.f32 %v12255_v8, %v4104_v18  ;;  %v4324_v17 = vadd.f32 %v12256_v32, %v4277_v59  ;;  %v12269_v8 = vld [vmem:[#allocation89_spill] sm:$0xff] }
 0x3d0   : > { %v4365_v50 = vadd.f32 %v4357_v57, %v4326_v29  ;;  %v12258_v5 = vrot.slane %v12257_v63, 2  ;;  %v4415_v33 = vrot.slane %v4394_v22, 2  ;;  %v4426_v62 = vrot.slane %v4398_v1, 2  ;;  %v12271_v63 = vld [vmem:[#allocation42_spill] sm:$0xff] }
 0x3d1   : > { %v4431_v20 = vsel %vm1296_vm1, %v4421_v35, %v4430_v53  ;;  %v4907_v4 = vmul.f32 %v12259_v23, %v4874_v14  ;;  %v4903_v37 = vmul.f32 %v12259_v23, %v4870_v7  ;;  %v4918_v49 = vrot.slane %v10442_v25, %v12260_v2  ;;  %v12268_v14 = vld [vmem:[#allocation113_spill] sm:$0xff]  ;;  %v12273_v23 = vld [vmem:[#allocation67_spill] sm:$0xff] }
 0x3d2   : > { %v4422_v54 = vsel %vm1296_vm1, %v12258_v5, %v4421_v35  ;;  %v4145_v60 = vmax.f32 %v4133_v30, 0.0  ;;  %v4909_v34 = vmul.f32 %v12261_v12, %v4876_v26  ;;  %v4905_v29 = vmul.f32 %v12261_v12, %v4872_v19  ;;  %v12267_v35 = vld [vmem:[#allocation82_spill] sm:$0xff] }
 0x3d3   : > { %v4926_v16 = vrot.slane %v10442_v25, %v12262_v48  ;;  %v4149_v44 = vmax.f32 %v4137_v10, 0.0  ;;  %v4363_v45 = vadd.f32 %v4355_v11, %v4324_v17  ;;  %v4570_v46 = vmul.f32 %v12263_v9, %v10277_v28 }
 0x3d4   : > { %v4574_v0 = vmul.f32 %v12263_v9, %v10265_v39  ;;  %v4170_v6 = vrot.slane %v4147_v31, 1  ;;  %v4448_v61 = vadd.f32 %v4431_v20, %v4365_v50  ;;  %v4653_v38 = vmul.f32 %v12264_v58, %v10270_v21  ;;  %v12270_v31 = vld [vmem:[#allocation99_spill] sm:$0xff] }
 0x3d5   : > { %v4427_v3 = vsel %vm1296_vm1, %v4415_v33, %v4426_v62  ;;  %v4657_v18 = vmul.f32 %v12264_v58, %v10330_v41  ;;  %v12266_v59 = vrot.slane %v12265_v52, 2  ;;  %v10470_v47 = vadd.f32 %v4918_v49, %v4903_v37 }
 0x3d6   : > { %v10472_v27 = vadd.f32 %v4918_v49, %v4907_v4  ;;  %v4175_v57 = vrot.slane %v4145_v60, 1  ;;  %v4444_v51 = vadd.f32 %v4422_v54, %v12267_v35  ;;  %v10475_v22 = vadd.f32 %v4926_v16, %v4905_v29 }
 0x3d7   : > { %v4416_v56 = vsel %vm1296_vm1, %v12266_v59, %v4415_v33  ;;  %v10477_v1 = vadd.f32 %v4926_v16, %v4909_v34  ;;  %v4176_v21 = vrot.slane %v4149_v44, 1  ;;  %v4595_v24 = vrot.slane %v4570_v46, 2  ;;  %v12272_v33 = vld [vmem:[#allocation98_spill] sm:$0xff]  ;;  %v12275_v34 = vld [vmem:[#allocation25_spill] sm:$0xff]  ;;  %v12281_v59 = vld [vmem:[#allocation48_spill] sm:$0xff] }
 0x3d8   : > { %v4446_v11 = vadd.f32 %v4427_v3, %v4363_v45  ;;  %v4604_v53 = vrot.slane %v4574_v0, 2  ;;  %v4678_v41 = vrot.slane %v4653_v38, 4  ;;  %v4442_v7 = vadd.f32 %v4416_v56, %v12268_v14  ;;  %v12277_v44 = vld [vmem:[#allocation70_spill] sm:$0xff]  ;;  %v12278_v0 = vld [vmem:[#allocation23_spill] sm:$0xff] }
 0x3d9   : > { %v4651_v30 = vmul.f32 %v12269_v8, %v10304_v42  ;;  %v4655_v26 = vmul.f32 %v12269_v8, %v10339_v15  ;;  %v4687_v19 = vrot.slane %v4657_v18, 4  ;;  %v4539_v10 = vadd.f32 %v12270_v31, %v4448_v61  ;;  %v12280_v38 = vld [vmem:[#allocation90_spill] sm:$0xff] }
 0x3da   : > { %v11472_v32 = vmax.f32 %v10470_v47, 0.0  ;;  %v11471_v17 = vmax.f32 %v10472_v27, 0.0  ;;  %v10488_v50 = vsel %vm1014_vm3, %v4169_v55, %v4170_v6  ;;  %v10492_v5 = vsel %vm1014_vm3, %v4170_v6, %v12271_v63  ;;  %v12274_v55 = vld [vmem:[#allocation79_spill] sm:$0xff]  ;;  %v12282_v56 = vld [vmem:[#allocation46_spill] sm:$0xff] }
 0x3db   : > { %v11470_v54 = vmax.f32 %v10475_v22, 0.0  ;;  %v11469_v42 = vmax.f32 %v10477_v1, 0.0  ;;  %v4537_v15 = vadd.f32 %v12272_v33, %v4446_v11  ;;  %v4605_v62 = vsel %vm1296_vm1, %v4595_v24, %v4604_v53  ;;  %v12284_v11 = vld [vmem:[#allocation73_spill] sm:$0xff]  ;;  %v12286_v8 = vld [vmem:[#allocation126_spill] sm:$0xff] }
 0x3dc   : > { %v10499_v20 = vsel %vm1014_vm3, %v4175_v57, %v4176_v21  ;;  %v10503_v4 = vsel %vm1014_vm3, %v4176_v21, %v12273_v23  ;;  %v4533_v37 = vadd.f32 %v12274_v55, %v4442_v7  ;;  %v4601_v49 = vsel %vm1296_vm1, %v4589_v40, %v4600_v13  ;;  %v12293_v23 = vld [vmem:[#allocation139_spill] sm:$0xff] }
 0x3dd   : > { %v4672_v60 = vrot.slane %v4651_v30, 4  ;;  %v4683_v12 = vrot.slane %v4655_v26, 4  ;;  %v12276_v29 = vrot.slane %v12275_v34, 2  ;;  %v4535_v45 = vadd.f32 %v12277_v44, %v4444_v51 }
 0x3de   : > { %v4956_v9 = vadd.f32 %v11472_v32, %v10488_v50  ;;  %v4960_v46 = vadd.f32 %v11471_v17, %v10492_v5  ;;  %v12279_v36 = vrot.slane %v12278_v0, 2  ;;  %v4622_v6 = vadd.f32 %v4605_v62, %v4539_v10  ;;  %v12290_v10 = vld [vmem:[#allocation114_spill] sm:$0xff]  ;;  %v12299_v0 = vld [vmem:[#allocation35_spill] sm:$0xff] }
 0x3df   : > { %v4590_v16 = vsel %vm1296_vm1, %v12276_v29, %v4589_v40  ;;  %v4958_v61 = vadd.f32 %v11470_v54, %v10499_v20  ;;  %v4962_v40 = vadd.f32 %v11469_v42, %v10503_v4  ;;  %v4688_v58 = vsel %vm2130_vm2, %v4678_v41, %v4687_v19 }
 0x3e0   : > { %v4596_v13 = vsel %vm1296_vm1, %v12279_v36, %v4595_v24  ;;  %v4823_v3 = vmul.f32 %v12280_v38, %v10277_v28  ;;  %v4620_v18 = vadd.f32 %v4601_v49, %v4537_v15  ;;  %v4827_v52 = vmul.f32 %v12280_v38, %v10265_v39  ;;  %v12283_v24 = vld [vmem:[#allocation136_spill] sm:$0xff]  ;;  %v12288_v39 = vld [vmem:[#allocation17_spill] sm:$0xff]  ;;  %v12291_v15 = vld [vmem:[#allocation103_spill] sm:$0xff] }
 0x3e1   : > { %v4825_v57 = vmul.f32 %v12282_v56, %v12281_v59  ;;  %v4821_v35 = vmul.f32 %v12282_v56, %v10241_v43  ;;  %v4616_v51 = vadd.f32 %v4590_v16, %v4533_v37  ;;  %v4684_v21 = vsel %vm2130_vm2, %v4672_v60, %v4683_v12  ;;  %v12297_v16 = vld [vmem:[#allocation56_spill] sm:$0xff] }
 0x3e2   : > { %v12285_v53 = vrot.slane %v12284_v11, 2  ;;  %v4618_v7 = vadd.f32 %v4596_v13, %v4535_v45  ;;  %v12287_v28 = vrot.slane %v12286_v8, 4  ;;  %v4970_v26 = vadd.f32 %v4960_v46, %v4956_v9 }
 0x3e3   : > { %v12289_v19 = vrot.slane %v12288_v39, 4  ;;  %v4819_v43 = vmul.f32 %v12280_v38, %v12290_v10  ;;  %v4705_v63 = vadd.f32 %v4688_v58, %v4622_v6  ;;  %v4984_v33 = vadd.f32 %v4962_v40, %v4958_v61  ;;  %v12301_v6 = vld [vmem:[#allocation130_spill] sm:$0xff] }
 0x3e4   : > { %v3979_v14 = vadd.f32 %v12285_v53, %v12283_v24  ;;  %v4673_v30 = vsel %vm2130_vm2, %v12287_v28, %v4672_v60  ;;  %v12292_v62 = vrot.slane %v12291_v15, 4  ;;  %v12294_v55 = vrot.slane %v12293_v23, 4  ;;  %v12295_v60 = vld [vmem:[#allocation12_spill] sm:$0xff]  ;;  %v12306_v53 = vld [vmem:[#allocation77_spill] sm:$0xff]  ;;  %v12309_v15 = vld [vmem:[#allocation6_spill] sm:$0xff] }
 0x3e5   : > { %v4679_v31 = vsel %vm2130_vm2, %v12289_v19, %v4678_v41  ;;  %v4848_v49 = vrot.slane %v4823_v3, 4  ;;  %v4703_v12 = vadd.f32 %v4684_v21, %v4620_v18  ;;  %v4857_v34 = vrot.slane %v4827_v52, 4  ;;  %v12303_v3 = vld [vmem:[#allocation100_spill] sm:$0xff]  ;;  %v2733_v28 = vld [vmem:[%s11135_s8] sm:$0x1] }
 0x3e6   : > { %v4775_v37 = vsel %vm2130_vm2, %v12294_v55, %v12292_v62  ;;  %v12296_v29 = vrot.slane %v12295_v60, 4  ;;  %v12298_v44 = vrot.slane %v12297_v16, 4  ;;  %v4853_v45 = vrot.slane %v4825_v57, 4  ;;  %v12307_v19 = vld [vmem:[#allocation8_spill] sm:$0xff]  ;;  %v2752_v60 = vld [vmem:[%s11136_s9 + $0x70] sm:$0xff] }
 0x3e7   : > { %v4842_v9 = vrot.slane %v4821_v35, 4  ;;  %v4699_v46 = vadd.f32 %v4673_v30, %v4616_v51  ;;  %v12300_v36 = vrot.slane %v12299_v0, 2  ;;  %v4841_v61 = vrot.slane %v12301_v6, 4  ;;  %v12305_v51 = vld [vmem:[#allocation95_spill] sm:$0xff]  ;;  %v2769_v0 = vld [vmem:[%s11136_s9 + $0xf8] sm:$0xff] }
 0x3e8   : > { %v4771_v41 = vsel %vm2130_vm2, %v12298_v44, %v12296_v29  ;;  %v4701_v40 = vadd.f32 %v4679_v31, %v4618_v7  ;;  %v4971_v58 = vrot.slane %v4970_v26, 4  ;;  %v12302_v38 = vmov %v12294_v55  ;;  %v12308_v31 = vld [vmem:[#allocation47_spill] sm:$0xff]  ;;  %v2759_v29 = vld [vmem:[%s11136_s9 + $0xa8] sm:$0xff]  ;;  %v12310_v44 = vld [vmem:[#allocation128_spill] sm:$0xff] }
 0x3e9   : > { %v4070_v13 = vadd.f32 %v12300_v36, %v3979_v14  ;;  %v12304_v18 = vrot.slane %v12303_v3, 4  ;;  %v4847_v59 = vrot.slane %v4819_v43, 4  ;;  %v4792_v56 = vadd.f32 %v4775_v37, %v4705_v63  ;;  %v2735_v37 = vld [vmem:[%s11135_s8 + $0x1] sm:$0x1] }
 0x3ea   : > { %v4985_v21 = vrot.slane %v4984_v33, 4  ;;  %v4790_v24 = vadd.f32 %v4771_v41, %v4703_v12  ;;  %v4858_v57 = vsel %vm2130_vm2, %v4848_v49, %v4857_v34  ;;  %v4854_v35 = vsel %vm2130_vm2, %v4842_v9, %v4853_v45 }
 0x3eb   : > { %v4766_v52 = vsel %vm2130_vm2, %v12304_v18, %v12302_v38  ;;  %v4786_v11 = vadd.f32 %v12305_v51, %v4699_v46  ;;  %v4107_v14 = vmul.f32 %v12306_v53, %v4070_v13  ;;  %v4843_v7 = vsel %vm2130_vm2, %v4841_v61, %v4842_v9  ;;  %v2767_v9 = vld [vmem:[%s11136_s9 + $0xe8] sm:$0xff]  ;;  %v2761_v46 = vld [vmem:[%s11136_s9 + $0xb8] sm:$0xff]  ;;  %v2758_v18 = vld [vmem:[%s11136_s9 + $0xa0] sm:$0xff] }
 0x3ec   : > { %v4788_v8 = vadd.f32 %v4766_v52, %v4701_v40  ;;  %v4972_v30 = vadd.f32 %v4971_v58, %v4970_v26  ;;  %v4849_v39 = vsel %vm2130_vm2, %v4847_v59, %v4848_v49  ;;  %v4893_v10 = vrot.slane %v12308_v31, %v12307_v19  ;;  %v2742_v26 = vld [vmem:[%s11136_s9 + $0x20] sm:$0xff] }
 0x3ed   : > { %v4875_v43 = vadd.f32 %v4858_v57, %v4792_v56  ;;  %v4986_v63 = vadd.f32 %v4985_v21, %v4984_v33  ;;  %v4885_v62 = vrot.slane %v12308_v31, %v12309_v15  ;;  %v4873_v23 = vadd.f32 %v4854_v35, %v4790_v24  ;;  %v2750_v49 = vld [vmem:[%s11136_s9 + $0x60] sm:$0xff]  ;;  %v2744_v33 = vld [vmem:[%s11136_s9 + $0x30] sm:$0xff] }
 0x3ee   : > { %v4869_v16 = vadd.f32 %v4843_v7, %v4786_v11  ;;  %v4140_v41 = vadd.f32 %v12310_v44, %v4107_v14  ;;  %v4871_v45 = vadd.f32 %v4849_v39, %v4788_v8  ;;  %v4973_v36 = vrot.slane %v4972_v30, 2  ;;  %v2766_v52 = vld [vmem:[%s11136_s9 + $0xe0] sm:$0xff]  ;;  %v2760_v57 = vld [vmem:[%s11136_s9 + $0xb0] sm:$0xff]  ;;  %v5040_v7 = vld [vmem:[%s11138_s11 + $0x188] sm:$0xff] }
 0x3ef   : > { %v4922_v13 = vrot.slane %v10442_v25, %v12307_v19  ;;  %v4908_v6 = vmul.f32 %v4893_v10, %v4875_v43  ;;  %v4987_v40 = vrot.slane %v4986_v63, 2  ;;  %v4906_v58 = vmul.f32 %v4885_v62, %v4873_v23  ;;  %v2768_v35 = vld [vmem:[%s11136_s9 + $0xf0] sm:$0xff]  ;;  %v5007_v51 = vld [vmem:[%s11138_s11 + $0x80] sm:$0xff]  ;;  %v5010_v44 = vld [vmem:[%s11138_s11 + $0x98] sm:$0xff] }
 0x3f0   : > { %v6224_v38 = vpack.c.bf16 %v2750_v49, %v2742_v26  ;;  %v6232_v3 = vpack.c.bf16 %v2752_v60, %v2744_v33  ;;  %v4914_v59 = vrot.slane %v10442_v25, %v12309_v15  ;;  %v6226_v21 = vpack.c.bf16 %v2767_v9, %v2759_v29  ;;  %v5008_v25 = vld [vmem:[%s11138_s11 + $0x88] sm:$0xff]  ;;  %v5039_v14 = vld [vmem:[%s11138_s11 + $0x180] sm:$0xff]  ;;  %v5009_v33 = vld [vmem:[%s11138_s11 + $0x90] sm:$0xff] }
 0x3f1   : > { %v6234_v24 = vpack.c.bf16 %v2769_v0, %v2761_v46  ;;  %v4902_v11 = vmul.f32 %v4885_v62, %v4869_v16  ;;  %v4904_v53 = vmul.f32 %v4893_v10, %v4871_v45  ;;  %v4974_v8 = vadd.f32 %v4973_v36, %v4972_v30  ;;  %v4991_v30 = vld [vmem:[%s11138_s11] sm:$0xff]  ;;  %v5042_v45 = vld [vmem:[%s11138_s11 + $0x198] sm:$0xff] }
 0x3f2   : > { %v10636_v39 = vadd.f32 %v4922_v13, %v4908_v6  ;;  %v4988_v31 = vadd.f32 %v4987_v40, %v4986_v63  ;;  %v6228_v10 = vpack.c.bf16 %v2766_v52, %v2758_v18  ;;  %v6236_v43 = vpack.c.bf16 %v2768_v35, %v2760_v57  ;;  %v4994_v6 = vld [vmem:[%s11138_s11 + $0x18] sm:$0xff]  ;;  %v5011_v52 = vld [vmem:[%s11138_s11 + $0xa0] sm:$0xff]  ;;  %v5044_v35 = vld [vmem:[%s11138_s11 + $0x1a8] sm:$0xff] }
 0x3f3   : > { %v10640_v62 = vadd.f32 %v4914_v59, %v4906_v58  ;;  %v6238_v23 = vpack.c.bf16 %v5008_v25, %v5007_v51  ;;  %v10648_v26 = vadd.f32 %v4914_v59, %v4902_v11  ;;  %v12311_v63 = vmov 0.0   ;;  %v5026_v18 = vld [vmem:[%s11138_s11 + $0x118] sm:$0xff]  ;;  %v5012_v59 = vld [vmem:[%s11138_s11 + $0xa8] sm:$0xff]  ;;  %v5043_v57 = vld [vmem:[%s11138_s11 + $0x1a0] sm:$0xff] }
 0x3f4   : > { %v4975_v49 = vrot.slane %v4974_v8, 1  ;;  %v10661_v60 = vadd.f32 %v4922_v13, %v4904_v53  ;;  %v4989_v16 = vrot.slane %v4988_v31, 1  ;;  %v4945_v0 = vmax.f32 %v10636_v39, 0.0  ;;  %v4993_v13 = vld [vmem:[%s11138_s11 + $0x10] sm:$0xff]  ;;  %v12312_v51 = vld [vmem:[#allocation80_spill] sm:$0xff]  ;;  %v12313_v25 = vld [vmem:[#allocation86_spill] sm:$0xff] }
 0x3f5   : > { %v4943_v46 = vmax.f32 %v10640_v62, 0.0  ;;  %v4939_v40 = vmax.f32 %v10648_v26, 0.0  ;;  %v6244_v53 = vpack.c.bf16 %v4994_v6, %v4993_v13 }
 0x3f6   : > { %v4976_v58 = vadd.f32 %v4975_v49, %v4974_v8  ;;  %v4995_v8 = vld [vmem:[%s11138_s11 + $0x20] sm:$0xff] }
 0x3f7   : > { %v12315_v49 = vld [vmem:[#allocation101_spill] sm:$0xff] }
 0x3fb   : > { %v2729_v55 = vpop.f32.mrb[6].mxu0 }
 0x3fc   : > { %v2734_v12 = vmul.f32 %v2733_v28, %v2729_v55  ;;  %v6060_v34 = vpop.f32.mrb[7].mxu0  ;;  %v4152_v28 = vmax.f32 %v4140_v41, 0.0  ;;  %v6270_v55 = vpack.c.bf16 %v5040_v7, %v5039_v14  ;;  %v5041_v41 = vld [vmem:[%s11138_s11 + $0x190] sm:$0xff]  ;;  %v6246_v7 = vpack.c.bf16 %v5012_v59, %v5011_v52  ;;  %v5048_v52 = vld [vmem:[%s11138_s11 + $0x1c8] sm:$0xff] }
 0x3fd   : > { %v5024_v34 = vld [vmem:[%s11138_s11 + $0x108] sm:$0xff] }
 0x3fe   : > { %v2736_v61 = vadd.f32 %v2735_v37, %v2734_v12  ;;  %v4992_v37 = vld [vmem:[%s11138_s11 + $0x8] sm:$0xff]  ;;  %v5023_v12 = vld [vmem:[%s11138_s11 + $0x100] sm:$0xff]  ;;  %v4182_v29 = vrot.slane %v4152_v28, 1 }
 0x3ff   : > { %v6240_v9 = vpack.c.bf16 %v4992_v37, %v4991_v30  ;;  %v6272_v36 = vpack.c.bf16 %v5024_v34, %v5023_v12  ;;  %v4996_v28 = vld [vmem:[%s11138_s11 + $0x28] sm:$0xff]  ;;  %v5013_v30 = vld [vmem:[%s11138_s11 + $0xb0] sm:$0xff]  ;;  %v5014_v37 = vld [vmem:[%s11138_s11 + $0xb8] sm:$0xff] }
 0x400   : > { %v2737_v56 = vmax.f32 %v2736_v61, 0.0  ;;  %v5025_v61 = vld [vmem:[%s11138_s11 + $0x110] sm:$0xff]  ;;  %v10704_v11 = vsel %vm1014_vm3, %v12312_v51, %v4182_v29  ;;  %v5046_v29 = vld [vmem:[%s11138_s11 + $0x1b8] sm:$0xff]  ;;  %v5000_v51 = vld [vmem:[%s11138_s11 + $0x48] sm:$0xff] }
 0x401   : > { %v6276_v14 = vpack.c.bf16 %v5026_v18, %v5025_v61  ;;  %v4961_v34 = vadd.f32 %v4945_v0, %v10704_v11  ;;  %v5030_v61 = vld [vmem:[%s11138_s11 + $0x138] sm:$0xff]  ;;  %v5047_v18 = vld [vmem:[%s11138_s11 + $0x1c0] sm:$0xff] }
 0x402   : > { %5863 = vmatmul.mubr.msk.f32.vlgmr.msra.gmra.mrb[6].mxu1 %vm2659_vm8, %v2737_v56  ;;  %5864 = vmatmul.mubr.msk.f32.vlgmr.msra.gmra.mrb[8].mxu0 %vm2659_vm8, %v2737_v56 }
 0x403   : > { %6225 = vmatpush1.bf16.msra.mxu1 %v6224_v38  ;;  %6233 = vmatpush1.bf16.msra.mxu0 %v6232_v3  ;;  %v6242_v38 = vpack.c.bf16 %v5010_v44, %v5009_v33  ;;  %v6274_v3 = vpack.c.bf16 %v5042_v45, %v5041_v41  ;;  %v5045_v33 = vld [vmem:[%s11138_s11 + $0x1b0] sm:$0xff]  ;;  %v6250_v41 = vpack.c.bf16 %v5014_v37, %v5013_v30 }
 0x404   : > { %6227 = vmatprep.subr.bf16.mxu1 %v6226_v21  ;;  %6235 = vmatprep.subr.bf16.mxu0 %v6234_v24  ;;  %v4941_v21 = vmax.f32 %v10661_v60, 0.0  ;;  %v4990_v24 = vadd.f32 %v4989_v16, %v4988_v31  ;;  %v5027_v31 = vld [vmem:[%s11138_s11 + $0x120] sm:$0xff]  ;;  %v6248_v16 = vpack.c.bf16 %v4996_v28, %v4995_v8  ;;  %v4997_v45 = vld [vmem:[%s11138_s11 + $0x30] sm:$0xff]  ;;  %v6282_v6 = vpack.c.bf16 %v5046_v29, %v5045_v33  ;;  %v5018_v28 = vld [vmem:[%s11138_s11 + $0xd8] sm:$0xff] }
 0x405   : > { %3021 = vmatprep.mubr.f32.mxu1 %v12311_v63  ;;  %3092 = vmatprep.mubr.f32.mxu0 %v12311_v63  ;;  %v5017_v8 = vld [vmem:[%s11138_s11 + $0xd0] sm:$0xff] }
 0x406   : > { %v4957_v12 = vadd.f32 %v4941_v21, %v12315_v49  ;;  %v6258_v37 = vpack.c.bf16 %v5018_v28, %v5017_v8  ;;  %v5033_v33 = vld [vmem:[%s11138_s11 + $0x150] sm:$0xff] }
 0x407   : > { %6229 = vmatpush1.bf16.msra.mxu1 %v6228_v10  ;;  %6237 = vmatpush1.bf16.msra.mxu0 %v6236_v43  ;;  %v12314_v10 = vld [vmem:[#allocation94_spill] sm:$0xff]  ;;  %v5005_v28 = vld [vmem:[%s11138_s11 + $0x70] sm:$0xff] }
 0x408   : > { %6239 = vmatprep.subr.bf16.mxu1 %v6238_v23  ;;  %6271 = vmatprep.subr.bf16.mxu0 %v6270_v55  ;;  %v4955_v43 = vadd.f32 %v4939_v40, %v12314_v10  ;;  %v6278_v23 = vpack.c.bf16 %v5044_v35, %v5043_v57  ;;  %v5028_v55 = vld [vmem:[%s11138_s11 + $0x128] sm:$0xff]  ;;  %v4999_v35 = vld [vmem:[%s11138_s11 + $0x40] sm:$0xff] }
 0x409   : > { %v6280_v44 = vpack.c.bf16 %v5028_v55, %v5027_v31  ;;  %v6256_v55 = vpack.c.bf16 %v5000_v51, %v4999_v35  ;;  %v5022_v35 = vld [vmem:[%s11138_s11 + $0xf8] sm:$0xff] }
 0x40a   : > { %5865 = vmatmul.mubr.msk.f32.vlgmr.msra.gmra.mrb[8].mxu1 %vm2659_vm8, %v2737_v56  ;;  %5866 = vmatmul.mubr.msk.f32.vlgmr.msra.gmra.mrb[10].mxu0 %vm2659_vm8, %v2737_v56  ;;  %v4959_v56 = vadd.f32 %v4943_v46, %v12313_v25 }
 0x40b   : > { %6241 = vmatpush3.bf16.msra.mxu1 %v6240_v9  ;;  %5119 = vmatprep.mubr.f32.mxu1 %v4976_v58  ;;  %v4998_v9 = vld [vmem:[%s11138_s11 + $0x38] sm:$0xff]  ;;  %v5015_v58 = vld [vmem:[%s11138_s11 + $0xc0] sm:$0xff] }
 0x40c   : > { %6273 = vmatpush3.bf16.msra.mxu0 %v6272_v36  ;;  %5189 = vmatprep.mubr.f32.mxu0 %v4990_v24  ;;  %v5029_v36 = vld [vmem:[%s11138_s11 + $0x130] sm:$0xff]  ;;  %v4963_v13 = vadd.f32 %v4959_v56, %v4955_v43  ;;  %v6252_v59 = vpack.c.bf16 %v4998_v9, %v4997_v45  ;;  %v5020_v45 = vld [vmem:[%s11138_s11 + $0xe8] sm:$0xff] }
 0x40d   : > { %6243 = vmatprep.subr.bf16.mxu1 %v6242_v38  ;;  %6275 = vmatprep.subr.bf16.mxu0 %v6274_v3  ;;  %v5016_v38 = vld [vmem:[%s11138_s11 + $0xc8] sm:$0xff]  ;;  %v4977_v3 = vadd.f32 %v4961_v34, %v4957_v12  ;;  %v6284_v24 = vpack.c.bf16 %v5030_v61, %v5029_v36  ;;  %v5049_v43 = vld [vmem:[%s11138_s11 + $0x1d0] sm:$0xff]  ;;  %v5002_v34 = vld [vmem:[%s11138_s11 + $0x58] sm:$0xff] }
 0x40e   : > { %v6254_v57 = vpack.c.bf16 %v5016_v38, %v5015_v58  ;;  %v4964_v56 = vrot.slane %v4963_v13, 4  ;;  %v5001_v12 = vld [vmem:[%s11138_s11 + $0x50] sm:$0xff]  ;;  %v5051_v36 = vld [vmem:[%s11138_s11 + $0x1e0] sm:$0xff] }
 0x40f   : > { %6245 = vmatpush3.bf16.msra.mxu1 %v6244_v53  ;;  %v5031_v53 = vld [vmem:[%s11138_s11 + $0x140] sm:$0xff]  ;;  %v4978_v31 = vrot.slane %v4977_v3, 4 }
 0x410   : > { %6277 = vmatpush3.bf16.msra.mxu0 %v6276_v14  ;;  %6247 = vmatprep.subr.bf16.mxu1 %v6246_v7  ;;  %v6286_v14 = vpack.c.bf16 %v5048_v52, %v5047_v18  ;;  %v5032_v7 = vld [vmem:[%s11138_s11 + $0x148] sm:$0xff]  ;;  %v4965_v29 = vadd.f32 %v4964_v56, %v4963_v13  ;;  %v5003_v38 = vld [vmem:[%s11138_s11 + $0x60] sm:$0xff]  ;;  %v5054_v56 = vld [vmem:[%s11138_s11 + $0x1f8] sm:$0xff] }
 0x411   : > { %6279 = vmatprep.subr.bf16.mxu0 %v6278_v23  ;;  %v5050_v23 = vld [vmem:[%s11138_s11 + $0x1d8] sm:$0xff]  ;;  %v6288_v30 = vpack.c.bf16 %v5032_v7, %v5031_v53  ;;  %v4979_v9 = vadd.f32 %v4978_v31, %v4977_v3  ;;  %v5052_v13 = vld [vmem:[%s11138_s11 + $0x1e8] sm:$0xff]  ;;  %v5035_v18 = vld [vmem:[%s11138_s11 + $0x160] sm:$0xff] }
 0x412   : > { %v5004_v3 = vld [vmem:[%s11138_s11 + $0x68] sm:$0xff]  ;;  %v4966_v52 = vrot.slane %v4965_v29, 2  ;;  %v5053_v53 = vld [vmem:[%s11138_s11 + $0x1f0] sm:$0xff]  ;;  %v5006_v31 = vld [vmem:[%s11138_s11 + $0x78] sm:$0xff] }
 0x413   : > { %6249 = vmatpush3.bf16.msra.mxu1 %v6248_v16  ;;  %v6290_v16 = vpack.c.bf16 %v5050_v23, %v5049_v43  ;;  %v4980_v51 = vrot.slane %v4979_v9, 2  ;;  %v6298_v23 = vpack.c.bf16 %v5054_v56, %v5053_v53 }
 0x414   : > { %6281 = vmatpush3.bf16.msra.mxu0 %v6280_v44  ;;  %6251 = vmatprep.subr.bf16.mxu1 %v6250_v41  ;;  %v5034_v44 = vld [vmem:[%s11138_s11 + $0x158] sm:$0xff]  ;;  %v5019_v41 = vld [vmem:[%s11138_s11 + $0xe0] sm:$0xff]  ;;  %v4967_v43 = vadd.f32 %v4966_v52, %v4965_v29 }
 0x415   : > { %6283 = vmatprep.subr.bf16.mxu0 %v6282_v6  ;;  %v6260_v6 = vpack.c.bf16 %v5002_v34, %v5001_v12  ;;  %v6292_v61 = vpack.c.bf16 %v5034_v44, %v5033_v33  ;;  %v6262_v58 = vpack.c.bf16 %v5020_v45, %v5019_v41  ;;  %v6268_v12 = vpack.c.bf16 %v5006_v31, %v5005_v28  ;;  %v5195_v45 = vld [vmem:[%s11134_s7 + $0x20] sm:$0xff] }
 0x416   : > { %v4968_v33 = vrot.slane %v4967_v43, 1  ;;  %v12316_v44 = vmov 0.0|0.0   ;;  %v5277_v52 = vld [vmem:[%s11136_s9 + $0x100] sm:$0xff] }
 0x417   : > { %6253 = vmatpush3.bf16.msra.mxu1 %v6252_v59  ;;  %v6294_v59 = vpack.c.bf16 %v5052_v13, %v5051_v36  ;;  %v5197_v36 = vld [vmem:[%s11134_s7 + $0x30] sm:$0xff]  ;;  %v2770_v31 = vld [vmem:[%s11137_s10] ss:$2 sm:$0xff] }
 0x418   : > { %6285 = vmatpush3.bf16.msra.mxu0 %v6284_v24  ;;  %6255 = vmatprep.subr.bf16.mxu1 %v6254_v57  ;;  %v5036_v24 = vld [vmem:[%s11138_s11 + $0x168] sm:$0xff]  ;;  %v5021_v57 = vld [vmem:[%s11138_s11 + $0xf0] sm:$0xff]  ;;  %v4969_v29 = vadd.f32 %v4968_v33, %v4967_v43  ;;  %v2787_v33 = vrot.slane %v2770_v31, %v12262_v48 }
 0x419   : > { %6287 = vmatprep.subr.bf16.mxu0 %v6286_v14  ;;  %v6264_v14 = vpack.c.bf16 %v5004_v3, %v5003_v38  ;;  %v6296_v7 = vpack.c.bf16 %v5036_v24, %v5035_v18  ;;  %v6266_v8 = vpack.c.bf16 %v5022_v35, %v5021_v57  ;;  %v5280_v3 = vld [vmem:[%s11136_s9 + $0x118] sm:$0xff]  ;;  %v5285_v24 = vld [vmem:[%s11136_s9 + $0x140] sm:$0xff] }
 0x41a   : > { %v5288_v18 = vld [vmem:[%s11136_s9 + $0x158] sm:$0xff]  ;;  %v6310_v35 = vpack.c.bf16 %v5285_v24, %v5277_v52 }
 0x41b   : > { %6257 = vmatpush3.bf16.msra.mxu1 %v6256_v55  ;;  %v5037_v55 = vld [vmem:[%s11138_s11 + $0x170] sm:$0xff]  ;;  %v6316_v57 = vpack.c.bf16 %v5288_v18, %v5280_v3 }
 0x41c   : > { %6289 = vmatpush3.bf16.msra.mxu0 %v6288_v30  ;;  %6259 = vmatprep.subr.bf16.mxu1 %v6258_v37  ;;  %v5038_v30 = vld [vmem:[%s11138_s11 + $0x178] sm:$0xff]  ;;  %v4981_v37 = vadd.f32 %v4980_v51, %v4979_v9  ;;  %v5196_v9 = vld [vmem:[%s11134_s7 + $0x28] sm:$0xff] }
 0x41d   : > { %6291 = vmatprep.subr.bf16.mxu0 %v6290_v16  ;;  %v6300_v34 = vpack.c.bf16 %v5038_v30, %v5037_v55  ;;  %v6303_v13 = vpack.c.bf16 %v5196_v9, %v5195_v45  ;;  %v2775_v55 = vrot.slane %v2770_v31, %v12309_v15  ;;  %v2783_v30 = vrot.slane %v2770_v31, %v12307_v19 }
 0x41e   : > { %v4982_v16 = vrot.slane %v4981_v37, 1 }
 0x41f   : > { %6261 = vmatpush3.bf16.msra.mxu1 %v6260_v6  ;;  %v5198_v6 = vld [vmem:[%s11134_s7 + $0x38] sm:$0xff] }
 0x420   : > { %6293 = vmatpush3.bf16.msra.mxu0 %v6292_v61  ;;  %6263 = vmatprep.subr.bf16.mxu1 %v6262_v58  ;;  %v4983_v41 = vadd.f32 %v4982_v16, %v4981_v37  ;;  %v5278_v61 = vld [vmem:[%s11136_s9 + $0x108] sm:$0xff] }
 0x421   : > { %6295 = vmatprep.subr.bf16.mxu0 %v6294_v59  ;;  %v5286_v58 = vld [vmem:[%s11136_s9 + $0x148] sm:$0xff]  ;;  %v6306_v59 = vpack.c.bf16 %v5198_v6, %v5197_v36 }
 0x422   : > { %v6308_v38 = vpack.c.bf16 %v5286_v58, %v5278_v61 }
 0x423   : > { %6265 = vmatpush3.bf16.msra.mxu1 %v6264_v14 }
 0x424   : > { %6297 = vmatpush3.bf16.msra.mxu0 %v6296_v7  ;;  %6267 = vmatprep.subr.bf16.mxu1 %v6266_v8  ;;  %v12317_v7 = vld [vmem:[#allocation5_spill] sm:$0xff] }
 0x425   : > { %6299 = vmatprep.subr.bf16.mxu0 %v6298_v23  ;;  %v2790_v8 = vsub.s32 4, %v12317_v7  ;;  %v2798_v28 = vsub.s32 6, %v12317_v7  ;;  %v2794_v43 = vsub.s32 5, %v12317_v7  ;;  %v2802_v23 = vsub.s32 7, %v12317_v7 }
 0x427   : > { %6269 = vmatpush3.bf16.msra.mxu1 %v6268_v12  ;;  %v2791_v37 = vrot.slane %v2770_v31, %v2790_v8  ;;  %v2799_v12 = vrot.slane %v2770_v31, %v2798_v28  ;;  %v2795_v16 = vrot.slane %v2770_v31, %v2794_v43 }
 0x428   : > { %6301 = vmatpush3.bf16.msra.mxu0 %v6300_v34  ;;  %6302 = vmatprep.subr.bf16.mxu1 %v12316_v44  ;;  %v2779_v34 = vrot.slane %v2770_v31, %v12260_v2 }
 0x429   : > { %6309 = vmatprep.subr.bf16.mxu0 %v6308_v38 }
 0x42a   : > { %5120 = vmatmul.mubr.f32.vlgmr.msra.gmra.mrb[10].mxu1 %v4969_v29  ;;  %v2803_v29 = vrot.slane %v2770_v31, %v2802_v23 }
 0x42b   : > { %5190 = vmatmul.mubr.f32.vlgmr.msra.gmra.mrb[12].mxu0 %v4983_v41  ;;  %6069 = vmatprep.mubr.msk.f32.mxu1 %vm6424_vm7, %v12311_v63 }
 0x42c   : > { %5419 = vmatprep.mubr.f32.mxu0 %v12311_v63  ;;  %6304 = vmatpush3.bf16.msra.mxu1 %v6303_v13 }
 0x42d   : > { %6305 = vmatprep.subr.bf16.mxu1 %v12316_v44  ;;  %6311 = vmatpush1.bf16.msra.mxu0 %v6310_v35 }
 0x430   : > { %6307 = vmatpush3.bf16.msra.mxu1 %v6306_v59 }
 0x431   : > { %6317 = vmatprep.subr.bf16.mxu1 %v6316_v57 }
 0x4d5   : > { %v2881_v51 = vpop.f32.mrb[6].mxu1  ;;  %v2952_v53 = vpop.f32.mrb[8].mxu0 }
 0x4d6   : > { %v2883_v56 = vpop.f32.mrb[7].mxu1  ;;  %v2954_v14 = vpop.f32.mrb[9].mxu0  ;;  %v2882_v45 = vadd.f32 %v2881_v51, %v2775_v55  ;;  %v2953_v9 = vadd.f32 %v2952_v53, %v2783_v30 }
 0x4d7   : > { %v2884_v58 = vadd.f32 %v2883_v56, %v2779_v34  ;;  %v2955_v38 = vadd.f32 %v2954_v14, %v2787_v33 }
 0x4dd   : > { %v3023_v44 = vpop.f32.mrb[8].mxu1  ;;  %v3094_v41 = vpop.f32.mrb[10].mxu0 }
 0x4de   : > { %v3024_v36 = vadd.f32 %v3023_v44, %v2791_v37  ;;  %v3095_v13 = vadd.f32 %v3094_v41, %v2799_v12  ;;  %v3025_v6 = vpop.f32.mrb[9].mxu1  ;;  %v3096_v61 = vpop.f32.mrb[11].mxu0 }
 0x4df   : > { %v3026_v3 = vadd.f32 %v3025_v6, %v2795_v16  ;;  %v3097_v18 = vadd.f32 %v3096_v61, %v2803_v29  ;;  %v5279_v61 = vld [vmem:[%s11136_s9 + $0x110] sm:$0xff] }
 0x4e0   : > { %v3099_v52 = vmax.f32 %v2882_v45, %v3024_v36  ;;  %v3101_v59 = vmax.f32 %v2953_v9, %v3095_v13 }
 0x4e1   : > { %v3100_v24 = vmax.f32 %v2884_v58, %v3026_v3  ;;  %v3102_v57 = vmax.f32 %v2955_v38, %v3097_v18 }
 0x4e2   : > { %v3103_v35 = vsub.f32 %v2882_v45, %v3099_v52  ;;  %v3115_v42 = vsub.f32 %v3024_v36, %v3099_v52  ;;  %v3105_v54 = vsub.f32 %v2953_v9, %v3101_v59  ;;  %v3117_v31 = vsub.f32 %v3095_v13, %v3101_v59 }
 0x4e3   : > { %v3104_v17 = vsub.f32 %v2884_v58, %v3100_v24  ;;  %v3116_v32 = vsub.f32 %v3026_v3, %v3100_v24  ;;  %v3106_v51 = vsub.f32 %v2955_v38, %v3102_v57  ;;  %v3118_v53 = vsub.f32 %v3097_v18, %v3102_v57  ;;  %v5287_v58 = vld [vmem:[%s11136_s9 + $0x150] sm:$0xff] }
 0x4e4   : > { %v3107_v55 = vmul.f32 1.442695, %v3103_v35  ;;  %v3119_v30 = vmul.f32 1.442695, %v3115_v42  ;;  %v3111_v37 = vmul.f32 1.442695, %v3105_v54 }
 0x4e5   : > { %v3123_v12 = vmul.f32 1.442695, %v3117_v31  ;;  %v3109_v56 = vmul.f32 1.442695, %v3104_v17  ;;  %v3121_v14 = vmul.f32 1.442695, %v3116_v32 }
 0x4e6   : > { %6354 = vpow2.f32 %v3107_v55  ;;  %v3113_v34 = vmul.f32 1.442695, %v3106_v51  ;;  %v3125_v33 = vmul.f32 1.442695, %v3118_v53  ;;  %v6318_v51 = vpack.c.bf16 %v5287_v58, %v5279_v61 }
 0x4e7   : > { %6356 = vpow2.f32 %v3119_v30 }
 0x4e8   : > { %6358 = vpow2.f32 %v3111_v37 }
 0x4e9   : > { %6360 = vpow2.f32 %v3123_v12 }
 0x4ea   : > { %6362 = vpow2.f32 %v3109_v56 }
 0x4eb   : > { %6364 = vpow2.f32 %v3121_v14  ;;  %v12318_v14 = vld [vmem:[#allocation81_spill] sm:$0xff] }
 0x4ec   : > { %6366 = vpow2.f32 %v3113_v34 }
 0x4ed   : > { %6368 = vpow2.f32 %v3125_v33  ;;  %v12319_v33 = vld [vmem:[#allocation111_spill] sm:$0xff] }
 0x4f0   : > { %v6355_v16 = vpop.eup %6354 }
 0x4f1   : > { %v6357_v29 = vpop.eup %6356 }
 0x4f2   : > { %v6359_v44 = vpop.eup %6358  ;;  %v3127_v41 = vadd.f32 %v6357_v29, %v6355_v16 }
 0x4f3   : > { %v6361_v45 = vpop.eup %6360 }
 0x4f4   : > { %v6363_v42 = vpop.eup %6362  ;;  %6370 = vrcp.f32 %v3127_v41  ;;  %v3129_v54 = vadd.f32 %v6361_v45, %v6359_v44 }
 0x4f5   : > { %v6365_v9 = vpop.eup %6364 }
 0x4f6   : > { %v6367_v17 = vpop.eup %6366  ;;  %6372 = vrcp.f32 %v3129_v54  ;;  %v3128_v32 = vadd.f32 %v6365_v9, %v6363_v42  ;;  %v12320_v54 = vld [vmem:[#allocation107_spill] sm:$0xff] }
 0x4f7   : > { %v6369_v36 = vpop.eup %6368 }
 0x4f8   : > { %6374 = vrcp.f32 %v3128_v32  ;;  %v3130_v13 = vadd.f32 %v6369_v36, %v6367_v17  ;;  %v12322_v32 = vld [vmem:[#allocation41_spill] sm:$0xff] }
 0x4fa   : > { %6376 = vrcp.f32 %v3130_v13  ;;  %v12323_v13 = vmax.f32 %v12322_v32, 0.0 }
 0x4fd   : > { %v6007_v6 = vpop.f32.mrb[10].mxu1 }
 0x4fe   : > { %v6371_v38 = vpop.eup %6370  ;;  %v6042_v3 = vpop.f32.mrb[12].mxu0 }
 0x4ff   : > { %v6008_v18 = vpop.f32.mrb[11].mxu1  ;;  %v3135_v52 = vmul.f32 %v6371_v38, %v6355_v16  ;;  %v3163_v59 = vmul.f32 %v6371_v38, %v6357_v29  ;;  %v6043_v57 = vpop.f32.mrb[13].mxu0  ;;  %v12321_v16 = vmax.f32 %v12320_v54, 0.0 }
 0x500   : > { %v6009_v24 = vadd.f32 %v6008_v18, %v6007_v6  ;;  %v6373_v35 = vpop.eup %6372  ;;  %v6044_v31 = vadd.f32 %v6043_v57, %v6042_v3 }
 0x501   : > { %v3142_v53 = vrot.slane %v3135_v52, %v12309_v15  ;;  %v3170_v55 = vrot.slane %v3163_v59, %v12309_v15  ;;  %v3137_v30 = vmul.f32 %v6373_v35, %v6359_v44  ;;  %v3165_v37 = vmul.f32 %v6373_v35, %v6361_v45  ;;  %v12325_v35 = vld [vmem:[#allocation105_spill] sm:$0xff] }
 0x502   : > { %v6375_v12 = vpop.eup %6374  ;;  %v5192_v56 = vadd.f32 %v6044_v31, %v6009_v24  ;;  %v12324_v24 = vld [vmem:[#allocation122_spill] sm:$0xff] }
 0x503   : > { %v3155_v34 = vmul.f32 %v3142_v53, %v12318_v14  ;;  %v3159_v41 = vmul.f32 %v3142_v53, %v12319_v33  ;;  %v3183_v29 = vmul.f32 %v3170_v55, %v12321_v16  ;;  %v3187_v6 = vmul.f32 %v3170_v55, %v12323_v13  ;;  %v12326_v53 = vld [vmem:[#allocation84_spill] sm:$0xff]  ;;  %v12328_v14 = vld [vmem:[#allocation85_spill] sm:$0xff]  ;;  %v12332_v16 = vld [vmem:[#allocation87_spill] sm:$0xff] }
 0x504   : > { %v6377_v38 = vpop.eup %6376  ;;  %v3150_v61 = vrot.slane %v3137_v30, %v12309_v15  ;;  %v3178_v58 = vrot.slane %v3165_v37, %v12309_v15  ;;  %v3136_v3 = vmul.f32 %v6375_v12, %v6363_v42  ;;  %v3164_v44 = vmul.f32 %v6375_v12, %v6365_v9  ;;  %6070 = vmatmul.mubr.msk.f32.vlgmr.msra.gmra.mrb[12].mxu1 %vm2659_vm8, %v5192_v56  ;;  %v12334_v13 = vld [vmem:[#allocation29_spill] sm:$0xff] }
 0x505   : > { %v10921_v45 = vadd.f32 %v3183_v29, %v3155_v34  ;;  %v10923_v18 = vadd.f32 %v3187_v6, %v3159_v41  ;;  %v3138_v52 = vmul.f32 %v6377_v38, %v6367_v17  ;;  %v3166_v59 = vmul.f32 %v6377_v38, %v6369_v36  ;;  %6319 = vmatpush1.bf16.msra.mxu1 %v6318_v51  ;;  %v12330_v34 = vld [vmem:[#allocation63_spill] sm:$0xff]  ;;  %v12331_v41 = vld [vmem:[#allocation10_spill] sm:$0xff] }
 0x506   : > { %v3157_v57 = vmul.f32 %v3150_v61, %v12324_v24  ;;  %v3161_v31 = vmul.f32 %v3150_v61, %v12325_v35  ;;  %v12327_v55 = vmax.f32 %v12326_v53, 0.0  ;;  %v12329_v37 = vmax.f32 %v12328_v14, 0.0  ;;  %5490 = vmatprep.mubr.f32.mxu1 %v12311_v63  ;;  %v12336_v61 = vld [vmem:[#allocation45_spill] sm:$0xff] }
 0x507   : > { %v3146_v9 = vrot.slane %v3136_v3, %v12309_v15  ;;  %v3174_v12 = vrot.slane %v3164_v44, %v12309_v15  ;;  %v3154_v36 = vrot.slane %v3138_v52, %v12309_v15  ;;  %v3182_v51 = vrot.slane %v3166_v59, %v12309_v15  ;;  %v12337_v3 = vld [vmem:[#allocation71_spill] sm:$0xff] }
 0x508   : > { %v3185_v30 = vmul.f32 %v3178_v58, %v12327_v55  ;;  %v3189_v42 = vmul.f32 %v3178_v58, %v12329_v37  ;;  %v12333_v29 = vmax.f32 %v12332_v16, 0.0  ;;  %v12335_v6 = vmax.f32 %v12334_v13, 0.0  ;;  %v12338_v52 = vld [vmem:[#allocation11_spill] sm:$0xff]  ;;  %v5294_v37 = vld [vmem:[%s11136_s9 + $0x188] sm:$0xff] }
 0x509   : > { %v3156_v33 = vmul.f32 %v3146_v9, %v12330_v34  ;;  %v3160_v54 = vmul.f32 %v3146_v9, %v12331_v41  ;;  %v3158_v58 = vmul.f32 %v3154_v36, %v12336_v61  ;;  %v3162_v44 = vmul.f32 %v3154_v36, %v12337_v3  ;;  %v5296_v9 = vld [vmem:[%s11136_s9 + $0x198] sm:$0xff]  ;;  %v5301_v34 = vld [vmem:[%s11136_s9 + $0x1c0] sm:$0xff]  ;;  %v5303_v16 = vld [vmem:[%s11136_s9 + $0x1d0] sm:$0xff] }
 0x50a   : > { %v10934_v56 = vadd.f32 %v3185_v30, %v3157_v57  ;;  %v10936_v17 = vadd.f32 %v3189_v42, %v3161_v31  ;;  %v3184_v32 = vmul.f32 %v3174_v12, %v12333_v29  ;;  %v3188_v38 = vmul.f32 %v3174_v12, %v12335_v6  ;;  %v12340_v31 = vld [vmem:[#allocation112_spill] sm:$0xff]  ;;  %v5302_v42 = vld [vmem:[%s11136_s9 + $0x1c8] sm:$0xff]  ;;  %v5272_v3 = vld [vmem:[%s11135_s8 + $0x2] sm:$0x1] }
 0x50b   : > { %v12339_v59 = vmax.f32 %v12338_v52, 0.0  ;;  %v12341_v53 = vmax.f32 %v12340_v31, 0.0  ;;  %v6312_v12 = vpack.c.bf16 %v5302_v42, %v5294_v37  ;;  %v5304_v36 = vld [vmem:[%s11136_s9 + $0x1d8] sm:$0xff]  ;;  %v5282_v29 = vld [vmem:[%s11136_s9 + $0x128] sm:$0xff]  ;;  %v5274_v52 = vld [vmem:[%s11135_s8 + $0x3] sm:$0x1] }
 0x50c   : > { %v10948_v24 = vadd.f32 %v3184_v32, %v3156_v33  ;;  %v10950_v57 = vadd.f32 %v3188_v38, %v3160_v54  ;;  %v6320_v33 = vpack.c.bf16 %v5304_v36, %v5296_v9  ;;  %v5295_v54 = vld [vmem:[%s11136_s9 + $0x190] sm:$0xff]  ;;  %v5290_v13 = vld [vmem:[%s11136_s9 + $0x168] sm:$0xff]  ;;  %v5284_v6 = vld [vmem:[%s11136_s9 + $0x138] sm:$0xff] }
 0x50d   : > { %v3186_v35 = vmul.f32 %v3182_v51, %v12339_v59  ;;  %v3190_v55 = vmul.f32 %v3182_v51, %v12341_v53  ;;  %v5293_v51 = vld [vmem:[%s11136_s9 + $0x180] sm:$0xff]  ;;  %6313 = vmatprep.subr.bf16.mxu0 %v6312_v12  ;;  %v6322_v32 = vpack.c.bf16 %v5303_v16, %v5295_v54  ;;  %v5292_v38 = vld [vmem:[%s11136_s9 + $0x178] sm:$0xff]  ;;  %v6324_v61 = vpack.c.bf16 %v5290_v13, %v5282_v29  ;;  %v5291_v37 = vld [vmem:[%s11136_s9 + $0x170] sm:$0xff] }
 0x50e   : > { %v6314_v41 = vpack.c.bf16 %v5301_v34, %v5293_v51  ;;  %6321 = vmatprep.subr.bf16.mxu1 %v6320_v33  ;;  %v5281_v59 = vld [vmem:[%s11136_s9 + $0x120] sm:$0xff]  ;;  %v5298_v42 = vld [vmem:[%s11136_s9 + $0x1a8] sm:$0xff]  ;;  %v5300_v12 = vld [vmem:[%s11136_s9 + $0x1b8] sm:$0xff] }
 0x50f   : > { %v10956_v30 = vadd.f32 %v3186_v35, %v3158_v58  ;;  %v10958_v14 = vadd.f32 %v3190_v55, %v3162_v44  ;;  %v6332_v58 = vpack.c.bf16 %v5292_v38, %v5284_v6  ;;  %6323 = vmatpush1.bf16.msra.mxu1 %v6322_v32  ;;  %v5289_v35 = vld [vmem:[%s11136_s9 + $0x160] sm:$0xff]  ;;  %v5283_v55 = vld [vmem:[%s11136_s9 + $0x130] sm:$0xff]  ;;  %v5306_v9 = vld [vmem:[%s11136_s9 + $0x1e8] sm:$0xff] }
 0x510   : > { %6315 = vmatpush1.bf16.msra.mxu0 %v6314_v41  ;;  %v5308_v36 = vld [vmem:[%s11136_s9 + $0x1f8] sm:$0xff]  ;;  %v6326_v34 = vpack.c.bf16 %v5289_v35, %v5281_v59  ;;  %v6334_v33 = vpack.c.bf16 %v5291_v37, %v5283_v55  ;;  %v5297_v41 = vld [vmem:[%s11136_s9 + $0x1a0] sm:$0xff]  ;;  %v6328_v16 = vpack.c.bf16 %v5306_v9, %v5298_v42  ;;  %v5299_v13 = vld [vmem:[%s11136_s9 + $0x1b0] sm:$0xff] }
 0x511   : > { %6325 = vmatprep.subr.bf16.mxu0 %v6324_v61  ;;  %6333 = vmatprep.subr.bf16.mxu1 %v6332_v58  ;;  %v6336_v29 = vpack.c.bf16 %v5308_v36, %v5300_v12  ;;  %v5305_v32 = vld [vmem:[%s11136_s9 + $0x1e0] sm:$0xff]  ;;  %v5307_v6 = vld [vmem:[%s11136_s9 + $0x1f0] sm:$0xff] }
 0x512   : > { %v6330_v38 = vpack.c.bf16 %v5305_v32, %v5297_v41  ;;  %v6338_v61 = vpack.c.bf16 %v5307_v6, %v5299_v13  ;;  %v5890_v59 = vld [vmem:[%s11137_s10 + $0x1] ss:$2 sm:$0xff] }
 0x513   : > { %v5315_v35 = vrot.slane %v5890_v59, %v12309_v15  ;;  %v5319_v55 = vrot.slane %v5890_v59, %v12260_v2  ;;  %v5327_v37 = vrot.slane %v5890_v59, %v12262_v48  ;;  %v5335_v42 = vrot.slane %v5890_v59, %v2794_v43 }
 0x514   : > { %v5343_v9 = vrot.slane %v5890_v59, %v2802_v23 }
 0x5d7   : > { %v5268_v44 = vpop.f32.mrb[12].mxu1 }
 0x5d8   : > { %v5273_v31 = vmul.f32 %v5272_v3, %v5268_v44  ;;  %v6071_v53 = vpop.f32.mrb[13].mxu1 }
 0x5d9   : > { %v5339_v53 = vrot.slane %v5890_v59, %v2798_v28 }
 0x5da   : > { %v5275_v51 = vadd.f32 %v5274_v52, %v5273_v31  ;;  %v5323_v31 = vrot.slane %v5890_v59, %v12307_v19 }
 0x5dc   : > { %v5276_v54 = vmax.f32 %v5275_v51, 0.0 }
 0x5de   : > { %5891 = vmatmul.mubr.msk.f32.vlgmr.msra.gmra.mrb[14].mxu0 %vm2659_vm8, %v5276_v54  ;;  %5892 = vmatmul.mubr.msk.f32.vlgmr.msra.gmra.mrb[14].mxu1 %vm2659_vm8, %v5276_v54 }
 0x5df   : > { %6327 = vmatpush1.bf16.msra.mxu0 %v6326_v34  ;;  %6335 = vmatpush1.bf16.msra.mxu1 %v6334_v33 }
 0x5e0   : > { %6329 = vmatprep.subr.bf16.mxu0 %v6328_v16  ;;  %6337 = vmatprep.subr.bf16.mxu1 %v6336_v29 }
 0x5e1   : > { %5561 = vmatprep.mubr.f32.mxu0 %v12311_v63  ;;  %5632 = vmatprep.mubr.f32.mxu1 %v12311_v63  ;;  %v5331_v63 = vrot.slane %v5890_v59, %v2790_v8 }
 0x5e3   : > { %6331 = vmatpush1.bf16.msra.mxu0 %v6330_v38  ;;  %6339 = vmatpush1.bf16.msra.mxu1 %v6338_v61 }
 0x5e6   : > { %5893 = vmatmul.mubr.msk.f32.vlgmr.msra.gmra.mrb[16].mxu0 %vm2659_vm8, %v5276_v54  ;;  %5894 = vmatmul.mubr.msk.f32.vlgmr.msra.gmra.mrb[16].mxu1 %vm2659_vm8, %v5276_v54 }
 0x6b1   : > { %v5421_v58 = vpop.f32.mrb[14].mxu0  ;;  %v5492_v3 = vpop.f32.mrb[14].mxu1 }
 0x6b2   : > { %v5423_v44 = vpop.f32.mrb[15].mxu0  ;;  %v5494_v52 = vpop.f32.mrb[15].mxu1  ;;  %v5422_v51 = vadd.f32 %v5421_v58, %v5315_v35  ;;  %v5493_v19 = vadd.f32 %v5492_v3, %v5323_v31 }
 0x6b3   : > { %v5424_v54 = vadd.f32 %v5423_v44, %v5319_v55  ;;  %v5495_v28 = vadd.f32 %v5494_v52, %v5327_v37 }
 0x6b9   : > { %v5563_v12 = vpop.f32.mrb[16].mxu0  ;;  %v5634_v36 = vpop.f32.mrb[16].mxu1 }
 0x6ba   : > { %v5564_v34 = vadd.f32 %v5563_v12, %v5331_v63  ;;  %v5635_v33 = vadd.f32 %v5634_v36, %v5339_v53  ;;  %v5565_v8 = vpop.f32.mrb[17].mxu0  ;;  %v5636_v41 = vpop.f32.mrb[17].mxu1 }
 0x6bb   : > { %v5566_v16 = vadd.f32 %v5565_v8, %v5335_v42  ;;  %v5637_v2 = vadd.f32 %v5636_v41, %v5343_v9 }
 0x6bc   : > { %v5639_v29 = vmax.f32 %v5422_v51, %v5564_v34  ;;  %v5641_v48 = vmax.f32 %v5493_v19, %v5635_v33 }
 0x6bd   : > { %v5640_v32 = vmax.f32 %v5424_v54, %v5566_v16  ;;  %v5642_v13 = vmax.f32 %v5495_v28, %v5637_v2 }
 0x6be   : > { %v5643_v43 = vsub.f32 %v5422_v51, %v5639_v29  ;;  %v5655_v6 = vsub.f32 %v5564_v34, %v5639_v29  ;;  %v5645_v7 = vsub.f32 %v5493_v19, %v5641_v48  ;;  %v5657_v23 = vsub.f32 %v5635_v33, %v5641_v48 }
 0x6bf   : > { %v5644_v38 = vsub.f32 %v5424_v54, %v5640_v32  ;;  %v5656_v61 = vsub.f32 %v5566_v16, %v5640_v32  ;;  %v5646_v58 = vsub.f32 %v5495_v28, %v5642_v13  ;;  %v5658_v3 = vsub.f32 %v5637_v2, %v5642_v13 }
 0x6c0   : > { %v5647_v59 = vmul.f32 1.442695, %v5643_v43  ;;  %v5659_v35 = vmul.f32 1.442695, %v5655_v6  ;;  %v5651_v31 = vmul.f32 1.442695, %v5645_v7  ;;  %v11059_v28 = vstv %s685_s13 }
 0x6c1   : > { %v5663_v63 = vmul.f32 1.442695, %v5657_v23  ;;  %v5649_v44 = vmul.f32 1.442695, %v5644_v38  ;;  %v5661_v52 = vmul.f32 1.442695, %v5656_v61  ;;  %v3200_v32 = vmul.f32 %v11059_v28, %v10921_v45 }
 0x6c2   : > { %6378 = vpow2.f32 %v5647_v59  ;;  %v5653_v53 = vmul.f32 1.442695, %v5646_v58  ;;  %v5665_v55 = vmul.f32 1.442695, %v5658_v3  ;;  %v3204_v38 = vmul.f32 %v11059_v28, %v10923_v18 }
 0x6c3   : > { %6380 = vpow2.f32 %v5659_v35  ;;  %v3202_v61 = vmul.f32 %v11059_v28, %v10934_v56  ;;  %v3206_v58 = vmul.f32 %v11059_v28, %v10936_v17  ;;  %v5739_v3 = vstv %s3224_s28 }
 0x6c4   : > { %6382 = vpow2.f32 %v5651_v31 }
 0x6c5   : > { %6384 = vpow2.f32 %v5663_v63 }
 0x6c6   : > { %6386 = vpow2.f32 %v5649_v44 }
 0x6c7   : > { %6388 = vpow2.f32 %v5661_v52 }
 0x6c8   : > { %6390 = vpow2.f32 %v5653_v53 }
 0x6c9   : > { %6392 = vpow2.f32 %v5665_v55 }
 0x6cc   : > { %v6379_v37 = vpop.eup %6378 }
 0x6cd   : > { %v6381_v42 = vpop.eup %6380 }
 0x6ce   : > { %v6383_v9 = vpop.eup %6382  ;;  %v5667_v12 = vadd.f32 %v6381_v42, %v6379_v37 }
 0x6cf   : > { %v6385_v36 = vpop.eup %6384 }
 0x6d0   : > { %v6387_v51 = vpop.eup %6386  ;;  %6394 = vrcp.f32 %v5667_v12  ;;  %v5669_v19 = vadd.f32 %v6385_v36, %v6383_v9 }
 0x6d1   : > { %v6389_v34 = vpop.eup %6388 }
 0x6d2   : > { %v6391_v33 = vpop.eup %6390  ;;  %6396 = vrcp.f32 %v5669_v19  ;;  %v5668_v8 = vadd.f32 %v6389_v34, %v6387_v51 }
 0x6d3   : > { %v6393_v41 = vpop.eup %6392 }
 0x6d4   : > { %6398 = vrcp.f32 %v5668_v8  ;;  %v5670_v54 = vadd.f32 %v6393_v41, %v6391_v33  ;;  %v12343_v8 = vmax.f32 %v10472_v27, 0.0 }
 0x6d6   : > { %6400 = vrcp.f32 %v5670_v54 }
 0x6da   : > { %v6395_v16 = vpop.eup %6394 }
 0x6db   : > { %v5675_v2 = vmul.f32 %v6395_v16, %v6379_v37  ;;  %v5703_v29 = vmul.f32 %v6395_v16, %v6381_v42 }
 0x6dc   : > { %v6397_v48 = vpop.eup %6396 }
 0x6dd   : > { %v5682_v13 = vrot.slane %v5675_v2, %v12309_v15  ;;  %v5710_v43 = vrot.slane %v5703_v29, %v12309_v15  ;;  %v5677_v6 = vmul.f32 %v6397_v48, %v6383_v9  ;;  %v5705_v7 = vmul.f32 %v6397_v48, %v6385_v36 }
 0x6de   : > { %v6399_v23 = vpop.eup %6398 }
 0x6df   : > { %v5695_v59 = vmul.f32 %v5682_v13, %v12314_v10  ;;  %v5699_v45 = vmul.f32 %v5682_v13, %v12313_v25  ;;  %v5723_v35 = vmul.f32 %v5710_v43, %v4939_v40  ;;  %v5727_v31 = vmul.f32 %v5710_v43, %v4943_v46 }
 0x6e0   : > { %v6401_v63 = vpop.eup %6400  ;;  %v5690_v18 = vrot.slane %v5677_v6, %v12309_v15  ;;  %v5718_v56 = vrot.slane %v5705_v7, %v12309_v15  ;;  %v5676_v44 = vmul.f32 %v6399_v23, %v6387_v51  ;;  %v5704_v52 = vmul.f32 %v6399_v23, %v6389_v34 }
 0x6e1   : > { %v5731_v17 = vadd.f32 %v5723_v35, %v5695_v59  ;;  %v5735_v53 = vadd.f32 %v5727_v31, %v5699_v45  ;;  %v5678_v55 = vmul.f32 %v6401_v63, %v6391_v33  ;;  %v5706_v10 = vmul.f32 %v6401_v63, %v6393_v41 }
 0x6e2   : > { %v5697_v25 = vmul.f32 %v5690_v18, %v12315_v49  ;;  %v5701_v26 = vmul.f32 %v5690_v18, %v10704_v11  ;;  %v5725_v62 = vmul.f32 %v5718_v56, %v4941_v21  ;;  %v5729_v46 = vmul.f32 %v5718_v56, %v4945_v0 }
 0x6e3   : > { %v5740_v40 = vmul.f32 %v5739_v3, %v5731_v17  ;;  %v5744_v37 = vmul.f32 %v5739_v3, %v5735_v53  ;;  %v5686_v42 = vrot.slane %v5676_v44, %v12309_v15  ;;  %v5714_v9 = vrot.slane %v5704_v52, %v12309_v15 }
 0x6e4   : > { %v5733_v11 = vadd.f32 %v5725_v62, %v5697_v25  ;;  %v5737_v60 = vadd.f32 %v5729_v46, %v5701_v26  ;;  %v5694_v21 = vrot.slane %v5678_v55, %v12309_v15  ;;  %v5722_v39 = vrot.slane %v5706_v10, %v12309_v15 }
 0x6e5   : > { %v5748_v0 = vadd.f32 %v5740_v40, %v3200_v32  ;;  %v5752_v49 = vadd.f32 %v5744_v37, %v3204_v38  ;;  %v5696_v12 = vmul.f32 %v5686_v42, %v10488_v50  ;;  %v5700_v36 = vmul.f32 %v5686_v42, %v10492_v5 }
 0x6e6   : > { %v5742_v51 = vmul.f32 %v5739_v3, %v5733_v11  ;;  %v5746_v19 = vmul.f32 %v5739_v3, %v5737_v60  ;;  %v12342_v34 = vmax.f32 %v10470_v47, 0.0  ;;  %v5728_v41 = vmul.f32 %v5714_v9, %v12343_v8 }
 0x6e7   : > { %5756 = vst [vmem:[%s11092_s14] sm:$0xff] %v5748_v0  ;;  %5760 = vst [vmem:[%s11092_s14 + $0x20] sm:$0xff] %v5752_v49  ;;  %v5698_v15 = vmul.f32 %v5694_v21, %v10499_v20  ;;  %v5702_v54 = vmul.f32 %v5694_v21, %v10503_v4  ;;  %v12344_v50 = vmax.f32 %v10475_v22, 0.0  ;;  %v12345_v5 = vmax.f32 %v10477_v1, 0.0 }
 0x6e8   : > { %v5724_v33 = vmul.f32 %v5714_v9, %v12342_v34  ;;  %v5750_v29 = vadd.f32 %v5742_v51, %v3202_v61  ;;  %v5754_v47 = vadd.f32 %v5746_v19, %v3206_v58  ;;  %v5736_v32 = vadd.f32 %v5728_v41, %v5700_v36 }
 0x6e9   : > { %v5726_v16 = vmul.f32 %v5722_v39, %v12344_v50  ;;  %v5730_v2 = vmul.f32 %v5722_v39, %v12345_v5  ;;  %v3201_v43 = vmul.f32 %v11059_v28, %v10948_v24  ;;  %v3205_v20 = vmul.f32 %v11059_v28, %v10950_v57 }
 0x6ea   : > { %v5732_v48 = vadd.f32 %v5724_v33, %v5696_v12  ;;  %5758 = vst [vmem:[%s11092_s14 + $0x10] sm:$0xff] %v5750_v29  ;;  %5762 = vst [vmem:[%s11092_s14 + $0x30] sm:$0xff] %v5754_v47  ;;  %v5745_v1 = vmul.f32 %v5739_v3, %v5736_v32  ;;  %v3203_v4 = vmul.f32 %v11059_v28, %v10956_v30 }
 0x6eb   : > { %v5734_v27 = vadd.f32 %v5726_v16, %v5698_v15  ;;  %v5738_v13 = vadd.f32 %v5730_v2, %v5702_v54  ;;  %v3207_v6 = vmul.f32 %v11059_v28, %v10958_v14 }
 0x6ec   : > { %v5741_v22 = vmul.f32 %v5739_v3, %v5732_v48  ;;  %v5753_v61 = vadd.f32 %v5745_v1, %v3205_v20 }
 0x6ed   : > { %v5743_v7 = vmul.f32 %v5739_v3, %v5734_v27  ;;  %v5747_v23 = vmul.f32 %v5739_v3, %v5738_v13 }
 0x6ee   : > { %v5749_v38 = vadd.f32 %v5741_v22, %v3201_v43  ;;  %5761 = vst [vmem:[%s11092_s14 + $0x28] sm:$0xff] %v5753_v61 }
 0x6ef   : > { %v5751_v24 = vadd.f32 %v5743_v7, %v3203_v4  ;;  %v5755_v58 = vadd.f32 %v5747_v23, %v3207_v6 }
 0x6f0   : > { %5757 = vst [vmem:[%s11092_s14 + $0x8] sm:$0xff] %v5749_v38 }
 0x6f1   : > { %5759 = vst [vmem:[%s11092_s14 + $0x18] sm:$0xff] %v5751_v24  ;;  %5763 = vst [vmem:[%s11092_s14 + $0x38] sm:$0xff] %v5755_v58 }
 0x6f2 PF: > { %s23_s23 = sadd.s32 1, %s6417_s23  }
 0x6f3   : > { %p20_p4 = scmp.ge.s32.totalorder %s23_s23, 4  }
 0x6f5   :  { %22 = sbr.rel (!%p20_p4) target bundleno = 2 (0x2), region = 144 }

</bundles_post_ra>
